<compile_context>
chip_gen: v6e
topology: v6e:2x2x1
jax: 0.10.0
libtpu: 0.0.40
codegen_flags: <defaults>
</compile_context>

<pallas_src>
import functools

import numpy as np
import jax
import jax.numpy as jnp
from jax import lax
from jax.experimental import pallas as pl
from jax.experimental.pallas import tpu as pltpu


_LW = 256  # lane width of the weight slab (max K*cin_p = 240; bias in lane 255)


def _ceil8(n):
    return ((n + 7) // 8) * 8


def _round16(n):
    return ((n + 15) // 16) * 16


# ---------------------------------------------------------------------------
# static network description
#   (name, cin, cout, K, level_div, act, imap, cin_p)
#   imap[c] = padded sublane position of original input channel c
#   cin_p   = padded channel count of the block input as laid out in-kernel
# ---------------------------------------------------------------------------
def _block_defs():
    rng = lambda n: list(range(n))
    cat = lambda a, ap, b: list(range(a)) + list(range(ap, ap + b))
    defs = [
        ("res_down_1", 3, 6, 5, 1, "relu", rng(3), 8),
        ("res_down_2", 6, 12, 5, 2, "relu", rng(6), 8),
        ("res_down_3", 12, 24, 5, 8, "relu", rng(12), 16),
    ]
    for sfx in ("p", "s"):
        defs += [
            ("res_up_1" + sfx, 48, 12, 5, 32, "leaky", rng(48), 48),
            ("res_up_2" + sfx, 24, 6, 5, 8, "leaky", cat(12, 16, 12), 32),
            ("res_up_3" + sfx, 12, 3, 5, 2, "leaky", cat(6, 8, 6), 16),
            ("res_dense_" + sfx, 6, 3, 5, 1, "leaky", cat(3, 8, 3), 16),
            ("res_output_" + sfx, 3, 1, 1, 1, "sigmoid", rng(3), 8),
        ]
    return defs


# ---------------------------------------------------------------------------
# the fused whole-network kernel
# ---------------------------------------------------------------------------
def _resunet_kernel(x_ref, w_ref, c_ref, out_ref, *, blocks, consts, N, L0):
    f32, bf16 = jnp.float32, jnp.bfloat16

    # hoisted per-level boundary masks for the reflection padding
    mask_tab = {}
    for div in (1, 2, 8, 32):
        L = L0 // div
        nlev = N * L
        pos = lax.broadcasted_iota(jnp.int32, (1, nlev), 1)
        if L & (L - 1) == 0:
            pos = pos & (L - 1)
        else:
            pos = pos % L
        mask_tab[L] = {l: pos == l for l in (0, 1, L - 2, L - 1)}

    def shift_cols(x, s):
        nl = x.shape[-1]
        s = s % nl
        if s == 0:
            return x
        if nl % 128 == 0:
            return pltpu.roll(x, shift=nl - s, axis=1)  # XLU lane rotation
        return jnp.concatenate([x[:, s:], x[:, :s]], axis=-1)

    def conv_taps(x, K, L):
        """K reflection-padded taps of x, one per kernel offset d = k - K//2."""
        if K == 1:
            return [x]
        p = K // 2
        masks = mask_tab[L]
        shifted = {s: shift_cols(x, s) for s in range(-p, p + 1)}
        taps = []
        for d in range(-p, p + 1):
            t = shifted[d]
            for i in range(abs(d)):
                if d < 0:
                    l = i
                    refl = -(l + d)
                else:
                    l = L - 1 - i
                    refl = 2 * (L - 1) - (l + d)
                t = jnp.where(masks[l], shifted[refl - l], t)
            taps.append(t)
        return taps

    def res_block(name, x_in):
        o1, o2, o3, cin_p, h1_p, cout_p, K, div, act = blocks[name]
        L = L0 // div

        # conv_1 (+ folded BN_1) + relu  -- weights loaded at point of use
        w1s = w_ref[o1:o1 + h1_p, :]
        cols = jnp.concatenate(conv_taps(x_in, K, L), axis=0).astype(bf16)
        h = jnp.dot(w1s[:, :K * cin_p], cols, preferred_element_type=f32)
        h = jnp.maximum(h + w1s[:, _LW - 1:_LW].astype(f32), 0.0)

        # conv_2 (+ folded BN_2) + 1x1 bottleneck residual
        w2s = w_ref[o2:o2 + cout_p, :]
        cols = jnp.concatenate(conv_taps(h, K, L), axis=0).astype(bf16)
        h = jnp.dot(w2s[:, :K * h1_p], cols, preferred_element_type=f32)
        h = h + w2s[:, _LW - 1:_LW].astype(f32)
        wbs = w_ref[o3:o3 + cout_p, :]
        h = h + jnp.dot(wbs[:, :cin_p], x_in.astype(bf16),
                        preferred_element_type=f32)

        if act == "relu":
            return jnp.maximum(h, 0.0)
        if act == "leaky":
            return jnp.where(h >= 0.0, h, 0.1 * h)
        return jax.nn.sigmoid(h)  # "sigmoid"

    def load_const(name):
        off, rows, cols = consts[name]
        return c_ref[off:off + rows, :cols]

    def max_pool(x, k, sel_name):
        m = x
        step = 1
        while step < k:  # k in {2, 4}; window max via lane shifts
            m = jnp.maximum(m, shift_cols(m, step))
            step *= 2
        return jnp.dot(m.astype(bf16), load_const(sel_name),
                       preferred_element_type=f32)

    def upsample(x, u_name):
        return jnp.dot(x.astype(bf16), load_const(u_name),
                       preferred_element_type=f32)

    # ----- encode -----------------------------------------------------------
    x = x_ref[...]                           # (8, N*L) f32, 3 real channel rows
    inter1 = x
    h = res_block("res_down_1", x)           # (8,  N*L)
    h = max_pool(h, 2, "s2")                 # (8,  N*L/2)
    inter2 = h
    h = res_block("res_down_2", h)           # (16, N*L/2)
    h = max_pool(h, 4, "s4a")                # (16, N*L/8)
    inter3 = h
    h = res_block("res_down_3", h)           # (24, N*L/8)
    h = max_pool(h, 4, "s4b")                # (24, N*L/32)
    inter4 = h
    vec = h

    # ----- decode (p and s branches share structure) -------------------------
    # TODO(synk): the reference decode_s feeds `vec` through a bidirectional
    # LSTM whose output is immediately overwritten (dead code in the PyTorch
    # forward); the LSTM is therefore omitted.
    def decode(sfx):
        o = res_block("res_up_1" + sfx, jnp.concatenate([inter4, vec], axis=0))
        o = upsample(o, "u4a")
        o = res_block("res_up_2" + sfx, jnp.concatenate([inter3, o], axis=0))
        o = upsample(o, "u4b")
        o = res_block("res_up_3" + sfx, jnp.concatenate([inter2, o], axis=0))
        o = upsample(o, "u2")
        o = res_block("res_dense_" + sfx, jnp.concatenate([inter1, o], axis=0))
        o = res_block("res_output_" + sfx, o)
        return o[0:1, :]                      # the single real output channel

    out_ref[...] = jnp.concatenate([decode("p"), decode("s")],
                                   axis=0).astype(out_ref.dtype)


# ---------------------------------------------------------------------------
# static glue matrices (plain numpy -> bf16 constant slab)
# ---------------------------------------------------------------------------
def _pool_select(nl, k):
    sel = np.zeros((nl, nl // k), np.float32)
    sel[np.arange(0, nl, k), np.arange(nl // k)] = 1.0
    return sel


def _upsample_matrix(lin, scale, n_batch):
    # torch.nn.Upsample(scale_factor=scale, mode='linear'), align_corners=False
    u = np.zeros((lin, lin * scale), np.float32)
    for o in range(lin * scale):
        src = max((o + 0.5) / scale - 0.5, 0.0)
        i0 = min(int(np.floor(src)), lin - 1)
        i1 = min(i0 + 1, lin - 1)
        w = src - i0
        u[i0, o] += 1.0 - w
        u[i1, o] += w
    return np.kron(np.eye(n_batch, dtype=np.float32), u)  # block-diag over batch


def build_const_slab(N, L0):
    nl = N * L0
    mats = [("s2", _pool_select(nl, 2)),
            ("s4a", _pool_select(nl // 2, 4)),
            ("s4b", _pool_select(nl // 8, 4)),
            ("u4a", _upsample_matrix(L0 // 32, 4, N)),
            ("u4b", _upsample_matrix(L0 // 8, 4, N)),
            ("u2", _upsample_matrix(L0 // 2, 2, N))]
    strips, meta, off = [], {}, 0
    for name, m in mats:
        rows, cols = m.shape
        prows = _round16(rows)
        buf = np.zeros((prows, nl), np.float32)
        buf[:rows, :cols] = m
        strips.append(buf)
        meta[name] = (off, rows, cols)
        off += prows
    slab = np.concatenate(strips, axis=0)
    # 0/1 selects and 2-tap interpolation weights are exact in bf16
    return jnp.asarray(slab, dtype=jnp.bfloat16), meta


# ---------------------------------------------------------------------------
# parameters: PyTorch-style init, then fold BN and pack into one bf16 slab
# ---------------------------------------------------------------------------
def init_raw_block_params(key, cin, cout, K):
    k1, k2, k3, k4, k5, k6 = jax.random.split(key, 6)
    bnd = 1.0 / np.sqrt(cin * K)
    w1 = jax.random.uniform(k1, (cin, cin, K), jnp.float32, -bnd, bnd)
    b1 = jax.random.uniform(k2, (cin,), jnp.float32, -bnd, bnd)
    w2 = jax.random.uniform(k3, (cout, cin, K), jnp.float32, -bnd, bnd)
    b2 = jax.random.uniform(k4, (cout,), jnp.float32, -bnd, bnd)
    bndb = 1.0 / np.sqrt(cin)
    wb = jax.random.uniform(k5, (cout, cin), jnp.float32, -bndb, bndb)
    bb = jax.random.uniform(k6, (cout,), jnp.float32, -bndb, bndb)
    return dict(w1=w1, b1=b1, w2=w2, b2=b2, wb=wb, bb=bb)


def build_weight_slab(params, defs):
    """One bf16 (rows, 256) slab with every block's fused, channel-padded weights.

    Per block: [W1 | b1] (h1_p rows), [W2 | b2+bb] (cout_p rows), [WB] (cout_p
    rows).  BatchNorm1d (inference, default buffers) is folded in; channels are
    zero-padded to multiples of 8 and every strip offset is rounded to 16 rows
    so all in-kernel bf16 loads are tile-aligned.
    """
    eps = 1e-5
    s = 1.0 / np.sqrt(1.0 + eps)
    strips, meta, off = [], {}, 0

    def add(mat):
        nonlocal off
        prows = _round16(mat.shape[0])
        buf = np.zeros((prows, _LW), np.float32)
        buf[:mat.shape[0]] = mat
        strips.append(buf)
        o = off
        off += prows
        return o

    for (name, cin, cout, K, div, act, imap, cin_p) in defs:
        p = {k: np.asarray(v, np.float32) for k, v in params[name].items()}
        h1_p, cout_p = _ceil8(cin), _ceil8(cout)
        im = np.asarray(imap)

        w1 = np.zeros((h1_p, _LW), np.float32)
        for k in range(K):
            w1[:cin, k * cin_p + im] = p["w1"][:, :, k] * s
        w1[:cin, _LW - 1] = p["b1"] * s

        w2 = np.zeros((cout_p, _LW), np.float32)
        for k in range(K):
            w2[:cout, k * h1_p:k * h1_p + cin] = p["w2"][:, :, k] * s
        w2[:cout, _LW - 1] = p["b2"] * s + p["bb"]

        wb = np.zeros((cout_p, _LW), np.float32)
        wb[np.arange(cout)[:, None], im[None, :]] = p["wb"]

        meta[name] = (add(w1), add(w2), add(wb),
                      cin_p, h1_p, cout_p, K, div, act)

    slab = np.concatenate(strips, axis=0)
    return jnp.asarray(slab, dtype=jnp.bfloat16), meta


def _cost_estimate(defs, N, L0, wslab, cslab):
    nl = N * L0
    flops = 0
    for (name, cin, cout, K, div, act, imap, cin_p) in defs:
        h1_p, cout_p = _ceil8(cin), _ceil8(cout)
        nlev = nl // div
        flops += 2 * nlev * (h1_p * K * cin_p + cout_p * K * h1_p
                             + cout_p * cin_p)
    # encode pool-select matmuls + decode upsample matmuls (x2 branches)
    flops += 2 * (8 * nl * (nl // 2) + 16 * (nl // 2) * (nl // 8)
                  + 24 * (nl // 8) * (nl // 32))
    flops += 4 * (16 * (nl // 32) * (nl // 8) + 8 * (nl // 8) * (nl // 2)
                  + 8 * (nl // 2) * nl)
    return pl.CostEstimate(
        flops=int(flops),
        transcendentals=int(2 * 8 * nl),
        bytes_accessed=int((8 * nl + 2 * nl) * 4
                           + (wslab.size + cslab.size) * 2))


# ---------------------------------------------------------------------------
# host-side wrapper
# ---------------------------------------------------------------------------
def resunet_lstm_forward(x, wslab, cslab, *, blocks, consts, N, L0, cost):
    assert L0 % 32 == 0 and L0 >= 128
    nl = N * L0
    # fold batch into lanes: (N, 3, L) -> (3, N*L); pad channels 3 -> 8
    x_flat = jnp.transpose(x, (1, 0, 2)).reshape(3, nl)
    x_pad = jnp.pad(x_flat.astype(jnp.float32), ((0, 5), (0, 0)))

    vspec = pl.BlockSpec(memory_space=pltpu.MemorySpace.VMEM)
    out_flat = pl.pallas_call(
        functools.partial(_resunet_kernel, blocks=blocks, consts=consts,
                          N=N, L0=L0),
        out_shape=jax.ShapeDtypeStruct((2, nl), jnp.float32),
        in_specs=[vspec, vspec, vspec],
        out_specs=vspec,
        compiler_params=pltpu.CompilerParams(
            vmem_limit_bytes=16 * 1024 * 1024),
        cost_estimate=cost,
    )(x_pad, wslab, cslab)

    # (2, N*L) -> (N, 2, L), matching torch.cat((out_p, out_s), dim=1)
    return jnp.transpose(out_flat.reshape(2, N, L0), (1, 0, 2))


if __name__ == "__main__":
    key = jax.random.PRNGKey(0)
    kx, kp = jax.random.split(key)

    N, C, L = 2, 3, 128            # x: (batch, 3 channels, length), L % 32 == 0
    x = jax.random.normal(kx, (N, C, L), jnp.float32)

    defs = _block_defs()
    keys = jax.random.split(kp, len(defs))
    params = {d[0]: init_raw_block_params(k, d[1], d[2], d[3])
              for k, d in zip(keys, defs)}

    wslab, blocks_meta = build_weight_slab(params, defs)
    cslab, consts_meta = build_const_slab(N, L)
    cost = _cost_estimate(defs, N, L, wslab, cslab)

    fwd = jax.jit(functools.partial(resunet_lstm_forward, blocks=blocks_meta,
                                    consts=consts_meta, N=N, L0=L, cost=cost))
    out = fwd(x, wslab, cslab)
    jax.block_until_ready(out)

    assert out.shape == (N, 2, L), out.shape
    assert bool(jnp.all(jnp.isfinite(out)))
    print("KERNEL_OK")
</pallas_src>

<mosaic_0001>
module attributes {stable_mosaic.version = 11 : i64} {
  func.func @_resunet_kernel(%arg0: memref<8x256xf32, #tpu.memory_space<vmem>>, %arg1: memref<752x256xbf16, #tpu.memory_space<vmem>>, %arg2: memref<592x256xbf16, #tpu.memory_space<vmem>>, %arg3: memref<2x256xf32, #tpu.memory_space<vmem>>) attributes {dimension_semantics = [], scalar_prefetch = 0 : i64, scratch_operands = 0 : i64, tpu.core_type = #tpu.core_type<tc>} {
    %0 = tpu.iota {dimensions = array<i32: 1>} : vector<1x256xi32>
    %c127_i32 = arith.constant 127 : i32
    %1 = vector.broadcast %c127_i32 : i32 to vector<1x256xi32>
    %2 = arith.andi %0, %1 : vector<1x256xi32>
    %c0_i32 = arith.constant 0 : i32
    %3 = vector.broadcast %c0_i32 : i32 to vector<1x256xi32>
    %4 = arith.cmpi eq, %2, %3 : vector<1x256xi32>
    %c1_i32 = arith.constant 1 : i32
    %5 = vector.broadcast %c1_i32 : i32 to vector<1x256xi32>
    %6 = arith.cmpi eq, %2, %5 : vector<1x256xi32>
    %c126_i32 = arith.constant 126 : i32
    %7 = vector.broadcast %c126_i32 : i32 to vector<1x256xi32>
    %8 = arith.cmpi eq, %2, %7 : vector<1x256xi32>
    %c127_i32_0 = arith.constant 127 : i32
    %9 = vector.broadcast %c127_i32_0 : i32 to vector<1x256xi32>
    %10 = arith.cmpi eq, %2, %9 : vector<1x256xi32>
    %11 = tpu.iota {dimensions = array<i32: 1>} : vector<1x128xi32>
    %c63_i32 = arith.constant 63 : i32
    %12 = vector.broadcast %c63_i32 : i32 to vector<1x128xi32>
    %13 = arith.andi %11, %12 : vector<1x128xi32>
    %c0_i32_1 = arith.constant 0 : i32
    %14 = vector.broadcast %c0_i32_1 : i32 to vector<1x128xi32>
    %15 = arith.cmpi eq, %13, %14 : vector<1x128xi32>
    %c1_i32_2 = arith.constant 1 : i32
    %16 = vector.broadcast %c1_i32_2 : i32 to vector<1x128xi32>
    %17 = arith.cmpi eq, %13, %16 : vector<1x128xi32>
    %c62_i32 = arith.constant 62 : i32
    %18 = vector.broadcast %c62_i32 : i32 to vector<1x128xi32>
    %19 = arith.cmpi eq, %13, %18 : vector<1x128xi32>
    %c63_i32_3 = arith.constant 63 : i32
    %20 = vector.broadcast %c63_i32_3 : i32 to vector<1x128xi32>
    %21 = arith.cmpi eq, %13, %20 : vector<1x128xi32>
    %22 = tpu.iota {dimensions = array<i32: 1>} : vector<1x32xi32>
    %c15_i32 = arith.constant 15 : i32
    %23 = vector.broadcast %c15_i32 : i32 to vector<1x32xi32>
    %24 = arith.andi %22, %23 : vector<1x32xi32>
    %c0_i32_4 = arith.constant 0 : i32
    %25 = vector.broadcast %c0_i32_4 : i32 to vector<1x32xi32>
    %26 = arith.cmpi eq, %24, %25 : vector<1x32xi32>
    %c1_i32_5 = arith.constant 1 : i32
    %27 = vector.broadcast %c1_i32_5 : i32 to vector<1x32xi32>
    %28 = arith.cmpi eq, %24, %27 : vector<1x32xi32>
    %c14_i32 = arith.constant 14 : i32
    %29 = vector.broadcast %c14_i32 : i32 to vector<1x32xi32>
    %30 = arith.cmpi eq, %24, %29 : vector<1x32xi32>
    %c15_i32_6 = arith.constant 15 : i32
    %31 = vector.broadcast %c15_i32_6 : i32 to vector<1x32xi32>
    %32 = arith.cmpi eq, %24, %31 : vector<1x32xi32>
    %33 = tpu.iota {dimensions = array<i32: 1>} : vector<1x8xi32>
    %c3_i32 = arith.constant 3 : i32
    %34 = vector.broadcast %c3_i32 : i32 to vector<1x8xi32>
    %35 = arith.andi %33, %34 : vector<1x8xi32>
    %c0_i32_7 = arith.constant 0 : i32
    %36 = vector.broadcast %c0_i32_7 : i32 to vector<1x8xi32>
    %37 = arith.cmpi eq, %35, %36 : vector<1x8xi32>
    %c1_i32_8 = arith.constant 1 : i32
    %38 = vector.broadcast %c1_i32_8 : i32 to vector<1x8xi32>
    %39 = arith.cmpi eq, %35, %38 : vector<1x8xi32>
    %c2_i32 = arith.constant 2 : i32
    %40 = vector.broadcast %c2_i32 : i32 to vector<1x8xi32>
    %41 = arith.cmpi eq, %35, %40 : vector<1x8xi32>
    %c3_i32_9 = arith.constant 3 : i32
    %42 = vector.broadcast %c3_i32_9 : i32 to vector<1x8xi32>
    %43 = arith.cmpi eq, %35, %42 : vector<1x8xi32>
    %c0 = arith.constant 0 : index
    %c0_10 = arith.constant 0 : index
    %44 = vector.load %arg0[%c0, %c0_10] : memref<8x256xf32, #tpu.memory_space<vmem>>, vector<8x256xf32>
    %c0_11 = arith.constant 0 : index
    %c0_12 = arith.constant 0 : index
    %45 = vector.load %arg1[%c0_11, %c0_12] : memref<752x256xbf16, #tpu.memory_space<vmem>>, vector<8x256xbf16>
    %c2_i32_13 = arith.constant 2 : i32
    %46 = tpu.dynamic_rotate %44 by %c2_i32_13 dim 1 : vector<8x256xf32>, i32 -> vector<8x256xf32>
    %c1_i32_14 = arith.constant 1 : i32
    %47 = tpu.dynamic_rotate %44 by %c1_i32_14 dim 1 : vector<8x256xf32>, i32 -> vector<8x256xf32>
    %c255_i32 = arith.constant 255 : i32
    %48 = tpu.dynamic_rotate %44 by %c255_i32 dim 1 : vector<8x256xf32>, i32 -> vector<8x256xf32>
    %c254_i32 = arith.constant 254 : i32
    %49 = tpu.dynamic_rotate %44 by %c254_i32 dim 1 : vector<8x256xf32>, i32 -> vector<8x256xf32>
    %50 = vector.shape_cast %4 : vector<1x256xi1> to vector<1x256xi1>
    %51 = vector.broadcast %50 : vector<1x256xi1> to vector<8x256xi1>
    %52 = arith.select %51, %49, %46 : vector<8x256xi1>, vector<8x256xf32>
    %53 = vector.shape_cast %6 : vector<1x256xi1> to vector<1x256xi1>
    %54 = vector.broadcast %53 : vector<1x256xi1> to vector<8x256xi1>
    %55 = arith.select %54, %44, %52 : vector<8x256xi1>, vector<8x256xf32>
    %56 = vector.shape_cast %4 : vector<1x256xi1> to vector<1x256xi1>
    %57 = vector.broadcast %56 : vector<1x256xi1> to vector<8x256xi1>
    %58 = arith.select %57, %48, %47 : vector<8x256xi1>, vector<8x256xf32>
    %59 = vector.shape_cast %10 : vector<1x256xi1> to vector<1x256xi1>
    %60 = vector.broadcast %59 : vector<1x256xi1> to vector<8x256xi1>
    %61 = arith.select %60, %47, %48 : vector<8x256xi1>, vector<8x256xf32>
    %62 = vector.shape_cast %10 : vector<1x256xi1> to vector<1x256xi1>
    %63 = vector.broadcast %62 : vector<1x256xi1> to vector<8x256xi1>
    %64 = arith.select %63, %46, %49 : vector<8x256xi1>, vector<8x256xf32>
    %65 = vector.shape_cast %8 : vector<1x256xi1> to vector<1x256xi1>
    %66 = vector.broadcast %65 : vector<1x256xi1> to vector<8x256xi1>
    %67 = arith.select %66, %44, %64 : vector<8x256xi1>, vector<8x256xf32>
    %68 = tpu.concatenate %55, %58, %44, %61, %67 in 0 : vector<8x256xf32>, vector<8x256xf32>, vector<8x256xf32>, vector<8x256xf32>, vector<8x256xf32> -> vector<40x256xf32>
    %69 = arith.truncf %68 : vector<40x256xf32> to vector<40x256xbf16>
    %70 = vector.extract_strided_slice %45 {offsets = [0, 0], sizes = [8, 40], strides = [1, 1]} : vector<8x256xbf16> to vector<8x40xbf16>
    %cst = arith.constant dense<0.000000e+00> : vector<8x256xf32>
    %71 = tpu.matmul %70, %69, %cst {dimension_numbers = #tpu.dot_dimension_numbers<[1], [0], [0], [1], [0, 0, 1, 1], [], []>} : vector<8x40xbf16>, vector<40x256xbf16>, vector<8x256xf32> -> vector<8x256xf32>
    %72 = vector.extract_strided_slice %45 {offsets = [0, 255], sizes = [8, 1], strides = [1, 1]} : vector<8x256xbf16> to vector<8x1xbf16>
    %73 = arith.extf %72 : vector<8x1xbf16> to vector<8x1xf32>
    %74 = vector.broadcast %73 : vector<8x1xf32> to vector<8x256xf32>
    %75 = arith.addf %71, %74 : vector<8x256xf32>
    %cst_15 = arith.constant 0.000000e+00 : f32
    %76 = vector.broadcast %cst_15 : f32 to vector<8x256xf32>
    %77 = arith.maximumf %75, %76 : vector<8x256xf32>
    %c16 = arith.constant 16 : index
    %c0_16 = arith.constant 0 : index
    %78 = vector.load %arg1[%c16, %c0_16] : memref<752x256xbf16, #tpu.memory_space<vmem>>, vector<8x256xbf16>
    %c2_i32_17 = arith.constant 2 : i32
    %79 = tpu.dynamic_rotate %77 by %c2_i32_17 dim 1 : vector<8x256xf32>, i32 -> vector<8x256xf32>
    %c1_i32_18 = arith.constant 1 : i32
    %80 = tpu.dynamic_rotate %77 by %c1_i32_18 dim 1 : vector<8x256xf32>, i32 -> vector<8x256xf32>
    %c255_i32_19 = arith.constant 255 : i32
    %81 = tpu.dynamic_rotate %77 by %c255_i32_19 dim 1 : vector<8x256xf32>, i32 -> vector<8x256xf32>
    %c254_i32_20 = arith.constant 254 : i32
    %82 = tpu.dynamic_rotate %77 by %c254_i32_20 dim 1 : vector<8x256xf32>, i32 -> vector<8x256xf32>
    %83 = vector.shape_cast %4 : vector<1x256xi1> to vector<1x256xi1>
    %84 = vector.broadcast %83 : vector<1x256xi1> to vector<8x256xi1>
    %85 = arith.select %84, %82, %79 : vector<8x256xi1>, vector<8x256xf32>
    %86 = vector.shape_cast %6 : vector<1x256xi1> to vector<1x256xi1>
    %87 = vector.broadcast %86 : vector<1x256xi1> to vector<8x256xi1>
    %88 = arith.select %87, %77, %85 : vector<8x256xi1>, vector<8x256xf32>
    %89 = vector.shape_cast %4 : vector<1x256xi1> to vector<1x256xi1>
    %90 = vector.broadcast %89 : vector<1x256xi1> to vector<8x256xi1>
    %91 = arith.select %90, %81, %80 : vector<8x256xi1>, vector<8x256xf32>
    %92 = vector.shape_cast %10 : vector<1x256xi1> to vector<1x256xi1>
    %93 = vector.broadcast %92 : vector<1x256xi1> to vector<8x256xi1>
    %94 = arith.select %93, %80, %81 : vector<8x256xi1>, vector<8x256xf32>
    %95 = vector.shape_cast %10 : vector<1x256xi1> to vector<1x256xi1>
    %96 = vector.broadcast %95 : vector<1x256xi1> to vector<8x256xi1>
    %97 = arith.select %96, %79, %82 : vector<8x256xi1>, vector<8x256xf32>
    %98 = vector.shape_cast %8 : vector<1x256xi1> to vector<1x256xi1>
    %99 = vector.broadcast %98 : vector<1x256xi1> to vector<8x256xi1>
    %100 = arith.select %99, %77, %97 : vector<8x256xi1>, vector<8x256xf32>
    %101 = tpu.concatenate %88, %91, %77, %94, %100 in 0 : vector<8x256xf32>, vector<8x256xf32>, vector<8x256xf32>, vector<8x256xf32>, vector<8x256xf32> -> vector<40x256xf32>
    %102 = arith.truncf %101 : vector<40x256xf32> to vector<40x256xbf16>
    %103 = vector.extract_strided_slice %78 {offsets = [0, 0], sizes = [8, 40], strides = [1, 1]} : vector<8x256xbf16> to vector<8x40xbf16>
    %cst_21 = arith.constant dense<0.000000e+00> : vector<8x256xf32>
    %104 = tpu.matmul %103, %102, %cst_21 {dimension_numbers = #tpu.dot_dimension_numbers<[1], [0], [0], [1], [0, 0, 1, 1], [], []>} : vector<8x40xbf16>, vector<40x256xbf16>, vector<8x256xf32> -> vector<8x256xf32>
    %105 = vector.extract_strided_slice %78 {offsets = [0, 255], sizes = [8, 1], strides = [1, 1]} : vector<8x256xbf16> to vector<8x1xbf16>
    %106 = arith.extf %105 : vector<8x1xbf16> to vector<8x1xf32>
    %107 = vector.broadcast %106 : vector<8x1xf32> to vector<8x256xf32>
    %108 = arith.addf %104, %107 : vector<8x256xf32>
    %c32 = arith.constant 32 : index
    %c0_22 = arith.constant 0 : index
    %109 = vector.load %arg1[%c32, %c0_22] : memref<752x256xbf16, #tpu.memory_space<vmem>>, vector<8x256xbf16>
    %110 = vector.extract_strided_slice %109 {offsets = [0, 0], sizes = [8, 8], strides = [1, 1]} : vector<8x256xbf16> to vector<8x8xbf16>
    %111 = arith.truncf %44 : vector<8x256xf32> to vector<8x256xbf16>
    %cst_23 = arith.constant dense<0.000000e+00> : vector<8x256xf32>
    %112 = tpu.matmul %110, %111, %cst_23 {dimension_numbers = #tpu.dot_dimension_numbers<[1], [0], [0], [1], [0, 0, 1, 1], [], []>} : vector<8x8xbf16>, vector<8x256xbf16>, vector<8x256xf32> -> vector<8x256xf32>
    %113 = arith.addf %108, %112 : vector<8x256xf32>
    %cst_24 = arith.constant 0.000000e+00 : f32
    %114 = vector.broadcast %cst_24 : f32 to vector<8x256xf32>
    %115 = arith.maximumf %113, %114 : vector<8x256xf32>
    %c255_i32_25 = arith.constant 255 : i32
    %116 = tpu.dynamic_rotate %115 by %c255_i32_25 dim 1 : vector<8x256xf32>, i32 -> vector<8x256xf32>
    %117 = arith.maximumf %115, %116 : vector<8x256xf32>
    %118 = arith.truncf %117 : vector<8x256xf32> to vector<8x256xbf16>
    %c0_26 = arith.constant 0 : index
    %c0_27 = arith.constant 0 : index
    %119 = vector.load %arg2[%c0_26, %c0_27] : memref<592x256xbf16, #tpu.memory_space<vmem>>, vector<256x128xbf16>
    %cst_28 = arith.constant dense<0.000000e+00> : vector<8x128xf32>
    %120 = tpu.matmul %118, %119, %cst_28 {dimension_numbers = #tpu.dot_dimension_numbers<[1], [0], [0], [1], [0, 0, 1, 1], [], []>} : vector<8x256xbf16>, vector<256x128xbf16>, vector<8x128xf32> -> vector<8x128xf32>
    %c48 = arith.constant 48 : index
    %c0_29 = arith.constant 0 : index
    %121 = vector.load %arg1[%c48, %c0_29] : memref<752x256xbf16, #tpu.memory_space<vmem>>, vector<8x256xbf16>
    %c2_i32_30 = arith.constant 2 : i32
    %122 = tpu.dynamic_rotate %120 by %c2_i32_30 dim 1 : vector<8x128xf32>, i32 -> vector<8x128xf32>
    %c1_i32_31 = arith.constant 1 : i32
    %123 = tpu.dynamic_rotate %120 by %c1_i32_31 dim 1 : vector<8x128xf32>, i32 -> vector<8x128xf32>
    %c127_i32_32 = arith.constant 127 : i32
    %124 = tpu.dynamic_rotate %120 by %c127_i32_32 dim 1 : vector<8x128xf32>, i32 -> vector<8x128xf32>
    %c126_i32_33 = arith.constant 126 : i32
    %125 = tpu.dynamic_rotate %120 by %c126_i32_33 dim 1 : vector<8x128xf32>, i32 -> vector<8x128xf32>
    %126 = vector.shape_cast %15 : vector<1x128xi1> to vector<1x128xi1>
    %127 = vector.broadcast %126 : vector<1x128xi1> to vector<8x128xi1>
    %128 = arith.select %127, %125, %122 : vector<8x128xi1>, vector<8x128xf32>
    %129 = vector.shape_cast %17 : vector<1x128xi1> to vector<1x128xi1>
    %130 = vector.broadcast %129 : vector<1x128xi1> to vector<8x128xi1>
    %131 = arith.select %130, %120, %128 : vector<8x128xi1>, vector<8x128xf32>
    %132 = vector.shape_cast %15 : vector<1x128xi1> to vector<1x128xi1>
    %133 = vector.broadcast %132 : vector<1x128xi1> to vector<8x128xi1>
    %134 = arith.select %133, %124, %123 : vector<8x128xi1>, vector<8x128xf32>
    %135 = vector.shape_cast %21 : vector<1x128xi1> to vector<1x128xi1>
    %136 = vector.broadcast %135 : vector<1x128xi1> to vector<8x128xi1>
    %137 = arith.select %136, %123, %124 : vector<8x128xi1>, vector<8x128xf32>
    %138 = vector.shape_cast %21 : vector<1x128xi1> to vector<1x128xi1>
    %139 = vector.broadcast %138 : vector<1x128xi1> to vector<8x128xi1>
    %140 = arith.select %139, %122, %125 : vector<8x128xi1>, vector<8x128xf32>
    %141 = vector.shape_cast %19 : vector<1x128xi1> to vector<1x128xi1>
    %142 = vector.broadcast %141 : vector<1x128xi1> to vector<8x128xi1>
    %143 = arith.select %142, %120, %140 : vector<8x128xi1>, vector<8x128xf32>
    %144 = tpu.concatenate %131, %134, %120, %137, %143 in 0 : vector<8x128xf32>, vector<8x128xf32>, vector<8x128xf32>, vector<8x128xf32>, vector<8x128xf32> -> vector<40x128xf32>
    %145 = arith.truncf %144 : vector<40x128xf32> to vector<40x128xbf16>
    %146 = vector.extract_strided_slice %121 {offsets = [0, 0], sizes = [8, 40], strides = [1, 1]} : vector<8x256xbf16> to vector<8x40xbf16>
    %cst_34 = arith.constant dense<0.000000e+00> : vector<8x128xf32>
    %147 = tpu.matmul %146, %145, %cst_34 {dimension_numbers = #tpu.dot_dimension_numbers<[1], [0], [0], [1], [0, 0, 1, 1], [], []>} : vector<8x40xbf16>, vector<40x128xbf16>, vector<8x128xf32> -> vector<8x128xf32>
    %148 = vector.extract_strided_slice %121 {offsets = [0, 255], sizes = [8, 1], strides = [1, 1]} : vector<8x256xbf16> to vector<8x1xbf16>
    %149 = arith.extf %148 : vector<8x1xbf16> to vector<8x1xf32>
    %150 = vector.broadcast %149 : vector<8x1xf32> to vector<8x128xf32>
    %151 = arith.addf %147, %150 : vector<8x128xf32>
    %cst_35 = arith.constant 0.000000e+00 : f32
    %152 = vector.broadcast %cst_35 : f32 to vector<8x128xf32>
    %153 = arith.maximumf %151, %152 : vector<8x128xf32>
    %c64 = arith.constant 64 : index
    %c0_36 = arith.constant 0 : index
    %154 = vector.load %arg1[%c64, %c0_36] : memref<752x256xbf16, #tpu.memory_space<vmem>>, vector<16x256xbf16>
    %c2_i32_37 = arith.constant 2 : i32
    %155 = tpu.dynamic_rotate %153 by %c2_i32_37 dim 1 : vector<8x128xf32>, i32 -> vector<8x128xf32>
    %c1_i32_38 = arith.constant 1 : i32
    %156 = tpu.dynamic_rotate %153 by %c1_i32_38 dim 1 : vector<8x128xf32>, i32 -> vector<8x128xf32>
    %c127_i32_39 = arith.constant 127 : i32
    %157 = tpu.dynamic_rotate %153 by %c127_i32_39 dim 1 : vector<8x128xf32>, i32 -> vector<8x128xf32>
    %c126_i32_40 = arith.constant 126 : i32
    %158 = tpu.dynamic_rotate %153 by %c126_i32_40 dim 1 : vector<8x128xf32>, i32 -> vector<8x128xf32>
    %159 = vector.shape_cast %15 : vector<1x128xi1> to vector<1x128xi1>
    %160 = vector.broadcast %159 : vector<1x128xi1> to vector<8x128xi1>
    %161 = arith.select %160, %158, %155 : vector<8x128xi1>, vector<8x128xf32>
    %162 = vector.shape_cast %17 : vector<1x128xi1> to vector<1x128xi1>
    %163 = vector.broadcast %162 : vector<1x128xi1> to vector<8x128xi1>
    %164 = arith.select %163, %153, %161 : vector<8x128xi1>, vector<8x128xf32>
    %165 = vector.shape_cast %15 : vector<1x128xi1> to vector<1x128xi1>
    %166 = vector.broadcast %165 : vector<1x128xi1> to vector<8x128xi1>
    %167 = arith.select %166, %157, %156 : vector<8x128xi1>, vector<8x128xf32>
    %168 = vector.shape_cast %21 : vector<1x128xi1> to vector<1x128xi1>
    %169 = vector.broadcast %168 : vector<1x128xi1> to vector<8x128xi1>
    %170 = arith.select %169, %156, %157 : vector<8x128xi1>, vector<8x128xf32>
    %171 = vector.shape_cast %21 : vector<1x128xi1> to vector<1x128xi1>
    %172 = vector.broadcast %171 : vector<1x128xi1> to vector<8x128xi1>
    %173 = arith.select %172, %155, %158 : vector<8x128xi1>, vector<8x128xf32>
    %174 = vector.shape_cast %19 : vector<1x128xi1> to vector<1x128xi1>
    %175 = vector.broadcast %174 : vector<1x128xi1> to vector<8x128xi1>
    %176 = arith.select %175, %153, %173 : vector<8x128xi1>, vector<8x128xf32>
    %177 = tpu.concatenate %164, %167, %153, %170, %176 in 0 : vector<8x128xf32>, vector<8x128xf32>, vector<8x128xf32>, vector<8x128xf32>, vector<8x128xf32> -> vector<40x128xf32>
    %178 = arith.truncf %177 : vector<40x128xf32> to vector<40x128xbf16>
    %179 = vector.extract_strided_slice %154 {offsets = [0, 0], sizes = [16, 40], strides = [1, 1]} : vector<16x256xbf16> to vector<16x40xbf16>
    %cst_41 = arith.constant dense<0.000000e+00> : vector<16x128xf32>
    %180 = tpu.matmul %179, %178, %cst_41 {dimension_numbers = #tpu.dot_dimension_numbers<[1], [0], [0], [1], [0, 0, 1, 1], [], []>} : vector<16x40xbf16>, vector<40x128xbf16>, vector<16x128xf32> -> vector<16x128xf32>
    %181 = vector.extract_strided_slice %154 {offsets = [0, 255], sizes = [16, 1], strides = [1, 1]} : vector<16x256xbf16> to vector<16x1xbf16>
    %182 = arith.extf %181 : vector<16x1xbf16> to vector<16x1xf32>
    %183 = vector.broadcast %182 : vector<16x1xf32> to vector<16x128xf32>
    %184 = arith.addf %180, %183 : vector<16x128xf32>
    %c80 = arith.constant 80 : index
    %c0_42 = arith.constant 0 : index
    %185 = vector.load %arg1[%c80, %c0_42] : memref<752x256xbf16, #tpu.memory_space<vmem>>, vector<16x256xbf16>
    %186 = vector.extract_strided_slice %185 {offsets = [0, 0], sizes = [16, 8], strides = [1, 1]} : vector<16x256xbf16> to vector<16x8xbf16>
    %187 = arith.truncf %120 : vector<8x128xf32> to vector<8x128xbf16>
    %cst_43 = arith.constant dense<0.000000e+00> : vector<16x128xf32>
    %188 = tpu.matmul %186, %187, %cst_43 {dimension_numbers = #tpu.dot_dimension_numbers<[1], [0], [0], [1], [0, 0, 1, 1], [], []>} : vector<16x8xbf16>, vector<8x128xbf16>, vector<16x128xf32> -> vector<16x128xf32>
    %189 = arith.addf %184, %188 : vector<16x128xf32>
    %cst_44 = arith.constant 0.000000e+00 : f32
    %190 = vector.broadcast %cst_44 : f32 to vector<16x128xf32>
    %191 = arith.maximumf %189, %190 : vector<16x128xf32>
    %c127_i32_45 = arith.constant 127 : i32
    %192 = tpu.dynamic_rotate %191 by %c127_i32_45 dim 1 : vector<16x128xf32>, i32 -> vector<16x128xf32>
    %193 = arith.maximumf %191, %192 : vector<16x128xf32>
    %c126_i32_46 = arith.constant 126 : i32
    %194 = tpu.dynamic_rotate %193 by %c126_i32_46 dim 1 : vector<16x128xf32>, i32 -> vector<16x128xf32>
    %195 = arith.maximumf %193, %194 : vector<16x128xf32>
    %196 = arith.truncf %195 : vector<16x128xf32> to vector<16x128xbf16>
    %c256 = arith.constant 256 : index
    %c0_47 = arith.constant 0 : index
    %197 = vector.load %arg2[%c256, %c0_47] : memref<592x256xbf16, #tpu.memory_space<vmem>>, vector<128x32xbf16>
    %cst_48 = arith.constant dense<0.000000e+00> : vector<16x32xf32>
    %198 = tpu.matmul %196, %197, %cst_48 {dimension_numbers = #tpu.dot_dimension_numbers<[1], [0], [0], [1], [0, 0, 1, 1], [], []>} : vector<16x128xbf16>, vector<128x32xbf16>, vector<16x32xf32> -> vector<16x32xf32>
    %c96 = arith.constant 96 : index
    %c0_49 = arith.constant 0 : index
    %199 = vector.load %arg1[%c96, %c0_49] : memref<752x256xbf16, #tpu.memory_space<vmem>>, vector<16x256xbf16>
    %200 = vector.extract_strided_slice %198 {offsets = [0, 30], sizes = [16, 2], strides = [1, 1]} : vector<16x32xf32> to vector<16x2xf32>
    %201 = vector.extract_strided_slice %198 {offsets = [0, 0], sizes = [16, 30], strides = [1, 1]} : vector<16x32xf32> to vector<16x30xf32>
    %202 = tpu.concatenate %200, %201 in 1 : vector<16x2xf32>, vector<16x30xf32> -> vector<16x32xf32>
    %203 = vector.extract_strided_slice %198 {offsets = [0, 31], sizes = [16, 1], strides = [1, 1]} : vector<16x32xf32> to vector<16x1xf32>
    %204 = vector.extract_strided_slice %198 {offsets = [0, 0], sizes = [16, 31], strides = [1, 1]} : vector<16x32xf32> to vector<16x31xf32>
    %205 = tpu.concatenate %203, %204 in 1 : vector<16x1xf32>, vector<16x31xf32> -> vector<16x32xf32>
    %206 = vector.extract_strided_slice %198 {offsets = [0, 1], sizes = [16, 31], strides = [1, 1]} : vector<16x32xf32> to vector<16x31xf32>
    %207 = vector.extract_strided_slice %198 {offsets = [0, 0], sizes = [16, 1], strides = [1, 1]} : vector<16x32xf32> to vector<16x1xf32>
    %208 = tpu.concatenate %206, %207 in 1 : vector<16x31xf32>, vector<16x1xf32> -> vector<16x32xf32>
    %209 = vector.extract_strided_slice %198 {offsets = [0, 2], sizes = [16, 30], strides = [1, 1]} : vector<16x32xf32> to vector<16x30xf32>
    %210 = vector.extract_strided_slice %198 {offsets = [0, 0], sizes = [16, 2], strides = [1, 1]} : vector<16x32xf32> to vector<16x2xf32>
    %211 = tpu.concatenate %209, %210 in 1 : vector<16x30xf32>, vector<16x2xf32> -> vector<16x32xf32>
    %212 = vector.shape_cast %26 : vector<1x32xi1> to vector<1x32xi1>
    %213 = vector.broadcast %212 : vector<1x32xi1> to vector<16x32xi1>
    %214 = arith.select %213, %211, %202 : vector<16x32xi1>, vector<16x32xf32>
    %215 = vector.shape_cast %28 : vector<1x32xi1> to vector<1x32xi1>
    %216 = vector.broadcast %215 : vector<1x32xi1> to vector<16x32xi1>
    %217 = arith.select %216, %198, %214 : vector<16x32xi1>, vector<16x32xf32>
    %218 = vector.shape_cast %26 : vector<1x32xi1> to vector<1x32xi1>
    %219 = vector.broadcast %218 : vector<1x32xi1> to vector<16x32xi1>
    %220 = arith.select %219, %208, %205 : vector<16x32xi1>, vector<16x32xf32>
    %221 = vector.shape_cast %32 : vector<1x32xi1> to vector<1x32xi1>
    %222 = vector.broadcast %221 : vector<1x32xi1> to vector<16x32xi1>
    %223 = arith.select %222, %205, %208 : vector<16x32xi1>, vector<16x32xf32>
    %224 = vector.shape_cast %32 : vector<1x32xi1> to vector<1x32xi1>
    %225 = vector.broadcast %224 : vector<1x32xi1> to vector<16x32xi1>
    %226 = arith.select %225, %202, %211 : vector<16x32xi1>, vector<16x32xf32>
    %227 = vector.shape_cast %30 : vector<1x32xi1> to vector<1x32xi1>
    %228 = vector.broadcast %227 : vector<1x32xi1> to vector<16x32xi1>
    %229 = arith.select %228, %198, %226 : vector<16x32xi1>, vector<16x32xf32>
    %230 = tpu.concatenate %217, %220, %198, %223, %229 in 0 : vector<16x32xf32>, vector<16x32xf32>, vector<16x32xf32>, vector<16x32xf32>, vector<16x32xf32> -> vector<80x32xf32>
    %231 = arith.truncf %230 : vector<80x32xf32> to vector<80x32xbf16>
    %232 = vector.extract_strided_slice %199 {offsets = [0, 0], sizes = [16, 80], strides = [1, 1]} : vector<16x256xbf16> to vector<16x80xbf16>
    %cst_50 = arith.constant dense<0.000000e+00> : vector<16x32xf32>
    %233 = tpu.matmul %232, %231, %cst_50 {dimension_numbers = #tpu.dot_dimension_numbers<[1], [0], [0], [1], [0, 0, 1, 1], [], []>} : vector<16x80xbf16>, vector<80x32xbf16>, vector<16x32xf32> -> vector<16x32xf32>
    %234 = vector.extract_strided_slice %199 {offsets = [0, 255], sizes = [16, 1], strides = [1, 1]} : vector<16x256xbf16> to vector<16x1xbf16>
    %235 = arith.extf %234 : vector<16x1xbf16> to vector<16x1xf32>
    %236 = vector.broadcast %235 : vector<16x1xf32> to vector<16x32xf32>
    %237 = arith.addf %233, %236 : vector<16x32xf32>
    %cst_51 = arith.constant 0.000000e+00 : f32
    %238 = vector.broadcast %cst_51 : f32 to vector<16x32xf32>
    %239 = arith.maximumf %237, %238 : vector<16x32xf32>
    %c112 = arith.constant 112 : index
    %c0_52 = arith.constant 0 : index
    %240 = vector.load %arg1[%c112, %c0_52] : memref<752x256xbf16, #tpu.memory_space<vmem>>, vector<24x256xbf16>
    %241 = vector.extract_strided_slice %239 {offsets = [0, 30], sizes = [16, 2], strides = [1, 1]} : vector<16x32xf32> to vector<16x2xf32>
    %242 = vector.extract_strided_slice %239 {offsets = [0, 0], sizes = [16, 30], strides = [1, 1]} : vector<16x32xf32> to vector<16x30xf32>
    %243 = tpu.concatenate %241, %242 in 1 : vector<16x2xf32>, vector<16x30xf32> -> vector<16x32xf32>
    %244 = vector.extract_strided_slice %239 {offsets = [0, 31], sizes = [16, 1], strides = [1, 1]} : vector<16x32xf32> to vector<16x1xf32>
    %245 = vector.extract_strided_slice %239 {offsets = [0, 0], sizes = [16, 31], strides = [1, 1]} : vector<16x32xf32> to vector<16x31xf32>
    %246 = tpu.concatenate %244, %245 in 1 : vector<16x1xf32>, vector<16x31xf32> -> vector<16x32xf32>
    %247 = vector.extract_strided_slice %239 {offsets = [0, 1], sizes = [16, 31], strides = [1, 1]} : vector<16x32xf32> to vector<16x31xf32>
    %248 = vector.extract_strided_slice %239 {offsets = [0, 0], sizes = [16, 1], strides = [1, 1]} : vector<16x32xf32> to vector<16x1xf32>
    %249 = tpu.concatenate %247, %248 in 1 : vector<16x31xf32>, vector<16x1xf32> -> vector<16x32xf32>
    %250 = vector.extract_strided_slice %239 {offsets = [0, 2], sizes = [16, 30], strides = [1, 1]} : vector<16x32xf32> to vector<16x30xf32>
    %251 = vector.extract_strided_slice %239 {offsets = [0, 0], sizes = [16, 2], strides = [1, 1]} : vector<16x32xf32> to vector<16x2xf32>
    %252 = tpu.concatenate %250, %251 in 1 : vector<16x30xf32>, vector<16x2xf32> -> vector<16x32xf32>
    %253 = vector.shape_cast %26 : vector<1x32xi1> to vector<1x32xi1>
    %254 = vector.broadcast %253 : vector<1x32xi1> to vector<16x32xi1>
    %255 = arith.select %254, %252, %243 : vector<16x32xi1>, vector<16x32xf32>
    %256 = vector.shape_cast %28 : vector<1x32xi1> to vector<1x32xi1>
    %257 = vector.broadcast %256 : vector<1x32xi1> to vector<16x32xi1>
    %258 = arith.select %257, %239, %255 : vector<16x32xi1>, vector<16x32xf32>
    %259 = vector.shape_cast %26 : vector<1x32xi1> to vector<1x32xi1>
    %260 = vector.broadcast %259 : vector<1x32xi1> to vector<16x32xi1>
    %261 = arith.select %260, %249, %246 : vector<16x32xi1>, vector<16x32xf32>
    %262 = vector.shape_cast %32 : vector<1x32xi1> to vector<1x32xi1>
    %263 = vector.broadcast %262 : vector<1x32xi1> to vector<16x32xi1>
    %264 = arith.select %263, %246, %249 : vector<16x32xi1>, vector<16x32xf32>
    %265 = vector.shape_cast %32 : vector<1x32xi1> to vector<1x32xi1>
    %266 = vector.broadcast %265 : vector<1x32xi1> to vector<16x32xi1>
    %267 = arith.select %266, %243, %252 : vector<16x32xi1>, vector<16x32xf32>
    %268 = vector.shape_cast %30 : vector<1x32xi1> to vector<1x32xi1>
    %269 = vector.broadcast %268 : vector<1x32xi1> to vector<16x32xi1>
    %270 = arith.select %269, %239, %267 : vector<16x32xi1>, vector<16x32xf32>
    %271 = tpu.concatenate %258, %261, %239, %264, %270 in 0 : vector<16x32xf32>, vector<16x32xf32>, vector<16x32xf32>, vector<16x32xf32>, vector<16x32xf32> -> vector<80x32xf32>
    %272 = arith.truncf %271 : vector<80x32xf32> to vector<80x32xbf16>
    %273 = vector.extract_strided_slice %240 {offsets = [0, 0], sizes = [24, 80], strides = [1, 1]} : vector<24x256xbf16> to vector<24x80xbf16>
    %cst_53 = arith.constant dense<0.000000e+00> : vector<24x32xf32>
    %274 = tpu.matmul %273, %272, %cst_53 {dimension_numbers = #tpu.dot_dimension_numbers<[1], [0], [0], [1], [0, 0, 1, 1], [], []>} : vector<24x80xbf16>, vector<80x32xbf16>, vector<24x32xf32> -> vector<24x32xf32>
    %275 = vector.extract_strided_slice %240 {offsets = [0, 255], sizes = [24, 1], strides = [1, 1]} : vector<24x256xbf16> to vector<24x1xbf16>
    %276 = arith.extf %275 : vector<24x1xbf16> to vector<24x1xf32>
    %277 = vector.broadcast %276 : vector<24x1xf32> to vector<24x32xf32>
    %278 = arith.addf %274, %277 : vector<24x32xf32>
    %c144 = arith.constant 144 : index
    %c0_54 = arith.constant 0 : index
    %279 = vector.load %arg1[%c144, %c0_54] : memref<752x256xbf16, #tpu.memory_space<vmem>>, vector<24x256xbf16>
    %280 = vector.extract_strided_slice %279 {offsets = [0, 0], sizes = [24, 16], strides = [1, 1]} : vector<24x256xbf16> to vector<24x16xbf16>
    %281 = arith.truncf %198 : vector<16x32xf32> to vector<16x32xbf16>
    %cst_55 = arith.constant dense<0.000000e+00> : vector<24x32xf32>
    %282 = tpu.matmul %280, %281, %cst_55 {dimension_numbers = #tpu.dot_dimension_numbers<[1], [0], [0], [1], [0, 0, 1, 1], [], []>} : vector<24x16xbf16>, vector<16x32xbf16>, vector<24x32xf32> -> vector<24x32xf32>
    %283 = arith.addf %278, %282 : vector<24x32xf32>
    %cst_56 = arith.constant 0.000000e+00 : f32
    %284 = vector.broadcast %cst_56 : f32 to vector<24x32xf32>
    %285 = arith.maximumf %283, %284 : vector<24x32xf32>
    %286 = vector.extract_strided_slice %285 {offsets = [0, 1], sizes = [24, 31], strides = [1, 1]} : vector<24x32xf32> to vector<24x31xf32>
    %287 = vector.extract_strided_slice %285 {offsets = [0, 0], sizes = [24, 1], strides = [1, 1]} : vector<24x32xf32> to vector<24x1xf32>
    %288 = tpu.concatenate %286, %287 in 1 : vector<24x31xf32>, vector<24x1xf32> -> vector<24x32xf32>
    %289 = arith.maximumf %285, %288 : vector<24x32xf32>
    %290 = vector.extract_strided_slice %289 {offsets = [0, 2], sizes = [24, 30], strides = [1, 1]} : vector<24x32xf32> to vector<24x30xf32>
    %291 = vector.extract_strided_slice %289 {offsets = [0, 0], sizes = [24, 2], strides = [1, 1]} : vector<24x32xf32> to vector<24x2xf32>
    %292 = tpu.concatenate %290, %291 in 1 : vector<24x30xf32>, vector<24x2xf32> -> vector<24x32xf32>
    %293 = arith.maximumf %289, %292 : vector<24x32xf32>
    %294 = arith.truncf %293 : vector<24x32xf32> to vector<24x32xbf16>
    %c384 = arith.constant 384 : index
    %c0_57 = arith.constant 0 : index
    %295 = vector.load %arg2[%c384, %c0_57] : memref<592x256xbf16, #tpu.memory_space<vmem>>, vector<32x8xbf16>
    %cst_58 = arith.constant dense<0.000000e+00> : vector<24x8xf32>
    %296 = tpu.matmul %294, %295, %cst_58 {dimension_numbers = #tpu.dot_dimension_numbers<[1], [0], [0], [1], [0, 0, 1, 1], [], []>} : vector<24x32xbf16>, vector<32x8xbf16>, vector<24x8xf32> -> vector<24x8xf32>
    %297 = tpu.concatenate %296, %296 in 0 : vector<24x8xf32>, vector<24x8xf32> -> vector<48x8xf32>
    %c176 = arith.constant 176 : index
    %c0_59 = arith.constant 0 : index
    %298 = vector.load %arg1[%c176, %c0_59] : memref<752x256xbf16, #tpu.memory_space<vmem>>, vector<48x256xbf16>
    %299 = vector.extract_strided_slice %297 {offsets = [0, 6], sizes = [48, 2], strides = [1, 1]} : vector<48x8xf32> to vector<48x2xf32>
    %300 = vector.extract_strided_slice %297 {offsets = [0, 0], sizes = [48, 6], strides = [1, 1]} : vector<48x8xf32> to vector<48x6xf32>
    %301 = tpu.concatenate %299, %300 in 1 : vector<48x2xf32>, vector<48x6xf32> -> vector<48x8xf32>
    %302 = vector.extract_strided_slice %297 {offsets = [0, 7], sizes = [48, 1], strides = [1, 1]} : vector<48x8xf32> to vector<48x1xf32>
    %303 = vector.extract_strided_slice %297 {offsets = [0, 0], sizes = [48, 7], strides = [1, 1]} : vector<48x8xf32> to vector<48x7xf32>
    %304 = tpu.concatenate %302, %303 in 1 : vector<48x1xf32>, vector<48x7xf32> -> vector<48x8xf32>
    %305 = vector.extract_strided_slice %297 {offsets = [0, 1], sizes = [48, 7], strides = [1, 1]} : vector<48x8xf32> to vector<48x7xf32>
    %306 = vector.extract_strided_slice %297 {offsets = [0, 0], sizes = [48, 1], strides = [1, 1]} : vector<48x8xf32> to vector<48x1xf32>
    %307 = tpu.concatenate %305, %306 in 1 : vector<48x7xf32>, vector<48x1xf32> -> vector<48x8xf32>
    %308 = vector.extract_strided_slice %297 {offsets = [0, 2], sizes = [48, 6], strides = [1, 1]} : vector<48x8xf32> to vector<48x6xf32>
    %309 = vector.extract_strided_slice %297 {offsets = [0, 0], sizes = [48, 2], strides = [1, 1]} : vector<48x8xf32> to vector<48x2xf32>
    %310 = tpu.concatenate %308, %309 in 1 : vector<48x6xf32>, vector<48x2xf32> -> vector<48x8xf32>
    %311 = vector.shape_cast %37 : vector<1x8xi1> to vector<1x8xi1>
    %312 = vector.broadcast %311 : vector<1x8xi1> to vector<48x8xi1>
    %313 = arith.select %312, %310, %301 : vector<48x8xi1>, vector<48x8xf32>
    %314 = vector.shape_cast %39 : vector<1x8xi1> to vector<1x8xi1>
    %315 = vector.broadcast %314 : vector<1x8xi1> to vector<48x8xi1>
    %316 = arith.select %315, %297, %313 : vector<48x8xi1>, vector<48x8xf32>
    %317 = vector.shape_cast %37 : vector<1x8xi1> to vector<1x8xi1>
    %318 = vector.broadcast %317 : vector<1x8xi1> to vector<48x8xi1>
    %319 = arith.select %318, %307, %304 : vector<48x8xi1>, vector<48x8xf32>
    %320 = vector.shape_cast %43 : vector<1x8xi1> to vector<1x8xi1>
    %321 = vector.broadcast %320 : vector<1x8xi1> to vector<48x8xi1>
    %322 = arith.select %321, %304, %307 : vector<48x8xi1>, vector<48x8xf32>
    %323 = vector.shape_cast %43 : vector<1x8xi1> to vector<1x8xi1>
    %324 = vector.broadcast %323 : vector<1x8xi1> to vector<48x8xi1>
    %325 = arith.select %324, %301, %310 : vector<48x8xi1>, vector<48x8xf32>
    %326 = vector.shape_cast %41 : vector<1x8xi1> to vector<1x8xi1>
    %327 = vector.broadcast %326 : vector<1x8xi1> to vector<48x8xi1>
    %328 = arith.select %327, %297, %325 : vector<48x8xi1>, vector<48x8xf32>
    %329 = tpu.concatenate %316, %319, %297, %322, %328 in 0 : vector<48x8xf32>, vector<48x8xf32>, vector<48x8xf32>, vector<48x8xf32>, vector<48x8xf32> -> vector<240x8xf32>
    %330 = arith.truncf %329 : vector<240x8xf32> to vector<240x8xbf16>
    %331 = vector.extract_strided_slice %298 {offsets = [0, 0], sizes = [48, 240], strides = [1, 1]} : vector<48x256xbf16> to vector<48x240xbf16>
    %cst_60 = arith.constant dense<0.000000e+00> : vector<48x8xf32>
    %332 = tpu.matmul %331, %330, %cst_60 {dimension_numbers = #tpu.dot_dimension_numbers<[1], [0], [0], [1], [0, 0, 1, 1], [], []>} : vector<48x240xbf16>, vector<240x8xbf16>, vector<48x8xf32> -> vector<48x8xf32>
    %333 = vector.extract_strided_slice %298 {offsets = [0, 255], sizes = [48, 1], strides = [1, 1]} : vector<48x256xbf16> to vector<48x1xbf16>
    %334 = arith.extf %333 : vector<48x1xbf16> to vector<48x1xf32>
    %335 = vector.broadcast %334 : vector<48x1xf32> to vector<48x8xf32>
    %336 = arith.addf %332, %335 : vector<48x8xf32>
    %cst_61 = arith.constant 0.000000e+00 : f32
    %337 = vector.broadcast %cst_61 : f32 to vector<48x8xf32>
    %338 = arith.maximumf %336, %337 : vector<48x8xf32>
    %c224 = arith.constant 224 : index
    %c0_62 = arith.constant 0 : index
    %339 = vector.load %arg1[%c224, %c0_62] : memref<752x256xbf16, #tpu.memory_space<vmem>>, vector<16x256xbf16>
    %340 = vector.extract_strided_slice %338 {offsets = [0, 6], sizes = [48, 2], strides = [1, 1]} : vector<48x8xf32> to vector<48x2xf32>
    %341 = vector.extract_strided_slice %338 {offsets = [0, 0], sizes = [48, 6], strides = [1, 1]} : vector<48x8xf32> to vector<48x6xf32>
    %342 = tpu.concatenate %340, %341 in 1 : vector<48x2xf32>, vector<48x6xf32> -> vector<48x8xf32>
    %343 = vector.extract_strided_slice %338 {offsets = [0, 7], sizes = [48, 1], strides = [1, 1]} : vector<48x8xf32> to vector<48x1xf32>
    %344 = vector.extract_strided_slice %338 {offsets = [0, 0], sizes = [48, 7], strides = [1, 1]} : vector<48x8xf32> to vector<48x7xf32>
    %345 = tpu.concatenate %343, %344 in 1 : vector<48x1xf32>, vector<48x7xf32> -> vector<48x8xf32>
    %346 = vector.extract_strided_slice %338 {offsets = [0, 1], sizes = [48, 7], strides = [1, 1]} : vector<48x8xf32> to vector<48x7xf32>
    %347 = vector.extract_strided_slice %338 {offsets = [0, 0], sizes = [48, 1], strides = [1, 1]} : vector<48x8xf32> to vector<48x1xf32>
    %348 = tpu.concatenate %346, %347 in 1 : vector<48x7xf32>, vector<48x1xf32> -> vector<48x8xf32>
    %349 = vector.extract_strided_slice %338 {offsets = [0, 2], sizes = [48, 6], strides = [1, 1]} : vector<48x8xf32> to vector<48x6xf32>
    %350 = vector.extract_strided_slice %338 {offsets = [0, 0], sizes = [48, 2], strides = [1, 1]} : vector<48x8xf32> to vector<48x2xf32>
    %351 = tpu.concatenate %349, %350 in 1 : vector<48x6xf32>, vector<48x2xf32> -> vector<48x8xf32>
    %352 = vector.shape_cast %37 : vector<1x8xi1> to vector<1x8xi1>
    %353 = vector.broadcast %352 : vector<1x8xi1> to vector<48x8xi1>
    %354 = arith.select %353, %351, %342 : vector<48x8xi1>, vector<48x8xf32>
    %355 = vector.shape_cast %39 : vector<1x8xi1> to vector<1x8xi1>
    %356 = vector.broadcast %355 : vector<1x8xi1> to vector<48x8xi1>
    %357 = arith.select %356, %338, %354 : vector<48x8xi1>, vector<48x8xf32>
    %358 = vector.shape_cast %37 : vector<1x8xi1> to vector<1x8xi1>
    %359 = vector.broadcast %358 : vector<1x8xi1> to vector<48x8xi1>
    %360 = arith.select %359, %348, %345 : vector<48x8xi1>, vector<48x8xf32>
    %361 = vector.shape_cast %43 : vector<1x8xi1> to vector<1x8xi1>
    %362 = vector.broadcast %361 : vector<1x8xi1> to vector<48x8xi1>
    %363 = arith.select %362, %345, %348 : vector<48x8xi1>, vector<48x8xf32>
    %364 = vector.shape_cast %43 : vector<1x8xi1> to vector<1x8xi1>
    %365 = vector.broadcast %364 : vector<1x8xi1> to vector<48x8xi1>
    %366 = arith.select %365, %342, %351 : vector<48x8xi1>, vector<48x8xf32>
    %367 = vector.shape_cast %41 : vector<1x8xi1> to vector<1x8xi1>
    %368 = vector.broadcast %367 : vector<1x8xi1> to vector<48x8xi1>
    %369 = arith.select %368, %338, %366 : vector<48x8xi1>, vector<48x8xf32>
    %370 = tpu.concatenate %357, %360, %338, %363, %369 in 0 : vector<48x8xf32>, vector<48x8xf32>, vector<48x8xf32>, vector<48x8xf32>, vector<48x8xf32> -> vector<240x8xf32>
    %371 = arith.truncf %370 : vector<240x8xf32> to vector<240x8xbf16>
    %372 = vector.extract_strided_slice %339 {offsets = [0, 0], sizes = [16, 240], strides = [1, 1]} : vector<16x256xbf16> to vector<16x240xbf16>
    %cst_63 = arith.constant dense<0.000000e+00> : vector<16x8xf32>
    %373 = tpu.matmul %372, %371, %cst_63 {dimension_numbers = #tpu.dot_dimension_numbers<[1], [0], [0], [1], [0, 0, 1, 1], [], []>} : vector<16x240xbf16>, vector<240x8xbf16>, vector<16x8xf32> -> vector<16x8xf32>
    %374 = vector.extract_strided_slice %339 {offsets = [0, 255], sizes = [16, 1], strides = [1, 1]} : vector<16x256xbf16> to vector<16x1xbf16>
    %375 = arith.extf %374 : vector<16x1xbf16> to vector<16x1xf32>
    %376 = vector.broadcast %375 : vector<16x1xf32> to vector<16x8xf32>
    %377 = arith.addf %373, %376 : vector<16x8xf32>
    %c240 = arith.constant 240 : index
    %c0_64 = arith.constant 0 : index
    %378 = vector.load %arg1[%c240, %c0_64] : memref<752x256xbf16, #tpu.memory_space<vmem>>, vector<16x256xbf16>
    %379 = vector.extract_strided_slice %378 {offsets = [0, 0], sizes = [16, 48], strides = [1, 1]} : vector<16x256xbf16> to vector<16x48xbf16>
    %380 = arith.truncf %297 : vector<48x8xf32> to vector<48x8xbf16>
    %cst_65 = arith.constant dense<0.000000e+00> : vector<16x8xf32>
    %381 = tpu.matmul %379, %380, %cst_65 {dimension_numbers = #tpu.dot_dimension_numbers<[1], [0], [0], [1], [0, 0, 1, 1], [], []>} : vector<16x48xbf16>, vector<48x8xbf16>, vector<16x8xf32> -> vector<16x8xf32>
    %382 = arith.addf %377, %381 : vector<16x8xf32>
    %cst_66 = arith.constant 0.000000e+00 : f32
    %383 = vector.broadcast %cst_66 : f32 to vector<16x8xf32>
    %384 = arith.cmpf oge, %382, %383 : vector<16x8xf32>
    %cst_67 = arith.constant 1.000000e-01 : f32
    %385 = vector.broadcast %cst_67 : f32 to vector<16x8xf32>
    %386 = arith.mulf %385, %382 : vector<16x8xf32>
    %387 = arith.select %384, %382, %386 : vector<16x8xi1>, vector<16x8xf32>
    %388 = arith.truncf %387 : vector<16x8xf32> to vector<16x8xbf16>
    %c416 = arith.constant 416 : index
    %c0_68 = arith.constant 0 : index
    %389 = vector.load %arg2[%c416, %c0_68] : memref<592x256xbf16, #tpu.memory_space<vmem>>, vector<8x32xbf16>
    %cst_69 = arith.constant dense<0.000000e+00> : vector<16x32xf32>
    %390 = tpu.matmul %388, %389, %cst_69 {dimension_numbers = #tpu.dot_dimension_numbers<[1], [0], [0], [1], [0, 0, 1, 1], [], []>} : vector<16x8xbf16>, vector<8x32xbf16>, vector<16x32xf32> -> vector<16x32xf32>
    %391 = tpu.concatenate %198, %390 in 0 : vector<16x32xf32>, vector<16x32xf32> -> vector<32x32xf32>
    %c256_70 = arith.constant 256 : index
    %c0_71 = arith.constant 0 : index
    %392 = vector.load %arg1[%c256_70, %c0_71] : memref<752x256xbf16, #tpu.memory_space<vmem>>, vector<24x256xbf16>
    %393 = vector.extract_strided_slice %391 {offsets = [0, 30], sizes = [32, 2], strides = [1, 1]} : vector<32x32xf32> to vector<32x2xf32>
    %394 = vector.extract_strided_slice %391 {offsets = [0, 0], sizes = [32, 30], strides = [1, 1]} : vector<32x32xf32> to vector<32x30xf32>
    %395 = tpu.concatenate %393, %394 in 1 : vector<32x2xf32>, vector<32x30xf32> -> vector<32x32xf32>
    %396 = vector.extract_strided_slice %391 {offsets = [0, 31], sizes = [32, 1], strides = [1, 1]} : vector<32x32xf32> to vector<32x1xf32>
    %397 = vector.extract_strided_slice %391 {offsets = [0, 0], sizes = [32, 31], strides = [1, 1]} : vector<32x32xf32> to vector<32x31xf32>
    %398 = tpu.concatenate %396, %397 in 1 : vector<32x1xf32>, vector<32x31xf32> -> vector<32x32xf32>
    %399 = vector.extract_strided_slice %391 {offsets = [0, 1], sizes = [32, 31], strides = [1, 1]} : vector<32x32xf32> to vector<32x31xf32>
    %400 = vector.extract_strided_slice %391 {offsets = [0, 0], sizes = [32, 1], strides = [1, 1]} : vector<32x32xf32> to vector<32x1xf32>
    %401 = tpu.concatenate %399, %400 in 1 : vector<32x31xf32>, vector<32x1xf32> -> vector<32x32xf32>
    %402 = vector.extract_strided_slice %391 {offsets = [0, 2], sizes = [32, 30], strides = [1, 1]} : vector<32x32xf32> to vector<32x30xf32>
    %403 = vector.extract_strided_slice %391 {offsets = [0, 0], sizes = [32, 2], strides = [1, 1]} : vector<32x32xf32> to vector<32x2xf32>
    %404 = tpu.concatenate %402, %403 in 1 : vector<32x30xf32>, vector<32x2xf32> -> vector<32x32xf32>
    %405 = vector.shape_cast %26 : vector<1x32xi1> to vector<1x32xi1>
    %406 = vector.broadcast %405 : vector<1x32xi1> to vector<32x32xi1>
    %407 = arith.select %406, %404, %395 : vector<32x32xi1>, vector<32x32xf32>
    %408 = vector.shape_cast %28 : vector<1x32xi1> to vector<1x32xi1>
    %409 = vector.broadcast %408 : vector<1x32xi1> to vector<32x32xi1>
    %410 = arith.select %409, %391, %407 : vector<32x32xi1>, vector<32x32xf32>
    %411 = vector.shape_cast %26 : vector<1x32xi1> to vector<1x32xi1>
    %412 = vector.broadcast %411 : vector<1x32xi1> to vector<32x32xi1>
    %413 = arith.select %412, %401, %398 : vector<32x32xi1>, vector<32x32xf32>
    %414 = vector.shape_cast %32 : vector<1x32xi1> to vector<1x32xi1>
    %415 = vector.broadcast %414 : vector<1x32xi1> to vector<32x32xi1>
    %416 = arith.select %415, %398, %401 : vector<32x32xi1>, vector<32x32xf32>
    %417 = vector.shape_cast %32 : vector<1x32xi1> to vector<1x32xi1>
    %418 = vector.broadcast %417 : vector<1x32xi1> to vector<32x32xi1>
    %419 = arith.select %418, %395, %404 : vector<32x32xi1>, vector<32x32xf32>
    %420 = vector.shape_cast %30 : vector<1x32xi1> to vector<1x32xi1>
    %421 = vector.broadcast %420 : vector<1x32xi1> to vector<32x32xi1>
    %422 = arith.select %421, %391, %419 : vector<32x32xi1>, vector<32x32xf32>
    %423 = tpu.concatenate %410, %413, %391, %416, %422 in 0 : vector<32x32xf32>, vector<32x32xf32>, vector<32x32xf32>, vector<32x32xf32>, vector<32x32xf32> -> vector<160x32xf32>
    %424 = arith.truncf %423 : vector<160x32xf32> to vector<160x32xbf16>
    %425 = vector.extract_strided_slice %392 {offsets = [0, 0], sizes = [24, 160], strides = [1, 1]} : vector<24x256xbf16> to vector<24x160xbf16>
    %cst_72 = arith.constant dense<0.000000e+00> : vector<24x32xf32>
    %426 = tpu.matmul %425, %424, %cst_72 {dimension_numbers = #tpu.dot_dimension_numbers<[1], [0], [0], [1], [0, 0, 1, 1], [], []>} : vector<24x160xbf16>, vector<160x32xbf16>, vector<24x32xf32> -> vector<24x32xf32>
    %427 = vector.extract_strided_slice %392 {offsets = [0, 255], sizes = [24, 1], strides = [1, 1]} : vector<24x256xbf16> to vector<24x1xbf16>
    %428 = arith.extf %427 : vector<24x1xbf16> to vector<24x1xf32>
    %429 = vector.broadcast %428 : vector<24x1xf32> to vector<24x32xf32>
    %430 = arith.addf %426, %429 : vector<24x32xf32>
    %cst_73 = arith.constant 0.000000e+00 : f32
    %431 = vector.broadcast %cst_73 : f32 to vector<24x32xf32>
    %432 = arith.maximumf %430, %431 : vector<24x32xf32>
    %c288 = arith.constant 288 : index
    %c0_74 = arith.constant 0 : index
    %433 = vector.load %arg1[%c288, %c0_74] : memref<752x256xbf16, #tpu.memory_space<vmem>>, vector<8x256xbf16>
    %434 = vector.extract_strided_slice %432 {offsets = [0, 30], sizes = [24, 2], strides = [1, 1]} : vector<24x32xf32> to vector<24x2xf32>
    %435 = vector.extract_strided_slice %432 {offsets = [0, 0], sizes = [24, 30], strides = [1, 1]} : vector<24x32xf32> to vector<24x30xf32>
    %436 = tpu.concatenate %434, %435 in 1 : vector<24x2xf32>, vector<24x30xf32> -> vector<24x32xf32>
    %437 = vector.extract_strided_slice %432 {offsets = [0, 31], sizes = [24, 1], strides = [1, 1]} : vector<24x32xf32> to vector<24x1xf32>
    %438 = vector.extract_strided_slice %432 {offsets = [0, 0], sizes = [24, 31], strides = [1, 1]} : vector<24x32xf32> to vector<24x31xf32>
    %439 = tpu.concatenate %437, %438 in 1 : vector<24x1xf32>, vector<24x31xf32> -> vector<24x32xf32>
    %440 = vector.extract_strided_slice %432 {offsets = [0, 1], sizes = [24, 31], strides = [1, 1]} : vector<24x32xf32> to vector<24x31xf32>
    %441 = vector.extract_strided_slice %432 {offsets = [0, 0], sizes = [24, 1], strides = [1, 1]} : vector<24x32xf32> to vector<24x1xf32>
    %442 = tpu.concatenate %440, %441 in 1 : vector<24x31xf32>, vector<24x1xf32> -> vector<24x32xf32>
    %443 = vector.extract_strided_slice %432 {offsets = [0, 2], sizes = [24, 30], strides = [1, 1]} : vector<24x32xf32> to vector<24x30xf32>
    %444 = vector.extract_strided_slice %432 {offsets = [0, 0], sizes = [24, 2], strides = [1, 1]} : vector<24x32xf32> to vector<24x2xf32>
    %445 = tpu.concatenate %443, %444 in 1 : vector<24x30xf32>, vector<24x2xf32> -> vector<24x32xf32>
    %446 = vector.shape_cast %26 : vector<1x32xi1> to vector<1x32xi1>
    %447 = vector.broadcast %446 : vector<1x32xi1> to vector<24x32xi1>
    %448 = arith.select %447, %445, %436 : vector<24x32xi1>, vector<24x32xf32>
    %449 = vector.shape_cast %28 : vector<1x32xi1> to vector<1x32xi1>
    %450 = vector.broadcast %449 : vector<1x32xi1> to vector<24x32xi1>
    %451 = arith.select %450, %432, %448 : vector<24x32xi1>, vector<24x32xf32>
    %452 = vector.shape_cast %26 : vector<1x32xi1> to vector<1x32xi1>
    %453 = vector.broadcast %452 : vector<1x32xi1> to vector<24x32xi1>
    %454 = arith.select %453, %442, %439 : vector<24x32xi1>, vector<24x32xf32>
    %455 = vector.shape_cast %32 : vector<1x32xi1> to vector<1x32xi1>
    %456 = vector.broadcast %455 : vector<1x32xi1> to vector<24x32xi1>
    %457 = arith.select %456, %439, %442 : vector<24x32xi1>, vector<24x32xf32>
    %458 = vector.shape_cast %32 : vector<1x32xi1> to vector<1x32xi1>
    %459 = vector.broadcast %458 : vector<1x32xi1> to vector<24x32xi1>
    %460 = arith.select %459, %436, %445 : vector<24x32xi1>, vector<24x32xf32>
    %461 = vector.shape_cast %30 : vector<1x32xi1> to vector<1x32xi1>
    %462 = vector.broadcast %461 : vector<1x32xi1> to vector<24x32xi1>
    %463 = arith.select %462, %432, %460 : vector<24x32xi1>, vector<24x32xf32>
    %464 = tpu.concatenate %451, %454, %432, %457, %463 in 0 : vector<24x32xf32>, vector<24x32xf32>, vector<24x32xf32>, vector<24x32xf32>, vector<24x32xf32> -> vector<120x32xf32>
    %465 = arith.truncf %464 : vector<120x32xf32> to vector<120x32xbf16>
    %466 = vector.extract_strided_slice %433 {offsets = [0, 0], sizes = [8, 120], strides = [1, 1]} : vector<8x256xbf16> to vector<8x120xbf16>
    %cst_75 = arith.constant dense<0.000000e+00> : vector<8x32xf32>
    %467 = tpu.matmul %466, %465, %cst_75 {dimension_numbers = #tpu.dot_dimension_numbers<[1], [0], [0], [1], [0, 0, 1, 1], [], []>} : vector<8x120xbf16>, vector<120x32xbf16>, vector<8x32xf32> -> vector<8x32xf32>
    %468 = vector.extract_strided_slice %433 {offsets = [0, 255], sizes = [8, 1], strides = [1, 1]} : vector<8x256xbf16> to vector<8x1xbf16>
    %469 = arith.extf %468 : vector<8x1xbf16> to vector<8x1xf32>
    %470 = vector.broadcast %469 : vector<8x1xf32> to vector<8x32xf32>
    %471 = arith.addf %467, %470 : vector<8x32xf32>
    %c304 = arith.constant 304 : index
    %c0_76 = arith.constant 0 : index
    %472 = vector.load %arg1[%c304, %c0_76] : memref<752x256xbf16, #tpu.memory_space<vmem>>, vector<8x256xbf16>
    %473 = vector.extract_strided_slice %472 {offsets = [0, 0], sizes = [8, 32], strides = [1, 1]} : vector<8x256xbf16> to vector<8x32xbf16>
    %474 = arith.truncf %391 : vector<32x32xf32> to vector<32x32xbf16>
    %cst_77 = arith.constant dense<0.000000e+00> : vector<8x32xf32>
    %475 = tpu.matmul %473, %474, %cst_77 {dimension_numbers = #tpu.dot_dimension_numbers<[1], [0], [0], [1], [0, 0, 1, 1], [], []>} : vector<8x32xbf16>, vector<32x32xbf16>, vector<8x32xf32> -> vector<8x32xf32>
    %476 = arith.addf %471, %475 : vector<8x32xf32>
    %cst_78 = arith.constant 0.000000e+00 : f32
    %477 = vector.broadcast %cst_78 : f32 to vector<8x32xf32>
    %478 = arith.cmpf oge, %476, %477 : vector<8x32xf32>
    %cst_79 = arith.constant 1.000000e-01 : f32
    %479 = vector.broadcast %cst_79 : f32 to vector<8x32xf32>
    %480 = arith.mulf %479, %476 : vector<8x32xf32>
    %481 = arith.select %478, %476, %480 : vector<8x32xi1>, vector<8x32xf32>
    %482 = arith.truncf %481 : vector<8x32xf32> to vector<8x32xbf16>
    %c432 = arith.constant 432 : index
    %c0_80 = arith.constant 0 : index
    %483 = vector.load %arg2[%c432, %c0_80] : memref<592x256xbf16, #tpu.memory_space<vmem>>, vector<32x128xbf16>
    %cst_81 = arith.constant dense<0.000000e+00> : vector<8x128xf32>
    %484 = tpu.matmul %482, %483, %cst_81 {dimension_numbers = #tpu.dot_dimension_numbers<[1], [0], [0], [1], [0, 0, 1, 1], [], []>} : vector<8x32xbf16>, vector<32x128xbf16>, vector<8x128xf32> -> vector<8x128xf32>
    %485 = tpu.concatenate %120, %484 in 0 : vector<8x128xf32>, vector<8x128xf32> -> vector<16x128xf32>
    %c320 = arith.constant 320 : index
    %c0_82 = arith.constant 0 : index
    %486 = vector.load %arg1[%c320, %c0_82] : memref<752x256xbf16, #tpu.memory_space<vmem>>, vector<16x256xbf16>
    %c2_i32_83 = arith.constant 2 : i32
    %487 = tpu.dynamic_rotate %485 by %c2_i32_83 dim 1 : vector<16x128xf32>, i32 -> vector<16x128xf32>
    %c1_i32_84 = arith.constant 1 : i32
    %488 = tpu.dynamic_rotate %485 by %c1_i32_84 dim 1 : vector<16x128xf32>, i32 -> vector<16x128xf32>
    %c127_i32_85 = arith.constant 127 : i32
    %489 = tpu.dynamic_rotate %485 by %c127_i32_85 dim 1 : vector<16x128xf32>, i32 -> vector<16x128xf32>
    %c126_i32_86 = arith.constant 126 : i32
    %490 = tpu.dynamic_rotate %485 by %c126_i32_86 dim 1 : vector<16x128xf32>, i32 -> vector<16x128xf32>
    %491 = vector.shape_cast %15 : vector<1x128xi1> to vector<1x128xi1>
    %492 = vector.broadcast %491 : vector<1x128xi1> to vector<16x128xi1>
    %493 = arith.select %492, %490, %487 : vector<16x128xi1>, vector<16x128xf32>
    %494 = vector.shape_cast %17 : vector<1x128xi1> to vector<1x128xi1>
    %495 = vector.broadcast %494 : vector<1x128xi1> to vector<16x128xi1>
    %496 = arith.select %495, %485, %493 : vector<16x128xi1>, vector<16x128xf32>
    %497 = vector.shape_cast %15 : vector<1x128xi1> to vector<1x128xi1>
    %498 = vector.broadcast %497 : vector<1x128xi1> to vector<16x128xi1>
    %499 = arith.select %498, %489, %488 : vector<16x128xi1>, vector<16x128xf32>
    %500 = vector.shape_cast %21 : vector<1x128xi1> to vector<1x128xi1>
    %501 = vector.broadcast %500 : vector<1x128xi1> to vector<16x128xi1>
    %502 = arith.select %501, %488, %489 : vector<16x128xi1>, vector<16x128xf32>
    %503 = vector.shape_cast %21 : vector<1x128xi1> to vector<1x128xi1>
    %504 = vector.broadcast %503 : vector<1x128xi1> to vector<16x128xi1>
    %505 = arith.select %504, %487, %490 : vector<16x128xi1>, vector<16x128xf32>
    %506 = vector.shape_cast %19 : vector<1x128xi1> to vector<1x128xi1>
    %507 = vector.broadcast %506 : vector<1x128xi1> to vector<16x128xi1>
    %508 = arith.select %507, %485, %505 : vector<16x128xi1>, vector<16x128xf32>
    %509 = tpu.concatenate %496, %499, %485, %502, %508 in 0 : vector<16x128xf32>, vector<16x128xf32>, vector<16x128xf32>, vector<16x128xf32>, vector<16x128xf32> -> vector<80x128xf32>
    %510 = arith.truncf %509 : vector<80x128xf32> to vector<80x128xbf16>
    %511 = vector.extract_strided_slice %486 {offsets = [0, 0], sizes = [16, 80], strides = [1, 1]} : vector<16x256xbf16> to vector<16x80xbf16>
    %cst_87 = arith.constant dense<0.000000e+00> : vector<16x128xf32>
    %512 = tpu.matmul %511, %510, %cst_87 {dimension_numbers = #tpu.dot_dimension_numbers<[1], [0], [0], [1], [0, 0, 1, 1], [], []>} : vector<16x80xbf16>, vector<80x128xbf16>, vector<16x128xf32> -> vector<16x128xf32>
    %513 = vector.extract_strided_slice %486 {offsets = [0, 255], sizes = [16, 1], strides = [1, 1]} : vector<16x256xbf16> to vector<16x1xbf16>
    %514 = arith.extf %513 : vector<16x1xbf16> to vector<16x1xf32>
    %515 = vector.broadcast %514 : vector<16x1xf32> to vector<16x128xf32>
    %516 = arith.addf %512, %515 : vector<16x128xf32>
    %cst_88 = arith.constant 0.000000e+00 : f32
    %517 = vector.broadcast %cst_88 : f32 to vector<16x128xf32>
    %518 = arith.maximumf %516, %517 : vector<16x128xf32>
    %c336 = arith.constant 336 : index
    %c0_89 = arith.constant 0 : index
    %519 = vector.load %arg1[%c336, %c0_89] : memref<752x256xbf16, #tpu.memory_space<vmem>>, vector<8x256xbf16>
    %c2_i32_90 = arith.constant 2 : i32
    %520 = tpu.dynamic_rotate %518 by %c2_i32_90 dim 1 : vector<16x128xf32>, i32 -> vector<16x128xf32>
    %c1_i32_91 = arith.constant 1 : i32
    %521 = tpu.dynamic_rotate %518 by %c1_i32_91 dim 1 : vector<16x128xf32>, i32 -> vector<16x128xf32>
    %c127_i32_92 = arith.constant 127 : i32
    %522 = tpu.dynamic_rotate %518 by %c127_i32_92 dim 1 : vector<16x128xf32>, i32 -> vector<16x128xf32>
    %c126_i32_93 = arith.constant 126 : i32
    %523 = tpu.dynamic_rotate %518 by %c126_i32_93 dim 1 : vector<16x128xf32>, i32 -> vector<16x128xf32>
    %524 = vector.shape_cast %15 : vector<1x128xi1> to vector<1x128xi1>
    %525 = vector.broadcast %524 : vector<1x128xi1> to vector<16x128xi1>
    %526 = arith.select %525, %523, %520 : vector<16x128xi1>, vector<16x128xf32>
    %527 = vector.shape_cast %17 : vector<1x128xi1> to vector<1x128xi1>
    %528 = vector.broadcast %527 : vector<1x128xi1> to vector<16x128xi1>
    %529 = arith.select %528, %518, %526 : vector<16x128xi1>, vector<16x128xf32>
    %530 = vector.shape_cast %15 : vector<1x128xi1> to vector<1x128xi1>
    %531 = vector.broadcast %530 : vector<1x128xi1> to vector<16x128xi1>
    %532 = arith.select %531, %522, %521 : vector<16x128xi1>, vector<16x128xf32>
    %533 = vector.shape_cast %21 : vector<1x128xi1> to vector<1x128xi1>
    %534 = vector.broadcast %533 : vector<1x128xi1> to vector<16x128xi1>
    %535 = arith.select %534, %521, %522 : vector<16x128xi1>, vector<16x128xf32>
    %536 = vector.shape_cast %21 : vector<1x128xi1> to vector<1x128xi1>
    %537 = vector.broadcast %536 : vector<1x128xi1> to vector<16x128xi1>
    %538 = arith.select %537, %520, %523 : vector<16x128xi1>, vector<16x128xf32>
    %539 = vector.shape_cast %19 : vector<1x128xi1> to vector<1x128xi1>
    %540 = vector.broadcast %539 : vector<1x128xi1> to vector<16x128xi1>
    %541 = arith.select %540, %518, %538 : vector<16x128xi1>, vector<16x128xf32>
    %542 = tpu.concatenate %529, %532, %518, %535, %541 in 0 : vector<16x128xf32>, vector<16x128xf32>, vector<16x128xf32>, vector<16x128xf32>, vector<16x128xf32> -> vector<80x128xf32>
    %543 = arith.truncf %542 : vector<80x128xf32> to vector<80x128xbf16>
    %544 = vector.extract_strided_slice %519 {offsets = [0, 0], sizes = [8, 80], strides = [1, 1]} : vector<8x256xbf16> to vector<8x80xbf16>
    %cst_94 = arith.constant dense<0.000000e+00> : vector<8x128xf32>
    %545 = tpu.matmul %544, %543, %cst_94 {dimension_numbers = #tpu.dot_dimension_numbers<[1], [0], [0], [1], [0, 0, 1, 1], [], []>} : vector<8x80xbf16>, vector<80x128xbf16>, vector<8x128xf32> -> vector<8x128xf32>
    %546 = vector.extract_strided_slice %519 {offsets = [0, 255], sizes = [8, 1], strides = [1, 1]} : vector<8x256xbf16> to vector<8x1xbf16>
    %547 = arith.extf %546 : vector<8x1xbf16> to vector<8x1xf32>
    %548 = vector.broadcast %547 : vector<8x1xf32> to vector<8x128xf32>
    %549 = arith.addf %545, %548 : vector<8x128xf32>
    %c352 = arith.constant 352 : index
    %c0_95 = arith.constant 0 : index
    %550 = vector.load %arg1[%c352, %c0_95] : memref<752x256xbf16, #tpu.memory_space<vmem>>, vector<8x256xbf16>
    %551 = vector.extract_strided_slice %550 {offsets = [0, 0], sizes = [8, 16], strides = [1, 1]} : vector<8x256xbf16> to vector<8x16xbf16>
    %552 = arith.truncf %485 : vector<16x128xf32> to vector<16x128xbf16>
    %cst_96 = arith.constant dense<0.000000e+00> : vector<8x128xf32>
    %553 = tpu.matmul %551, %552, %cst_96 {dimension_numbers = #tpu.dot_dimension_numbers<[1], [0], [0], [1], [0, 0, 1, 1], [], []>} : vector<8x16xbf16>, vector<16x128xbf16>, vector<8x128xf32> -> vector<8x128xf32>
    %554 = arith.addf %549, %553 : vector<8x128xf32>
    %cst_97 = arith.constant 0.000000e+00 : f32
    %555 = vector.broadcast %cst_97 : f32 to vector<8x128xf32>
    %556 = arith.cmpf oge, %554, %555 : vector<8x128xf32>
    %cst_98 = arith.constant 1.000000e-01 : f32
    %557 = vector.broadcast %cst_98 : f32 to vector<8x128xf32>
    %558 = arith.mulf %557, %554 : vector<8x128xf32>
    %559 = arith.select %556, %554, %558 : vector<8x128xi1>, vector<8x128xf32>
    %560 = arith.truncf %559 : vector<8x128xf32> to vector<8x128xbf16>
    %c464 = arith.constant 464 : index
    %c0_99 = arith.constant 0 : index
    %561 = vector.load %arg2[%c464, %c0_99] : memref<592x256xbf16, #tpu.memory_space<vmem>>, vector<128x256xbf16>
    %cst_100 = arith.constant dense<0.000000e+00> : vector<8x256xf32>
    %562 = tpu.matmul %560, %561, %cst_100 {dimension_numbers = #tpu.dot_dimension_numbers<[1], [0], [0], [1], [0, 0, 1, 1], [], []>} : vector<8x128xbf16>, vector<128x256xbf16>, vector<8x256xf32> -> vector<8x256xf32>
    %563 = tpu.concatenate %44, %562 in 0 : vector<8x256xf32>, vector<8x256xf32> -> vector<16x256xf32>
    %c368 = arith.constant 368 : index
    %c0_101 = arith.constant 0 : index
    %564 = vector.load %arg1[%c368, %c0_101] : memref<752x256xbf16, #tpu.memory_space<vmem>>, vector<8x256xbf16>
    %c2_i32_102 = arith.constant 2 : i32
    %565 = tpu.dynamic_rotate %563 by %c2_i32_102 dim 1 : vector<16x256xf32>, i32 -> vector<16x256xf32>
    %c1_i32_103 = arith.constant 1 : i32
    %566 = tpu.dynamic_rotate %563 by %c1_i32_103 dim 1 : vector<16x256xf32>, i32 -> vector<16x256xf32>
    %c255_i32_104 = arith.constant 255 : i32
    %567 = tpu.dynamic_rotate %563 by %c255_i32_104 dim 1 : vector<16x256xf32>, i32 -> vector<16x256xf32>
    %c254_i32_105 = arith.constant 254 : i32
    %568 = tpu.dynamic_rotate %563 by %c254_i32_105 dim 1 : vector<16x256xf32>, i32 -> vector<16x256xf32>
    %569 = vector.shape_cast %4 : vector<1x256xi1> to vector<1x256xi1>
    %570 = vector.broadcast %569 : vector<1x256xi1> to vector<16x256xi1>
    %571 = arith.select %570, %568, %565 : vector<16x256xi1>, vector<16x256xf32>
    %572 = vector.shape_cast %6 : vector<1x256xi1> to vector<1x256xi1>
    %573 = vector.broadcast %572 : vector<1x256xi1> to vector<16x256xi1>
    %574 = arith.select %573, %563, %571 : vector<16x256xi1>, vector<16x256xf32>
    %575 = vector.shape_cast %4 : vector<1x256xi1> to vector<1x256xi1>
    %576 = vector.broadcast %575 : vector<1x256xi1> to vector<16x256xi1>
    %577 = arith.select %576, %567, %566 : vector<16x256xi1>, vector<16x256xf32>
    %578 = vector.shape_cast %10 : vector<1x256xi1> to vector<1x256xi1>
    %579 = vector.broadcast %578 : vector<1x256xi1> to vector<16x256xi1>
    %580 = arith.select %579, %566, %567 : vector<16x256xi1>, vector<16x256xf32>
    %581 = vector.shape_cast %10 : vector<1x256xi1> to vector<1x256xi1>
    %582 = vector.broadcast %581 : vector<1x256xi1> to vector<16x256xi1>
    %583 = arith.select %582, %565, %568 : vector<16x256xi1>, vector<16x256xf32>
    %584 = vector.shape_cast %8 : vector<1x256xi1> to vector<1x256xi1>
    %585 = vector.broadcast %584 : vector<1x256xi1> to vector<16x256xi1>
    %586 = arith.select %585, %563, %583 : vector<16x256xi1>, vector<16x256xf32>
    %587 = tpu.concatenate %574, %577, %563, %580, %586 in 0 : vector<16x256xf32>, vector<16x256xf32>, vector<16x256xf32>, vector<16x256xf32>, vector<16x256xf32> -> vector<80x256xf32>
    %588 = arith.truncf %587 : vector<80x256xf32> to vector<80x256xbf16>
    %589 = vector.extract_strided_slice %564 {offsets = [0, 0], sizes = [8, 80], strides = [1, 1]} : vector<8x256xbf16> to vector<8x80xbf16>
    %cst_106 = arith.constant dense<0.000000e+00> : vector<8x256xf32>
    %590 = tpu.matmul %589, %588, %cst_106 {dimension_numbers = #tpu.dot_dimension_numbers<[1], [0], [0], [1], [0, 0, 1, 1], [], []>} : vector<8x80xbf16>, vector<80x256xbf16>, vector<8x256xf32> -> vector<8x256xf32>
    %591 = vector.extract_strided_slice %564 {offsets = [0, 255], sizes = [8, 1], strides = [1, 1]} : vector<8x256xbf16> to vector<8x1xbf16>
    %592 = arith.extf %591 : vector<8x1xbf16> to vector<8x1xf32>
    %593 = vector.broadcast %592 : vector<8x1xf32> to vector<8x256xf32>
    %594 = arith.addf %590, %593 : vector<8x256xf32>
    %cst_107 = arith.constant 0.000000e+00 : f32
    %595 = vector.broadcast %cst_107 : f32 to vector<8x256xf32>
    %596 = arith.maximumf %594, %595 : vector<8x256xf32>
    %c384_108 = arith.constant 384 : index
    %c0_109 = arith.constant 0 : index
    %597 = vector.load %arg1[%c384_108, %c0_109] : memref<752x256xbf16, #tpu.memory_space<vmem>>, vector<8x256xbf16>
    %c2_i32_110 = arith.constant 2 : i32
    %598 = tpu.dynamic_rotate %596 by %c2_i32_110 dim 1 : vector<8x256xf32>, i32 -> vector<8x256xf32>
    %c1_i32_111 = arith.constant 1 : i32
    %599 = tpu.dynamic_rotate %596 by %c1_i32_111 dim 1 : vector<8x256xf32>, i32 -> vector<8x256xf32>
    %c255_i32_112 = arith.constant 255 : i32
    %600 = tpu.dynamic_rotate %596 by %c255_i32_112 dim 1 : vector<8x256xf32>, i32 -> vector<8x256xf32>
    %c254_i32_113 = arith.constant 254 : i32
    %601 = tpu.dynamic_rotate %596 by %c254_i32_113 dim 1 : vector<8x256xf32>, i32 -> vector<8x256xf32>
    %602 = vector.shape_cast %4 : vector<1x256xi1> to vector<1x256xi1>
    %603 = vector.broadcast %602 : vector<1x256xi1> to vector<8x256xi1>
    %604 = arith.select %603, %601, %598 : vector<8x256xi1>, vector<8x256xf32>
    %605 = vector.shape_cast %6 : vector<1x256xi1> to vector<1x256xi1>
    %606 = vector.broadcast %605 : vector<1x256xi1> to vector<8x256xi1>
    %607 = arith.select %606, %596, %604 : vector<8x256xi1>, vector<8x256xf32>
    %608 = vector.shape_cast %4 : vector<1x256xi1> to vector<1x256xi1>
    %609 = vector.broadcast %608 : vector<1x256xi1> to vector<8x256xi1>
    %610 = arith.select %609, %600, %599 : vector<8x256xi1>, vector<8x256xf32>
    %611 = vector.shape_cast %10 : vector<1x256xi1> to vector<1x256xi1>
    %612 = vector.broadcast %611 : vector<1x256xi1> to vector<8x256xi1>
    %613 = arith.select %612, %599, %600 : vector<8x256xi1>, vector<8x256xf32>
    %614 = vector.shape_cast %10 : vector<1x256xi1> to vector<1x256xi1>
    %615 = vector.broadcast %614 : vector<1x256xi1> to vector<8x256xi1>
    %616 = arith.select %615, %598, %601 : vector<8x256xi1>, vector<8x256xf32>
    %617 = vector.shape_cast %8 : vector<1x256xi1> to vector<1x256xi1>
    %618 = vector.broadcast %617 : vector<1x256xi1> to vector<8x256xi1>
    %619 = arith.select %618, %596, %616 : vector<8x256xi1>, vector<8x256xf32>
    %620 = tpu.concatenate %607, %610, %596, %613, %619 in 0 : vector<8x256xf32>, vector<8x256xf32>, vector<8x256xf32>, vector<8x256xf32>, vector<8x256xf32> -> vector<40x256xf32>
    %621 = arith.truncf %620 : vector<40x256xf32> to vector<40x256xbf16>
    %622 = vector.extract_strided_slice %597 {offsets = [0, 0], sizes = [8, 40], strides = [1, 1]} : vector<8x256xbf16> to vector<8x40xbf16>
    %cst_114 = arith.constant dense<0.000000e+00> : vector<8x256xf32>
    %623 = tpu.matmul %622, %621, %cst_114 {dimension_numbers = #tpu.dot_dimension_numbers<[1], [0], [0], [1], [0, 0, 1, 1], [], []>} : vector<8x40xbf16>, vector<40x256xbf16>, vector<8x256xf32> -> vector<8x256xf32>
    %624 = vector.extract_strided_slice %597 {offsets = [0, 255], sizes = [8, 1], strides = [1, 1]} : vector<8x256xbf16> to vector<8x1xbf16>
    %625 = arith.extf %624 : vector<8x1xbf16> to vector<8x1xf32>
    %626 = vector.broadcast %625 : vector<8x1xf32> to vector<8x256xf32>
    %627 = arith.addf %623, %626 : vector<8x256xf32>
    %c400 = arith.constant 400 : index
    %c0_115 = arith.constant 0 : index
    %628 = vector.load %arg1[%c400, %c0_115] : memref<752x256xbf16, #tpu.memory_space<vmem>>, vector<8x256xbf16>
    %629 = vector.extract_strided_slice %628 {offsets = [0, 0], sizes = [8, 16], strides = [1, 1]} : vector<8x256xbf16> to vector<8x16xbf16>
    %630 = arith.truncf %563 : vector<16x256xf32> to vector<16x256xbf16>
    %cst_116 = arith.constant dense<0.000000e+00> : vector<8x256xf32>
    %631 = tpu.matmul %629, %630, %cst_116 {dimension_numbers = #tpu.dot_dimension_numbers<[1], [0], [0], [1], [0, 0, 1, 1], [], []>} : vector<8x16xbf16>, vector<16x256xbf16>, vector<8x256xf32> -> vector<8x256xf32>
    %632 = arith.addf %627, %631 : vector<8x256xf32>
    %cst_117 = arith.constant 0.000000e+00 : f32
    %633 = vector.broadcast %cst_117 : f32 to vector<8x256xf32>
    %634 = arith.cmpf oge, %632, %633 : vector<8x256xf32>
    %cst_118 = arith.constant 1.000000e-01 : f32
    %635 = vector.broadcast %cst_118 : f32 to vector<8x256xf32>
    %636 = arith.mulf %635, %632 : vector<8x256xf32>
    %637 = arith.select %634, %632, %636 : vector<8x256xi1>, vector<8x256xf32>
    %c416_119 = arith.constant 416 : index
    %c0_120 = arith.constant 0 : index
    %638 = vector.load %arg1[%c416_119, %c0_120] : memref<752x256xbf16, #tpu.memory_space<vmem>>, vector<8x256xbf16>
    %639 = arith.truncf %637 : vector<8x256xf32> to vector<8x256xbf16>
    %640 = vector.extract_strided_slice %638 {offsets = [0, 0], sizes = [8, 8], strides = [1, 1]} : vector<8x256xbf16> to vector<8x8xbf16>
    %cst_121 = arith.constant dense<0.000000e+00> : vector<8x256xf32>
    %641 = tpu.matmul %640, %639, %cst_121 {dimension_numbers = #tpu.dot_dimension_numbers<[1], [0], [0], [1], [0, 0, 1, 1], [], []>} : vector<8x8xbf16>, vector<8x256xbf16>, vector<8x256xf32> -> vector<8x256xf32>
    %642 = vector.extract_strided_slice %638 {offsets = [0, 255], sizes = [8, 1], strides = [1, 1]} : vector<8x256xbf16> to vector<8x1xbf16>
    %643 = arith.extf %642 : vector<8x1xbf16> to vector<8x1xf32>
    %644 = vector.broadcast %643 : vector<8x1xf32> to vector<8x256xf32>
    %645 = arith.addf %641, %644 : vector<8x256xf32>
    %cst_122 = arith.constant 0.000000e+00 : f32
    %646 = vector.broadcast %cst_122 : f32 to vector<8x256xf32>
    %647 = arith.maximumf %645, %646 : vector<8x256xf32>
    %c432_123 = arith.constant 432 : index
    %c0_124 = arith.constant 0 : index
    %648 = vector.load %arg1[%c432_123, %c0_124] : memref<752x256xbf16, #tpu.memory_space<vmem>>, vector<8x256xbf16>
    %649 = arith.truncf %647 : vector<8x256xf32> to vector<8x256xbf16>
    %650 = vector.extract_strided_slice %648 {offsets = [0, 0], sizes = [8, 8], strides = [1, 1]} : vector<8x256xbf16> to vector<8x8xbf16>
    %cst_125 = arith.constant dense<0.000000e+00> : vector<8x256xf32>
    %651 = tpu.matmul %650, %649, %cst_125 {dimension_numbers = #tpu.dot_dimension_numbers<[1], [0], [0], [1], [0, 0, 1, 1], [], []>} : vector<8x8xbf16>, vector<8x256xbf16>, vector<8x256xf32> -> vector<8x256xf32>
    %652 = vector.extract_strided_slice %648 {offsets = [0, 255], sizes = [8, 1], strides = [1, 1]} : vector<8x256xbf16> to vector<8x1xbf16>
    %653 = arith.extf %652 : vector<8x1xbf16> to vector<8x1xf32>
    %654 = vector.broadcast %653 : vector<8x1xf32> to vector<8x256xf32>
    %655 = arith.addf %651, %654 : vector<8x256xf32>
    %c448 = arith.constant 448 : index
    %c0_126 = arith.constant 0 : index
    %656 = vector.load %arg1[%c448, %c0_126] : memref<752x256xbf16, #tpu.memory_space<vmem>>, vector<8x256xbf16>
    %657 = vector.extract_strided_slice %656 {offsets = [0, 0], sizes = [8, 8], strides = [1, 1]} : vector<8x256xbf16> to vector<8x8xbf16>
    %658 = arith.truncf %637 : vector<8x256xf32> to vector<8x256xbf16>
    %cst_127 = arith.constant dense<0.000000e+00> : vector<8x256xf32>
    %659 = tpu.matmul %657, %658, %cst_127 {dimension_numbers = #tpu.dot_dimension_numbers<[1], [0], [0], [1], [0, 0, 1, 1], [], []>} : vector<8x8xbf16>, vector<8x256xbf16>, vector<8x256xf32> -> vector<8x256xf32>
    %660 = arith.addf %655, %659 : vector<8x256xf32>
    %661 = arith.negf %660 : vector<8x256xf32>
    %662 = math.exp %661 : vector<8x256xf32>
    %cst_128 = arith.constant 1.000000e+00 : f32
    %663 = vector.broadcast %cst_128 : f32 to vector<8x256xf32>
    %664 = arith.addf %663, %662 : vector<8x256xf32>
    %665 = arith.divf %663, %664 : vector<8x256xf32>
    %666 = vector.extract_strided_slice %665 {offsets = [0, 0], sizes = [1, 256], strides = [1, 1]} : vector<8x256xf32> to vector<1x256xf32>
    %667 = tpu.concatenate %296, %296 in 0 : vector<24x8xf32>, vector<24x8xf32> -> vector<48x8xf32>
    %c464_129 = arith.constant 464 : index
    %c0_130 = arith.constant 0 : index
    %668 = vector.load %arg1[%c464_129, %c0_130] : memref<752x256xbf16, #tpu.memory_space<vmem>>, vector<48x256xbf16>
    %669 = vector.extract_strided_slice %667 {offsets = [0, 6], sizes = [48, 2], strides = [1, 1]} : vector<48x8xf32> to vector<48x2xf32>
    %670 = vector.extract_strided_slice %667 {offsets = [0, 0], sizes = [48, 6], strides = [1, 1]} : vector<48x8xf32> to vector<48x6xf32>
    %671 = tpu.concatenate %669, %670 in 1 : vector<48x2xf32>, vector<48x6xf32> -> vector<48x8xf32>
    %672 = vector.extract_strided_slice %667 {offsets = [0, 7], sizes = [48, 1], strides = [1, 1]} : vector<48x8xf32> to vector<48x1xf32>
    %673 = vector.extract_strided_slice %667 {offsets = [0, 0], sizes = [48, 7], strides = [1, 1]} : vector<48x8xf32> to vector<48x7xf32>
    %674 = tpu.concatenate %672, %673 in 1 : vector<48x1xf32>, vector<48x7xf32> -> vector<48x8xf32>
    %675 = vector.extract_strided_slice %667 {offsets = [0, 1], sizes = [48, 7], strides = [1, 1]} : vector<48x8xf32> to vector<48x7xf32>
    %676 = vector.extract_strided_slice %667 {offsets = [0, 0], sizes = [48, 1], strides = [1, 1]} : vector<48x8xf32> to vector<48x1xf32>
    %677 = tpu.concatenate %675, %676 in 1 : vector<48x7xf32>, vector<48x1xf32> -> vector<48x8xf32>
    %678 = vector.extract_strided_slice %667 {offsets = [0, 2], sizes = [48, 6], strides = [1, 1]} : vector<48x8xf32> to vector<48x6xf32>
    %679 = vector.extract_strided_slice %667 {offsets = [0, 0], sizes = [48, 2], strides = [1, 1]} : vector<48x8xf32> to vector<48x2xf32>
    %680 = tpu.concatenate %678, %679 in 1 : vector<48x6xf32>, vector<48x2xf32> -> vector<48x8xf32>
    %681 = vector.shape_cast %37 : vector<1x8xi1> to vector<1x8xi1>
    %682 = vector.broadcast %681 : vector<1x8xi1> to vector<48x8xi1>
    %683 = arith.select %682, %680, %671 : vector<48x8xi1>, vector<48x8xf32>
    %684 = vector.shape_cast %39 : vector<1x8xi1> to vector<1x8xi1>
    %685 = vector.broadcast %684 : vector<1x8xi1> to vector<48x8xi1>
    %686 = arith.select %685, %667, %683 : vector<48x8xi1>, vector<48x8xf32>
    %687 = vector.shape_cast %37 : vector<1x8xi1> to vector<1x8xi1>
    %688 = vector.broadcast %687 : vector<1x8xi1> to vector<48x8xi1>
    %689 = arith.select %688, %677, %674 : vector<48x8xi1>, vector<48x8xf32>
    %690 = vector.shape_cast %43 : vector<1x8xi1> to vector<1x8xi1>
    %691 = vector.broadcast %690 : vector<1x8xi1> to vector<48x8xi1>
    %692 = arith.select %691, %674, %677 : vector<48x8xi1>, vector<48x8xf32>
    %693 = vector.shape_cast %43 : vector<1x8xi1> to vector<1x8xi1>
    %694 = vector.broadcast %693 : vector<1x8xi1> to vector<48x8xi1>
    %695 = arith.select %694, %671, %680 : vector<48x8xi1>, vector<48x8xf32>
    %696 = vector.shape_cast %41 : vector<1x8xi1> to vector<1x8xi1>
    %697 = vector.broadcast %696 : vector<1x8xi1> to vector<48x8xi1>
    %698 = arith.select %697, %667, %695 : vector<48x8xi1>, vector<48x8xf32>
    %699 = tpu.concatenate %686, %689, %667, %692, %698 in 0 : vector<48x8xf32>, vector<48x8xf32>, vector<48x8xf32>, vector<48x8xf32>, vector<48x8xf32> -> vector<240x8xf32>
    %700 = arith.truncf %699 : vector<240x8xf32> to vector<240x8xbf16>
    %701 = vector.extract_strided_slice %668 {offsets = [0, 0], sizes = [48, 240], strides = [1, 1]} : vector<48x256xbf16> to vector<48x240xbf16>
    %cst_131 = arith.constant dense<0.000000e+00> : vector<48x8xf32>
    %702 = tpu.matmul %701, %700, %cst_131 {dimension_numbers = #tpu.dot_dimension_numbers<[1], [0], [0], [1], [0, 0, 1, 1], [], []>} : vector<48x240xbf16>, vector<240x8xbf16>, vector<48x8xf32> -> vector<48x8xf32>
    %703 = vector.extract_strided_slice %668 {offsets = [0, 255], sizes = [48, 1], strides = [1, 1]} : vector<48x256xbf16> to vector<48x1xbf16>
    %704 = arith.extf %703 : vector<48x1xbf16> to vector<48x1xf32>
    %705 = vector.broadcast %704 : vector<48x1xf32> to vector<48x8xf32>
    %706 = arith.addf %702, %705 : vector<48x8xf32>
    %cst_132 = arith.constant 0.000000e+00 : f32
    %707 = vector.broadcast %cst_132 : f32 to vector<48x8xf32>
    %708 = arith.maximumf %706, %707 : vector<48x8xf32>
    %c512 = arith.constant 512 : index
    %c0_133 = arith.constant 0 : index
    %709 = vector.load %arg1[%c512, %c0_133] : memref<752x256xbf16, #tpu.memory_space<vmem>>, vector<16x256xbf16>
    %710 = vector.extract_strided_slice %708 {offsets = [0, 6], sizes = [48, 2], strides = [1, 1]} : vector<48x8xf32> to vector<48x2xf32>
    %711 = vector.extract_strided_slice %708 {offsets = [0, 0], sizes = [48, 6], strides = [1, 1]} : vector<48x8xf32> to vector<48x6xf32>
    %712 = tpu.concatenate %710, %711 in 1 : vector<48x2xf32>, vector<48x6xf32> -> vector<48x8xf32>
    %713 = vector.extract_strided_slice %708 {offsets = [0, 7], sizes = [48, 1], strides = [1, 1]} : vector<48x8xf32> to vector<48x1xf32>
    %714 = vector.extract_strided_slice %708 {offsets = [0, 0], sizes = [48, 7], strides = [1, 1]} : vector<48x8xf32> to vector<48x7xf32>
    %715 = tpu.concatenate %713, %714 in 1 : vector<48x1xf32>, vector<48x7xf32> -> vector<48x8xf32>
    %716 = vector.extract_strided_slice %708 {offsets = [0, 1], sizes = [48, 7], strides = [1, 1]} : vector<48x8xf32> to vector<48x7xf32>
    %717 = vector.extract_strided_slice %708 {offsets = [0, 0], sizes = [48, 1], strides = [1, 1]} : vector<48x8xf32> to vector<48x1xf32>
    %718 = tpu.concatenate %716, %717 in 1 : vector<48x7xf32>, vector<48x1xf32> -> vector<48x8xf32>
    %719 = vector.extract_strided_slice %708 {offsets = [0, 2], sizes = [48, 6], strides = [1, 1]} : vector<48x8xf32> to vector<48x6xf32>
    %720 = vector.extract_strided_slice %708 {offsets = [0, 0], sizes = [48, 2], strides = [1, 1]} : vector<48x8xf32> to vector<48x2xf32>
    %721 = tpu.concatenate %719, %720 in 1 : vector<48x6xf32>, vector<48x2xf32> -> vector<48x8xf32>
    %722 = vector.shape_cast %37 : vector<1x8xi1> to vector<1x8xi1>
    %723 = vector.broadcast %722 : vector<1x8xi1> to vector<48x8xi1>
    %724 = arith.select %723, %721, %712 : vector<48x8xi1>, vector<48x8xf32>
    %725 = vector.shape_cast %39 : vector<1x8xi1> to vector<1x8xi1>
    %726 = vector.broadcast %725 : vector<1x8xi1> to vector<48x8xi1>
    %727 = arith.select %726, %708, %724 : vector<48x8xi1>, vector<48x8xf32>
    %728 = vector.shape_cast %37 : vector<1x8xi1> to vector<1x8xi1>
    %729 = vector.broadcast %728 : vector<1x8xi1> to vector<48x8xi1>
    %730 = arith.select %729, %718, %715 : vector<48x8xi1>, vector<48x8xf32>
    %731 = vector.shape_cast %43 : vector<1x8xi1> to vector<1x8xi1>
    %732 = vector.broadcast %731 : vector<1x8xi1> to vector<48x8xi1>
    %733 = arith.select %732, %715, %718 : vector<48x8xi1>, vector<48x8xf32>
    %734 = vector.shape_cast %43 : vector<1x8xi1> to vector<1x8xi1>
    %735 = vector.broadcast %734 : vector<1x8xi1> to vector<48x8xi1>
    %736 = arith.select %735, %712, %721 : vector<48x8xi1>, vector<48x8xf32>
    %737 = vector.shape_cast %41 : vector<1x8xi1> to vector<1x8xi1>
    %738 = vector.broadcast %737 : vector<1x8xi1> to vector<48x8xi1>
    %739 = arith.select %738, %708, %736 : vector<48x8xi1>, vector<48x8xf32>
    %740 = tpu.concatenate %727, %730, %708, %733, %739 in 0 : vector<48x8xf32>, vector<48x8xf32>, vector<48x8xf32>, vector<48x8xf32>, vector<48x8xf32> -> vector<240x8xf32>
    %741 = arith.truncf %740 : vector<240x8xf32> to vector<240x8xbf16>
    %742 = vector.extract_strided_slice %709 {offsets = [0, 0], sizes = [16, 240], strides = [1, 1]} : vector<16x256xbf16> to vector<16x240xbf16>
    %cst_134 = arith.constant dense<0.000000e+00> : vector<16x8xf32>
    %743 = tpu.matmul %742, %741, %cst_134 {dimension_numbers = #tpu.dot_dimension_numbers<[1], [0], [0], [1], [0, 0, 1, 1], [], []>} : vector<16x240xbf16>, vector<240x8xbf16>, vector<16x8xf32> -> vector<16x8xf32>
    %744 = vector.extract_strided_slice %709 {offsets = [0, 255], sizes = [16, 1], strides = [1, 1]} : vector<16x256xbf16> to vector<16x1xbf16>
    %745 = arith.extf %744 : vector<16x1xbf16> to vector<16x1xf32>
    %746 = vector.broadcast %745 : vector<16x1xf32> to vector<16x8xf32>
    %747 = arith.addf %743, %746 : vector<16x8xf32>
    %c528 = arith.constant 528 : index
    %c0_135 = arith.constant 0 : index
    %748 = vector.load %arg1[%c528, %c0_135] : memref<752x256xbf16, #tpu.memory_space<vmem>>, vector<16x256xbf16>
    %749 = vector.extract_strided_slice %748 {offsets = [0, 0], sizes = [16, 48], strides = [1, 1]} : vector<16x256xbf16> to vector<16x48xbf16>
    %750 = arith.truncf %667 : vector<48x8xf32> to vector<48x8xbf16>
    %cst_136 = arith.constant dense<0.000000e+00> : vector<16x8xf32>
    %751 = tpu.matmul %749, %750, %cst_136 {dimension_numbers = #tpu.dot_dimension_numbers<[1], [0], [0], [1], [0, 0, 1, 1], [], []>} : vector<16x48xbf16>, vector<48x8xbf16>, vector<16x8xf32> -> vector<16x8xf32>
    %752 = arith.addf %747, %751 : vector<16x8xf32>
    %cst_137 = arith.constant 0.000000e+00 : f32
    %753 = vector.broadcast %cst_137 : f32 to vector<16x8xf32>
    %754 = arith.cmpf oge, %752, %753 : vector<16x8xf32>
    %cst_138 = arith.constant 1.000000e-01 : f32
    %755 = vector.broadcast %cst_138 : f32 to vector<16x8xf32>
    %756 = arith.mulf %755, %752 : vector<16x8xf32>
    %757 = arith.select %754, %752, %756 : vector<16x8xi1>, vector<16x8xf32>
    %758 = arith.truncf %757 : vector<16x8xf32> to vector<16x8xbf16>
    %c416_139 = arith.constant 416 : index
    %c0_140 = arith.constant 0 : index
    %759 = vector.load %arg2[%c416_139, %c0_140] : memref<592x256xbf16, #tpu.memory_space<vmem>>, vector<8x32xbf16>
    %cst_141 = arith.constant dense<0.000000e+00> : vector<16x32xf32>
    %760 = tpu.matmul %758, %759, %cst_141 {dimension_numbers = #tpu.dot_dimension_numbers<[1], [0], [0], [1], [0, 0, 1, 1], [], []>} : vector<16x8xbf16>, vector<8x32xbf16>, vector<16x32xf32> -> vector<16x32xf32>
    %761 = tpu.concatenate %198, %760 in 0 : vector<16x32xf32>, vector<16x32xf32> -> vector<32x32xf32>
    %c544 = arith.constant 544 : index
    %c0_142 = arith.constant 0 : index
    %762 = vector.load %arg1[%c544, %c0_142] : memref<752x256xbf16, #tpu.memory_space<vmem>>, vector<24x256xbf16>
    %763 = vector.extract_strided_slice %761 {offsets = [0, 30], sizes = [32, 2], strides = [1, 1]} : vector<32x32xf32> to vector<32x2xf32>
    %764 = vector.extract_strided_slice %761 {offsets = [0, 0], sizes = [32, 30], strides = [1, 1]} : vector<32x32xf32> to vector<32x30xf32>
    %765 = tpu.concatenate %763, %764 in 1 : vector<32x2xf32>, vector<32x30xf32> -> vector<32x32xf32>
    %766 = vector.extract_strided_slice %761 {offsets = [0, 31], sizes = [32, 1], strides = [1, 1]} : vector<32x32xf32> to vector<32x1xf32>
    %767 = vector.extract_strided_slice %761 {offsets = [0, 0], sizes = [32, 31], strides = [1, 1]} : vector<32x32xf32> to vector<32x31xf32>
    %768 = tpu.concatenate %766, %767 in 1 : vector<32x1xf32>, vector<32x31xf32> -> vector<32x32xf32>
    %769 = vector.extract_strided_slice %761 {offsets = [0, 1], sizes = [32, 31], strides = [1, 1]} : vector<32x32xf32> to vector<32x31xf32>
    %770 = vector.extract_strided_slice %761 {offsets = [0, 0], sizes = [32, 1], strides = [1, 1]} : vector<32x32xf32> to vector<32x1xf32>
    %771 = tpu.concatenate %769, %770 in 1 : vector<32x31xf32>, vector<32x1xf32> -> vector<32x32xf32>
    %772 = vector.extract_strided_slice %761 {offsets = [0, 2], sizes = [32, 30], strides = [1, 1]} : vector<32x32xf32> to vector<32x30xf32>
    %773 = vector.extract_strided_slice %761 {offsets = [0, 0], sizes = [32, 2], strides = [1, 1]} : vector<32x32xf32> to vector<32x2xf32>
    %774 = tpu.concatenate %772, %773 in 1 : vector<32x30xf32>, vector<32x2xf32> -> vector<32x32xf32>
    %775 = vector.shape_cast %26 : vector<1x32xi1> to vector<1x32xi1>
    %776 = vector.broadcast %775 : vector<1x32xi1> to vector<32x32xi1>
    %777 = arith.select %776, %774, %765 : vector<32x32xi1>, vector<32x32xf32>
    %778 = vector.shape_cast %28 : vector<1x32xi1> to vector<1x32xi1>
    %779 = vector.broadcast %778 : vector<1x32xi1> to vector<32x32xi1>
    %780 = arith.select %779, %761, %777 : vector<32x32xi1>, vector<32x32xf32>
    %781 = vector.shape_cast %26 : vector<1x32xi1> to vector<1x32xi1>
    %782 = vector.broadcast %781 : vector<1x32xi1> to vector<32x32xi1>
    %783 = arith.select %782, %771, %768 : vector<32x32xi1>, vector<32x32xf32>
    %784 = vector.shape_cast %32 : vector<1x32xi1> to vector<1x32xi1>
    %785 = vector.broadcast %784 : vector<1x32xi1> to vector<32x32xi1>
    %786 = arith.select %785, %768, %771 : vector<32x32xi1>, vector<32x32xf32>
    %787 = vector.shape_cast %32 : vector<1x32xi1> to vector<1x32xi1>
    %788 = vector.broadcast %787 : vector<1x32xi1> to vector<32x32xi1>
    %789 = arith.select %788, %765, %774 : vector<32x32xi1>, vector<32x32xf32>
    %790 = vector.shape_cast %30 : vector<1x32xi1> to vector<1x32xi1>
    %791 = vector.broadcast %790 : vector<1x32xi1> to vector<32x32xi1>
    %792 = arith.select %791, %761, %789 : vector<32x32xi1>, vector<32x32xf32>
    %793 = tpu.concatenate %780, %783, %761, %786, %792 in 0 : vector<32x32xf32>, vector<32x32xf32>, vector<32x32xf32>, vector<32x32xf32>, vector<32x32xf32> -> vector<160x32xf32>
    %794 = arith.truncf %793 : vector<160x32xf32> to vector<160x32xbf16>
    %795 = vector.extract_strided_slice %762 {offsets = [0, 0], sizes = [24, 160], strides = [1, 1]} : vector<24x256xbf16> to vector<24x160xbf16>
    %cst_143 = arith.constant dense<0.000000e+00> : vector<24x32xf32>
    %796 = tpu.matmul %795, %794, %cst_143 {dimension_numbers = #tpu.dot_dimension_numbers<[1], [0], [0], [1], [0, 0, 1, 1], [], []>} : vector<24x160xbf16>, vector<160x32xbf16>, vector<24x32xf32> -> vector<24x32xf32>
    %797 = vector.extract_strided_slice %762 {offsets = [0, 255], sizes = [24, 1], strides = [1, 1]} : vector<24x256xbf16> to vector<24x1xbf16>
    %798 = arith.extf %797 : vector<24x1xbf16> to vector<24x1xf32>
    %799 = vector.broadcast %798 : vector<24x1xf32> to vector<24x32xf32>
    %800 = arith.addf %796, %799 : vector<24x32xf32>
    %cst_144 = arith.constant 0.000000e+00 : f32
    %801 = vector.broadcast %cst_144 : f32 to vector<24x32xf32>
    %802 = arith.maximumf %800, %801 : vector<24x32xf32>
    %c576 = arith.constant 576 : index
    %c0_145 = arith.constant 0 : index
    %803 = vector.load %arg1[%c576, %c0_145] : memref<752x256xbf16, #tpu.memory_space<vmem>>, vector<8x256xbf16>
    %804 = vector.extract_strided_slice %802 {offsets = [0, 30], sizes = [24, 2], strides = [1, 1]} : vector<24x32xf32> to vector<24x2xf32>
    %805 = vector.extract_strided_slice %802 {offsets = [0, 0], sizes = [24, 30], strides = [1, 1]} : vector<24x32xf32> to vector<24x30xf32>
    %806 = tpu.concatenate %804, %805 in 1 : vector<24x2xf32>, vector<24x30xf32> -> vector<24x32xf32>
    %807 = vector.extract_strided_slice %802 {offsets = [0, 31], sizes = [24, 1], strides = [1, 1]} : vector<24x32xf32> to vector<24x1xf32>
    %808 = vector.extract_strided_slice %802 {offsets = [0, 0], sizes = [24, 31], strides = [1, 1]} : vector<24x32xf32> to vector<24x31xf32>
    %809 = tpu.concatenate %807, %808 in 1 : vector<24x1xf32>, vector<24x31xf32> -> vector<24x32xf32>
    %810 = vector.extract_strided_slice %802 {offsets = [0, 1], sizes = [24, 31], strides = [1, 1]} : vector<24x32xf32> to vector<24x31xf32>
    %811 = vector.extract_strided_slice %802 {offsets = [0, 0], sizes = [24, 1], strides = [1, 1]} : vector<24x32xf32> to vector<24x1xf32>
    %812 = tpu.concatenate %810, %811 in 1 : vector<24x31xf32>, vector<24x1xf32> -> vector<24x32xf32>
    %813 = vector.extract_strided_slice %802 {offsets = [0, 2], sizes = [24, 30], strides = [1, 1]} : vector<24x32xf32> to vector<24x30xf32>
    %814 = vector.extract_strided_slice %802 {offsets = [0, 0], sizes = [24, 2], strides = [1, 1]} : vector<24x32xf32> to vector<24x2xf32>
    %815 = tpu.concatenate %813, %814 in 1 : vector<24x30xf32>, vector<24x2xf32> -> vector<24x32xf32>
    %816 = vector.shape_cast %26 : vector<1x32xi1> to vector<1x32xi1>
    %817 = vector.broadcast %816 : vector<1x32xi1> to vector<24x32xi1>
    %818 = arith.select %817, %815, %806 : vector<24x32xi1>, vector<24x32xf32>
    %819 = vector.shape_cast %28 : vector<1x32xi1> to vector<1x32xi1>
    %820 = vector.broadcast %819 : vector<1x32xi1> to vector<24x32xi1>
    %821 = arith.select %820, %802, %818 : vector<24x32xi1>, vector<24x32xf32>
    %822 = vector.shape_cast %26 : vector<1x32xi1> to vector<1x32xi1>
    %823 = vector.broadcast %822 : vector<1x32xi1> to vector<24x32xi1>
    %824 = arith.select %823, %812, %809 : vector<24x32xi1>, vector<24x32xf32>
    %825 = vector.shape_cast %32 : vector<1x32xi1> to vector<1x32xi1>
    %826 = vector.broadcast %825 : vector<1x32xi1> to vector<24x32xi1>
    %827 = arith.select %826, %809, %812 : vector<24x32xi1>, vector<24x32xf32>
    %828 = vector.shape_cast %32 : vector<1x32xi1> to vector<1x32xi1>
    %829 = vector.broadcast %828 : vector<1x32xi1> to vector<24x32xi1>
    %830 = arith.select %829, %806, %815 : vector<24x32xi1>, vector<24x32xf32>
    %831 = vector.shape_cast %30 : vector<1x32xi1> to vector<1x32xi1>
    %832 = vector.broadcast %831 : vector<1x32xi1> to vector<24x32xi1>
    %833 = arith.select %832, %802, %830 : vector<24x32xi1>, vector<24x32xf32>
    %834 = tpu.concatenate %821, %824, %802, %827, %833 in 0 : vector<24x32xf32>, vector<24x32xf32>, vector<24x32xf32>, vector<24x32xf32>, vector<24x32xf32> -> vector<120x32xf32>
    %835 = arith.truncf %834 : vector<120x32xf32> to vector<120x32xbf16>
    %836 = vector.extract_strided_slice %803 {offsets = [0, 0], sizes = [8, 120], strides = [1, 1]} : vector<8x256xbf16> to vector<8x120xbf16>
    %cst_146 = arith.constant dense<0.000000e+00> : vector<8x32xf32>
    %837 = tpu.matmul %836, %835, %cst_146 {dimension_numbers = #tpu.dot_dimension_numbers<[1], [0], [0], [1], [0, 0, 1, 1], [], []>} : vector<8x120xbf16>, vector<120x32xbf16>, vector<8x32xf32> -> vector<8x32xf32>
    %838 = vector.extract_strided_slice %803 {offsets = [0, 255], sizes = [8, 1], strides = [1, 1]} : vector<8x256xbf16> to vector<8x1xbf16>
    %839 = arith.extf %838 : vector<8x1xbf16> to vector<8x1xf32>
    %840 = vector.broadcast %839 : vector<8x1xf32> to vector<8x32xf32>
    %841 = arith.addf %837, %840 : vector<8x32xf32>
    %c592 = arith.constant 592 : index
    %c0_147 = arith.constant 0 : index
    %842 = vector.load %arg1[%c592, %c0_147] : memref<752x256xbf16, #tpu.memory_space<vmem>>, vector<8x256xbf16>
    %843 = vector.extract_strided_slice %842 {offsets = [0, 0], sizes = [8, 32], strides = [1, 1]} : vector<8x256xbf16> to vector<8x32xbf16>
    %844 = arith.truncf %761 : vector<32x32xf32> to vector<32x32xbf16>
    %cst_148 = arith.constant dense<0.000000e+00> : vector<8x32xf32>
    %845 = tpu.matmul %843, %844, %cst_148 {dimension_numbers = #tpu.dot_dimension_numbers<[1], [0], [0], [1], [0, 0, 1, 1], [], []>} : vector<8x32xbf16>, vector<32x32xbf16>, vector<8x32xf32> -> vector<8x32xf32>
    %846 = arith.addf %841, %845 : vector<8x32xf32>
    %cst_149 = arith.constant 0.000000e+00 : f32
    %847 = vector.broadcast %cst_149 : f32 to vector<8x32xf32>
    %848 = arith.cmpf oge, %846, %847 : vector<8x32xf32>
    %cst_150 = arith.constant 1.000000e-01 : f32
    %849 = vector.broadcast %cst_150 : f32 to vector<8x32xf32>
    %850 = arith.mulf %849, %846 : vector<8x32xf32>
    %851 = arith.select %848, %846, %850 : vector<8x32xi1>, vector<8x32xf32>
    %852 = arith.truncf %851 : vector<8x32xf32> to vector<8x32xbf16>
    %c432_151 = arith.constant 432 : index
    %c0_152 = arith.constant 0 : index
    %853 = vector.load %arg2[%c432_151, %c0_152] : memref<592x256xbf16, #tpu.memory_space<vmem>>, vector<32x128xbf16>
    %cst_153 = arith.constant dense<0.000000e+00> : vector<8x128xf32>
    %854 = tpu.matmul %852, %853, %cst_153 {dimension_numbers = #tpu.dot_dimension_numbers<[1], [0], [0], [1], [0, 0, 1, 1], [], []>} : vector<8x32xbf16>, vector<32x128xbf16>, vector<8x128xf32> -> vector<8x128xf32>
    %855 = tpu.concatenate %120, %854 in 0 : vector<8x128xf32>, vector<8x128xf32> -> vector<16x128xf32>
    %c608 = arith.constant 608 : index
    %c0_154 = arith.constant 0 : index
    %856 = vector.load %arg1[%c608, %c0_154] : memref<752x256xbf16, #tpu.memory_space<vmem>>, vector<16x256xbf16>
    %c2_i32_155 = arith.constant 2 : i32
    %857 = tpu.dynamic_rotate %855 by %c2_i32_155 dim 1 : vector<16x128xf32>, i32 -> vector<16x128xf32>
    %c1_i32_156 = arith.constant 1 : i32
    %858 = tpu.dynamic_rotate %855 by %c1_i32_156 dim 1 : vector<16x128xf32>, i32 -> vector<16x128xf32>
    %c127_i32_157 = arith.constant 127 : i32
    %859 = tpu.dynamic_rotate %855 by %c127_i32_157 dim 1 : vector<16x128xf32>, i32 -> vector<16x128xf32>
    %c126_i32_158 = arith.constant 126 : i32
    %860 = tpu.dynamic_rotate %855 by %c126_i32_158 dim 1 : vector<16x128xf32>, i32 -> vector<16x128xf32>
    %861 = vector.shape_cast %15 : vector<1x128xi1> to vector<1x128xi1>
    %862 = vector.broadcast %861 : vector<1x128xi1> to vector<16x128xi1>
    %863 = arith.select %862, %860, %857 : vector<16x128xi1>, vector<16x128xf32>
    %864 = vector.shape_cast %17 : vector<1x128xi1> to vector<1x128xi1>
    %865 = vector.broadcast %864 : vector<1x128xi1> to vector<16x128xi1>
    %866 = arith.select %865, %855, %863 : vector<16x128xi1>, vector<16x128xf32>
    %867 = vector.shape_cast %15 : vector<1x128xi1> to vector<1x128xi1>
    %868 = vector.broadcast %867 : vector<1x128xi1> to vector<16x128xi1>
    %869 = arith.select %868, %859, %858 : vector<16x128xi1>, vector<16x128xf32>
    %870 = vector.shape_cast %21 : vector<1x128xi1> to vector<1x128xi1>
    %871 = vector.broadcast %870 : vector<1x128xi1> to vector<16x128xi1>
    %872 = arith.select %871, %858, %859 : vector<16x128xi1>, vector<16x128xf32>
    %873 = vector.shape_cast %21 : vector<1x128xi1> to vector<1x128xi1>
    %874 = vector.broadcast %873 : vector<1x128xi1> to vector<16x128xi1>
    %875 = arith.select %874, %857, %860 : vector<16x128xi1>, vector<16x128xf32>
    %876 = vector.shape_cast %19 : vector<1x128xi1> to vector<1x128xi1>
    %877 = vector.broadcast %876 : vector<1x128xi1> to vector<16x128xi1>
    %878 = arith.select %877, %855, %875 : vector<16x128xi1>, vector<16x128xf32>
    %879 = tpu.concatenate %866, %869, %855, %872, %878 in 0 : vector<16x128xf32>, vector<16x128xf32>, vector<16x128xf32>, vector<16x128xf32>, vector<16x128xf32> -> vector<80x128xf32>
    %880 = arith.truncf %879 : vector<80x128xf32> to vector<80x128xbf16>
    %881 = vector.extract_strided_slice %856 {offsets = [0, 0], sizes = [16, 80], strides = [1, 1]} : vector<16x256xbf16> to vector<16x80xbf16>
    %cst_159 = arith.constant dense<0.000000e+00> : vector<16x128xf32>
    %882 = tpu.matmul %881, %880, %cst_159 {dimension_numbers = #tpu.dot_dimension_numbers<[1], [0], [0], [1], [0, 0, 1, 1], [], []>} : vector<16x80xbf16>, vector<80x128xbf16>, vector<16x128xf32> -> vector<16x128xf32>
    %883 = vector.extract_strided_slice %856 {offsets = [0, 255], sizes = [16, 1], strides = [1, 1]} : vector<16x256xbf16> to vector<16x1xbf16>
    %884 = arith.extf %883 : vector<16x1xbf16> to vector<16x1xf32>
    %885 = vector.broadcast %884 : vector<16x1xf32> to vector<16x128xf32>
    %886 = arith.addf %882, %885 : vector<16x128xf32>
    %cst_160 = arith.constant 0.000000e+00 : f32
    %887 = vector.broadcast %cst_160 : f32 to vector<16x128xf32>
    %888 = arith.maximumf %886, %887 : vector<16x128xf32>
    %c624 = arith.constant 624 : index
    %c0_161 = arith.constant 0 : index
    %889 = vector.load %arg1[%c624, %c0_161] : memref<752x256xbf16, #tpu.memory_space<vmem>>, vector<8x256xbf16>
    %c2_i32_162 = arith.constant 2 : i32
    %890 = tpu.dynamic_rotate %888 by %c2_i32_162 dim 1 : vector<16x128xf32>, i32 -> vector<16x128xf32>
    %c1_i32_163 = arith.constant 1 : i32
    %891 = tpu.dynamic_rotate %888 by %c1_i32_163 dim 1 : vector<16x128xf32>, i32 -> vector<16x128xf32>
    %c127_i32_164 = arith.constant 127 : i32
    %892 = tpu.dynamic_rotate %888 by %c127_i32_164 dim 1 : vector<16x128xf32>, i32 -> vector<16x128xf32>
    %c126_i32_165 = arith.constant 126 : i32
    %893 = tpu.dynamic_rotate %888 by %c126_i32_165 dim 1 : vector<16x128xf32>, i32 -> vector<16x128xf32>
    %894 = vector.shape_cast %15 : vector<1x128xi1> to vector<1x128xi1>
    %895 = vector.broadcast %894 : vector<1x128xi1> to vector<16x128xi1>
    %896 = arith.select %895, %893, %890 : vector<16x128xi1>, vector<16x128xf32>
    %897 = vector.shape_cast %17 : vector<1x128xi1> to vector<1x128xi1>
    %898 = vector.broadcast %897 : vector<1x128xi1> to vector<16x128xi1>
    %899 = arith.select %898, %888, %896 : vector<16x128xi1>, vector<16x128xf32>
    %900 = vector.shape_cast %15 : vector<1x128xi1> to vector<1x128xi1>
    %901 = vector.broadcast %900 : vector<1x128xi1> to vector<16x128xi1>
    %902 = arith.select %901, %892, %891 : vector<16x128xi1>, vector<16x128xf32>
    %903 = vector.shape_cast %21 : vector<1x128xi1> to vector<1x128xi1>
    %904 = vector.broadcast %903 : vector<1x128xi1> to vector<16x128xi1>
    %905 = arith.select %904, %891, %892 : vector<16x128xi1>, vector<16x128xf32>
    %906 = vector.shape_cast %21 : vector<1x128xi1> to vector<1x128xi1>
    %907 = vector.broadcast %906 : vector<1x128xi1> to vector<16x128xi1>
    %908 = arith.select %907, %890, %893 : vector<16x128xi1>, vector<16x128xf32>
    %909 = vector.shape_cast %19 : vector<1x128xi1> to vector<1x128xi1>
    %910 = vector.broadcast %909 : vector<1x128xi1> to vector<16x128xi1>
    %911 = arith.select %910, %888, %908 : vector<16x128xi1>, vector<16x128xf32>
    %912 = tpu.concatenate %899, %902, %888, %905, %911 in 0 : vector<16x128xf32>, vector<16x128xf32>, vector<16x128xf32>, vector<16x128xf32>, vector<16x128xf32> -> vector<80x128xf32>
    %913 = arith.truncf %912 : vector<80x128xf32> to vector<80x128xbf16>
    %914 = vector.extract_strided_slice %889 {offsets = [0, 0], sizes = [8, 80], strides = [1, 1]} : vector<8x256xbf16> to vector<8x80xbf16>
    %cst_166 = arith.constant dense<0.000000e+00> : vector<8x128xf32>
    %915 = tpu.matmul %914, %913, %cst_166 {dimension_numbers = #tpu.dot_dimension_numbers<[1], [0], [0], [1], [0, 0, 1, 1], [], []>} : vector<8x80xbf16>, vector<80x128xbf16>, vector<8x128xf32> -> vector<8x128xf32>
    %916 = vector.extract_strided_slice %889 {offsets = [0, 255], sizes = [8, 1], strides = [1, 1]} : vector<8x256xbf16> to vector<8x1xbf16>
    %917 = arith.extf %916 : vector<8x1xbf16> to vector<8x1xf32>
    %918 = vector.broadcast %917 : vector<8x1xf32> to vector<8x128xf32>
    %919 = arith.addf %915, %918 : vector<8x128xf32>
    %c640 = arith.constant 640 : index
    %c0_167 = arith.constant 0 : index
    %920 = vector.load %arg1[%c640, %c0_167] : memref<752x256xbf16, #tpu.memory_space<vmem>>, vector<8x256xbf16>
    %921 = vector.extract_strided_slice %920 {offsets = [0, 0], sizes = [8, 16], strides = [1, 1]} : vector<8x256xbf16> to vector<8x16xbf16>
    %922 = arith.truncf %855 : vector<16x128xf32> to vector<16x128xbf16>
    %cst_168 = arith.constant dense<0.000000e+00> : vector<8x128xf32>
    %923 = tpu.matmul %921, %922, %cst_168 {dimension_numbers = #tpu.dot_dimension_numbers<[1], [0], [0], [1], [0, 0, 1, 1], [], []>} : vector<8x16xbf16>, vector<16x128xbf16>, vector<8x128xf32> -> vector<8x128xf32>
    %924 = arith.addf %919, %923 : vector<8x128xf32>
    %cst_169 = arith.constant 0.000000e+00 : f32
    %925 = vector.broadcast %cst_169 : f32 to vector<8x128xf32>
    %926 = arith.cmpf oge, %924, %925 : vector<8x128xf32>
    %cst_170 = arith.constant 1.000000e-01 : f32
    %927 = vector.broadcast %cst_170 : f32 to vector<8x128xf32>
    %928 = arith.mulf %927, %924 : vector<8x128xf32>
    %929 = arith.select %926, %924, %928 : vector<8x128xi1>, vector<8x128xf32>
    %930 = arith.truncf %929 : vector<8x128xf32> to vector<8x128xbf16>
    %c464_171 = arith.constant 464 : index
    %c0_172 = arith.constant 0 : index
    %931 = vector.load %arg2[%c464_171, %c0_172] : memref<592x256xbf16, #tpu.memory_space<vmem>>, vector<128x256xbf16>
    %cst_173 = arith.constant dense<0.000000e+00> : vector<8x256xf32>
    %932 = tpu.matmul %930, %931, %cst_173 {dimension_numbers = #tpu.dot_dimension_numbers<[1], [0], [0], [1], [0, 0, 1, 1], [], []>} : vector<8x128xbf16>, vector<128x256xbf16>, vector<8x256xf32> -> vector<8x256xf32>
    %933 = tpu.concatenate %44, %932 in 0 : vector<8x256xf32>, vector<8x256xf32> -> vector<16x256xf32>
    %c656 = arith.constant 656 : index
    %c0_174 = arith.constant 0 : index
    %934 = vector.load %arg1[%c656, %c0_174] : memref<752x256xbf16, #tpu.memory_space<vmem>>, vector<8x256xbf16>
    %c2_i32_175 = arith.constant 2 : i32
    %935 = tpu.dynamic_rotate %933 by %c2_i32_175 dim 1 : vector<16x256xf32>, i32 -> vector<16x256xf32>
    %c1_i32_176 = arith.constant 1 : i32
    %936 = tpu.dynamic_rotate %933 by %c1_i32_176 dim 1 : vector<16x256xf32>, i32 -> vector<16x256xf32>
    %c255_i32_177 = arith.constant 255 : i32
    %937 = tpu.dynamic_rotate %933 by %c255_i32_177 dim 1 : vector<16x256xf32>, i32 -> vector<16x256xf32>
    %c254_i32_178 = arith.constant 254 : i32
    %938 = tpu.dynamic_rotate %933 by %c254_i32_178 dim 1 : vector<16x256xf32>, i32 -> vector<16x256xf32>
    %939 = vector.shape_cast %4 : vector<1x256xi1> to vector<1x256xi1>
    %940 = vector.broadcast %939 : vector<1x256xi1> to vector<16x256xi1>
    %941 = arith.select %940, %938, %935 : vector<16x256xi1>, vector<16x256xf32>
    %942 = vector.shape_cast %6 : vector<1x256xi1> to vector<1x256xi1>
    %943 = vector.broadcast %942 : vector<1x256xi1> to vector<16x256xi1>
    %944 = arith.select %943, %933, %941 : vector<16x256xi1>, vector<16x256xf32>
    %945 = vector.shape_cast %4 : vector<1x256xi1> to vector<1x256xi1>
    %946 = vector.broadcast %945 : vector<1x256xi1> to vector<16x256xi1>
    %947 = arith.select %946, %937, %936 : vector<16x256xi1>, vector<16x256xf32>
    %948 = vector.shape_cast %10 : vector<1x256xi1> to vector<1x256xi1>
    %949 = vector.broadcast %948 : vector<1x256xi1> to vector<16x256xi1>
    %950 = arith.select %949, %936, %937 : vector<16x256xi1>, vector<16x256xf32>
    %951 = vector.shape_cast %10 : vector<1x256xi1> to vector<1x256xi1>
    %952 = vector.broadcast %951 : vector<1x256xi1> to vector<16x256xi1>
    %953 = arith.select %952, %935, %938 : vector<16x256xi1>, vector<16x256xf32>
    %954 = vector.shape_cast %8 : vector<1x256xi1> to vector<1x256xi1>
    %955 = vector.broadcast %954 : vector<1x256xi1> to vector<16x256xi1>
    %956 = arith.select %955, %933, %953 : vector<16x256xi1>, vector<16x256xf32>
    %957 = tpu.concatenate %944, %947, %933, %950, %956 in 0 : vector<16x256xf32>, vector<16x256xf32>, vector<16x256xf32>, vector<16x256xf32>, vector<16x256xf32> -> vector<80x256xf32>
    %958 = arith.truncf %957 : vector<80x256xf32> to vector<80x256xbf16>
    %959 = vector.extract_strided_slice %934 {offsets = [0, 0], sizes = [8, 80], strides = [1, 1]} : vector<8x256xbf16> to vector<8x80xbf16>
    %cst_179 = arith.constant dense<0.000000e+00> : vector<8x256xf32>
    %960 = tpu.matmul %959, %958, %cst_179 {dimension_numbers = #tpu.dot_dimension_numbers<[1], [0], [0], [1], [0, 0, 1, 1], [], []>} : vector<8x80xbf16>, vector<80x256xbf16>, vector<8x256xf32> -> vector<8x256xf32>
    %961 = vector.extract_strided_slice %934 {offsets = [0, 255], sizes = [8, 1], strides = [1, 1]} : vector<8x256xbf16> to vector<8x1xbf16>
    %962 = arith.extf %961 : vector<8x1xbf16> to vector<8x1xf32>
    %963 = vector.broadcast %962 : vector<8x1xf32> to vector<8x256xf32>
    %964 = arith.addf %960, %963 : vector<8x256xf32>
    %cst_180 = arith.constant 0.000000e+00 : f32
    %965 = vector.broadcast %cst_180 : f32 to vector<8x256xf32>
    %966 = arith.maximumf %964, %965 : vector<8x256xf32>
    %c672 = arith.constant 672 : index
    %c0_181 = arith.constant 0 : index
    %967 = vector.load %arg1[%c672, %c0_181] : memref<752x256xbf16, #tpu.memory_space<vmem>>, vector<8x256xbf16>
    %c2_i32_182 = arith.constant 2 : i32
    %968 = tpu.dynamic_rotate %966 by %c2_i32_182 dim 1 : vector<8x256xf32>, i32 -> vector<8x256xf32>
    %c1_i32_183 = arith.constant 1 : i32
    %969 = tpu.dynamic_rotate %966 by %c1_i32_183 dim 1 : vector<8x256xf32>, i32 -> vector<8x256xf32>
    %c255_i32_184 = arith.constant 255 : i32
    %970 = tpu.dynamic_rotate %966 by %c255_i32_184 dim 1 : vector<8x256xf32>, i32 -> vector<8x256xf32>
    %c254_i32_185 = arith.constant 254 : i32
    %971 = tpu.dynamic_rotate %966 by %c254_i32_185 dim 1 : vector<8x256xf32>, i32 -> vector<8x256xf32>
    %972 = vector.shape_cast %4 : vector<1x256xi1> to vector<1x256xi1>
    %973 = vector.broadcast %972 : vector<1x256xi1> to vector<8x256xi1>
    %974 = arith.select %973, %971, %968 : vector<8x256xi1>, vector<8x256xf32>
    %975 = vector.shape_cast %6 : vector<1x256xi1> to vector<1x256xi1>
    %976 = vector.broadcast %975 : vector<1x256xi1> to vector<8x256xi1>
    %977 = arith.select %976, %966, %974 : vector<8x256xi1>, vector<8x256xf32>
    %978 = vector.shape_cast %4 : vector<1x256xi1> to vector<1x256xi1>
    %979 = vector.broadcast %978 : vector<1x256xi1> to vector<8x256xi1>
    %980 = arith.select %979, %970, %969 : vector<8x256xi1>, vector<8x256xf32>
    %981 = vector.shape_cast %10 : vector<1x256xi1> to vector<1x256xi1>
    %982 = vector.broadcast %981 : vector<1x256xi1> to vector<8x256xi1>
    %983 = arith.select %982, %969, %970 : vector<8x256xi1>, vector<8x256xf32>
    %984 = vector.shape_cast %10 : vector<1x256xi1> to vector<1x256xi1>
    %985 = vector.broadcast %984 : vector<1x256xi1> to vector<8x256xi1>
    %986 = arith.select %985, %968, %971 : vector<8x256xi1>, vector<8x256xf32>
    %987 = vector.shape_cast %8 : vector<1x256xi1> to vector<1x256xi1>
    %988 = vector.broadcast %987 : vector<1x256xi1> to vector<8x256xi1>
    %989 = arith.select %988, %966, %986 : vector<8x256xi1>, vector<8x256xf32>
    %990 = tpu.concatenate %977, %980, %966, %983, %989 in 0 : vector<8x256xf32>, vector<8x256xf32>, vector<8x256xf32>, vector<8x256xf32>, vector<8x256xf32> -> vector<40x256xf32>
    %991 = arith.truncf %990 : vector<40x256xf32> to vector<40x256xbf16>
    %992 = vector.extract_strided_slice %967 {offsets = [0, 0], sizes = [8, 40], strides = [1, 1]} : vector<8x256xbf16> to vector<8x40xbf16>
    %cst_186 = arith.constant dense<0.000000e+00> : vector<8x256xf32>
    %993 = tpu.matmul %992, %991, %cst_186 {dimension_numbers = #tpu.dot_dimension_numbers<[1], [0], [0], [1], [0, 0, 1, 1], [], []>} : vector<8x40xbf16>, vector<40x256xbf16>, vector<8x256xf32> -> vector<8x256xf32>
    %994 = vector.extract_strided_slice %967 {offsets = [0, 255], sizes = [8, 1], strides = [1, 1]} : vector<8x256xbf16> to vector<8x1xbf16>
    %995 = arith.extf %994 : vector<8x1xbf16> to vector<8x1xf32>
    %996 = vector.broadcast %995 : vector<8x1xf32> to vector<8x256xf32>
    %997 = arith.addf %993, %996 : vector<8x256xf32>
    %c688 = arith.constant 688 : index
    %c0_187 = arith.constant 0 : index
    %998 = vector.load %arg1[%c688, %c0_187] : memref<752x256xbf16, #tpu.memory_space<vmem>>, vector<8x256xbf16>
    %999 = vector.extract_strided_slice %998 {offsets = [0, 0], sizes = [8, 16], strides = [1, 1]} : vector<8x256xbf16> to vector<8x16xbf16>
    %1000 = arith.truncf %933 : vector<16x256xf32> to vector<16x256xbf16>
    %cst_188 = arith.constant dense<0.000000e+00> : vector<8x256xf32>
    %1001 = tpu.matmul %999, %1000, %cst_188 {dimension_numbers = #tpu.dot_dimension_numbers<[1], [0], [0], [1], [0, 0, 1, 1], [], []>} : vector<8x16xbf16>, vector<16x256xbf16>, vector<8x256xf32> -> vector<8x256xf32>
    %1002 = arith.addf %997, %1001 : vector<8x256xf32>
    %cst_189 = arith.constant 0.000000e+00 : f32
    %1003 = vector.broadcast %cst_189 : f32 to vector<8x256xf32>
    %1004 = arith.cmpf oge, %1002, %1003 : vector<8x256xf32>
    %cst_190 = arith.constant 1.000000e-01 : f32
    %1005 = vector.broadcast %cst_190 : f32 to vector<8x256xf32>
    %1006 = arith.mulf %1005, %1002 : vector<8x256xf32>
    %1007 = arith.select %1004, %1002, %1006 : vector<8x256xi1>, vector<8x256xf32>
    %c704 = arith.constant 704 : index
    %c0_191 = arith.constant 0 : index
    %1008 = vector.load %arg1[%c704, %c0_191] : memref<752x256xbf16, #tpu.memory_space<vmem>>, vector<8x256xbf16>
    %1009 = arith.truncf %1007 : vector<8x256xf32> to vector<8x256xbf16>
    %1010 = vector.extract_strided_slice %1008 {offsets = [0, 0], sizes = [8, 8], strides = [1, 1]} : vector<8x256xbf16> to vector<8x8xbf16>
    %cst_192 = arith.constant dense<0.000000e+00> : vector<8x256xf32>
    %1011 = tpu.matmul %1010, %1009, %cst_192 {dimension_numbers = #tpu.dot_dimension_numbers<[1], [0], [0], [1], [0, 0, 1, 1], [], []>} : vector<8x8xbf16>, vector<8x256xbf16>, vector<8x256xf32> -> vector<8x256xf32>
    %1012 = vector.extract_strided_slice %1008 {offsets = [0, 255], sizes = [8, 1], strides = [1, 1]} : vector<8x256xbf16> to vector<8x1xbf16>
    %1013 = arith.extf %1012 : vector<8x1xbf16> to vector<8x1xf32>
    %1014 = vector.broadcast %1013 : vector<8x1xf32> to vector<8x256xf32>
    %1015 = arith.addf %1011, %1014 : vector<8x256xf32>
    %cst_193 = arith.constant 0.000000e+00 : f32
    %1016 = vector.broadcast %cst_193 : f32 to vector<8x256xf32>
    %1017 = arith.maximumf %1015, %1016 : vector<8x256xf32>
    %c720 = arith.constant 720 : index
    %c0_194 = arith.constant 0 : index
    %1018 = vector.load %arg1[%c720, %c0_194] : memref<752x256xbf16, #tpu.memory_space<vmem>>, vector<8x256xbf16>
    %1019 = arith.truncf %1017 : vector<8x256xf32> to vector<8x256xbf16>
    %1020 = vector.extract_strided_slice %1018 {offsets = [0, 0], sizes = [8, 8], strides = [1, 1]} : vector<8x256xbf16> to vector<8x8xbf16>
    %cst_195 = arith.constant dense<0.000000e+00> : vector<8x256xf32>
    %1021 = tpu.matmul %1020, %1019, %cst_195 {dimension_numbers = #tpu.dot_dimension_numbers<[1], [0], [0], [1], [0, 0, 1, 1], [], []>} : vector<8x8xbf16>, vector<8x256xbf16>, vector<8x256xf32> -> vector<8x256xf32>
    %1022 = vector.extract_strided_slice %1018 {offsets = [0, 255], sizes = [8, 1], strides = [1, 1]} : vector<8x256xbf16> to vector<8x1xbf16>
    %1023 = arith.extf %1022 : vector<8x1xbf16> to vector<8x1xf32>
    %1024 = vector.broadcast %1023 : vector<8x1xf32> to vector<8x256xf32>
    %1025 = arith.addf %1021, %1024 : vector<8x256xf32>
    %c736 = arith.constant 736 : index
    %c0_196 = arith.constant 0 : index
    %1026 = vector.load %arg1[%c736, %c0_196] : memref<752x256xbf16, #tpu.memory_space<vmem>>, vector<8x256xbf16>
    %1027 = vector.extract_strided_slice %1026 {offsets = [0, 0], sizes = [8, 8], strides = [1, 1]} : vector<8x256xbf16> to vector<8x8xbf16>
    %1028 = arith.truncf %1007 : vector<8x256xf32> to vector<8x256xbf16>
    %cst_197 = arith.constant dense<0.000000e+00> : vector<8x256xf32>
    %1029 = tpu.matmul %1027, %1028, %cst_197 {dimension_numbers = #tpu.dot_dimension_numbers<[1], [0], [0], [1], [0, 0, 1, 1], [], []>} : vector<8x8xbf16>, vector<8x256xbf16>, vector<8x256xf32> -> vector<8x256xf32>
    %1030 = arith.addf %1025, %1029 : vector<8x256xf32>
    %1031 = arith.negf %1030 : vector<8x256xf32>
    %1032 = math.exp %1031 : vector<8x256xf32>
    %cst_198 = arith.constant 1.000000e+00 : f32
    %1033 = vector.broadcast %cst_198 : f32 to vector<8x256xf32>
    %1034 = arith.addf %1033, %1032 : vector<8x256xf32>
    %1035 = arith.divf %1033, %1034 : vector<8x256xf32>
    %1036 = vector.extract_strided_slice %1035 {offsets = [0, 0], sizes = [1, 256], strides = [1, 1]} : vector<8x256xf32> to vector<1x256xf32>
    %1037 = tpu.concatenate %666, %1036 in 0 : vector<1x256xf32>, vector<1x256xf32> -> vector<2x256xf32>
    %c0_199 = arith.constant 0 : index
    %c0_200 = arith.constant 0 : index
    %1038 = vector.load %arg3[%c0_199, %c0_200] : memref<2x256xf32, #tpu.memory_space<vmem>>, vector<2x256xf32>
    tpu.vector_store %arg3[%c0_199, %c0_200], %1037 {strides = array<i32>} : memref<2x256xf32, #tpu.memory_space<vmem>>, vector<2x256xf32>,
    return
  }
}

</mosaic_0001>

<bundles_post_ra>
// kernel: resunet_lstm_forward.1
= control target key start
LH: loop header
LB: loop body
LE: loop exit
PB: predicated region body
PF: predicated region fallthrough
CT: control target
= control target key end

     0   :  { %8 = vsyncpa [#allocation3], 0  ;;  %s8945_s0 = inlined_call_operand.vmem [shape: f32[8,256], index: 0, kind: input, shape index: {}]   ;;  %s8946_s1 = inlined_call_operand.hbm [shape: bf16[752,256], index: 1, kind: input, shape index: {}]   ;;  %s8947_s2 = inlined_call_operand.hbm [shape: bf16[592,256], index: 2, kind: input, shape index: {}]   ;;  %s8948_s3 = inlined_call_operand.hbm [shape: f32[2,256], index: 3, kind: output, shape index: {}]  }
   0x1   :  { %9 = vsyncpa [#allocation6], 0 }
   0x2   :  { %10 = vsyncpa [#allocation4], 0  ;;  %s6747_s12 = smov [#allocation2]  }
   0x3   :  { %s18_s13 = sshll.u32 %s6747_s12, 4  ;;  %s19_s13 = int_to_ptr.vmem [resolvable:$true] %s18_s13 }
   0x4   :  { %s6689_s14 = scalar_lea.vmem %s19_s13, 12032  ;;  %p6694_p1 = scmp.lt.s32.totalorder %s19_s13, %s19_s13 }
   0x5   :  { %p6690_p0 = scmp.ne.s32.totalorder %s19_s13, %s6689_s14  ;;  %p6695_p2 = scmp.lt.s32.totalorder %s6689_s14, %s6689_s14 }
   0x7   :  { %p6696_p3 = por %p6695_p2, %p6694_p1 }
   0x9   :  { %p6697_p4 = pnand %p6696_p3, %p6690_p0 }
   0xb   :  { %6700 = shalt.err (!%p6697_p4)
}
   0xc   :  { %s6748_s15 = smov 128   ;;  %s6749_s16 = smov 8  }
   0xd   :  { %24 = dma.hbm_to_vmem [thread:$0]  %s8946_s1, 12032, %s19_s13, [#allocation3], %s6748_s15, %s6748_s15, %s6749_s16  }
   0xe   :  { %s6750_s19 = smov [#allocation5]  }
   0xf   :  { %s30_s20 = sshll.u32 %s6750_s19, 4  ;;  %s31_s20 = int_to_ptr.vmem [resolvable:$true] %s30_s20 }
  0x10   :  { %s6709_s21 = scalar_lea.vmem %s31_s20, 9472  ;;  %p6714_p6 = scmp.lt.s32.totalorder %s31_s20, %s31_s20 }
  0x11   :  { %p6710_p5 = scmp.ne.s32.totalorder %s31_s20, %s6709_s21  ;;  %p6715_p7 = scmp.lt.s32.totalorder %s6709_s21, %s6709_s21 }
  0x13   :  { %p6716_p8 = por %p6715_p7, %p6714_p6 }
  0x15   :  { %p6717_p9 = pnand %p6716_p8, %p6710_p5 }
  0x17   :  { %6720 = shalt.err (!%p6717_p9)
}
  0x18   :  { %36 = dma.hbm_to_vmem [thread:$0]  %s8947_s2, 9472, %s31_s20, [#allocation6], %s6748_s15, %s6748_s15, %s6749_s16  }
  0x19   :  { %6741 = dma.done.wait [#allocation3], 12032  }
  0x1a   :  { %6742 = vsyncadd [#allocation3], 4294955264 }
  0x1b   :  { %6743 = dma.done.wait [#allocation6], 9472  }
  0x1c   :  { %6744 = vsyncadd [#allocation6], 4294957824  ;;  %v6796_v0 = vld [vmem:[%s8945_s0] sm:$0xff]  ;;  %v6801_v1 = vld [vmem:[%s8945_s0 + $0x8] sm:$0xff]  ;;  %s6751_s27 = smov 2   ;;  %s6752_s2 = smov 1   ;;  %v44_v5 = vlaneseq }
  0x1d   :  { %v5733_v2 = vpack.i.bf16 %v6801_v1, %v6796_v0  ;;  %v6807_v3 = vld [vmem:[#allocation2] sm:$0xff]  ;;  %s6753_s28 = smov 126   ;;  %s6754_s29 = smov 127   ;;  %v8975_v4 = vmov 0   ;;  %vm152_vm5 = vcmask 1043456   ;;  %vm8953_vm13 = vcmask 326656  }
  0x1e   :  { %191 = vmatprep.mubr.bf16.mxu0 %v8975_v4  ;;  %5753 = vset.pattern.permute.xlu1 %v8975_v4  ;;  %v6817_v6 = vand.u32 127, %v44_v5  ;;  %v308_v60 = vpack.c.bf16 %v6801_v1, %v6801_v1  ;;  %v307_v62 = vpack.c.bf16 %v6796_v0, %v6796_v0  ;;  %vm309_vm14 = vcmask 64512   ;;  %s6758_s30 = smov 98   ;;  %s6759_s4 = smov 30  }
  0x1f   :  { %5734 = vrot.lane.b32.xlu0 %v5733_v2, %s6751_s27  ;;  %5744 = vrot.lane.b32.xlu1 %v5733_v2, %s6752_s2  ;;  %vm6757_vm15 = vmmov 0   ;;  %s6760_s5 = smov 97   ;;  %s6761_s6 = smov 31  }
  0x20   :  { %297 = vmatprep.mubr.bf16.mxu1 %v8975_v4  ;;  %5779 = vset.pattern.permute.xlu0 %v8975_v4  ;;  %9023 = vst [vmem:[#allocation11_spill] sm:$0xff] %v6817_v6  ;;  %v46_v7 = vadd.s32 128, %v6817_v6  ;;  %vm8960_vm0 = vcmp.lt.s32.totalorder %v6817_v6, 2  ;;  %vm8954_vm1 = vcmp.lt.s32.totalorder %v6817_v6, 1  ;;  %vm8961_vm2 = vcmp.lt.s32.totalorder %v6817_v6, 126  ;;  %s6762_s7 = smov 121  }
  0x21   :  { %vm8955_vm3 = vcmp.lt.s32.totalorder %v6817_v6, 127  ;;  %vm8956_vm6 = vcmp.eq.s32.totalorder %v6817_v6, 126  ;;  %vm8959_vm7 = vcmp.eq.s32.totalorder %v6817_v6, 127  ;;  %vm8951_vm10 = vcmp.eq.s32.totalorder %v6817_v6, 0  ;;  %s6763_s8 = smov 7   ;;  %s6764_s9 = smov 122  }
  0x22   :  { %v6820_v10 = vand.u32 127, %v46_v7  ;;  %vm8949_vm12 = vcmp.eq.s32.totalorder %v6817_v6, 1  ;;  %v314_v63 = vsel %vm152_vm5, %v307_v62, 0  ;;  %v6527_v62 = vld [vmem:[#allocation5 + $0xe0] ss:$8 sps:$4 sm:$0xff]   ;;  %s6765_s10 = smov 6  }
  0x23   :  { %5739 = vrot.lane.b32.xlu0 %v5733_v2, %s6753_s28  ;;  %5749 = vrot.lane.b32.xlu1 %v5733_v2, %s6754_s29  ;;  %v306_v2 = vld [vmem:[#allocation2 + $0x20] sm:$0xff] }
  0x24   :  { %9024 = vst [vmem:[#allocation12_spill] sm:$0xff] %v6820_v10  ;;  %vm8958_vm4 = vcmp.eq.s32.totalorder %v6820_v10, 127  ;;  %vm8952_vm8 = vcmp.eq.s32.totalorder %v6820_v10, 0  ;;  %vm8957_vm9 = vcmp.eq.s32.totalorder %v6820_v10, 126  ;;  %vm8950_vm11 = vcmp.eq.s32.totalorder %v6820_v10, 1 }
  0x27   :  { %138 = vrot.lane.b32.xlu0 %v6807_v3, %s6752_s2 }
  0x91   :  { %v5735_v8 = vpop.permute.xlu0 %5734  ;;  %v5745_v9 = vpop.permute.xlu1 %5744 }
  0x92   :  { %v5737_v11 = vunpack.i.h.bf16 %v5735_v8  ;;  %v5736_v12 = vunpack.i.l.bf16 %v5735_v8  ;;  %v5747_v13 = vunpack.i.h.bf16 %v5745_v9  ;;  %v5746_v14 = vunpack.i.l.bf16 %v5745_v9 }
  0x94   :  { %v80_v21 = vsel %vm8960_vm0, %v5736_v12, %v5737_v11  ;;  %v87_v22 = vsel %vm8954_vm1, %v5746_v14, %v5747_v13  ;;  %v81_v23 = vsel %vm8960_vm0, %v5737_v11, %v5736_v12  ;;  %v88_v27 = vsel %vm8954_vm1, %v5747_v13, %v5746_v14 }
  0x95   :  { %v5740_v15 = vpop.permute.xlu0 %5739  ;;  %v5750_v16 = vpop.permute.xlu1 %5749 }
  0x96   :  { %v5742_v17 = vunpack.i.h.bf16 %v5740_v15  ;;  %v5741_v18 = vunpack.i.l.bf16 %v5740_v15  ;;  %v5752_v19 = vunpack.i.h.bf16 %v5750_v16  ;;  %v5751_v20 = vunpack.i.l.bf16 %v5750_v16 }
  0x98   :  { %v101_v24 = vsel %vm8961_vm2, %v5741_v18, %v5742_v17  ;;  %v102_v25 = vsel %vm8961_vm2, %v5742_v17, %v5741_v18  ;;  %v95_v26 = vsel %vm8955_vm3, %v5752_v19, %v5751_v20  ;;  %v94_v31 = vsel %vm8955_vm3, %v5751_v20, %v5752_v19 }
  0x99   :  { %v124_v28 = vsel %vm8958_vm4, %v80_v21, %v102_v25  ;;  %v123_v29 = vsel %vm8959_vm7, %v81_v23, %v101_v24  ;;  %v139_v30 = vpop.permute.xlu0 %138  ;;  %v6864_v34 = vsel %vm8958_vm4, %v87_v22, %v95_v26  ;;  %v108_v37 = vsel %vm8952_vm8, %v102_v25, %v80_v21 }
  0x9a   :  { %v6855_v32 = vsel %vm8957_vm9, %v6801_v1, %v124_v28  ;;  %v6860_v33 = vsel %vm8956_vm6, %v6796_v0, %v123_v29  ;;  %9027 = vst [vmem:[#allocation15_spill] sm:$0xff] %v6864_v34  ;;  %v140_v38 = vrot.slane %v139_v30, 4  ;;  %v134_v40 = vpack.c.bf16 %v6864_v34, %v6801_v1 }
  0x9b   :  { %9025 = vst [vmem:[#allocation13_spill] sm:$0xff] %v6855_v32  ;;  %9026 = vst [vmem:[#allocation14_spill] sm:$0xff] %v6860_v33  ;;  %v136_v35 = vpack.c.bf16 %v6855_v32, %v6855_v32  ;;  %v135_v36 = vpack.c.bf16 %v6860_v33, %v6860_v33  ;;  %v6879_v41 = vsel %vm8959_vm7, %v88_v27, %v94_v31 }
  0x9c   :  { %9028 = vst [vmem:[#allocation16_spill] sm:$0xff] %v6879_v41  ;;  %v6885_v42 = vsel %vm8950_vm11, %v6801_v1, %v108_v37  ;;  %v6889_v43 = vsel %vm8952_vm8, %v95_v26, %v87_v22  ;;  %v107_v44 = vsel %vm8951_vm10, %v101_v24, %v81_v23  ;;  %v142_v45 = vunpack.c.l.bf16 %v140_v38  ;;  %v202_v1 = vld [vmem:[#allocation2 + $0x10] sm:$0xff] }
  0x9d   :  { %5174 = vmatprep.subr.msk.bf16.mxu0 %vm152_vm5, %v136_v35  ;;  %v154_v39 = vsel %vm152_vm5, %v135_v36, 0  ;;  %9029 = vst [vmem:[#allocation17_spill] sm:$0xff] %v6885_v42  ;;  %9030 = vst [vmem:[#allocation18_spill] sm:$0xff] %v6889_v43  ;;  %v133_v46 = vpack.c.bf16 %v6879_v41, %v6796_v0  ;;  %v132_v47 = vpack.c.bf16 %v6889_v43, %v6885_v42 }
  0x9e   :  { %170 = vmatpush1.bf16.msra.mxu0 %v154_v39  ;;  %145 = vperm.xlu1 %5753, %v142_v45   ;;  %v6900_v48 = vsel %vm8949_vm12, %v6796_v0, %v107_v44  ;;  %v6904_v49 = vsel %vm8951_vm10, %v94_v31, %v88_v27 }
  0x9f   :  { %171 = vmatprep.subr.bf16.mxu0 %v134_v40  ;;  %9031 = vst [vmem:[#allocation19_spill] sm:$0xff] %v6900_v48  ;;  %9032 = vst [vmem:[#allocation20_spill] sm:$0xff] %v6904_v49  ;;  %v131_v50 = vpack.c.bf16 %v6904_v49, %v6900_v48 }
  0xa2   :  { %172 = vmatpush1.bf16.msra.mxu0 %v133_v46 }
  0xa3   :  { %173 = vmatprep.subr.bf16.mxu0 %v132_v47 }
  0xa6   :  { %174 = vmatpush1.bf16.msra.mxu0 %v131_v50 }
  0xa7   :  { %5178 = vmatprep.subr.msk.bf16.mxu0 %vm152_vm5, %v308_v60  ;;  %v6525_v60 = vld [vmem:[#allocation5 + $0xf0] ss:$8 sps:$4 sm:$0xff]  }
  0xa9   :  { %5175 = vmatmul.mubr.msk.bf16.vlgmr.msra.gmra.mxu0 %vm8953_vm13, %v6807_v3 }
  0xaa   :  { %351 = vmatprep.mubr.bf16.mxu0 %v8975_v4  ;;  %334 = vmatpush1.bf16.msra.mxu0 %v314_v63  ;;  %v6528_v63 = vld [vmem:[#allocation5 + $0x60] ss:$8 sps:$4 sm:$0xff]  }
  0xb1   :  { %5179 = vmatmul.mubr.msk.bf16.vlgmr.msra.gmra.mxu0 %vm309_vm14, %v306_v2  ;;  %v6529_v2 = vld [vmem:[#allocation5 + $0xd0] ss:$8 sps:$4 sm:$0xff]  }
 0x119   :  { %v146_v51 = vpop.permute.xlu1 %145 }
 0x169   :  { %v193_v52 = vpop.f32.mrf.mxu0 }
 0x16a   :  { %v194_v53 = vadd.f32 %v193_v52, %v146_v51 }
 0x16b   :  { %v195_v54 = vpop.f32.mrf.mxu0 }
 0x16c   :  { %v196_v55 = vadd.f32 %v195_v54, %v146_v51  ;;  %v6911_v57 = vmax.f32 %v194_v53, 0.0 }
 0x16d   :  { %v197_v56 = vpop.f32.mrf.mxu0 }
 0x16e   :  { %v201_v58 = vmax.f32 %v196_v55, 0.0 }
 0x16f   :  { %v198_v59 = vpop.f32.mrf.mxu0 }
 0x170   :  { %v5759_v61 = vpack.i.bf16 %v201_v58, %v6911_v57 }
 0x171   :  { %v353_v55 = vpop.f32.mrf.mxu0 }
 0x172   :  { %5760 = vrot.lane.b32.xlu1 %v5759_v61, %s6753_s28  ;;  %5755 = vrot.lane.b32.xlu0 %v5759_v61, %s6751_s27 }
 0x173   :  { %v355_v56 = vpop.f32.mrf.mxu0 }
 0x176   :  { %5770 = vrot.lane.b32.xlu1 %v5759_v61, %s6754_s29  ;;  %5765 = vrot.lane.b32.xlu0 %v5759_v61, %s6752_s2  ;;  %v6526_v61 = vld [vmem:[#allocation5 + $0x70] ss:$8 sps:$4 sm:$0xff]  }
 0x17a   :  { %246 = vrot.lane.b32.xlu0 %v202_v1, %s6752_s2 }
 0x1e4   :  { %v5761_v3 = vpop.permute.xlu1 %5760  ;;  %v5756_v0 = vpop.permute.xlu0 %5755 }
 0x1e5   :  { %v5763_v5 = vunpack.i.h.bf16 %v5761_v3  ;;  %v5762_v7 = vunpack.i.l.bf16 %v5761_v3  ;;  %v5758_v8 = vunpack.i.h.bf16 %v5756_v0  ;;  %v5757_v9 = vunpack.i.l.bf16 %v5756_v0  ;;  %v6530_v3 = vld [vmem:[#allocation5 + $0x50] ss:$8 sps:$4 sm:$0xff]   ;;  %v6532_v0 = vld [vmem:[#allocation5 + $0x40] ss:$8 sps:$4 sm:$0xff]  }
 0x1e7   :  { %v207_v11 = vsel %vm8960_vm0, %v5757_v9, %v5758_v8  ;;  %v226_v12 = vsel %vm8961_vm2, %v5763_v5, %v5762_v7  ;;  %v208_v13 = vsel %vm8960_vm0, %v5758_v8, %v5757_v9  ;;  %v225_v14 = vsel %vm8961_vm2, %v5762_v7, %v5763_v5  ;;  %v6534_v5 = vld [vmem:[#allocation5 + $0x30] ss:$8 sps:$4 sm:$0xff]   ;;  %v6535_v7 = vld [vmem:[#allocation5 + $0xa0] ss:$8 sps:$4 sm:$0xff]  }
 0x1e8   :  { %v5771_v15 = vpop.permute.xlu1 %5770  ;;  %v5766_v16 = vpop.permute.xlu0 %5765  ;;  %v236_v17 = vsel %vm8958_vm4, %v207_v11, %v226_v12  ;;  %v235_v18 = vsel %vm8959_vm7, %v208_v13, %v225_v14  ;;  %v228_v36 = vsel %vm8952_vm8, %v226_v12, %v207_v11  ;;  %v227_v50 = vsel %vm8951_vm10, %v225_v14, %v208_v13  ;;  %v6536_v8 = vld [vmem:[#allocation5 + $0x20] ss:$8 sps:$4 sm:$0xff]   ;;  %v6537_v9 = vld [vmem:[#allocation5 + $0x90] ss:$8 sps:$4 sm:$0xff]  }
 0x1e9   :  { %v5773_v19 = vunpack.i.h.bf16 %v5771_v15  ;;  %v5772_v20 = vunpack.i.l.bf16 %v5771_v15  ;;  %v5768_v21 = vunpack.i.h.bf16 %v5766_v16  ;;  %v5767_v22 = vunpack.i.l.bf16 %v5766_v16  ;;  %v6538_v11 = vld [vmem:[#allocation5 + $0x10] ss:$8 sps:$4 sm:$0xff]   ;;  %v6539_v14 = vld [vmem:[#allocation5 + $0x80] ss:$8 sps:$4 sm:$0xff]  }
 0x1ea   :  { %v238_v23 = vsel %vm8957_vm9, %v201_v58, %v236_v17  ;;  %v237_v24 = vsel %vm8956_vm6, %v6911_v57, %v235_v18  ;;  %v230_v47 = vsel %vm8950_vm11, %v201_v58, %v228_v36  ;;  %v229_v53 = vsel %vm8949_vm12, %v6911_v57, %v227_v50  ;;  %v6540_v16 = vld [vmem:[#allocation5] ss:$8 sps:$4 sm:$0xff]  }
 0x1eb   :  { %v244_v25 = vpack.c.bf16 %v238_v23, %v238_v23  ;;  %v243_v26 = vpack.c.bf16 %v237_v24, %v237_v24  ;;  %v213_v27 = vsel %vm8954_vm1, %v5767_v22, %v5768_v21  ;;  %v220_v28 = vsel %vm8955_vm3, %v5773_v19, %v5772_v20 }
 0x1ec   :  { %v247_v29 = vpop.permute.xlu0 %246  ;;  %v234_v30 = vsel %vm8958_vm4, %v213_v27, %v220_v28  ;;  %v214_v31 = vsel %vm8954_vm1, %v5768_v21, %v5767_v22  ;;  %v219_v35 = vsel %vm8955_vm3, %v5772_v20, %v5773_v19  ;;  %v232_v44 = vsel %vm8952_vm8, %v220_v28, %v213_v27 }
 0x1ed   :  { %v248_v37 = vrot.slane %v247_v29, 4  ;;  %5176 = vmatprep.subr.msk.bf16.mxu1 %vm152_vm5, %v244_v25  ;;  %v260_v38 = vsel %vm152_vm5, %v243_v26, 0  ;;  %v242_v39 = vpack.c.bf16 %v234_v30, %v201_v58  ;;  %v233_v40 = vsel %vm8959_vm7, %v214_v31, %v219_v35  ;;  %v357_v58 = vpop.f32.mrf.mxu0 }
 0x1ee   :  { %276 = vmatpush1.bf16.msra.mxu1 %v260_v38  ;;  %v241_v46 = vpack.c.bf16 %v233_v40, %v6911_v57  ;;  %v240_v51 = vpack.c.bf16 %v232_v44, %v230_v47  ;;  %v231_v52 = vsel %vm8951_vm10, %v219_v35, %v214_v31  ;;  %v6531_v57 = vld [vmem:[#allocation5 + $0xc0] ss:$8 sps:$4 sm:$0xff]   ;;  %v8971_v38 = vmov 0.0  }
 0x1ef   :  { %v250_v45 = vunpack.c.l.bf16 %v248_v37  ;;  %277 = vmatprep.subr.bf16.mxu1 %v242_v39  ;;  %v239_v54 = vpack.c.bf16 %v231_v52, %v229_v53  ;;  %v358_v59 = vpop.f32.mrf.mxu0  ;;  %5453 = vmatprep.subr.bf16.mxu0 %v8971_v38  ;;  %v542_v47 = vld [vmem:[#allocation2 + $0x30] sm:$0xff]  ;;  %v6995_v50 = vand.u32 63, %v6817_v6  ;;  %vm925_vm9 = vcmask 7168  }
 0x1f0   :  { %5459 = vmatprep.mubr.msk.bf16.mxu0 %vm6757_vm15, %v8971_v38  ;;  %vm9018_vm4 = vcmask 252928   ;;  %vm8964_vm2 = vcmask 654336  }
 0x1f1   :  { %253 = vperm.xlu1 %5753, %v250_v45   ;;  %vm8967_vm12 = vcmp.eq.s32.totalorder %v6995_v50, 63  ;;  %vm8966_vm11 = vcmp.eq.s32.totalorder %v6995_v50, 62  ;;  %vm8965_vm10 = vcmp.eq.s32.totalorder %v6995_v50, 0  ;;  %vm8962_vm8 = vcmp.eq.s32.totalorder %v6995_v50, 1 }
 0x1f2   :  { %278 = vmatpush1.bf16.msra.mxu1 %v241_v46 }
 0x1f3   :  { %279 = vmatprep.subr.bf16.mxu1 %v240_v51 }
 0x1f6   :  { %280 = vmatpush1.bf16.msra.mxu1 %v239_v54 }
 0x1f7   :  { %5322 = vmatprep.subr.bf16.mxu1 %v6525_v60 }
 0x1f9   :  { %5177 = vmatmul.mubr.msk.bf16.vlgmr.msra.gmra.mxu1 %vm8953_vm13, %v202_v1  ;;  %v6533_v1 = vld [vmem:[#allocation5 + $0xb0] ss:$8 sps:$4 sm:$0xff]  }
 0x1fa   :  { %5323 = vmatpush3.bf16.msra.mxu1 %v6526_v61 }
 0x1fb   :  { %5324 = vmatprep.subr.bf16.mxu1 %v6527_v62 }
 0x1fe   :  { %5325 = vmatpush3.bf16.msra.mxu1 %v6528_v63 }
 0x1ff   :  { %5326 = vmatprep.subr.bf16.mxu1 %v6529_v2 }
 0x202   :  { %5327 = vmatpush3.bf16.msra.mxu1 %v6530_v3 }
 0x203   :  { %5328 = vmatprep.subr.bf16.mxu1 %v6531_v57 }
 0x206   :  { %5329 = vmatpush3.bf16.msra.mxu1 %v6532_v0 }
 0x207   :  { %5330 = vmatprep.subr.bf16.mxu1 %v6533_v1 }
 0x20a   :  { %5331 = vmatpush3.bf16.msra.mxu1 %v6534_v5 }
 0x20b   :  { %5332 = vmatprep.subr.bf16.mxu1 %v6535_v7 }
 0x20e   :  { %5333 = vmatpush3.bf16.msra.mxu1 %v6536_v8 }
 0x20f   :  { %5334 = vmatprep.subr.bf16.mxu1 %v6537_v9 }
 0x212   :  { %5335 = vmatpush3.bf16.msra.mxu1 %v6538_v11 }
 0x213   :  { %5336 = vmatprep.subr.bf16.mxu1 %v6539_v14  ;;  %v626_v14 = vld [vmem:[#allocation2 + $0x40] sm:$0xff] }
 0x216   :  { %5337 = vmatpush3.bf16.msra.mxu1 %v6540_v16 }
 0x217   :  { %5479 = vmatprep.subr.bf16.mxu1 %v8971_v38 }
 0x26c   :  { %v254_v12 = vpop.permute.xlu1 %253 }
 0x2b9   :  { %v299_v13 = vpop.f32.mrf.mxu1 }
 0x2ba   :  { %v300_v15 = vadd.f32 %v299_v13, %v254_v12 }
 0x2bb   :  { %v301_v17 = vpop.f32.mrf.mxu1 }
 0x2bc   :  { %v360_v18 = vadd.f32 %v353_v55, %v300_v15  ;;  %v302_v19 = vadd.f32 %v301_v17, %v254_v12  ;;  %v627_v15 = vld [vmem:[#allocation2 + $0x48] sm:$0xff] }
 0x2bd   :  { %v303_v20 = vpop.f32.mrf.mxu1 }
 0x2be   :  { %v361_v21 = vadd.f32 %v355_v56, %v302_v19  ;;  %v362_v23 = vmax.f32 %v360_v18, 0.0 }
 0x2bf   :  { %v304_v22 = vpop.f32.mrf.mxu1 }
 0x2c0   :  { %v363_v24 = vmax.f32 %v361_v21, 0.0 }
 0x2c2   :  { %v5774_v25 = vpack.i.bf16 %v363_v24, %v362_v23 }
 0x2c4   :  { %5775 = vrot.lane.b32.xlu0 %v5774_v25, %s6754_s29 }
 0x336   :  { %v5776_v26 = vpop.permute.xlu0 %5775 }
 0x337   :  { %v5778_v27 = vunpack.i.h.bf16 %v5776_v26  ;;  %v5777_v28 = vunpack.i.l.bf16 %v5776_v26 }
 0x339   :  { %v368_v29 = vsel %vm8955_vm3, %v5777_v28, %v5778_v27  ;;  %v369_v30 = vsel %vm8955_vm3, %v5778_v27, %v5777_v28  ;;  %vm8970_vm3 = vcmask 244736  }
 0x33a   :  { %v371_v31 = vmax.f32 %v363_v24, %v369_v30  ;;  %v370_v35 = vmax.f32 %v362_v23, %v368_v29 }
 0x33c   :  { %v373_v36 = vpack.c.bf16 %v371_v31, %v371_v31  ;;  %v372_v37 = vpack.c.bf16 %v370_v35, %v370_v35 }
 0x33e   :  { %534 = vmatprep.mubr.bf16.mxu1 %v373_v36 }
 0x33f   :  { %535 = vmatmul.mubr.bf16.vlgmr.msra.gmra.mxu1 %v372_v37 }
 0x340   :  { %5495 = vmatprep.mubr.msk.bf16.mxu1 %vm6757_vm15, %v8971_v38 }
 0x3ff   :  { %v5338_v39 = vpop.f32.mrf.mxu1 }
 0x401   :  { %v5339_v40 = vpop.f32.mrf.mxu1 }
 0x402   :  { %v6979_v44 = vadd.f32 %v5339_v40, %v5338_v39  ;;  %v5197_v40 = vcombine.low %v626_v14, %v627_v15 }
 0x403   :  { %v5341_v45 = vpop.f32.mrf.mxu1 }
 0x404   :  { %9033 = vst [vmem:[#allocation21_spill] sm:$0xff] %v6979_v44  ;;  %549 = vrot.lane.b32.xlu0 %v6979_v44, %s6753_s28  ;;  %543 = vrot.lane.b32.xlu1 %v6979_v44, %s6751_s27 }
 0x405   :  { %v5342_v46 = vpop.f32.mrf.mxu1 }
 0x406   :  { %v719_v46 = vpack.c.bf16 %v6979_v44, %v6979_v44 }
 0x408   :  { %547 = vrot.lane.b32.xlu0 %v6979_v44, %s6754_s29  ;;  %545 = vrot.lane.b32.xlu1 %v6979_v44, %s6752_s2 }
 0x40c   :  { %569 = vrot.lane.b32.xlu1 %v542_v47, %s6752_s2 }
 0x476   :  { %v550_v51 = vpop.permute.xlu0 %549  ;;  %v544_v52 = vpop.permute.xlu1 %543 }
 0x477   :  { %v561_v53 = vsel %vm8967_vm12, %v544_v52, %v550_v51  ;;  %v553_v61 = vsel %vm8965_vm10, %v550_v51, %v544_v52  ;;  %v6542_v51 = vld [vmem:[#allocation2 + $0x50] ss:$8 sps:$4 sm:$0xff]  }
 0x478   :  { %v7004_v54 = vsel %vm8966_vm11, %v6979_v44, %v561_v53  ;;  %v7027_v57 = vsel %vm8962_vm8, %v6979_v44, %v553_v61 }
 0x479   :  { %v567_v55 = vpack.c.bf16 %v7004_v54, %v7004_v54  ;;  %9036 = vst [vmem:[#allocation24_spill] sm:$0xff] %v7027_v57 }
 0x47a   :  { %v548_v56 = vpop.permute.xlu0 %547  ;;  %v546_v58 = vpop.permute.xlu1 %545 }
 0x47b   :  { %v7011_v59 = vsel %vm8967_vm12, %v546_v58, %v548_v56  ;;  %v583_v60 = vsel %vm152_vm5, %v567_v55, 0  ;;  %v7022_v2 = vsel %vm8965_vm10, %v548_v56, %v546_v58 }
 0x47c   :  { %9034 = vst [vmem:[#allocation22_spill] sm:$0xff] %v7011_v59  ;;  %5454 = vmatpush3.bf16.msra.mxu0 %v583_v60  ;;  %v566_v62 = vpack.c.bf16 %v7011_v59, %v6979_v44  ;;  %9035 = vst [vmem:[#allocation23_spill] sm:$0xff] %v7022_v2  ;;  %v565_v1 = vpack.c.bf16 %v7022_v2, %v7027_v57 }
 0x47d   :  { %5455 = vmatprep.subr.bf16.mxu0 %v8971_v38 }
 0x47e   :  { %v570_v63 = vpop.permute.xlu1 %569 }
 0x47f   :  { %v571_v3 = vrot.slane %v570_v63, 4 }
 0x480   :  { %5456 = vmatpush3.bf16.msra.mxu0 %v566_v62 }
 0x481   :  { %5457 = vmatprep.subr.bf16.mxu0 %v8971_v38  ;;  %v573_v0 = vunpack.c.l.bf16 %v571_v3 }
 0x483   :  { %576 = vperm.xlu0 %5779, %v573_v0  }
 0x484   :  { %5458 = vmatpush3.bf16.msra.mxu0 %v565_v1  ;;  %v6543_v1 = vld [vmem:[#allocation5 + $0x170] ss:$8 sps:$4 sm:$0xff]  }
 0x485   :  { %5463 = vmatprep.subr.bf16.mxu0 %v8971_v38  ;;  %5480 = vmatpush3.bf16.msra.mxu1 %v6543_v1 }
 0x486   :  { %5481 = vmatprep.subr.bf16.mxu1 %v8971_v38 }
 0x487   :  { %5460 = vmatmul.mubr.msk.bf16.vlgmr.msra.gmra.mxu0 %vm8953_vm13, %v542_v47  ;;  %v729_v47 = vsel %vm152_vm5, %v719_v46, 0  ;;  %v7099_v46 = vld [vmem:[#allocation2 + $0x60] sm:$0xff] }
 0x488   :  { %5469 = vmatprep.mubr.msk.bf16.mxu0 %vm6757_vm15, %v8971_v38 }
 0x4fe   :  { %v577_v5 = vpop.permute.xlu0 %576 }
 0x547   :  { %v619_v7 = vpop.f32.mrf.mxu0 }
 0x548   :  { %v620_v8 = vadd.f32 %v619_v7, %v577_v5 }
 0x549   :  { %v5461_v9 = vpop.f32.mrf.mxu0 }
 0x54a   :  { %v625_v11 = vmax.f32 %v620_v8, 0.0  ;;  %v6544_v8 = vld [vmem:[#allocation5 + $0x160] ss:$8 sps:$4 sm:$0xff]  }
 0x54b   :  { %v622_v12 = vpop.f32.mrf.mxu0  ;;  %5482 = vmatpush3.bf16.msra.mxu1 %v6544_v8 }
 0x54c   :  { %630 = vrot.lane.b32.xlu0 %v625_v11, %s6752_s2  ;;  %628 = vrot.lane.b32.xlu1 %v625_v11, %s6751_s27 }
 0x54d   :  { %v5462_v13 = vpop.f32.mrf.mxu0  ;;  %5483 = vmatprep.subr.bf16.mxu1 %v8971_v38 }
 0x54e   :  { %v6545_v13 = vld [vmem:[#allocation5 + $0x150] ss:$8 sps:$4 sm:$0xff]  }
 0x54f   :  { %5484 = vmatpush3.bf16.msra.mxu1 %v6545_v13 }
 0x550   :  { %634 = vrot.lane.b32.xlu1 %v625_v11, %s6753_s28  ;;  %647 = vrot.lane.b32.xlu0 %v626_v14, %s6752_s2  ;;  %v6546_v14 = vld [vmem:[#allocation5 + $0x140] ss:$8 sps:$4 sm:$0xff]  }
 0x551   :  { %5485 = vmatprep.subr.bf16.mxu1 %v8971_v38 }
 0x553   :  { %5486 = vmatpush3.bf16.msra.mxu1 %v6546_v14 }
 0x554   :  { %632 = vrot.lane.b32.xlu1 %v625_v11, %s6754_s29  ;;  %5487 = vmatprep.subr.bf16.mxu1 %v8971_v38 }
 0x558   :  { %649 = vrot.lane.b32.xlu1 %v627_v15, %s6752_s2  ;;  %v6547_v15 = vld [vmem:[#allocation5 + $0x130] ss:$8 sps:$4 sm:$0xff]  }
 0x559   :  { %5488 = vmatpush3.bf16.msra.mxu1 %v6547_v15 }
 0x55a   :  { %5489 = vmatprep.subr.bf16.mxu1 %v8971_v38 }
 0x5be   :  { %v629_v16 = vpop.permute.xlu1 %628  ;;  %v631_v17 = vpop.permute.xlu0 %630 }
 0x5c2   :  { %v635_v18 = vpop.permute.xlu1 %634  ;;  %v648_v21 = vpop.permute.xlu0 %647 }
 0x5c3   :  { %v640_v19 = vsel %vm8967_vm12, %v629_v16, %v635_v18  ;;  %v651_v26 = vrot.slane %v648_v21, 4  ;;  %v636_v27 = vsel %vm8965_vm10, %v635_v18, %v629_v16  ;;  %v6548_v16 = vld [vmem:[#allocation5 + $0x120] ss:$8 sps:$4 sm:$0xff]  }
 0x5c4   :  { %v641_v20 = vsel %vm8966_vm11, %v625_v11, %v640_v19  ;;  %v637_v36 = vsel %vm8962_vm8, %v625_v11, %v636_v27  ;;  %5490 = vmatpush3.bf16.msra.mxu1 %v6548_v16  ;;  %v6550_v18 = vld [vmem:[#allocation5 + $0x100] ss:$8 sps:$4 sm:$0xff]   ;;  %vm8963_vm8 = vcmask 130048   ;;  %vm1493_vm11 = vcmask 56320  }
 0x5c5   :  { %v644_v22 = vpack.c.bf16 %v641_v20, %v641_v20  ;;  %v655_v31 = vunpack.c.l.bf16 %v651_v26  ;;  %5491 = vmatprep.subr.bf16.mxu1 %v8971_v38 }
 0x5c6   :  { %v633_v23 = vpop.permute.xlu1 %632 }
 0x5c7   :  { %v639_v24 = vsel %vm8967_vm12, %v631_v17, %v633_v23  ;;  %v674_v25 = vsel %vm152_vm5, %v644_v22, 0  ;;  %v638_v30 = vsel %vm8965_vm10, %v633_v23, %v631_v17  ;;  %v6549_v17 = vld [vmem:[#allocation5 + $0x110] ss:$8 sps:$4 sm:$0xff]   ;;  %vm1515_vm12 = vcmask 48128  }
 0x5c8   :  { %5464 = vmatpush3.bf16.msra.mxu0 %v674_v25  ;;  %v643_v28 = vpack.c.bf16 %v639_v24, %v625_v11  ;;  %v642_v39 = vpack.c.bf16 %v638_v30, %v637_v36  ;;  %5492 = vmatpush3.bf16.msra.mxu1 %v6549_v17 }
 0x5c9   :  { %5465 = vmatprep.subr.bf16.mxu0 %v8971_v38  ;;  %5493 = vmatprep.subr.bf16.mxu1 %v8971_v38 }
 0x5ca   :  { %v650_v29 = vpop.permute.xlu1 %649 }
 0x5cb   :  { %v652_v35 = vrot.slane %v650_v29, 4 }
 0x5cc   :  { %5466 = vmatpush3.bf16.msra.mxu0 %v643_v28  ;;  %5494 = vmatpush3.bf16.msra.mxu1 %v6550_v18 }
 0x5cd   :  { %v656_v37 = vunpack.c.l.bf16 %v652_v35  ;;  %5467 = vmatprep.subr.bf16.mxu0 %v8971_v38 }
 0x5cf   :  { %v5780_v45 = vpack.i.bf16 %v656_v37, %v655_v31 }
 0x5d0   :  { %5468 = vmatpush3.bf16.msra.mxu0 %v642_v39 }
 0x5d1   :  { %5781 = vperm.xlu0 %5779, %v5780_v45   ;;  %5473 = vmatprep.subr.bf16.mxu0 %v8971_v38  ;;  %v7097_v45 = vld [vmem:[#allocation2 + $0x68] sm:$0xff] }
 0x5d3   :  { %5470 = vmatmul.mubr.msk.bf16.vlgmr.msra.gmra.mxu0 %vm8953_vm13, %v5197_v40  ;;  %vm910_vm13 = vcmask 15360  }
 0x5d4   :  { %5474 = vmatpush3.bf16.msra.mxu0 %v729_v47  ;;  %5475 = vmatprep.mubr.msk.bf16.mxu0 %vm6757_vm15, %v8971_v38 }
 0x5d5   :  { %5499 = vmatprep.subr.bf16.mxu0 %v8971_v38 }
 0x5db   :  { %5476 = vmatmul.mubr.msk.bf16.vlgmr.msra.gmra.mxu0 %vm309_vm14, %v6542_v51 }
 0x5dc   :  { %5509 = vmatprep.mubr.msk.bf16.mxu0 %vm6757_vm15, %v8971_v38 }
 0x64c   :  { %v5782_v55 = vpop.permute.xlu0 %5781 }
 0x693   :  { %v710_v52 = vpop.f32.mrf.mxu0 }
 0x694   :  { %v6651_v61 = vadd.low.f32.bf16 %v710_v52, %v5782_v55  ;;  %v7106_v52 = vand.u32 15, %v6817_v6 }
 0x695   :  { %v5471_v53 = vpop.f32.mrf.mxu0 }
 0x696   :  { %vm9017_vm1 = vcmp.eq.s32.totalorder %v7106_v52, 15  ;;  %vm8968_vm6 = vcmp.eq.s32.totalorder %v7106_v52, 14  ;;  %vm9016_vm7 = vcmp.eq.s32.totalorder %v7106_v52, 0  ;;  %vm8969_vm0 = vcmp.eq.s32.totalorder %v7106_v52, 1 }
 0x697   :  { %v713_v56 = vpop.f32.mrf.mxu0 }
 0x698   :  { %v6652_v63 = vadd.high.f32.bf16 %v713_v56, %v5782_v55 }
 0x699   :  { %v5472_v58 = vpop.f32.mrf.mxu0 }
 0x69b   :  { %v765_v60 = vpop.f32.mrf.mxu0 }
 0x69c   :  { %v772_v3 = vadd.f32 %v6651_v61, %v765_v60 }
 0x69d   :  { %v5477_v62 = vpop.f32.mrf.mxu0 }
 0x69e   :  { %v774_v9 = vmax.f32 %v772_v3, 0.0 }
 0x69f   :  { %v768_v0 = vpop.f32.mrf.mxu0 }
 0x6a0   :  { %v773_v5 = vadd.f32 %v6652_v63, %v768_v0 }
 0x6a1   :  { %v5478_v7 = vpop.f32.mrf.mxu0 }
 0x6a2   :  { %v775_v11 = vmax.f32 %v773_v5, 0.0 }
 0x6a4   :  { %v5785_v12 = vpack.i.bf16 %v775_v11, %v774_v9 }
 0x6a6   :  { %5786 = vrot.lane.b32.xlu1 %v5785_v12, %s6754_s29 }
 0x718   :  { %v5787_v19 = vpop.permute.xlu1 %5786 }
 0x719   :  { %v5789_v20 = vunpack.i.h.bf16 %v5787_v19  ;;  %v5788_v21 = vunpack.i.l.bf16 %v5787_v19 }
 0x71b   :  { %v781_v22 = vmax.f32 %v775_v11, %v5789_v20  ;;  %v780_v23 = vmax.f32 %v774_v9, %v5788_v21 }
 0x71d   :  { %v5790_v24 = vpack.i.bf16 %v781_v22, %v780_v23 }
 0x71f   :  { %5791 = vrot.lane.b32.xlu0 %v5790_v24, %s6753_s28 }
 0x791   :  { %v5792_v25 = vpop.permute.xlu0 %5791 }
 0x792   :  { %v5794_v26 = vunpack.i.h.bf16 %v5792_v25  ;;  %v5793_v27 = vunpack.i.l.bf16 %v5792_v25 }
 0x794   :  { %v787_v28 = vmax.f32 %v781_v22, %v5794_v26  ;;  %v786_v29 = vmax.f32 %v780_v23, %v5793_v27 }
 0x796   :  { %v788_v30 = vpack.c.bf16 %v787_v28, %v786_v29 }
 0x798   :  { %5496 = vmatmul.mubr.bf16.vlgmr.msra.gmra.mxu1 %v788_v30 }
 0x858   :  { %v7077_v31 = vpop.f32.mrf.mxu1 }
 0x85a   :  { %v5497_v35 = vpop.f32.mrf.mxu1 }
 0x85c   :  { %v7079_v36 = vpop.f32.mrf.mxu1 }
 0x85d   :  { %v5800_v37 = vpack.i.bf16 %v7079_v36, %v7077_v31  ;;  %v7085_v39 = vpack.c.bf16 %v7079_v36, %v7077_v31 }
 0x85e   :  { %v5498_v40 = vpop.f32.mrf.mxu1 }
 0x85f   :  { %5801 = vrot.lane.b32.xlu0 %v5800_v37, %s6751_s27  ;;  %5796 = vrot.lane.b32.xlu1 %v5800_v37, %s6758_s30 }
 0x860   :  { %5527 = vmatprep.subr.bf16.mxu1 %v7085_v39 }
 0x861   :  { %5528 = vmatpush3.bf16.msra.mxu1 %v7085_v39 }
 0x863   :  { %5811 = vrot.lane.b32.xlu0 %v5800_v37, %s6759_s4  ;;  %5806 = vrot.lane.b32.xlu1 %v5800_v37, %s6753_s28 }
 0x867   :  { %5821 = vrot.lane.b32.xlu0 %v5800_v37, %s6752_s2  ;;  %5816 = vrot.lane.b32.xlu1 %v5800_v37, %s6760_s5 }
 0x86b   :  { %5831 = vrot.lane.b32.xlu0 %v5800_v37, %s6761_s6  ;;  %5826 = vrot.lane.b32.xlu1 %v5800_v37, %s6754_s29 }
 0x86f   :  { %987 = vrot.lane.b32.xlu0 %v7097_v45, %s6752_s2  ;;  %985 = vrot.lane.b32.xlu1 %v7099_v46, %s6752_s2 }
 0x8d1   :  { %v5802_v47 = vpop.permute.xlu0 %5801  ;;  %v5797_v51 = vpop.permute.xlu1 %5796 }
 0x8d2   :  { %v5804_v53 = vunpack.i.h.bf16 %v5802_v47  ;;  %v5803_v55 = vunpack.i.l.bf16 %v5802_v47  ;;  %v5799_v56 = vunpack.i.h.bf16 %v5797_v51  ;;  %v5798_v58 = vunpack.i.l.bf16 %v5797_v51 }
 0x8d4   :  { %v912_v1 = vsel %vm910_vm13, %v5799_v56, %v5804_v53  ;;  %v911_v5 = vsel %vm910_vm13, %v5798_v58, %v5803_v55 }
 0x8d5   :  { %v5812_v60 = vpop.permute.xlu0 %5811  ;;  %v5807_v61 = vpop.permute.xlu1 %5806 }
 0x8d6   :  { %v5814_v62 = vunpack.i.h.bf16 %v5812_v60  ;;  %v5813_v63 = vunpack.i.l.bf16 %v5812_v60  ;;  %v5809_v3 = vunpack.i.h.bf16 %v5807_v61  ;;  %v5808_v0 = vunpack.i.l.bf16 %v5807_v61 }
 0x8d8   :  { %v957_v7 = vsel %vm8970_vm3, %v5809_v3, %v5814_v62  ;;  %v956_v8 = vsel %vm8970_vm3, %v5808_v0, %v5813_v63 }
 0x8d9   :  { %v972_v9 = vsel %vm9017_vm1, %v911_v5, %v956_v8  ;;  %v973_v11 = vsel %vm9017_vm1, %v912_v1, %v957_v7  ;;  %v5822_v12 = vpop.permute.xlu0 %5821  ;;  %v5817_v13 = vpop.permute.xlu1 %5816  ;;  %v960_v63 = vsel %vm9016_vm7, %v956_v8, %v911_v5  ;;  %v961_v3 = vsel %vm9016_vm7, %v957_v7, %v912_v1  ;;  %v1056_v8 = vld [vmem:[#allocation2 + $0x78] sm:$0xff] }
 0x8da   :  { %v5824_v14 = vunpack.i.h.bf16 %v5822_v12  ;;  %v976_v15 = vsel %vm8968_vm6, %v7077_v31, %v972_v9  ;;  %v977_v16 = vsel %vm8968_vm6, %v7079_v36, %v973_v11  ;;  %v5823_v17 = vunpack.i.l.bf16 %v5822_v12 }
 0x8db   :  { %v5819_v18 = vunpack.i.h.bf16 %v5817_v13  ;;  %v5818_v19 = vunpack.i.l.bf16 %v5817_v13  ;;  %v7124_v20 = vpack.c.bf16 %v977_v16, %v976_v15  ;;  %v964_v9 = vsel %vm8969_vm0, %v7077_v31, %v960_v63  ;;  %v1055_v31 = vld [vmem:[#allocation2 + $0x70] sm:$0xff] }
 0x8dc   :  { %v965_v5 = vsel %vm8969_vm0, %v7079_v36, %v961_v3  ;;  %v5209_v7 = vcombine.low %v7099_v46, %v7097_v45  ;;  %v5211_v11 = vcombine.low %v1055_v31, %v1056_v8 }
 0x8dd   :  { %v5832_v21 = vpop.permute.xlu0 %5831  ;;  %v5827_v22 = vpop.permute.xlu1 %5826  ;;  %5500 = vmatpush3.bf16.msra.mxu0 %v7124_v20  ;;  %v927_v27 = vsel %vm925_vm9, %v5819_v18, %v5824_v14  ;;  %v926_v28 = vsel %vm925_vm9, %v5818_v19, %v5823_v17  ;;  %v7162_v1 = vpack.c.bf16 %v965_v5, %v964_v9  ;;  %v6554_v19 = vld [vmem:[#allocation2 + $0x90] ss:$8 sps:$4 sm:$0xff]  }
 0x8de   :  { %v5834_v23 = vunpack.i.h.bf16 %v5832_v21  ;;  %v5833_v24 = vunpack.i.l.bf16 %v5832_v21  ;;  %v5829_v25 = vunpack.i.h.bf16 %v5827_v22  ;;  %v5828_v26 = vunpack.i.l.bf16 %v5827_v22  ;;  %5501 = vmatprep.subr.bf16.mxu0 %v8971_v38  ;;  %v6555_v21 = vld [vmem:[#allocation2 + $0xa0] ss:$0 sps:$4 sm:$0xff]   ;;  %5529 = vmatprep.mubr.msk.bf16.mxu1 %vm8963_vm8, %v6554_v19 }
 0x8df   :  { %v7185_v22 = vld [vmem:[#allocation2 + $0x80] sm:$0xff]  ;;  %5530 = vmatmul.mubr.msk.bf16.vlgmr.msra.gmra.mxu1 %vm8963_vm8, %v6555_v21  ;;  %vm1369_vm8 = vcmask 261120  }
 0x8e0   :  { %v942_v29 = vsel %vm9018_vm4, %v5829_v25, %v5834_v23  ;;  %v941_v30 = vsel %vm9018_vm4, %v5828_v26, %v5833_v24 }
 0x8e1   :  { %v988_v35 = vpop.permute.xlu0 %987  ;;  %v986_v37 = vpop.permute.xlu1 %985  ;;  %v970_v40 = vsel %vm9017_vm1, %v926_v28, %v941_v30  ;;  %v971_v47 = vsel %vm9017_vm1, %v927_v27, %v942_v29  ;;  %v966_v61 = vsel %vm9016_vm7, %v941_v30, %v926_v28  ;;  %v967_v62 = vsel %vm9016_vm7, %v942_v29, %v927_v27 }
 0x8e2   :  { %v990_v51 = vrot.slane %v988_v35, 4  ;;  %v989_v53 = vrot.slane %v986_v37, 4  ;;  %v7136_v55 = vpack.c.bf16 %v971_v47, %v970_v40  ;;  %v7152_v0 = vpack.c.bf16 %v967_v62, %v966_v61 }
 0x8e4   :  { %v994_v56 = vunpack.c.l.bf16 %v990_v51  ;;  %v993_v58 = vunpack.c.l.bf16 %v989_v53  ;;  %5502 = vmatpush3.bf16.msra.mxu0 %v7136_v55 }
 0x8e5   :  { %5503 = vmatprep.subr.bf16.mxu0 %v8971_v38 }
 0x8e6   :  { %v5835_v60 = vpack.i.bf16 %v994_v56, %v993_v58 }
 0x8e8   :  { %5836 = vperm.xlu1 %5753, %v5835_v60   ;;  %5504 = vmatpush3.bf16.msra.mxu0 %v7085_v39 }
 0x8e9   :  { %5505 = vmatprep.subr.bf16.mxu0 %v8971_v38 }
 0x8ec   :  { %5506 = vmatpush3.bf16.msra.mxu0 %v7152_v0 }
 0x8ed   :  { %5507 = vmatprep.subr.bf16.mxu0 %v8971_v38 }
 0x8f0   :  { %5508 = vmatpush3.bf16.msra.mxu0 %v7162_v1 }
 0x8f3   :  { %5510 = vmatmul.mubr.msk.bf16.vlgmr.msra.gmra.mxu0 %vm8964_vm2, %v5209_v7 }
 0x8f4   :  { %5523 = vmatprep.mubr.msk.bf16.mxu0 %vm8964_vm2, %v5211_v11 }
 0x963   :  { %v5837_v36 = vpop.permute.xlu1 %5836 }
 0x9b3   :  { %v1046_v12 = vpop.f32.mrf.mxu0 }
 0x9b4   :  { %v6653_v14 = vadd.low.f32.bf16 %v1046_v12, %v5837_v36 }
 0x9b5   :  { %v5511_v13 = vpop.f32.mrf.mxu0 }
 0x9b6   :  { %v7169_v18 = vmax.f32 %v6653_v14, 0.0 }
 0x9b7   :  { %v1049_v15 = vpop.f32.mrf.mxu0 }
 0x9b8   :  { %v6654_v16 = vadd.high.f32.bf16 %v1049_v15, %v5837_v36 }
 0x9b9   :  { %v5512_v17 = vpop.f32.mrf.mxu0 }
 0x9ba   :  { %v7171_v45 = vmax.f32 %v6654_v16, 0.0 }
 0x9bc   :  { %v5845_v46 = vpack.i.bf16 %v7171_v45, %v7169_v18 }
 0x9be   :  { %5846 = vrot.lane.b32.xlu1 %v5845_v46, %s6751_s27  ;;  %5841 = vrot.lane.b32.xlu0 %v5845_v46, %s6758_s30 }
 0x9c2   :  { %5856 = vrot.lane.b32.xlu1 %v5845_v46, %s6759_s4  ;;  %5851 = vrot.lane.b32.xlu0 %v5845_v46, %s6753_s28 }
 0x9c6   :  { %5866 = vrot.lane.b32.xlu1 %v5845_v46, %s6752_s2  ;;  %5861 = vrot.lane.b32.xlu0 %v5845_v46, %s6760_s5 }
 0x9ca   :  { %5876 = vrot.lane.b32.xlu1 %v5845_v46, %s6761_s6  ;;  %5871 = vrot.lane.b32.xlu0 %v5845_v46, %s6754_s29 }
 0x9ce   :  { %1138 = vrot.lane.b32.xlu1 %v1056_v8, %s6752_s2  ;;  %1136 = vrot.lane.b32.xlu0 %v1055_v31, %s6752_s2 }
 0x9d2   :  { %1140 = vrot.lane.b32.xlu0 %v7185_v22, %s6752_s2 }
 0xa30   :  { %v5847_v23 = vpop.permute.xlu1 %5846  ;;  %v5842_v24 = vpop.permute.xlu0 %5841 }
 0xa31   :  { %v5849_v25 = vunpack.i.h.bf16 %v5847_v23  ;;  %v5848_v26 = vunpack.i.l.bf16 %v5847_v23  ;;  %v5844_v27 = vunpack.i.h.bf16 %v5842_v24  ;;  %v5843_v28 = vunpack.i.l.bf16 %v5842_v24 }
 0xa33   :  { %v1073_v51 = vsel %vm910_vm13, %v5844_v27, %v5849_v25  ;;  %v1072_v53 = vsel %vm910_vm13, %v5843_v28, %v5848_v26 }
 0xa34   :  { %v5857_v29 = vpop.permute.xlu1 %5856  ;;  %v5852_v30 = vpop.permute.xlu0 %5851 }
 0xa35   :  { %v5859_v35 = vunpack.i.h.bf16 %v5857_v29  ;;  %v5858_v37 = vunpack.i.l.bf16 %v5857_v29  ;;  %v5854_v40 = vunpack.i.h.bf16 %v5852_v30  ;;  %v5853_v47 = vunpack.i.l.bf16 %v5852_v30 }
 0xa37   :  { %v1115_v56 = vsel %vm8970_vm3, %v5854_v40, %v5859_v35  ;;  %v1114_v58 = vsel %vm8970_vm3, %v5853_v47, %v5858_v37  ;;  %v1130_v37 = vpack.c.bf16 %v7171_v45, %v7169_v18 }
 0xa38   :  { %v5867_v60 = vpop.permute.xlu1 %5866  ;;  %v5862_v61 = vpop.permute.xlu0 %5861  ;;  %v1124_v62 = vsel %vm9017_vm1, %v1072_v53, %v1114_v58  ;;  %v1125_v63 = vsel %vm9017_vm1, %v1073_v51, %v1115_v56 }
 0xa39   :  { %v5869_v3 = vunpack.i.h.bf16 %v5867_v60  ;;  %v1126_v9 = vsel %vm8968_vm6, %v7169_v18, %v1124_v62  ;;  %v1127_v5 = vsel %vm8968_vm6, %v7171_v45, %v1125_v63  ;;  %v5868_v7 = vunpack.i.l.bf16 %v5867_v60 }
 0xa3a   :  { %v5864_v8 = vunpack.i.h.bf16 %v5862_v61  ;;  %v5863_v31 = vunpack.i.l.bf16 %v5862_v61  ;;  %v1132_v11 = vpack.c.bf16 %v1127_v5, %v1126_v9  ;;  %v1116_v63 = vsel %vm9016_vm7, %v1114_v58, %v1072_v53  ;;  %v5531_v53 = vpop.f32.mrf.mxu1 }
 0xa3c   :  { %v5877_v36 = vpop.permute.xlu1 %5876  ;;  %v5872_v12 = vpop.permute.xlu0 %5871  ;;  %5513 = vmatprep.subr.bf16.mxu0 %v1132_v11  ;;  %v1086_v17 = vsel %vm925_vm9, %v5863_v31, %v5868_v7  ;;  %v1087_v46 = vsel %vm925_vm9, %v5864_v8, %v5869_v3  ;;  %v1117_v3 = vsel %vm9016_vm7, %v1115_v56, %v1073_v51  ;;  %v1118_v7 = vsel %vm8969_vm0, %v7169_v18, %v1116_v63 }
 0xa3d   :  { %v5879_v13 = vunpack.i.h.bf16 %v5877_v36  ;;  %v5878_v14 = vunpack.i.l.bf16 %v5877_v36  ;;  %v5874_v15 = vunpack.i.h.bf16 %v5872_v12  ;;  %v5873_v16 = vunpack.i.l.bf16 %v5872_v12  ;;  %5514 = vmatpush3.bf16.msra.mxu0 %v1132_v11  ;;  %v1277_v56 = vpop.f32.mrf.mxu1 }
 0xa3e   :  { %v1119_v8 = vsel %vm8969_vm0, %v7171_v45, %v1117_v3  ;;  %v5212_v51 = vcombine.low %v7185_v22, %v7185_v22 }
 0xa3f   :  { %v1100_v19 = vsel %vm9018_vm4, %v5873_v16, %v5878_v14  ;;  %v1101_v21 = vsel %vm9018_vm4, %v5874_v15, %v5879_v13  ;;  %v1128_v31 = vpack.c.bf16 %v1119_v8, %v1118_v7  ;;  %v5532_v18 = vpop.f32.mrf.mxu1 }
 0xa40   :  { %v1139_v23 = vpop.permute.xlu1 %1138  ;;  %v1137_v24 = vpop.permute.xlu0 %1136  ;;  %v1122_v25 = vsel %vm9017_vm1, %v1086_v17, %v1100_v19  ;;  %v1123_v26 = vsel %vm9017_vm1, %v1087_v46, %v1101_v21  ;;  %v1120_v47 = vsel %vm9016_vm7, %v1100_v19, %v1086_v17  ;;  %v1121_v60 = vsel %vm9016_vm7, %v1101_v21, %v1087_v46 }
 0xa41   :  { %v1143_v27 = vrot.slane %v1139_v23, 4  ;;  %v1142_v28 = vrot.slane %v1137_v24, 4  ;;  %v1131_v29 = vpack.c.bf16 %v1123_v26, %v1122_v25  ;;  %v1129_v5 = vpack.c.bf16 %v1121_v60, %v1120_v47  ;;  %v1280_v17 = vpop.f32.mrf.mxu1  ;;  %v6556_v26 = vld [vmem:[#allocation5 + $0x190] ss:$8 sps:$4 sm:$0xff]  }
 0xa42   :  { %5533 = vmatprep.subr.bf16.mxu1 %v6556_v26 }
 0xa43   :  { %v1149_v30 = vunpack.c.l.bf16 %v1143_v27  ;;  %v1148_v35 = vunpack.c.l.bf16 %v1142_v28  ;;  %5515 = vmatprep.subr.bf16.mxu0 %v1131_v29  ;;  %5534 = vmatpush3.bf16.msra.mxu1 %v6556_v26  ;;  %v7294_v26 = vld [vmem:[#allocation2 + $0xd8] sm:$0xff] }
 0xa44   :  { %v1141_v40 = vpop.permute.xlu0 %1140  ;;  %5516 = vmatpush3.bf16.msra.mxu0 %v1131_v29  ;;  %v6557_v29 = vld [vmem:[#allocation5 + $0x180] ss:$8 sps:$4 sm:$0xff]  }
 0xa45   :  { %v1144_v61 = vrot.slane %v1141_v40, 4  ;;  %5517 = vmatprep.subr.bf16.mxu0 %v1130_v37  ;;  %v5880_v62 = vpack.i.bf16 %v1149_v30, %v1148_v35  ;;  %5535 = vmatprep.subr.bf16.mxu1 %v6557_v29 }
 0xa47   :  { %v1150_v9 = vunpack.c.l.bf16 %v1144_v61  ;;  %5881 = vperm.xlu1 %5753, %v5880_v62   ;;  %5536 = vmatpush3.bf16.msra.mxu1 %v6557_v29  ;;  %v7304_v29 = vld [vmem:[#allocation2 + $0xc0] sm:$0xff] }
 0xa48   :  { %5518 = vmatpush3.bf16.msra.mxu0 %v1130_v37  ;;  %1979 = vmatprep.subr.bf16.mxu1 %v8975_v4 }
 0xa49   :  { %1163 = vperm.xlu0 %5779, %v1150_v9   ;;  %5519 = vmatprep.subr.bf16.mxu0 %v1129_v5 }
 0xa4c   :  { %5520 = vmatpush3.bf16.msra.mxu0 %v1129_v5 }
 0xa4d   :  { %5521 = vmatprep.subr.bf16.mxu0 %v1128_v31 }
 0xa50   :  { %5522 = vmatpush3.bf16.msra.mxu0 %v1128_v31 }
 0xa51   :  { %1657 = vmatprep.subr.bf16.mxu0 %v8975_v4 }
 0xa53   :  { %5524 = vmatmul.mubr.msk.bf16.vlgmr.msra.gmra.mxu0 %vm8964_vm2, %v5212_v51  ;;  %vm1647_vm2 = vcmask 916480  }
 0xac2   :  { %v5882_v58 = vpop.permute.xlu1 %5881 }
 0xac4   :  { %v1164_v16 = vpop.permute.xlu0 %1163 }
 0xb13   :  { %v5525_v11 = vpop.f32.mrf.mxu0 }
 0xb14   :  { %v1220_v46 = vadd.f32 %v5525_v11, %v1164_v16 }
 0xb15   :  { %v1211_v36 = vpop.f32.mrf.mxu0 }
 0xb16   :  { %v6655_v45 = vadd.low.f32.bf16 %v1211_v36, %v5882_v58  ;;  %v1293_v23 = vadd.f32 %v5531_v53, %v1220_v46 }
 0xb17   :  { %v5526_v12 = vpop.f32.mrf.mxu0 }
 0xb18   :  { %v1291_v14 = vadd.f32 %v6655_v45, %v1277_v56  ;;  %v1296_v25 = vmax.f32 %v1293_v23, 0.0 }
 0xb19   :  { %v1214_v13 = vpop.f32.mrf.mxu0 }
 0xb1a   :  { %v6656_v15 = vadd.high.f32.bf16 %v1214_v13, %v5882_v58  ;;  %v1294_v19 = vmax.f32 %v1291_v14, 0.0 }
 0xb1c   :  { %v1292_v22 = vadd.f32 %v6656_v15, %v1280_v17 }
 0xb1e   :  { %v1295_v21 = vmax.f32 %v1292_v22, 0.0 }
 0xb20   :  { %v5890_v24 = vpack.i.bf16 %v1295_v21, %v1294_v19 }
 0xb22   :  { %5891 = vrot.lane.b32.xlu0 %v5890_v24, %s6761_s6  ;;  %5886 = vrot.lane.b32.xlu1 %v5890_v24, %s6754_s29 }
 0xb26   :  { %1313 = vrot.lane.b32.xlu0 %v1296_v25, %s6761_s6  ;;  %1304 = vrot.lane.b32.xlu1 %v1296_v25, %s6754_s29 }
 0xb94   :  { %v5892_v27 = vpop.permute.xlu0 %5891  ;;  %v5887_v28 = vpop.permute.xlu1 %5886 }
 0xb95   :  { %v5894_v30 = vunpack.i.h.bf16 %v5892_v27  ;;  %v5893_v35 = vunpack.i.l.bf16 %v5892_v27  ;;  %v5889_v37 = vunpack.i.h.bf16 %v5887_v28  ;;  %v5888_v40 = vunpack.i.l.bf16 %v5887_v28  ;;  %v7296_v27 = vld [vmem:[#allocation2 + $0xd0] sm:$0xff]  ;;  %v7302_v28 = vld [vmem:[#allocation2 + $0xc8] sm:$0xff] }
 0xb97   :  { %v1319_v47 = vsel %vm9018_vm4, %v5889_v37, %v5894_v30  ;;  %v1318_v60 = vsel %vm9018_vm4, %v5888_v40, %v5893_v35  ;;  %v7310_v30 = vld [vmem:[#allocation2 + $0xb8] sm:$0xff]  ;;  %v7312_v35 = vld [vmem:[#allocation2 + $0xb0] sm:$0xff] }
 0xb98   :  { %v1314_v61 = vpop.permute.xlu0 %1313  ;;  %v1305_v62 = vpop.permute.xlu1 %1304  ;;  %v1321_v63 = vmax.f32 %v1294_v19, %v1318_v60  ;;  %v1322_v3 = vmax.f32 %v1295_v21, %v1319_v47  ;;  %v5224_v37 = vcombine.high %v7312_v35, %v7310_v30 }
 0xb99   :  { %v1320_v5 = vsel %vm9018_vm4, %v1305_v62, %v1314_v61 }
 0xb9a   :  { %v5900_v9 = vpack.i.bf16 %v1322_v3, %v1321_v63  ;;  %v1323_v7 = vmax.f32 %v1296_v25, %v1320_v5  ;;  %5229 = vmatprep.mubr.msk.bf16.mxu0 %vm1647_vm2, %v5224_v37 }
 0xb9c   :  { %5901 = vrot.lane.b32.xlu0 %v5900_v9, %s6759_s4  ;;  %5896 = vrot.lane.b32.xlu1 %v5900_v9, %s6753_s28 }
 0xba0   :  { %1340 = vrot.lane.b32.xlu0 %v1323_v7, %s6759_s4  ;;  %1331 = vrot.lane.b32.xlu1 %v1323_v7, %s6753_s28 }
 0xc0e   :  { %v5902_v8 = vpop.permute.xlu0 %5901  ;;  %v5897_v31 = vpop.permute.xlu1 %5896 }
 0xc0f   :  { %v5904_v51 = vunpack.i.h.bf16 %v5902_v8  ;;  %v5903_v53 = vunpack.i.l.bf16 %v5902_v8  ;;  %v5899_v56 = vunpack.i.h.bf16 %v5897_v31  ;;  %v5898_v18 = vunpack.i.l.bf16 %v5897_v31 }
 0xc11   :  { %v1346_v58 = vsel %vm8970_vm3, %v5899_v56, %v5904_v51  ;;  %v1345_v11 = vsel %vm8970_vm3, %v5898_v18, %v5903_v53 }
 0xc12   :  { %v1349_v36 = vmax.f32 %v1322_v3, %v1346_v58  ;;  %v1348_v45 = vmax.f32 %v1321_v63, %v1345_v11  ;;  %v1341_v12 = vpop.permute.xlu0 %1340  ;;  %v1332_v13 = vpop.permute.xlu1 %1331  ;;  %v7322_v3 = vand.u32 3, %v6817_v6 }
 0xc13   :  { %v1347_v14 = vsel %vm8970_vm3, %v1332_v13, %v1341_v12 }
 0xc14   :  { %v1350_v15 = vmax.f32 %v1323_v7, %v1347_v14  ;;  %v1351_v16 = vpack.c.bf16 %v1349_v36, %v1348_v45  ;;  %vm68_vm10 = vcmp.eq.s32.totalorder %v7322_v3, 0  ;;  %vm9014_vm6 = vcmp.eq.s32.totalorder %v7322_v3, 1 }
 0xc15   :  { %vm9013_vm0 = vcmp.eq.s32.totalorder %v7322_v3, 3  ;;  %vm9011_vm3 = vcmp.eq.s32.totalorder %v7322_v3, 2 }
 0xc16   :  { %v1352_v17 = vpack.c.bf16 %v1350_v15, %v1350_v15  ;;  %5537 = vmatprep.mubr.msk.bf16.mxu1 %vm1369_vm8, %v1351_v16 }
 0xc18   :  { %5538 = vmatmul.mubr.msk.bf16.vlgmr.msra.gmra.mxu1 %vm1369_vm8, %v1352_v17 }
 0xcd8   :  { %v7250_v46 = vpop.f32.mrf.mxu1 }
 0xcda   :  { %v7252_v22 = vpop.f32.mrf.mxu1 }
 0xcdb   :  { %1463 = vrot.lane.b32.xlu0 %v7252_v22, %s6752_s2  ;;  %1454 = vrot.lane.b32.xlu1 %v7252_v22, %s6762_s7  ;;  %v7260_v19 = vpack.c.bf16 %v7252_v22, %v7250_v46 }
 0xcdc   :  { %v5540_v21 = vpop.f32.mrf.mxu1 }
 0xcdd   :  { %1658 = vmatpush1.bf16.msra.mxu0 %v7260_v19 }
 0xcde   :  { %v7263_v23 = vpop.f32.mrf.mxu1  ;;  %1659 = vmatprep.subr.bf16.mxu0 %v8975_v4 }
 0xcdf   :  { %1484 = vrot.lane.b32.xlu0 %v7252_v22, %s6763_s8  ;;  %1475 = vrot.lane.b32.xlu1 %v7252_v22, %s6754_s29  ;;  %v7272_v24 = vpack.c.bf16 %v7263_v23, %v7252_v22  ;;  %v5910_v25 = vpack.i.bf16 %v7250_v46, %v7263_v23 }
 0xce1   :  { %1660 = vmatpush1.bf16.msra.mxu0 %v7272_v24 }
 0xce2   :  { %1661 = vmatprep.subr.bf16.mxu0 %v8975_v4 }
 0xce3   :  { %5911 = vrot.lane.b32.xlu0 %v5910_v25, %s6752_s2  ;;  %5906 = vrot.lane.b32.xlu1 %v5910_v25, %s6762_s7 }
 0xce7   :  { %5921 = vrot.lane.b32.xlu0 %v5910_v25, %s6763_s8  ;;  %5916 = vrot.lane.b32.xlu1 %v5910_v25, %s6754_s29 }
 0xceb   :  { %1442 = vrot.lane.b32.xlu0 %v7252_v22, %s6751_s27  ;;  %1433 = vrot.lane.b32.xlu1 %v7252_v22, %s6764_s9 }
 0xcef   :  { %5931 = vrot.lane.b32.xlu0 %v5910_v25, %s6751_s27  ;;  %5926 = vrot.lane.b32.xlu1 %v5910_v25, %s6764_s9 }
 0xcf3   :  { %5941 = vrot.lane.b32.xlu0 %v5910_v25, %s6765_s10  ;;  %5936 = vrot.lane.b32.xlu1 %v5910_v25, %s6753_s28 }
 0xcf7   :  { %1506 = vrot.lane.b32.xlu0 %v7252_v22, %s6765_s10  ;;  %1497 = vrot.lane.b32.xlu1 %v7252_v22, %s6753_s28 }
 0xcfb   :  { %1576 = vrot.lane.b32.xlu0 %v7294_v26, %s6752_s2  ;;  %1574 = vrot.lane.b32.xlu1 %v7296_v27, %s6752_s2 }
 0xcff   :  { %1572 = vrot.lane.b32.xlu0 %v7302_v28, %s6752_s2  ;;  %1570 = vrot.lane.b32.xlu1 %v7304_v29, %s6752_s2 }
 0xd03   :  { %1568 = vrot.lane.b32.xlu0 %v7310_v30, %s6752_s2  ;;  %1566 = vrot.lane.b32.xlu1 %v7312_v35, %s6752_s2 }
 0xd4d   :  { %v1464_v40 = vpop.permute.xlu0 %1463  ;;  %v1455_v47 = vpop.permute.xlu1 %1454 }
 0xd4e   :  { %v7351_v25 = vsel %vm925_vm9, %v1455_v47, %v1464_v40 }
 0xd51   :  { %v1485_v60 = vpop.permute.xlu0 %1484  ;;  %v1476_v61 = vpop.permute.xlu1 %1475 }
 0xd52   :  { %v7346_v17 = vsel %vm1493_vm11, %v1476_v61, %v1485_v60 }
 0xd53   :  { %v1529_v37 = vsel %vm68_vm10, %v7346_v17, %v7351_v25 }
 0xd55   :  { %v5912_v62 = vpop.permute.xlu0 %5911  ;;  %v5907_v63 = vpop.permute.xlu1 %5906 }
 0xd56   :  { %v5914_v9 = vunpack.i.h.bf16 %v5912_v62  ;;  %v5913_v5 = vunpack.i.l.bf16 %v5912_v62  ;;  %v5909_v7 = vunpack.i.h.bf16 %v5907_v63  ;;  %v5908_v8 = vunpack.i.l.bf16 %v5907_v63 }
 0xd58   :  { %v7326_v11 = vsel %vm925_vm9, %v5909_v7, %v5914_v9  ;;  %v7329_v36 = vsel %vm925_vm9, %v5908_v8, %v5913_v5 }
 0xd59   :  { %v5922_v31 = vpop.permute.xlu0 %5921  ;;  %v5917_v51 = vpop.permute.xlu1 %5916 }
 0xd5a   :  { %v5924_v53 = vunpack.i.h.bf16 %v5922_v31  ;;  %v5923_v56 = vunpack.i.l.bf16 %v5922_v31  ;;  %v5919_v18 = vunpack.i.h.bf16 %v5917_v51  ;;  %v5918_v58 = vunpack.i.l.bf16 %v5917_v51 }
 0xd5c   :  { %v7332_v45 = vsel %vm1493_vm11, %v5919_v18, %v5924_v53  ;;  %v7335_v12 = vsel %vm1493_vm11, %v5918_v58, %v5923_v56 }
 0xd5d   :  { %v1443_v13 = vpop.permute.xlu0 %1442  ;;  %v1434_v14 = vpop.permute.xlu1 %1433  ;;  %v1530_v15 = vsel %vm68_vm10, %v7335_v12, %v7329_v36  ;;  %v1531_v16 = vsel %vm68_vm10, %v7332_v45, %v7326_v11 }
 0xd5e   :  { %v7348_v21 = vpack.c.bf16 %v1531_v16, %v1530_v15  ;;  %v7359_v9 = vpack.c.bf16 %v1529_v37, %v1531_v16  ;;  %v7363_v8 = vpack.c.bf16 %v1530_v15, %v1529_v37 }
 0xd60   :  { %9037 = vst [vmem:[#allocation25_spill] sm:$0xff] %v7348_v21  ;;  %1662 = vmatpush1.bf16.msra.mxu0 %v7348_v21  ;;  %9038 = vst [vmem:[#allocation26_spill] sm:$0xff] %v7359_v9 }
 0xd61   :  { %v5932_v62 = vpop.permute.xlu0 %5931  ;;  %v5927_v63 = vpop.permute.xlu1 %5926  ;;  %1663 = vmatprep.subr.bf16.mxu0 %v8975_v4  ;;  %9039 = vst [vmem:[#allocation27_spill] sm:$0xff] %v7363_v8 }
 0xd62   :  { %v5934_v60 = vunpack.i.h.bf16 %v5932_v62  ;;  %v5933_v61 = vunpack.i.l.bf16 %v5932_v62  ;;  %v5929_v5 = vunpack.i.h.bf16 %v5927_v63  ;;  %v5928_v7 = vunpack.i.l.bf16 %v5927_v63 }
 0xd64   :  { %1664 = vmatpush1.bf16.msra.mxu0 %v7359_v9  ;;  %v1453_v18 = vsel %vm910_vm13, %v5929_v5, %v5934_v60  ;;  %v1452_v58 = vsel %vm910_vm13, %v5928_v7, %v5933_v61  ;;  %v1451_v60 = vsel %vm910_vm13, %v1434_v14, %v1443_v13 }
 0xd65   :  { %v5942_v40 = vpop.permute.xlu0 %5941  ;;  %v5937_v47 = vpop.permute.xlu1 %5936  ;;  %1665 = vmatprep.subr.bf16.mxu0 %v8975_v4 }
 0xd66   :  { %v5944_v31 = vunpack.i.h.bf16 %v5942_v40  ;;  %v5943_v51 = vunpack.i.l.bf16 %v5942_v40  ;;  %v5939_v53 = vunpack.i.h.bf16 %v5937_v47  ;;  %v5938_v56 = vunpack.i.l.bf16 %v5937_v47 }
 0xd68   :  { %v1518_v16 = vsel %vm1515_vm12, %v5939_v53, %v5944_v31  ;;  %v1517_v62 = vsel %vm1515_vm12, %v5938_v56, %v5943_v51  ;;  %1666 = vmatpush1.bf16.msra.mxu0 %v7363_v8 }
 0xd69   :  { %v1522_v15 = vsel %vm68_vm10, %v1517_v62, %v1452_v58  ;;  %v1523_v37 = vsel %vm68_vm10, %v1518_v16, %v1453_v18  ;;  %v1507_v63 = vpop.permute.xlu0 %1506  ;;  %v1498_v40 = vpop.permute.xlu1 %1497  ;;  %1667 = vmatprep.subr.bf16.mxu0 %v8975_v4 }
 0xd6a   :  { %v1516_v61 = vsel %vm1515_vm12, %v1498_v40, %v1507_v63  ;;  %v1527_v5 = vsel %vm9014_vm6, %v7263_v23, %v1522_v15  ;;  %v1528_v7 = vsel %vm9014_vm6, %v7250_v46, %v1523_v37  ;;  %v1538_v40 = vsel %vm9013_vm0, %v1452_v58, %v1517_v62 }
 0xd6b   :  { %v1521_v47 = vsel %vm68_vm10, %v1516_v61, %v1451_v60  ;;  %v7386_v31 = vpack.c.bf16 %v1528_v7, %v1527_v5  ;;  %v1543_v58 = vsel %vm9011_vm3, %v7263_v23, %v1538_v40 }
 0xd6c   :  { %v1526_v51 = vsel %vm9014_vm6, %v7252_v22, %v1521_v47  ;;  %v1539_v47 = vsel %vm9013_vm0, %v1453_v18, %v1518_v16 }
 0xd6d   :  { %9040 = vst [vmem:[#allocation28_spill] sm:$0xff] %v7386_v31  ;;  %v1577_v13 = vpop.permute.xlu0 %1576  ;;  %v1575_v14 = vpop.permute.xlu1 %1574  ;;  %1668 = vmatpush1.bf16.msra.mxu0 %v7386_v31  ;;  %v7393_v15 = vpack.c.bf16 %v1526_v51, %v1528_v7  ;;  %v7403_v8 = vpack.c.bf16 %v1527_v5, %v1526_v51  ;;  %v1544_v18 = vsel %vm9011_vm3, %v7250_v46, %v1539_v47 }
 0xd6e   :  { %v1583_v53 = vrot.slane %v1577_v13, 4  ;;  %v1582_v56 = vrot.slane %v1575_v14, 4  ;;  %1669 = vmatprep.subr.bf16.mxu0 %v8975_v4 }
 0xd6f   :  { %9041 = vst [vmem:[#allocation29_spill] sm:$0xff] %v7393_v15  ;;  %9042 = vst [vmem:[#allocation30_spill] sm:$0xff] %v7403_v8 }
 0xd70   :  { %v1595_v37 = vunpack.c.l.bf16 %v1583_v53  ;;  %v1594_v63 = vunpack.c.l.bf16 %v1582_v56 }
 0xd71   :  { %v1573_v38 = vpop.permute.xlu0 %1572  ;;  %v1571_v31 = vpop.permute.xlu1 %1570  ;;  %1670 = vmatpush1.bf16.msra.mxu0 %v7393_v15 }
 0xd72   :  { %v1581_v13 = vrot.slane %v1573_v38, 4  ;;  %v1580_v14 = vrot.slane %v1571_v31, 4  ;;  %v5945_v7 = vpack.i.bf16 %v1595_v37, %v1594_v63  ;;  %1671 = vmatprep.subr.bf16.mxu0 %v8975_v4  ;;  %v1537_v38 = vsel %vm9013_vm0, %v1451_v60, %v1516_v61 }
 0xd73   :  { %v7415_v37 = vpack.c.bf16 %v1544_v18, %v1543_v58  ;;  %v1542_v63 = vsel %vm9011_vm3, %v7252_v22, %v1537_v38  ;;  %v1535_v22 = vsel %vm9013_vm0, %v7329_v36, %v7335_v12  ;;  %v5223_v12 = vcombine.low %v7312_v35, %v7310_v30  ;;  %v7472_v30 = vld [vmem:[#allocation2 + $0xe8] sm:$0xff]  ;;  %v7474_v35 = vld [vmem:[#allocation2 + $0xe0] sm:$0xff] }
 0xd74   :  { %v1593_v16 = vunpack.c.l.bf16 %v1581_v13  ;;  %v1592_v62 = vunpack.c.l.bf16 %v1580_v14  ;;  %5946 = vperm.xlu1 %5753, %v5945_v7   ;;  %v7422_v61 = vpack.c.bf16 %v1542_v63, %v1544_v18  ;;  %v7426_v13 = vpack.c.bf16 %v1543_v58, %v1542_v63 }
 0xd75   :  { %v1569_v31 = vpop.permute.xlu0 %1568  ;;  %v1567_v53 = vpop.permute.xlu1 %1566  ;;  %1672 = vmatpush1.bf16.msra.mxu0 %v7403_v8  ;;  %9043 = vst [vmem:[#allocation31_spill] sm:$0xff] %v7415_v37  ;;  %v1536_v14 = vsel %vm9013_vm0, %v7326_v11, %v7332_v45  ;;  %v1534_v58 = vsel %vm9013_vm0, %v7351_v25, %v7346_v17  ;;  %v7456_v45 = vpack.c.bf16 %v7250_v46, %v7263_v23 }
 0xd76   :  { %v1579_v5 = vrot.slane %v1569_v31, 4  ;;  %v1578_v51 = vrot.slane %v1567_v53, 4  ;;  %v5950_v56 = vpack.i.bf16 %v1593_v16, %v1592_v62  ;;  %1675 = vmatprep.subr.bf16.mxu0 %v8975_v4  ;;  %9044 = vst [vmem:[#allocation32_spill] sm:$0xff] %v7422_v61  ;;  %9045 = vst [vmem:[#allocation33_spill] sm:$0xff] %v7426_v13  ;;  %v7438_v7 = vpack.c.bf16 %v1536_v14, %v1535_v22 }
 0xd77   :  { %v7446_v36 = vpack.c.bf16 %v1534_v58, %v1536_v14  ;;  %v7450_v11 = vpack.c.bf16 %v1535_v22, %v1534_v58  ;;  %v5226_v17 = vcombine.high %v7304_v29, %v7302_v28  ;;  %v5225_v25 = vcombine.low %v7304_v29, %v7302_v28 }
 0xd78   :  { %v1591_v40 = vunpack.c.l.bf16 %v1579_v5  ;;  %v1590_v47 = vunpack.c.l.bf16 %v1578_v51  ;;  %5951 = vperm.xlu0 %5779, %v5950_v56   ;;  %9046 = vst [vmem:[#allocation34_spill] sm:$0xff] %v7438_v7  ;;  %v5228_v46 = vcombine.high %v7296_v27, %v7294_v26  ;;  %v5227_v23 = vcombine.low %v7296_v27, %v7294_v26 }
 0xd79   :  { %1676 = vmatpush2.bf16.msra.mxu0 %v7415_v37  ;;  %9047 = vst [vmem:[#allocation35_spill] sm:$0xff] %v7446_v36  ;;  %9048 = vst [vmem:[#allocation36_spill] sm:$0xff] %v7450_v11  ;;  %v5233_v18 = vcombine.high %v7474_v35, %v7472_v30 }
 0xd7a   :  { %v5955_v60 = vpack.i.bf16 %v1591_v40, %v1590_v47  ;;  %1677 = vmatprep.subr.bf16.mxu0 %v8975_v4 }
 0xd7b   :  { %5234 = vmatprep.mubr.msk.bf16.mxu1 %vm1647_vm2, %v5233_v18 }
 0xd7c   :  { %5956 = vperm.xlu1 %5753, %v5955_v60  }
 0xd7d   :  { %1678 = vmatpush2.bf16.msra.mxu0 %v7422_v61 }
 0xd7e   :  { %1679 = vmatprep.subr.bf16.mxu0 %v8975_v4 }
 0xd81   :  { %1680 = vmatpush2.bf16.msra.mxu0 %v7426_v13 }
 0xd82   :  { %1681 = vmatprep.subr.bf16.mxu0 %v8975_v4 }
 0xd85   :  { %1682 = vmatpush2.bf16.msra.mxu0 %v7438_v7 }
 0xd86   :  { %1683 = vmatprep.subr.bf16.mxu0 %v8975_v4 }
 0xd89   :  { %1684 = vmatpush2.bf16.msra.mxu0 %v7446_v36 }
 0xd8a   :  { %1685 = vmatprep.subr.bf16.mxu0 %v8975_v4 }
 0xd8d   :  { %1686 = vmatpush2.bf16.msra.mxu0 %v7450_v11 }
 0xd8e   :  { %1687 = vmatprep.subr.bf16.mxu0 %v8975_v4 }
 0xd91   :  { %1688 = vmatpush2.bf16.msra.mxu0 %v7456_v45 }
 0xd92   :  { %2258 = vmatprep.subr.bf16.mxu0 %v8975_v4 }
 0xd94   :  { %1690 = vmatmul.mubr.bf16.vlgmr.msra.gmra.mxu0 %v5223_v12 }
 0xd95   :  { %5230 = vmatprep.mubr.msk.bf16.mxu0 %vm1647_vm2, %v5226_v17 }
 0xd9c   :  { %1698 = vmatmul.mubr.bf16.gmra.mxu0 %v5225_v25 }
 0xd9d   :  { %5231 = vmatprep.mubr.msk.bf16.mxu0 %vm1647_vm2, %v5228_v46 }
 0xda4   :  { %1706 = vmatmul.mubr.bf16.gmra.mxu0 %v5227_v23 }
 0xdef   :  { %v5947_v28 = vpop.permute.xlu1 %5946 }
 0xdf3   :  { %v5952_v5 = vpop.permute.xlu0 %5951 }
 0xdf7   :  { %v5957_v29 = vpop.permute.xlu1 %5956 }
 0xe54   :  { %v1691_v16 = vpop.f32.mrf.mxu0 }
 0xe55   :  { %v6657_v38 = vadd.low.f32.bf16 %v1691_v16, %v5957_v29 }
 0xe56   :  { %v1693_v62 = vpop.f32.mrf.mxu0 }
 0xe57   :  { %v7479_v26 = vmax.f32 %v6657_v38, 0.0 }
 0xe58   :  { %v1694_v31 = vpop.f32.mrf.mxu0 }
 0xe59   :  { %v6658_v53 = vadd.high.f32.bf16 %v1694_v31, %v5957_v29 }
 0xe5a   :  { %v1696_v51 = vpop.f32.mrf.mxu0 }
 0xe5b   :  { %v7481_v27 = vmax.f32 %v6658_v53, 0.0 }
 0xe5c   :  { %v1699_v56 = vpop.f32.mrf.mxu0 }
 0xe5d   :  { %v5965_v63 = vpack.i.bf16 %v7481_v27, %v7479_v26  ;;  %v6659_v47 = vadd.low.f32.bf16 %v1699_v56, %v5952_v5  ;;  %v1938_v16 = vpack.c.bf16 %v7481_v27, %v7479_v26 }
 0xe5e   :  { %v1701_v40 = vpop.f32.mrf.mxu0 }
 0xe5f   :  { %5966 = vrot.lane.b32.xlu1 %v5965_v63, %s6752_s2  ;;  %5961 = vrot.lane.b32.xlu0 %v5965_v63, %s6762_s7  ;;  %v7487_v58 = vmax.f32 %v6659_v47, 0.0 }
 0xe60   :  { %v1702_v60 = vpop.f32.mrf.mxu0 }
 0xe61   :  { %v6660_v22 = vadd.high.f32.bf16 %v1702_v60, %v5952_v5 }
 0xe62   :  { %v1704_v14 = vpop.f32.mrf.mxu0 }
 0xe63   :  { %v7489_v12 = vmax.f32 %v6660_v22, 0.0  ;;  %5976 = vrot.lane.b32.xlu1 %v5965_v63, %s6763_s8  ;;  %5971 = vrot.lane.b32.xlu0 %v5965_v63, %s6754_s29 }
 0xe64   :  { %v1707_v17 = vpop.f32.mrf.mxu0 }
 0xe65   :  { %v1939_v25 = vpack.c.bf16 %v7489_v12, %v7487_v58  ;;  %v5985_v46 = vpack.i.bf16 %v7489_v12, %v7487_v58  ;;  %v6662_v38 = vadd.low.f32.bf16 %v1707_v17, %v5947_v28 }
 0xe66   :  { %v1709_v23 = vpop.f32.mrf.mxu0 }
 0xe67   :  { %1980 = vmatpush1.bf16.msra.mxu1 %v1939_v25  ;;  %5986 = vrot.lane.b32.xlu1 %v5985_v46, %s6752_s2  ;;  %v7507_v53 = vmax.f32 %v6662_v38, 0.0 }
 0xe68   :  { %5981 = vrot.lane.b32.xlu0 %v5985_v46, %s6762_s7  ;;  %v1710_v18 = vpop.f32.mrf.mxu0  ;;  %1981 = vmatprep.subr.bf16.mxu1 %v8975_v4 }
 0xe69   :  { %v6661_v29 = vadd.high.f32.bf16 %v1710_v18, %v5947_v28 }
 0xe6a   :  { %v1712_v62 = vpop.f32.mrf.mxu0 }
 0xe6b   :  { %5996 = vrot.lane.b32.xlu1 %v5985_v46, %s6763_s8  ;;  %1982 = vmatpush1.bf16.msra.mxu1 %v1938_v16  ;;  %v7505_v31 = vmax.f32 %v6661_v29, 0.0 }
 0xe6c   :  { %5991 = vrot.lane.b32.xlu0 %v5985_v46, %s6754_s29  ;;  %1983 = vmatprep.subr.bf16.mxu1 %v8975_v4 }
 0xe6d   :  { %v6015_v5 = vpack.i.bf16 %v7505_v31, %v7507_v53 }
 0xe6f   :  { %6006 = vrot.lane.b32.xlu1 %v5985_v46, %s6751_s27 }
 0xe70   :  { %6001 = vrot.lane.b32.xlu0 %v5985_v46, %s6764_s9 }
 0xe73   :  { %6016 = vrot.lane.b32.xlu1 %v6015_v5, %s6752_s2 }
 0xe74   :  { %6011 = vrot.lane.b32.xlu0 %v6015_v5, %s6762_s7 }
 0xe77   :  { %6031 = vrot.lane.b32.xlu1 %v6015_v5, %s6763_s8 }
 0xe78   :  { %6021 = vrot.lane.b32.xlu0 %v6015_v5, %s6754_s29 }
 0xe7b   :  { %6036 = vrot.lane.b32.xlu1 %v5985_v46, %s6765_s10 }
 0xe7c   :  { %6026 = vrot.lane.b32.xlu0 %v5985_v46, %s6753_s28 }
 0xe7f   :  { %6046 = vrot.lane.b32.xlu1 %v6015_v5, %s6751_s27 }
 0xe80   :  { %6041 = vrot.lane.b32.xlu0 %v6015_v5, %s6764_s9 }
 0xe83   :  { %6061 = vrot.lane.b32.xlu1 %v6015_v5, %s6765_s10 }
 0xe84   :  { %6051 = vrot.lane.b32.xlu0 %v6015_v5, %s6753_s28 }
 0xe87   :  { %6066 = vrot.lane.b32.xlu1 %v5965_v63, %s6751_s27 }
 0xe88   :  { %6056 = vrot.lane.b32.xlu0 %v5965_v63, %s6764_s9 }
 0xe8b   :  { %6076 = vrot.lane.b32.xlu1 %v5965_v63, %s6765_s10 }
 0xe8c   :  { %6071 = vrot.lane.b32.xlu0 %v5965_v63, %s6753_s28 }
 0xe8f   :  { %1951 = vrot.lane.b32.xlu1 %v7472_v30, %s6752_s2 }
 0xe90   :  { %1949 = vrot.lane.b32.xlu0 %v7474_v35, %s6752_s2 }
 0xed1   :  { %v5967_v28 = vpop.permute.xlu1 %5966  ;;  %v5962_v51 = vpop.permute.xlu0 %5961 }
 0xed2   :  { %v5969_v63 = vunpack.i.h.bf16 %v5967_v28  ;;  %v5968_v23 = vunpack.i.l.bf16 %v5967_v28  ;;  %v5964_v18 = vunpack.i.h.bf16 %v5962_v51  ;;  %v5963_v33 = vunpack.i.l.bf16 %v5962_v51 }
 0xed5   :  { %v5977_v56 = vpop.permute.xlu1 %5976  ;;  %v5972_v40 = vpop.permute.xlu0 %5971 }
 0xed6   :  { %v5979_v16 = vunpack.i.h.bf16 %v5977_v56  ;;  %v5974_v62 = vunpack.i.h.bf16 %v5972_v40  ;;  %v5978_v49 = vunpack.i.l.bf16 %v5977_v56  ;;  %v5973_v43 = vunpack.i.l.bf16 %v5972_v40 }
 0xed9   :  { %v5987_v47 = vpop.permute.xlu1 %5986 }
 0xeda   :  { %v5982_v60 = vpop.permute.xlu0 %5981  ;;  %v5989_v38 = vunpack.i.h.bf16 %v5987_v47  ;;  %v5988_v5 = vunpack.i.l.bf16 %v5987_v47  ;;  %v7536_v47 = vsel %vm1493_vm11, %v5974_v62, %v5979_v16  ;;  %v9049_v16 = vmov 0  }
 0xedb   :  { %v5984_v9 = vunpack.i.h.bf16 %v5982_v60  ;;  %v5983_v21 = vunpack.i.l.bf16 %v5982_v60 }
 0xedd   :  { %v5997_v22 = vpop.permute.xlu1 %5996  ;;  %v7557_v60 = vsel %vm925_vm9, %v5984_v9, %v5989_v38 }
 0xede   :  { %v5992_v14 = vpop.permute.xlu0 %5991  ;;  %v5999_v4 = vunpack.i.h.bf16 %v5997_v22  ;;  %v5998_v11 = vunpack.i.l.bf16 %v5997_v22 }
 0xedf   :  { %v5994_v36 = vunpack.i.h.bf16 %v5992_v14  ;;  %v5993_v7 = vunpack.i.l.bf16 %v5992_v14 }
 0xee1   :  { %v7531_v17 = vpop.permute.xlu1 %6006  ;;  %v7539_v22 = vsel %vm1493_vm11, %v5994_v36, %v5999_v4  ;;  %v7542_v14 = vsel %vm1493_vm11, %v5993_v7, %v5998_v11  ;;  %v7560_v4 = vsel %vm925_vm9, %v5983_v21, %v5988_v5  ;;  %v7582_v36 = vsel %vm925_vm9, %v5964_v18, %v5969_v63 }
 0xee2   :  { %v7533_v25 = vpop.permute.xlu0 %6001  ;;  %v1911_v21 = vsel %vm68_vm10, %v7539_v22, %v7557_v60  ;;  %v6009_v11 = vunpack.i.h.bf16 %v7531_v17  ;;  %v1909_v63 = vsel %vm68_vm10, %v7536_v47, %v7582_v36 }
 0xee3   :  { %v6003_v18 = vunpack.i.l.bf16 %v7533_v25 }
 0xee5   :  { %v6017_v46 = vpop.permute.xlu1 %6016 }
 0xee6   :  { %v6012_v29 = vpop.permute.xlu0 %6011  ;;  %v6019_v13 = vunpack.i.h.bf16 %v6017_v46  ;;  %v6018_v61 = vunpack.i.l.bf16 %v6017_v46 }
 0xee7   :  { %v6014_v37 = vunpack.i.h.bf16 %v6012_v29  ;;  %v6013_v8 = vunpack.i.l.bf16 %v6012_v29 }
 0xee9   :  { %v6032_v15 = vpop.permute.xlu1 %6031  ;;  %v7545_v46 = vsel %vm925_vm9, %v6014_v37, %v6019_v13 }
 0xeea   :  { %v6034_v48 = vunpack.i.h.bf16 %v6032_v15  ;;  %v6033_v42 = vunpack.i.l.bf16 %v6032_v15  ;;  %v6022_v28 = vpop.permute.xlu0 %6021  ;;  %v7548_v15 = vsel %vm925_vm9, %v6013_v8, %v6018_v61 }
 0xeeb   :  { %v6024_v41 = vunpack.i.h.bf16 %v6022_v28  ;;  %v6023_v34 = vunpack.i.l.bf16 %v6022_v28 }
 0xeed   :  { %v7551_v56 = vsel %vm1493_vm11, %v6024_v41, %v6034_v48  ;;  %v7554_v51 = vsel %vm1493_vm11, %v6023_v34, %v6033_v42  ;;  %v6037_v40 = vpop.permute.xlu1 %6036  ;;  %v7571_v34 = vsel %vm1493_vm11, %v5973_v43, %v5978_v49  ;;  %v1910_v48 = vsel %vm68_vm10, %v7542_v14, %v7560_v4 }
 0xeee   :  { %v6027_v7 = vpop.permute.xlu0 %6026  ;;  %v1912_v8 = vsel %vm68_vm10, %v7554_v51, %v7548_v15  ;;  %v1913_v41 = vsel %vm68_vm10, %v7551_v56, %v7545_v46  ;;  %v6039_v9 = vunpack.i.h.bf16 %v6037_v40  ;;  %v6038_v37 = vunpack.i.l.bf16 %v6037_v40 }
 0xeef   :  { %v1937_v42 = vpack.c.bf16 %v1913_v41, %v1912_v8  ;;  %v6029_v61 = vunpack.i.h.bf16 %v6027_v7  ;;  %v6028_v13 = vunpack.i.l.bf16 %v6027_v7  ;;  %v7585_v43 = vsel %vm925_vm9, %v5963_v33, %v5968_v23 }
 0xef0   :  { %v1908_v62 = vsel %vm68_vm10, %v7571_v34, %v7585_v43  ;;  %v6008_v33 = vunpack.i.l.bf16 %v7531_v17  ;;  %v6004_v23 = vunpack.i.h.bf16 %v7533_v25  ;;  %v1936_v38 = vpack.c.bf16 %v1911_v21, %v1910_v48 }
 0xef1   :  { %1984 = vmatpush1.bf16.msra.mxu1 %v1937_v42  ;;  %v6047_v49 = vpop.permute.xlu1 %6046  ;;  %v7601_v5 = vsel %vm1515_vm12, %v6029_v61, %v6039_v9  ;;  %v7604_v28 = vsel %vm1515_vm12, %v6028_v13, %v6038_v37  ;;  %v1935_v6 = vpack.c.bf16 %v1909_v63, %v1908_v62 }
 0xef2   :  { %v6042_v29 = vpop.permute.xlu0 %6041  ;;  %1985 = vmatprep.subr.bf16.mxu1 %v9049_v16  ;;  %v6049_v40 = vunpack.i.h.bf16 %v6047_v49  ;;  %v6048_v7 = vunpack.i.l.bf16 %v6047_v49  ;;  %v1767_v25 = vsel %vm910_vm13, %v6004_v23, %v6009_v11  ;;  %v1766_v48 = vsel %vm910_vm13, %v6003_v18, %v6008_v33 }
 0xef3   :  { %v6044_v8 = vunpack.i.h.bf16 %v6042_v29  ;;  %v6043_v41 = vunpack.i.l.bf16 %v6042_v29  ;;  %v1898_v37 = vsel %vm68_vm10, %v7604_v28, %v1766_v48  ;;  %v1899_v61 = vsel %vm68_vm10, %v7601_v5, %v1767_v25 }
 0xef4   :  { %v1904_v18 = vsel %vm9014_vm6, %v7487_v58, %v1898_v37 }
 0xef5   :  { %1986 = vmatpush1.bf16.msra.mxu1 %v1936_v38  ;;  %v6062_v42 = vpop.permute.xlu1 %6061  ;;  %v1769_v13 = vsel %vm910_vm13, %v6044_v8, %v6049_v40  ;;  %v1768_v49 = vsel %vm910_vm13, %v6043_v41, %v6048_v7 }
 0xef6   :  { %v6064_v32 = vunpack.i.h.bf16 %v6062_v42  ;;  %v6063_v10 = vunpack.i.l.bf16 %v6062_v42  ;;  %v6052_v17 = vpop.permute.xlu0 %6051  ;;  %1987 = vmatprep.subr.bf16.mxu1 %v9049_v16 }
 0xef7   :  { %v6054_v21 = vunpack.i.h.bf16 %v6052_v17  ;;  %v6053_v9 = vunpack.i.l.bf16 %v6052_v17 }
 0xef9   :  { %v1895_v29 = vsel %vm1515_vm12, %v6054_v21, %v6064_v32  ;;  %v1894_v11 = vsel %vm1515_vm12, %v6053_v9, %v6063_v10  ;;  %1988 = vmatpush1.bf16.msra.mxu1 %v1935_v6  ;;  %v6067_v62 = vpop.permute.xlu1 %6066  ;;  %v1905_v32 = vsel %vm9014_vm6, %v7489_v12, %v1899_v61 }
 0xefa   :  { %v1900_v63 = vsel %vm68_vm10, %v1894_v11, %v1768_v49  ;;  %v1901_v33 = vsel %vm68_vm10, %v1895_v29, %v1769_v13  ;;  %v6057_v23 = vpop.permute.xlu0 %6056  ;;  %1989 = vmatprep.subr.bf16.mxu1 %v9049_v16  ;;  %v6069_v38 = vunpack.i.h.bf16 %v6067_v62  ;;  %v6068_v40 = vunpack.i.l.bf16 %v6067_v62 }
 0xefb   :  { %v1906_v10 = vsel %vm9014_vm6, %v7507_v53, %v1900_v63  ;;  %v1907_v6 = vsel %vm9014_vm6, %v7505_v31, %v1901_v33  ;;  %v6059_v7 = vunpack.i.h.bf16 %v6057_v23  ;;  %v6058_v8 = vunpack.i.l.bf16 %v6057_v23 }
 0xefc   :  { %v1934_v42 = vpack.c.bf16 %v1907_v6, %v1906_v10  ;;  %v1933_v63 = vpack.c.bf16 %v1905_v32, %v1904_v18  ;;  %v1924_v10 = vsel %vm9013_vm0, %v1768_v49, %v1894_v11  ;;  %v1925_v6 = vsel %vm9013_vm0, %v1769_v13, %v1895_v29 }
 0xefd   :  { %v6077_v41 = vpop.permute.xlu1 %6076  ;;  %v1765_v33 = vsel %vm910_vm13, %v6059_v7, %v6069_v38  ;;  %v1764_v2 = vsel %vm910_vm13, %v6058_v8, %v6068_v40  ;;  %v1930_v7 = vsel %vm9011_vm3, %v7507_v53, %v1924_v10  ;;  %v1931_v8 = vsel %vm9011_vm3, %v7505_v31, %v1925_v6 }
 0xefe   :  { %v6079_v17 = vunpack.i.h.bf16 %v6077_v41  ;;  %v6078_v21 = vunpack.i.l.bf16 %v6077_v41  ;;  %v6072_v9 = vpop.permute.xlu0 %6071  ;;  %1990 = vmatpush1.bf16.msra.mxu1 %v1934_v42  ;;  %v1922_v42 = vsel %vm9013_vm0, %v1766_v48, %v7604_v28 }
 0xeff   :  { %v6074_v37 = vunpack.i.h.bf16 %v6072_v9  ;;  %v6073_v57 = vunpack.i.l.bf16 %v6072_v9  ;;  %1991 = vmatprep.subr.bf16.mxu1 %v9049_v16  ;;  %v1946_v9 = vpack.c.bf16 %v1931_v8, %v1930_v7 }
 0xf01   :  { %v1891_v61 = vsel %vm1515_vm12, %v6074_v37, %v6079_v17  ;;  %v1890_v62 = vsel %vm1515_vm12, %v6073_v57, %v6078_v21  ;;  %v1952_v23 = vpop.permute.xlu1 %1951  ;;  %v1923_v17 = vsel %vm9013_vm0, %v1767_v25, %v7601_v5  ;;  %v1928_v37 = vsel %vm9011_vm3, %v7487_v58, %v1922_v42 }
 0xf02   :  { %v1896_v41 = vsel %vm68_vm10, %v1890_v62, %v1764_v2  ;;  %v1897_v18 = vsel %vm68_vm10, %v1891_v61, %v1765_v33  ;;  %v1950_v38 = vpop.permute.xlu0 %1949  ;;  %v1954_v32 = vrot.slane %v1952_v23, 4  ;;  %1992 = vmatpush1.bf16.msra.mxu1 %v1933_v63  ;;  %v1929_v63 = vsel %vm9011_vm3, %v7489_v12, %v1923_v17 }
 0xf03   :  { %v1953_v40 = vrot.slane %v1950_v38, 4  ;;  %v1902_v57 = vsel %vm9014_vm6, %v7479_v26, %v1896_v41  ;;  %v1903_v49 = vsel %vm9014_vm6, %v7481_v27, %v1897_v18  ;;  %1993 = vmatprep.subr.bf16.mxu1 %v9049_v16  ;;  %v1920_v28 = vsel %vm9013_vm0, %v1764_v2, %v1890_v62 }
 0xf04   :  { %v1932_v13 = vpack.c.bf16 %v1903_v49, %v1902_v57  ;;  %v1958_v29 = vunpack.c.l.bf16 %v1954_v32  ;;  %v1921_v5 = vsel %vm9013_vm0, %v1765_v33, %v1891_v61  ;;  %v1945_v25 = vpack.c.bf16 %v1929_v63, %v1928_v37  ;;  %v7760_v37 = vld [vmem:[#allocation2 + $0x110] sm:$0xff] }
 0xf05   :  { %v1957_v11 = vunpack.c.l.bf16 %v1953_v40  ;;  %v1926_v48 = vsel %vm9011_vm3, %v7479_v26, %v1920_v28  ;;  %v1927_v58 = vsel %vm9011_vm3, %v7481_v27, %v1921_v5  ;;  %v1918_v2 = vsel %vm9013_vm0, %v7548_v15, %v7554_v51 }
 0xf06   :  { %1994 = vmatpush1.bf16.msra.mxu1 %v1932_v13  ;;  %v1944_v12 = vpack.c.bf16 %v1927_v58, %v1926_v48  ;;  %v1919_v33 = vsel %vm9013_vm0, %v7545_v46, %v7551_v56  ;;  %v1916_v27 = vsel %vm9013_vm0, %v7560_v4, %v7542_v14  ;;  %v1917_v61 = vsel %vm9013_vm0, %v7557_v60, %v7539_v22 }
 0xf07   :  { %v6080_v21 = vpack.i.bf16 %v1958_v29, %v1957_v11  ;;  %1997 = vmatprep.subr.bf16.mxu1 %v9049_v16  ;;  %v1943_v26 = vpack.c.bf16 %v1919_v33, %v1918_v2  ;;  %v1942_v15 = vpack.c.bf16 %v1917_v61, %v1916_v27  ;;  %v1914_v46 = vsel %vm9013_vm0, %v7585_v43, %v7571_v34  ;;  %v7739_v29 = vld [vmem:[#allocation2 + $0x100] sm:$0xff]  ;;  %v7741_v11 = vld [vmem:[#allocation2 + $0x108] sm:$0xff] }
 0xf08   :  { %v1915_v56 = vsel %vm9013_vm0, %v7582_v36, %v7536_v47  ;;  %v1940_v22 = vpack.c.bf16 %v7505_v31, %v7507_v53  ;;  %v5232_v51 = vcombine.low %v7474_v35, %v7472_v30  ;;  %v9050_v60 = vmov 0.0   ;;  %v6566_v47 = vld [vmem:[#allocation2 + $0xf0] ss:$8 sps:$4 sm:$0xff]  }
 0xf09   :  { %6081 = vperm.xlu0 %5779, %v6080_v21   ;;  %v1941_v14 = vpack.c.bf16 %v1915_v56, %v1914_v46  ;;  %vm9012_vm3 = vcmask 392192   ;;  %v2081_v30 = vld [vmem:[#allocation5 + $0x1a0] sm:$0xf]  ;;  %v5239_v7 = vcombine.high %v7739_v29, %v7741_v11 }
 0xf0a   :  { %1998 = vmatpush2.bf16.msra.mxu1 %v1946_v9  ;;  %v7732_v35 = vsel %vm152_vm5, %v2081_v30, 0 }
 0xf0b   :  { %1999 = vmatprep.subr.bf16.mxu1 %v9049_v16  ;;  %5242 = vmatprep.mubr.msk.bf16.mxu0 %vm1369_vm8, %v5239_v7 }
 0xf0e   :  { %2000 = vmatpush2.bf16.msra.mxu1 %v1945_v25 }
 0xf0f   :  { %2001 = vmatprep.subr.bf16.mxu1 %v9049_v16 }
 0xf12   :  { %2002 = vmatpush2.bf16.msra.mxu1 %v1944_v12 }
 0xf13   :  { %2003 = vmatprep.subr.bf16.mxu1 %v9049_v16 }
 0xf16   :  { %2004 = vmatpush2.bf16.msra.mxu1 %v1943_v26 }
 0xf17   :  { %2005 = vmatprep.subr.bf16.mxu1 %v9049_v16 }
 0xf1a   :  { %2006 = vmatpush2.bf16.msra.mxu1 %v1942_v15 }
 0xf1b   :  { %2007 = vmatprep.subr.bf16.mxu1 %v9049_v16 }
 0xf1e   :  { %2008 = vmatpush2.bf16.msra.mxu1 %v1941_v14 }
 0xf1f   :  { %2009 = vmatprep.subr.bf16.mxu1 %v9049_v16 }
 0xf22   :  { %2010 = vmatpush2.bf16.msra.mxu1 %v1940_v22 }
 0xf23   :  { %5541 = vmatprep.subr.bf16.mxu1 %v9050_v60 }
 0xf25   :  { %2012 = vmatmul.mubr.bf16.vlgmr.msra.gmra.mxu1 %v5232_v51 }
 0xf26   :  { %5542 = vmatpush3.bf16.msra.mxu1 %v7456_v45  ;;  %5547 = vmatprep.mubr.msk.bf16.mxu1 %vm6757_vm15, %v9050_v60 }
 0xf27   :  { %5543 = vmatprep.subr.bf16.mxu1 %v9050_v60 }
 0xf2a   :  { %5544 = vmatpush3.bf16.msra.mxu1 %v7260_v19 }
 0xf2b   :  { %5545 = vmatprep.subr.bf16.mxu1 %v9050_v60 }
 0xf2e   :  { %5546 = vmatpush3.bf16.msra.mxu1 %v7272_v24 }
 0xf2f   :  { %5551 = vmatprep.subr.bf16.mxu1 %v9050_v60 }
 0xf31   :  { %5548 = vmatmul.mubr.msk.bf16.vlgmr.msra.gmra.mxu1 %vm9012_vm3, %v6566_v47 }
 0xf32   :  { %5553 = vmatprep.mubr.msk.bf16.mxu1 %vm6757_vm15, %v9050_v60  ;;  %5552 = vmatpush3.bf16.msra.mxu1 %v7732_v35 }
 0xf33   :  { %5557 = vmatprep.subr.bf16.mxu1 %v9050_v60 }
 0xf84   :  { %v6082_v34 = vpop.permute.xlu0 %6081 }
 0xfe5   :  { %v2013_v31 = vpop.f32.mrf.mxu1 }
 0xfe6   :  { %v6663_v43 = vadd.low.f32.bf16 %v2013_v31, %v6082_v34 }
 0xfe7   :  { %v2015_v53 = vpop.f32.mrf.mxu1 }
 0xfe9   :  { %v2016_v4 = vpop.f32.mrf.mxu1 }
 0xfea   :  { %v6664_v6 = vadd.high.f32.bf16 %v2016_v4, %v6082_v34 }
 0xfeb   :  { %v2018_v36 = vpop.f32.mrf.mxu1 }
 0xff1   :  { %v2065_v62 = vpop.f32.mrf.mxu1 }
 0xff2   :  { %v2072_v23 = vadd.f32 %v6663_v43, %v2065_v62 }
 0xff3   :  { %v5549_v10 = vpop.f32.mrf.mxu1 }
 0xff4   :  { %v2076_v18 = vmul.f32 0.1, %v2072_v23  ;;  %vm2074_vm3 = vcmp.ge.f32.partialorder %v2072_v23, 0.0 }
 0xff5   :  { %v2068_v41 = vpop.f32.mrf.mxu1 }
 0xff6   :  { %v2073_v38 = vadd.f32 %v6664_v6, %v2068_v41  ;;  %v2078_v57 = vsel %vm2074_vm3, %v2072_v23, %v2076_v18 }
 0xff7   :  { %v5550_v32 = vpop.f32.mrf.mxu1 }
 0xff8   :  { %vm2075_vm0 = vcmp.ge.f32.partialorder %v2073_v38, 0.0  ;;  %v2077_v40 = vmul.f32 0.1, %v2073_v38 }
 0xffa   :  { %v2079_v49 = vsel %vm2075_vm0, %v2073_v38, %v2077_v40  ;;  %vm9051_vm0 = vcmask 244736  }
 0xffb   :  { %v2080_v13 = vpack.c.bf16 %v2079_v49, %v2078_v57  ;;  %vm9052_vm3 = vmmov %vm9051_vm0 }
 0xffd   :  { %5554 = vmatmul.mubr.msk.bf16.vlgmr.msra.gmra.mxu1 %vm309_vm14, %v2080_v13 }
 0xffe   :  { %5573 = vmatprep.mubr.msk.bf16.mxu1 %vm6757_vm15, %v9050_v60 }
0x10bd   :  { %v7746_v8 = vpop.f32.mrf.mxu1 }
0x10bf   :  { %v5555_v42 = vpop.f32.mrf.mxu1 }
0x10c1   :  { %v7748_v17 = vpop.f32.mrf.mxu1 }
0x10c2   :  { %v6090_v21 = vpack.i.bf16 %v7748_v17, %v7746_v8  ;;  %v2204_v23 = vpack.c.bf16 %v7748_v17, %v7746_v8 }
0x10c3   :  { %v5556_v9 = vpop.f32.mrf.mxu1 }
0x10c4   :  { %6091 = vrot.lane.b32.xlu0 %v6090_v21, %s6752_s2  ;;  %6086 = vrot.lane.b32.xlu1 %v6090_v21, %s6760_s5 }
0x10c8   :  { %6101 = vrot.lane.b32.xlu0 %v6090_v21, %s6761_s6  ;;  %6096 = vrot.lane.b32.xlu1 %v6090_v21, %s6754_s29 }
0x10cc   :  { %6111 = vrot.lane.b32.xlu0 %v6090_v21, %s6751_s27  ;;  %6106 = vrot.lane.b32.xlu1 %v6090_v21, %s6758_s30 }
0x10d0   :  { %6121 = vrot.lane.b32.xlu0 %v6090_v21, %s6759_s4  ;;  %6116 = vrot.lane.b32.xlu1 %v6090_v21, %s6753_s28 }
0x10d4   :  { %2214 = vrot.lane.b32.xlu1 %v7760_v37, %s6752_s2  ;;  %2210 = vrot.lane.b32.xlu0 %v7739_v29, %s6752_s2 }
0x10d8   :  { %2212 = vrot.lane.b32.xlu1 %v7741_v11, %s6752_s2 }
0x1136   :  { %v6092_v63 = vpop.permute.xlu0 %6091  ;;  %v6087_v28 = vpop.permute.xlu1 %6086 }
0x1137   :  { %v6094_v5 = vunpack.i.h.bf16 %v6092_v63  ;;  %v6093_v25 = vunpack.i.l.bf16 %v6092_v63  ;;  %v6089_v48 = vunpack.i.h.bf16 %v6087_v28  ;;  %v6088_v58 = vunpack.i.l.bf16 %v6087_v28 }
0x1139   :  { %v2161_v15 = vsel %vm925_vm9, %v6089_v48, %v6094_v5  ;;  %v2160_v46 = vsel %vm925_vm9, %v6088_v58, %v6093_v25 }
0x113a   :  { %v6102_v12 = vpop.permute.xlu0 %6101  ;;  %v6097_v2 = vpop.permute.xlu1 %6096 }
0x113b   :  { %v6104_v33 = vunpack.i.h.bf16 %v6102_v12  ;;  %v6103_v26 = vunpack.i.l.bf16 %v6102_v12  ;;  %v6099_v27 = vunpack.i.h.bf16 %v6097_v2  ;;  %v6098_v61 = vunpack.i.l.bf16 %v6097_v2 }
0x113d   :  { %v2175_v56 = vsel %vm9018_vm4, %v6099_v27, %v6104_v33  ;;  %v2174_v14 = vsel %vm9018_vm4, %v6098_v61, %v6103_v26 }
0x113e   :  { %v6112_v22 = vpop.permute.xlu0 %6111  ;;  %v6107_v51 = vpop.permute.xlu1 %6106  ;;  %v2196_v47 = vsel %vm9017_vm1, %v2160_v46, %v2174_v14  ;;  %v2197_v30 = vsel %vm9017_vm1, %v2161_v15, %v2175_v56  ;;  %v2194_v13 = vsel %vm9016_vm7, %v2174_v14, %v2160_v46  ;;  %v2195_v7 = vsel %vm9016_vm7, %v2175_v56, %v2161_v15 }
0x113f   :  { %v2205_v31 = vpack.c.bf16 %v2197_v30, %v2196_v47  ;;  %v6114_v49 = vunpack.i.h.bf16 %v6112_v22  ;;  %v6113_v42 = vunpack.i.l.bf16 %v6112_v22  ;;  %v6109_v21 = vunpack.i.h.bf16 %v6107_v51 }
0x1140   :  { %v6108_v9 = vunpack.i.l.bf16 %v6107_v51  ;;  %v2203_v48 = vpack.c.bf16 %v2195_v7, %v2194_v13  ;;  %v5238_v51 = vcombine.low %v7739_v29, %v7741_v11  ;;  %v5241_v47 = vcombine.high %v7760_v37, %v7760_v37 }
0x1141   :  { %2259 = vmatpush1.bf16.msra.mxu0 %v2205_v31  ;;  %v2147_v58 = vsel %vm910_vm13, %v6109_v21, %v6114_v49 }
0x1142   :  { %v6122_v53 = vpop.permute.xlu0 %6121  ;;  %v6117_v4 = vpop.permute.xlu1 %6116  ;;  %2260 = vmatprep.subr.bf16.mxu0 %v9049_v16  ;;  %v2146_v12 = vsel %vm910_vm13, %v6108_v9, %v6113_v42 }
0x1143   :  { %v6124_v6 = vunpack.i.h.bf16 %v6122_v53  ;;  %v6123_v41 = vunpack.i.l.bf16 %v6122_v53  ;;  %v6119_v38 = vunpack.i.h.bf16 %v6117_v4  ;;  %v6118_v32 = vunpack.i.l.bf16 %v6117_v4 }
0x1145   :  { %2261 = vmatpush1.bf16.msra.mxu0 %v7136_v55  ;;  %v2189_v28 = vsel %vm9051_vm0, %v6119_v38, %v6124_v6  ;;  %v2188_v5 = vsel %vm9052_vm3, %v6118_v32, %v6123_v41  ;;  %vm9053_vm0 = vcmp.eq.s32.totalorder %v7106_v52, 1  ;;  %v7867_v32 = vld [vmem:[#allocation2 + $0x120] sm:$0xff] }
0x1146   :  { %v2215_v34 = vpop.permute.xlu1 %2214  ;;  %v2211_v36 = vpop.permute.xlu0 %2210  ;;  %2262 = vmatprep.subr.bf16.mxu0 %v9049_v16  ;;  %v2190_v2 = vsel %vm9016_vm7, %v2188_v5, %v2146_v12  ;;  %v2191_v33 = vsel %vm9016_vm7, %v2189_v28, %v2147_v58  ;;  %vm9054_vm3 = vmmov %vm9053_vm0  ;;  %v2198_v15 = vsel %vm9017_vm1, %v2146_v12, %v2188_v5  ;;  %v2199_v46 = vsel %vm9017_vm1, %v2147_v58, %v2189_v28 }
0x1147   :  { %v2218_v43 = vrot.slane %v2215_v34, 4  ;;  %v2216_v62 = vrot.slane %v2211_v36, 4  ;;  %v2192_v26 = vsel %vm9053_vm0, %v7746_v8, %v2190_v2  ;;  %v2193_v27 = vsel %vm9054_vm3, %v7748_v17, %v2191_v33 }
0x1148   :  { %v2202_v61 = vpack.c.bf16 %v2193_v27, %v2192_v26  ;;  %vm9055_vm0 = vcmp.eq.s32.totalorder %v7106_v52, 14 }
0x1149   :  { %v2224_v10 = vunpack.c.l.bf16 %v2218_v43  ;;  %2263 = vmatpush1.bf16.msra.mxu0 %v2204_v23  ;;  %v2222_v40 = vunpack.c.l.bf16 %v2216_v62  ;;  %v2200_v56 = vsel %vm9055_vm0, %v7746_v8, %v2198_v15  ;;  %vm9056_vm3 = vmmov %vm9055_vm0  ;;  %v5240_v8 = vcombine.low %v7760_v37, %v7760_v37 }
0x114a   :  { %v2213_v18 = vpop.permute.xlu1 %2212  ;;  %2264 = vmatprep.subr.bf16.mxu0 %v9049_v16  ;;  %v2201_v14 = vsel %vm9056_vm3, %v7748_v17, %v2199_v46  ;;  %vm9057_vm0 = vcmask 244736  }
0x114b   :  { %v2217_v57 = vrot.slane %v2213_v18, 4  ;;  %2237 = vperm.xlu0 %5779, %v2224_v10   ;;  %v2206_v22 = vpack.c.bf16 %v2201_v14, %v2200_v56  ;;  %vm9058_vm3 = vmmov %vm9057_vm0 }
0x114c   :  { %vm9059_vm6 = vmmov %vm9057_vm0 }
0x114d   :  { %v2223_v63 = vunpack.c.l.bf16 %v2217_v57  ;;  %2265 = vmatpush1.bf16.msra.mxu0 %v7085_v39 }
0x114e   :  { %2266 = vmatprep.subr.bf16.mxu0 %v9049_v16 }
0x114f   :  { %v6125_v25 = vpack.i.bf16 %v2223_v63, %v2222_v40  ;;  %v2481_v40 = vld [vmem:[#allocation2 + $0x130] sm:$0xff] }
0x1151   :  { %6126 = vperm.xlu1 %5753, %v6125_v25   ;;  %2267 = vmatpush1.bf16.msra.mxu0 %v2203_v48 }
0x1152   :  { %2268 = vmatprep.subr.bf16.mxu0 %v9049_v16 }
0x1155   :  { %2269 = vmatpush1.bf16.msra.mxu0 %v7152_v0 }
0x1156   :  { %2270 = vmatprep.subr.bf16.mxu0 %v9049_v16 }
0x1159   :  { %2271 = vmatpush1.bf16.msra.mxu0 %v2202_v61 }
0x115a   :  { %2272 = vmatprep.subr.bf16.mxu0 %v9049_v16 }
0x115d   :  { %2273 = vmatpush1.bf16.msra.mxu0 %v7162_v1 }
0x115e   :  { %2286 = vmatprep.subr.bf16.mxu0 %v9049_v16 }
0x1161   :  { %2287 = vmatpush2.bf16.msra.mxu0 %v2206_v22 }
0x1162   :  { %2288 = vmatprep.subr.bf16.mxu0 %v9049_v16 }
0x1165   :  { %2289 = vmatpush2.bf16.msra.mxu0 %v7124_v20 }
0x1166   :  { %5577 = vmatprep.subr.bf16.mxu0 %v9050_v60 }
0x1168   :  { %2291 = vmatmul.mubr.bf16.vlgmr.msra.gmra.mxu0 %v5238_v51 }
0x1169   :  { %5578 = vmatpush3.bf16.msra.mxu0 %v2204_v23  ;;  %5243 = vmatprep.mubr.msk.bf16.mxu0 %vm1369_vm8, %v5241_v47 }
0x116a   :  { %5579 = vmatprep.subr.bf16.mxu0 %v9050_v60 }
0x116d   :  { %5580 = vmatpush3.bf16.msra.mxu0 %v7085_v39 }
0x116e   :  { %5593 = vmatprep.subr.bf16.mxu0 %v9050_v60 }
0x1170   :  { %2299 = vmatmul.mubr.bf16.gmra.mxu0 %v5240_v8 }
0x1171   :  { %5581 = vmatprep.mubr.msk.bf16.mxu0 %vm6757_vm15, %v9050_v60 }
0x1178   :  { %5582 = vmatmul.mubr.msk.bf16.vlgmr.msra.gmra.mxu0 %vm1369_vm8, %v2481_v40 }
0x1179   :  { %5603 = vmatprep.mubr.msk.bf16.mxu0 %vm6757_vm15, %v9050_v60 }
0x11c6   :  { %v2238_v34 = vpop.permute.xlu0 %2237 }
0x11cc   :  { %v6127_v29 = vpop.permute.xlu1 %6126 }
0x1228   :  { %v2292_v11 = vpop.f32.mrf.mxu0 }
0x1229   :  { %v6666_v43 = vadd.low.f32.bf16 %v2292_v11, %v6127_v29 }
0x122a   :  { %v2294_v17 = vpop.f32.mrf.mxu0 }
0x122b   :  { %v7841_v6 = vmax.f32 %v6666_v43, 0.0 }
0x122c   :  { %v2295_v30 = vpop.f32.mrf.mxu0 }
0x122d   :  { %v6665_v31 = vadd.high.f32.bf16 %v2295_v30, %v6127_v29 }
0x122e   :  { %v2297_v53 = vpop.f32.mrf.mxu0 }
0x122f   :  { %v7833_v4 = vmax.f32 %v6665_v31, 0.0 }
0x1230   :  { %v2300_v36 = vpop.f32.mrf.mxu0 }
0x1231   :  { %v2301_v37 = vadd.f32 %v2300_v36, %v2238_v34  ;;  %2324 = vrot.lane.b32.xlu1 %v7833_v4, %s6751_s27  ;;  %2315 = vrot.lane.b32.xlu0 %v7833_v4, %s6758_s30 }
0x1232   :  { %v2302_v62 = vpop.f32.mrf.mxu0 }
0x1233   :  { %v7839_v23 = vmax.f32 %v2301_v37, 0.0 }
0x1234   :  { %v2303_v10 = vpop.f32.mrf.mxu0 }
0x1235   :  { %2387 = vrot.lane.b32.xlu1 %v7833_v4, %s6759_s4  ;;  %2378 = vrot.lane.b32.xlu0 %v7833_v4, %s6753_s28  ;;  %v6135_v18 = vpack.i.bf16 %v7841_v6, %v7839_v23  ;;  %v6155_v38 = vpack.i.bf16 %v7839_v23, %v7833_v4 }
0x1236   :  { %v2304_v41 = vpop.f32.mrf.mxu0 }
0x1239   :  { %6136 = vrot.lane.b32.xlu1 %v6135_v18, %s6751_s27  ;;  %6131 = vrot.lane.b32.xlu0 %v6135_v18, %s6758_s30 }
0x123d   :  { %6146 = vrot.lane.b32.xlu1 %v6135_v18, %s6759_s4  ;;  %6141 = vrot.lane.b32.xlu0 %v6135_v18, %s6753_s28 }
0x1241   :  { %2343 = vrot.lane.b32.xlu1 %v7841_v6, %s6752_s2  ;;  %2334 = vrot.lane.b32.xlu0 %v7841_v6, %s6760_s5 }
0x1245   :  { %6156 = vrot.lane.b32.xlu1 %v6155_v38, %s6752_s2  ;;  %6151 = vrot.lane.b32.xlu0 %v6155_v38, %s6760_s5 }
0x1249   :  { %6166 = vrot.lane.b32.xlu1 %v6155_v38, %s6761_s6  ;;  %6161 = vrot.lane.b32.xlu0 %v6155_v38, %s6754_s29 }
0x124d   :  { %2364 = vrot.lane.b32.xlu1 %v7841_v6, %s6761_s6  ;;  %2355 = vrot.lane.b32.xlu0 %v7841_v6, %s6754_s29 }
0x1251   :  { %2424 = vrot.lane.b32.xlu0 %v7867_v32, %s6752_s2 }
0x12a3   :  { %v2325_v57 = vpop.permute.xlu1 %2324  ;;  %v2316_v49 = vpop.permute.xlu0 %2315 }
0x12a4   :  { %v2332_v47 = vsel %vm910_vm13, %v2316_v49, %v2325_v57 }
0x12a7   :  { %v2388_v13 = vpop.permute.xlu1 %2387  ;;  %v2379_v7 = vpop.permute.xlu0 %2378 }
0x12a8   :  { %v7875_v26 = vsel %vm9057_vm0, %v2379_v7, %v2388_v13  ;;  %vm9060_vm0 = vcmp.eq.s32.totalorder %v7106_v52, 14 }
0x12a9   :  { %v2410_v29 = vsel %vm9017_vm1, %v2332_v47, %v7875_v26 }
0x12ab   :  { %v6137_v42 = vpop.permute.xlu1 %6136  ;;  %v6132_v21 = vpop.permute.xlu0 %6131 }
0x12ac   :  { %v6139_v9 = vunpack.i.h.bf16 %v6137_v42  ;;  %v6138_v63 = vunpack.i.l.bf16 %v6137_v42  ;;  %v6134_v28 = vunpack.i.h.bf16 %v6132_v21  ;;  %v6133_v5 = vunpack.i.l.bf16 %v6132_v21 }
0x12ae   :  { %v2331_v27 = vsel %vm910_vm13, %v6134_v28, %v6139_v9  ;;  %v2333_v61 = vsel %vm910_vm13, %v6133_v5, %v6138_v63 }
0x12af   :  { %v6147_v25 = vpop.permute.xlu1 %6146  ;;  %v6142_v48 = vpop.permute.xlu0 %6141 }
0x12b0   :  { %v6149_v58 = vunpack.i.h.bf16 %v6147_v25  ;;  %v6148_v12 = vunpack.i.l.bf16 %v6147_v25  ;;  %v6144_v2 = vunpack.i.h.bf16 %v6142_v48  ;;  %v6143_v33 = vunpack.i.l.bf16 %v6142_v48 }
0x12b2   :  { %v2394_v15 = vsel %vm9058_vm3, %v6144_v2, %v6149_v58  ;;  %v2396_v46 = vsel %vm9059_vm6, %v6143_v33, %v6148_v12  ;;  %vm9061_vm6 = vmmov %vm9060_vm0 }
0x12b3   :  { %v2409_v56 = vsel %vm9017_vm1, %v2331_v27, %v2394_v15  ;;  %v2344_v14 = vpop.permute.xlu1 %2343  ;;  %v2335_v22 = vpop.permute.xlu0 %2334  ;;  %v2411_v51 = vsel %vm9017_vm1, %v2333_v61, %v2396_v46  ;;  %vm9062_vm3 = vmmov %vm9060_vm0 }
0x12b4   :  { %v2414_v8 = vsel %vm9060_vm0, %v7839_v23, %v2411_v51  ;;  %v2412_v17 = vsel %vm9061_vm6, %v7841_v6, %v2409_v56  ;;  %v2413_v34 = vsel %vm9062_vm3, %v7833_v4, %v2410_v29  ;;  %v2352_v25 = vsel %vm925_vm9, %v2335_v22, %v2344_v14 }
0x12b5   :  { %v2422_v11 = vpack.c.bf16 %v2414_v8, %v2414_v8  ;;  %v2421_v36 = vpack.c.bf16 %v2413_v34, %v2412_v17  ;;  %v2418_v14 = vpack.c.bf16 %v7833_v4, %v7841_v6  ;;  %v2399_v29 = vsel %vm9016_vm7, %v2396_v46, %v2333_v61 }
0x12b6   :  { %vm9063_vm0 = vcmp.eq.s32.totalorder %v7106_v52, 1 }
0x12b7   :  { %v6157_v30 = vpop.permute.xlu1 %6156  ;;  %v6152_v31 = vpop.permute.xlu0 %6151  ;;  %v2439_v53 = vsel %vm152_vm5, %v2422_v11, 0  ;;  %vm9064_vm6 = vmmov %vm9063_vm0 }
0x12b8   :  { %5558 = vmatpush3.bf16.msra.mxu1 %v2439_v53  ;;  %v6159_v43 = vunpack.i.h.bf16 %v6157_v30  ;;  %v6158_v37 = vunpack.i.l.bf16 %v6157_v30  ;;  %v6154_v62 = vunpack.i.h.bf16 %v6152_v31  ;;  %v6153_v10 = vunpack.i.l.bf16 %v6152_v31  ;;  %vm9065_vm3 = vmmov %vm9063_vm0 }
0x12b9   :  { %5559 = vmatprep.subr.bf16.mxu1 %v9050_v60  ;;  %v2397_v30 = vsel %vm9016_vm7, %v2394_v15, %v2331_v27  ;;  %v2402_v31 = vsel %vm9063_vm0, %v7839_v23, %v2399_v29  ;;  %v2398_v53 = vsel %vm9016_vm7, %v7875_v26, %v2332_v47  ;;  %vm9015_vm0 = vcmask 982016   ;;  %v6571_v47 = vld [vmem:[#allocation5 + $0x1c0] ss:$8 sps:$4 sm:$0xff]  }
0x12ba   :  { %v2354_v13 = vsel %vm925_vm9, %v6154_v62, %v6159_v43  ;;  %v2353_v7 = vsel %vm925_vm9, %v6153_v10, %v6158_v37  ;;  %v2400_v61 = vsel %vm9064_vm6, %v7841_v6, %v2397_v30  ;;  %v2401_v27 = vsel %vm9065_vm3, %v7833_v4, %v2398_v53  ;;  %v6572_v4 = vld [vmem:[#allocation5 + $0x1b0] ss:$8 sps:$4 sm:$0xff]  }
0x12bb   :  { %v6167_v41 = vpop.permute.xlu1 %6166  ;;  %v6162_v18 = vpop.permute.xlu0 %6161  ;;  %v2415_v15 = vpack.c.bf16 %v2401_v27, %v2400_v61  ;;  %vm9066_vm3 = vcmp.eq.s32.totalorder %v6995_v50, 63  ;;  %v9073_v61 = vld [vmem:[#allocation24_spill] sm:$0xff] }
0x12bc   :  { %v6169_v38 = vunpack.i.h.bf16 %v6167_v41  ;;  %v6168_v40 = vunpack.i.l.bf16 %v6167_v41  ;;  %v6164_v57 = vunpack.i.h.bf16 %v6162_v18  ;;  %v6163_v49 = vunpack.i.l.bf16 %v6162_v18  ;;  %5560 = vmatpush3.bf16.msra.mxu1 %v2421_v36 }
0x12bd   :  { %5561 = vmatprep.subr.bf16.mxu1 %v9050_v60 }
0x12be   :  { %v2375_v42 = vsel %vm9018_vm4, %v6164_v57, %v6169_v38  ;;  %v2374_v21 = vsel %vm9018_vm4, %v6163_v49, %v6168_v40 }
0x12bf   :  { %v2365_v9 = vpop.permute.xlu1 %2364  ;;  %v2356_v63 = vpop.permute.xlu0 %2355  ;;  %v2407_v28 = vsel %vm9017_vm1, %v2353_v7, %v2374_v21  ;;  %v2408_v5 = vsel %vm9017_vm1, %v2354_v13, %v2375_v42  ;;  %v2404_v22 = vsel %vm9016_vm7, %v2374_v21, %v2353_v7  ;;  %v2405_v8 = vsel %vm9016_vm7, %v2375_v42, %v2354_v13  ;;  %v2590_v42 = vld [vmem:[#allocation2 + $0x148] sm:$0xff]  ;;  %v2589_v21 = vld [vmem:[#allocation2 + $0x140] sm:$0xff] }
0x12c0   :  { %v2373_v48 = vsel %vm9018_vm4, %v2356_v63, %v2365_v9  ;;  %v2420_v58 = vpack.c.bf16 %v2408_v5, %v2407_v28  ;;  %v2417_v11 = vpack.c.bf16 %v2405_v8, %v2404_v22 }
0x12c1   :  { %v2406_v12 = vsel %vm9017_vm1, %v2352_v25, %v2373_v48  ;;  %v2403_v17 = vsel %vm9016_vm7, %v2373_v48, %v2352_v25  ;;  %vm9078_vm7 = vcmp.eq.s32.totalorder %v6995_v50, 62 }
0x12c2   :  { %5562 = vmatpush3.bf16.msra.mxu1 %v2420_v58  ;;  %v2419_v33 = vpack.c.bf16 %v2406_v12, %v7839_v23  ;;  %v2416_v34 = vpack.c.bf16 %v2403_v17, %v2402_v31  ;;  %v2519_v23 = vpop.f32.mrf.mxu0  ;;  %v9071_v31 = vld [vmem:[#allocation23_spill] sm:$0xff] }
0x12c3   :  { %v2425_v2 = vpop.permute.xlu0 %2424  ;;  %5563 = vmatprep.subr.bf16.mxu1 %v9050_v60 }
0x12c4   :  { %v2426_v56 = vrot.slane %v2425_v2, 4  ;;  %v5583_v6 = vpop.f32.mrf.mxu0 }
0x12c6   :  { %v2428_v51 = vunpack.c.l.bf16 %v2426_v56  ;;  %5564 = vmatpush3.bf16.msra.mxu1 %v2419_v33  ;;  %v2522_v26 = vpop.f32.mrf.mxu0 }
0x12c7   :  { %5565 = vmatprep.subr.bf16.mxu1 %v9050_v60 }
0x12c8   :  { %2431 = vperm.xlu1 %5753, %v2428_v51   ;;  %v5584_v46 = vpop.f32.mrf.mxu0 }
0x12ca   :  { %5566 = vmatpush3.bf16.msra.mxu1 %v2418_v14 }
0x12cb   :  { %5567 = vmatprep.subr.bf16.mxu1 %v9050_v60 }
0x12ce   :  { %5568 = vmatpush3.bf16.msra.mxu1 %v2417_v11 }
0x12cf   :  { %5569 = vmatprep.subr.bf16.mxu1 %v9050_v60 }
0x12d2   :  { %5570 = vmatpush3.bf16.msra.mxu1 %v2416_v34 }
0x12d3   :  { %5571 = vmatprep.subr.bf16.mxu1 %v9050_v60 }
0x12d6   :  { %5572 = vmatpush3.bf16.msra.mxu1 %v2415_v15  ;;  %v5249_v15 = vcombine.low %v2589_v21, %v2590_v42 }
0x12d7   :  { %5585 = vmatprep.subr.bf16.mxu1 %v9050_v60 }
0x12d9   :  { %5574 = vmatmul.mubr.msk.bf16.vlgmr.msra.gmra.mxu1 %vm9015_vm0, %v7867_v32  ;;  %vm9068_vm0 = vmmov %vm9066_vm3 }
0x12da   :  { %5589 = vmatprep.mubr.msk.bf16.mxu1 %vm6757_vm15, %v9050_v60  ;;  %5586 = vmatpush3.bf16.msra.mxu1 %v6571_v47 }
0x12db   :  { %5587 = vmatprep.subr.bf16.mxu1 %v9050_v60 }
0x12de   :  { %5588 = vmatpush3.bf16.msra.mxu1 %v6572_v4 }
0x12df   :  { %5607 = vmatprep.subr.bf16.mxu1 %v9050_v60 }
0x1343   :  { %v2432_v36 = vpop.permute.xlu1 %2431 }
0x1399   :  { %v2475_v43 = vpop.f32.mrf.mxu1 }
0x139a   :  { %v2476_v37 = vadd.f32 %v2475_v43, %v2432_v36 }
0x139b   :  { %v5575_v62 = vpop.f32.mrf.mxu1 }
0x139c   :  { %v2525_v32 = vadd.f32 %v2519_v23, %v2476_v37 }
0x139d   :  { %v2478_v10 = vpop.f32.mrf.mxu1 }
0x139e   :  { %vm2526_vm6 = vcmp.ge.f32.partialorder %v2525_v32, 0.0  ;;  %v2527_v41 = vmul.f32 0.1, %v2525_v32  ;;  %v2769_v10 = vld [vmem:[#allocation2 + $0x160] sm:$0xff] }
0x139f   :  { %v5576_v18 = vpop.f32.mrf.mxu1 }
0x13a0   :  { %v2528_v38 = vsel %vm2526_vm6, %v2525_v32, %v2527_v41  ;;  %vm9067_vm6 = vcmp.eq.s32.totalorder %v6995_v50, 62  ;;  %v2681_v32 = vld [vmem:[#allocation2 + $0x150] sm:$0xff] }
0x13a1   :  { %v2529_v40 = vpack.c.bf16 %v2528_v38, %v2528_v38 }
0x13a3   :  { %5590 = vmatmul.mubr.msk.bf16.vlgmr.msra.gmra.mxu1 %vm1369_vm8, %v2529_v40 }
0x13a4   :  { %5617 = vmatprep.mubr.msk.bf16.mxu1 %vm6757_vm15, %v9050_v60 }
0x1463   :  { %v2583_v57 = vpop.f32.mrf.mxu1 }
0x1464   :  { %2597 = vrot.lane.b32.xlu1 %v2583_v57, %s6753_s28  ;;  %2591 = vrot.lane.b32.xlu0 %v2583_v57, %s6751_s27  ;;  %v2607_v29 = vpack.c.bf16 %v2583_v57, %v6979_v44 }
0x1465   :  { %v5591_v49 = vpop.f32.mrf.mxu1 }
0x1467   :  { %v2586_v13 = vpop.f32.mrf.mxu1 }
0x1468   :  { %2595 = vrot.lane.b32.xlu1 %v2583_v57, %s6754_s29  ;;  %2593 = vrot.lane.b32.xlu0 %v2583_v57, %s6752_s2 }
0x1469   :  { %v5592_v7 = vpop.f32.mrf.mxu1 }
0x146c   :  { %2614 = vrot.lane.b32.xlu1 %v2590_v42, %s6752_s2  ;;  %2612 = vrot.lane.b32.xlu0 %v2589_v21, %s6752_s2 }
0x14d6   :  { %v2598_v9 = vpop.permute.xlu1 %2597  ;;  %v2592_v63 = vpop.permute.xlu0 %2591 }
0x14d7   :  { %v2603_v28 = vsel %vm9066_vm3, %v2592_v63, %v2598_v9  ;;  %vm9069_vm3 = vcmp.eq.s32.totalorder %v6995_v50, 0 }
0x14d8   :  { %v2604_v5 = vsel %vm9067_vm6, %v2583_v57, %v2603_v28  ;;  %vm9072_vm6 = vcmp.eq.s32.totalorder %v6995_v50, 1 }
0x14d9   :  { %v2609_v25 = vpack.c.bf16 %v2604_v5, %v7004_v54 }
0x14da   :  { %v2596_v48 = vpop.permute.xlu1 %2595  ;;  %v2594_v58 = vpop.permute.xlu0 %2593 }
0x14db   :  { %v2602_v12 = vsel %vm9068_vm0, %v2594_v58, %v2596_v48  ;;  %5594 = vmatpush3.bf16.msra.mxu0 %v2609_v25  ;;  %v2601_v11 = vsel %vm9069_vm3, %v2596_v48, %v2594_v58  ;;  %vm9070_vm0 = vmmov %vm9069_vm3  ;;  %vm9074_vm3 = vcmask 654336  }
0x14dc   :  { %v2608_v2 = vpack.c.bf16 %v2602_v12, %v7011_v59  ;;  %5595 = vmatprep.subr.bf16.mxu0 %v9050_v60  ;;  %v2599_v17 = vsel %vm9070_vm0, %v2598_v9, %v2592_v63  ;;  %v2606_v53 = vpack.c.bf16 %v2601_v11, %v9071_v31  ;;  %vm9075_vm0 = vcmask 130048  }
0x14dd   :  { %v2600_v34 = vsel %vm9072_vm6, %v2583_v57, %v2599_v17  ;;  %vm9076_vm6 = vcmp.eq.s32.totalorder %v6995_v50, 63 }
0x14de   :  { %v2615_v33 = vpop.permute.xlu1 %2614  ;;  %v2613_v56 = vpop.permute.xlu0 %2612  ;;  %v2605_v27 = vpack.c.bf16 %v2600_v34, %v9073_v61 }
0x14df   :  { %v2617_v51 = vrot.slane %v2615_v33, 4  ;;  %v2616_v14 = vrot.slane %v2613_v56, 4  ;;  %5596 = vmatpush3.bf16.msra.mxu0 %v2608_v2 }
0x14e0   :  { %5597 = vmatprep.subr.bf16.mxu0 %v9050_v60 }
0x14e1   :  { %v2621_v22 = vunpack.c.l.bf16 %v2617_v51  ;;  %v2620_v8 = vunpack.c.l.bf16 %v2616_v14 }
0x14e3   :  { %v6170_v30 = vpack.i.bf16 %v2621_v22, %v2620_v8  ;;  %5598 = vmatpush3.bf16.msra.mxu0 %v2607_v29 }
0x14e4   :  { %5599 = vmatprep.subr.bf16.mxu0 %v9050_v60 }
0x14e5   :  { %6171 = vperm.xlu0 %5779, %v6170_v30  }
0x14e7   :  { %5600 = vmatpush3.bf16.msra.mxu0 %v2606_v53 }
0x14e8   :  { %5601 = vmatprep.subr.bf16.mxu0 %v9050_v60 }
0x14eb   :  { %5602 = vmatpush3.bf16.msra.mxu0 %v2605_v27  ;;  %v6576_v27 = vld [vmem:[#allocation5 + $0x244] ss:$8 sps:$4 sm:$0xff]  }
0x14ec   :  { %5621 = vmatprep.subr.bf16.mxu0 %v9050_v60 }
0x14ee   :  { %5604 = vmatmul.mubr.msk.bf16.vlgmr.msra.gmra.mxu0 %vm9074_vm3, %v5249_v15  ;;  %vm9077_vm3 = vmmov %vm9076_vm6 }
0x14ef   :  { %5622 = vmatpush3.bf16.msra.mxu0 %v2607_v29  ;;  %5623 = vmatprep.mubr.msk.bf16.mxu0 %vm6757_vm15, %v9050_v60  ;;  %vm9080_vm1 = vmmov %vm9077_vm3 }
0x14f6   :  { %5624 = vmatmul.mubr.msk.bf16.vlgmr.msra.gmra.mxu0 %vm9075_vm0, %v2769_v10  ;;  %vm9079_vm0 = vmmov %vm9078_vm7 }
0x14f7   :  { %3048 = vmatprep.mubr.bf16.mxu0 %v9049_v16 }
0x1560   :  { %v6172_v23 = vpop.permute.xlu0 %6171 }
0x15ae   :  { %v2672_v6 = vpop.f32.mrf.mxu0 }
0x15af   :  { %v6667_v46 = vadd.low.f32.bf16 %v2672_v6, %v6172_v23  ;;  %v6579_v6 = vld [vmem:[#allocation5 + $0x234] ss:$8 sps:$4 sm:$0xff]  }
0x15b0   :  { %v5605_v26 = vpop.f32.mrf.mxu0 }
0x15b1   :  { %v2679_v43 = vmax.f32 %v6667_v46, 0.0  ;;  %v6577_v26 = vld [vmem:[#allocation5 + $0x230] ss:$8 sps:$4 sm:$0xff]   ;;  %v6582_v46 = vld [vmem:[#allocation5 + $0x224] ss:$8 sps:$4 sm:$0xff]  }
0x15b2   :  { %v2675_v47 = vpop.f32.mrf.mxu0 }
0x15b3   :  { %v6668_v4 = vadd.high.f32.bf16 %v2675_v47, %v6172_v23  ;;  %v6574_v23 = vld [vmem:[#allocation5 + $0x240] ss:$8 sps:$4 sm:$0xff]  }
0x15b4   :  { %v5606_v36 = vpop.f32.mrf.mxu0  ;;  %v6580_v47 = vld [vmem:[#allocation5 + $0x220] ss:$8 sps:$4 sm:$0xff]  }
0x15b5   :  { %v2680_v37 = vmax.f32 %v6668_v4, 0.0  ;;  %v6585_v4 = vld [vmem:[#allocation5 + $0x214] ss:$8 sps:$4 sm:$0xff]   ;;  %v6583_v36 = vld [vmem:[#allocation5 + $0x210] ss:$8 sps:$4 sm:$0xff]  }
0x15b6   :  { %v2807_v10 = vpop.f32.mrf.mxu0 }
0x15b7   :  { %v6180_v62 = vpack.i.bf16 %v2680_v37, %v2679_v43  ;;  %v2712_v22 = vpack.c.bf16 %v2680_v37, %v2679_v43 }
0x15b9   :  { %6181 = vrot.lane.b32.xlu0 %v6180_v62, %s6753_s28  ;;  %6176 = vrot.lane.b32.xlu1 %v6180_v62, %s6751_s27 }
0x15bd   :  { %6191 = vrot.lane.b32.xlu0 %v6180_v62, %s6754_s29  ;;  %6186 = vrot.lane.b32.xlu1 %v6180_v62, %s6752_s2  ;;  %v6591_v62 = vld [vmem:[#allocation5 + $0x1f4] ss:$8 sps:$4 sm:$0xff]  }
0x15c1   :  { %2716 = vrot.lane.b32.xlu1 %v2681_v32, %s6752_s2 }
0x162b   :  { %v6182_v41 = vpop.permute.xlu0 %6181  ;;  %v6177_v18 = vpop.permute.xlu1 %6176 }
0x162c   :  { %v6184_v38 = vunpack.i.h.bf16 %v6182_v41  ;;  %v6183_v40 = vunpack.i.l.bf16 %v6182_v41  ;;  %v6179_v57 = vunpack.i.h.bf16 %v6177_v18  ;;  %v6178_v49 = vunpack.i.l.bf16 %v6177_v18  ;;  %v5625_v41 = vpop.f32.mrf.mxu0 }
0x162e   :  { %v2707_v13 = vsel %vm9076_vm6, %v6179_v57, %v6184_v38  ;;  %v2706_v7 = vsel %vm9077_vm3, %v6178_v49, %v6183_v40  ;;  %vm9081_vm6 = vmmov %vm9080_vm1  ;;  %v2810_v18 = vpop.f32.mrf.mxu0 }
0x162f   :  { %v6192_v42 = vpop.permute.xlu0 %6191  ;;  %v6187_v21 = vpop.permute.xlu1 %6186  ;;  %v2708_v9 = vsel %vm9078_vm7, %v2679_v43, %v2706_v7  ;;  %v2709_v63 = vsel %vm9079_vm0, %v2680_v37, %v2707_v13  ;;  %vm9082_vm7 = vcmp.eq.s32.totalorder %v6995_v50, 0  ;;  %v6595_v13 = vld [vmem:[#allocation5 + $0x1d0] ss:$8 sps:$4 sm:$0xff]  }
0x1630   :  { %v6194_v28 = vunpack.i.h.bf16 %v6192_v42  ;;  %v6193_v5 = vunpack.i.l.bf16 %v6192_v42  ;;  %v6189_v25 = vunpack.i.h.bf16 %v6187_v21  ;;  %v6188_v48 = vunpack.i.l.bf16 %v6187_v21 }
0x1631   :  { %v2714_v58 = vpack.c.bf16 %v2709_v63, %v2708_v9 }
0x1632   :  { %v2705_v12 = vsel %vm9080_vm1, %v6189_v25, %v6194_v28  ;;  %v2704_v2 = vsel %vm9081_vm6, %v6188_v48, %v6193_v5  ;;  %v2703_v8 = vsel %vm9082_vm7, %v6194_v28, %v6189_v25  ;;  %vm9083_vm1 = vmmov %vm9082_vm7  ;;  %vm9086_vm6 = vcmp.eq.s32.totalorder %v6995_v50, 1 }
0x1633   :  { %5608 = vmatpush3.bf16.msra.mxu1 %v2714_v58  ;;  %v2717_v33 = vpop.permute.xlu1 %2716  ;;  %v2713_v56 = vpack.c.bf16 %v2705_v12, %v2704_v2  ;;  %v2702_v29 = vsel %vm9083_vm1, %v6193_v5, %v6188_v48  ;;  %vm9084_vm3 = vmmov %vm9083_vm1  ;;  %vm9088_vm7 = vcmask 654336  }
0x1634   :  { %v2718_v51 = vrot.slane %v2717_v33, 4  ;;  %5609 = vmatprep.subr.bf16.mxu1 %v9050_v60  ;;  %v2699_v11 = vsel %vm9084_vm3, %v6184_v38, %v6179_v57  ;;  %vm9085_vm0 = vmmov %vm9083_vm1  ;;  %v2711_v30 = vpack.c.bf16 %v2703_v8, %v2702_v29  ;;  %v5626_v38 = vpop.f32.mrf.mxu0  ;;  %v6592_v57 = vld [vmem:[#allocation5 + $0x1e0] ss:$8 sps:$4 sm:$0xff]  }
0x1635   :  { %v2698_v17 = vsel %vm9085_vm0, %v6183_v40, %v6178_v49  ;;  %vm9087_vm4 = vmmov %vm9086_vm6  ;;  %v6594_v40 = vld [vmem:[#allocation5 + $0x1e4] ss:$8 sps:$4 sm:$0xff]   ;;  %v6597_v49 = vld [vmem:[#allocation5 + $0x1d4] ss:$8 sps:$4 sm:$0xff]  }
0x1636   :  { %v2720_v14 = vunpack.c.l.bf16 %v2718_v51  ;;  %v2700_v53 = vsel %vm9086_vm6, %v2679_v43, %v2698_v17  ;;  %v2701_v34 = vsel %vm9087_vm4, %v2680_v37, %v2699_v11  ;;  %v6588_v43 = vld [vmem:[#allocation5 + $0x204] ss:$8 sps:$4 sm:$0xff]   ;;  %v6586_v37 = vld [vmem:[#allocation5 + $0x200] ss:$8 sps:$4 sm:$0xff]  }
0x1637   :  { %5610 = vmatpush3.bf16.msra.mxu1 %v2713_v56  ;;  %v2710_v15 = vpack.c.bf16 %v2701_v34, %v2700_v53  ;;  %v6628_v56 = vld [vmem:[%s8945_s0 + $0x8] sm:$0xff]  ;;  %v2955_v11 = vld [vmem:[#allocation2 + $0x170] sm:$0xff] }
0x1638   :  { %2723 = vperm.xlu0 %5779, %v2720_v14   ;;  %5611 = vmatprep.subr.bf16.mxu1 %v9050_v60 }
0x163b   :  { %5612 = vmatpush3.bf16.msra.mxu1 %v2712_v22  ;;  %v6629_v22 = vld [vmem:[%s8945_s0] sm:$0xff] }
0x163c   :  { %5613 = vmatprep.subr.bf16.mxu1 %v9050_v60 }
0x163f   :  { %5614 = vmatpush3.bf16.msra.mxu1 %v2711_v30 }
0x1640   :  { %5615 = vmatprep.subr.bf16.mxu1 %v9050_v60 }
0x1643   :  { %5616 = vmatpush3.bf16.msra.mxu1 %v2710_v15 }
0x1644   :  { %2914 = vmatprep.subr.bf16.mxu1 %v6576_v27 }
0x1646   :  { %5618 = vmatmul.mubr.msk.bf16.vlgmr.msra.gmra.mxu1 %vm9088_vm7, %v2681_v32  ;;  %v6589_v32 = vld [vmem:[#allocation5 + $0x1f0] ss:$8 sps:$4 sm:$0xff]  }
0x1647   :  { %2915 = vmatpush1.bf16.msra.mxu1 %v6574_v23  ;;  %2946 = vmatprep.mubr.bf16.mxu1 %v9049_v16  ;;  %v9089_v23 = vld [vmem:[#allocation11_spill] sm:$0xff] }
0x1648   :  { %2916 = vmatprep.subr.bf16.mxu1 %v6579_v6  ;;  %vm9090_vm1 = vcmp.lt.s32.totalorder %v9089_v23, 126  ;;  %vm9092_vm0 = vcmp.lt.s32.totalorder %v9089_v23, 2  ;;  %vm9094_vm7 = vcmp.eq.s32.totalorder %v9089_v23, 127 }
0x1649   :  { %vm9091_vm3 = vmmov %vm9090_vm1 }
0x164a   :  { %vm9093_vm6 = vmmov %vm9092_vm0 }
0x164b   :  { %2917 = vmatpush1.bf16.msra.mxu1 %v6577_v26 }
0x164c   :  { %2918 = vmatprep.subr.bf16.mxu1 %v6582_v46 }
0x164f   :  { %2919 = vmatpush1.bf16.msra.mxu1 %v6580_v47 }
0x1650   :  { %2920 = vmatprep.subr.bf16.mxu1 %v6585_v4 }
0x1653   :  { %2921 = vmatpush1.bf16.msra.mxu1 %v6583_v36 }
0x1654   :  { %2922 = vmatprep.subr.bf16.mxu1 %v6588_v43 }
0x1657   :  { %2923 = vmatpush1.bf16.msra.mxu1 %v6586_v37  ;;  %v9095_v37 = vld [vmem:[#allocation12_spill] sm:$0xff] }
0x1658   :  { %2924 = vmatprep.subr.bf16.mxu1 %v6591_v62 }
0x165b   :  { %2925 = vmatpush1.bf16.msra.mxu1 %v6589_v32 }
0x165c   :  { %2926 = vmatprep.subr.bf16.mxu1 %v6594_v40 }
0x165f   :  { %2927 = vmatpush1.bf16.msra.mxu1 %v6592_v57 }
0x1660   :  { %2928 = vmatprep.subr.bf16.mxu1 %v6597_v49 }
0x1663   :  { %2929 = vmatpush1.bf16.msra.mxu1 %v6595_v13  ;;  %v9101_v13 = vld [vmem:[#allocation13_spill] sm:$0xff] }
0x16b3   :  { %v2724_v7 = vpop.permute.xlu0 %2723 }
0x1706   :  { %v2763_v42 = vpop.f32.mrf.mxu1 }
0x1707   :  { %v2764_v21 = vadd.f32 %v2763_v42, %v2724_v7  ;;  %v9102_v42 = vld [vmem:[#allocation14_spill] sm:$0xff] }
0x1708   :  { %v5619_v9 = vpop.f32.mrf.mxu1 }
0x1709   :  { %v2813_v63 = vadd.f32 %v2807_v10, %v2764_v21 }
0x170a   :  { %v2766_v28 = vpop.f32.mrf.mxu1 }
0x170b   :  { %vm2814_vm4 = vcmp.ge.f32.partialorder %v2813_v63, 0.0  ;;  %v2815_v5 = vmul.f32 0.1, %v2813_v63 }
0x170c   :  { %v5620_v25 = vpop.f32.mrf.mxu1 }
0x170d   :  { %v2816_v48 = vsel %vm2814_vm4, %v2813_v63, %v2815_v5  ;;  %vm9096_vm4 = vcmp.eq.s32.totalorder %v9095_v37, 127 }
0x170e   :  { %v2817_v58 = vpack.c.bf16 %v2816_v48, %v2816_v48 }
0x1710   :  { %2947 = vmatmul.mubr.bf16.vlgmr.msra.gmra.mxu1 %v2817_v58  ;;  %v9107_v58 = vld [vmem:[#allocation15_spill] sm:$0xff] }
0x1711   :  { %3199 = vmatprep.mubr.bf16.mxu1 %v9049_v16 }
0x17d0   :  { %v8022_v12 = vpop.f32.mrf.mxu1 }
0x17d1   :  { %v2996_v8 = vpack.c.bf16 %v8022_v12, %v6629_v22 }
0x17d2   :  { %v2950_v2 = vpop.f32.mrf.mxu1 }
0x17d3   :  { %v6200_v33 = vpack.i.bf16 %v2950_v2, %v8022_v12  ;;  %v2997_v51 = vpack.c.bf16 %v2950_v2, %v6628_v56 }
0x17d4   :  { %v2952_v14 = vpop.f32.mrf.mxu1 }
0x17d5   :  { %6201 = vrot.lane.b32.xlu0 %v6200_v33, %s6753_s28  ;;  %6196 = vrot.lane.b32.xlu1 %v6200_v33, %s6751_s27  ;;  %v9108_v14 = vld [vmem:[#allocation16_spill] sm:$0xff] }
0x17d6   :  { %3181 = vmatprep.subr.bf16.mxu1 %v2997_v51  ;;  %v2953_v29 = vpop.f32.mrf.mxu1 }
0x17d7   :  { %3182 = vmatpush1.bf16.msra.mxu1 %v2996_v8 }
0x17d9   :  { %6211 = vrot.lane.b32.xlu0 %v6200_v33, %s6754_s29  ;;  %6206 = vrot.lane.b32.xlu1 %v6200_v33, %s6752_s2 }
0x17dd   :  { %3003 = vrot.lane.b32.xlu1 %v2955_v11, %s6752_s2 }
0x1847   :  { %v6202_v17 = vpop.permute.xlu0 %6201  ;;  %v6197_v30 = vpop.permute.xlu1 %6196 }
0x1848   :  { %v6204_v53 = vunpack.i.h.bf16 %v6202_v17  ;;  %v6203_v34 = vunpack.i.l.bf16 %v6202_v17  ;;  %v6199_v27 = vunpack.i.h.bf16 %v6197_v30  ;;  %v6198_v15 = vunpack.i.l.bf16 %v6197_v30  ;;  %v9111_v30 = vld [vmem:[#allocation18_spill] sm:$0xff] }
0x184a   :  { %v2978_v6 = vsel %vm9090_vm1, %v6203_v34, %v6204_v53  ;;  %v2979_v26 = vsel %vm9091_vm3, %v6204_v53, %v6203_v34  ;;  %v2960_v46 = vsel %vm9092_vm0, %v6198_v15, %v6199_v27  ;;  %v2961_v47 = vsel %vm9093_vm6, %v6199_v27, %v6198_v15 }
0x184b   :  { %v2988_v4 = vsel %vm9094_vm7, %v2961_v47, %v2978_v6  ;;  %v6212_v36 = vpop.permute.xlu0 %6211  ;;  %v6207_v43 = vpop.permute.xlu1 %6206  ;;  %v2989_v62 = vsel %vm9096_vm4, %v2960_v46, %v2979_v26  ;;  %vm9097_vm1 = vcmp.eq.s32.totalorder %v9095_v37, 126  ;;  %vm9098_vm3 = vcmp.eq.s32.totalorder %v9089_v23, 126 }
0x184c   :  { %v6214_v32 = vunpack.i.h.bf16 %v6212_v36  ;;  %v6213_v10 = vunpack.i.l.bf16 %v6212_v36  ;;  %v6209_v41 = vunpack.i.h.bf16 %v6207_v43  ;;  %v6208_v18 = vunpack.i.l.bf16 %v6207_v43  ;;  %v9116_v43 = vld [vmem:[#allocation17_spill] sm:$0xff] }
0x184d   :  { %v2991_v38 = vsel %vm9097_vm1, %v2950_v2, %v2989_v62  ;;  %v2990_v40 = vsel %vm9098_vm3, %v8022_v12, %v2988_v4  ;;  %vm9099_vm0 = vcmp.lt.s32.totalorder %v9089_v23, 127  ;;  %vm9100_vm6 = vcmp.lt.s32.totalorder %v9089_v23, 1  ;;  %v9115_v4 = vld [vmem:[#allocation20_spill] sm:$0xff] }
0x184e   :  { %v2972_v57 = vsel %vm9099_vm0, %v6213_v10, %v6214_v32  ;;  %v2967_v49 = vsel %vm9100_vm6, %v6209_v41, %v6208_v18  ;;  %v3001_v7 = vpack.c.bf16 %v2991_v38, %v9101_v13  ;;  %v3000_v21 = vpack.c.bf16 %v2990_v40, %v9102_v42  ;;  %vm9103_vm7 = vmmov %vm9100_vm6  ;;  %v3163_v40 = vld [vmem:[#allocation2 + $0x190] sm:$0xff] }
0x184f   :  { %v3004_v9 = vpop.permute.xlu1 %3003  ;;  %v2966_v63 = vsel %vm9103_vm7, %v6208_v18, %v6209_v41  ;;  %vm9104_vm4 = vmmov %vm9099_vm0  ;;  %vm9105_vm1 = vcmp.eq.s32.totalorder %v9095_v37, 127  ;;  %vm9106_vm3 = vcmp.eq.s32.totalorder %v9089_v23, 127  ;;  %vm9109_vm0 = vcmp.eq.s32.totalorder %v9095_v37, 0 }
0x1850   :  { %v2973_v28 = vsel %vm9104_vm4, %v6214_v32, %v6213_v10  ;;  %v3005_v5 = vrot.slane %v3004_v9, 4  ;;  %3022 = vmatprep.subr.bf16.mxu0 %v3001_v7  ;;  %v2986_v48 = vsel %vm9106_vm3, %v2967_v49, %v2972_v57  ;;  %vm9110_vm6 = vmmov %vm9109_vm0  ;;  %vm9112_vm7 = vcmp.eq.s32.totalorder %v9089_v23, 0  ;;  %v8110_v7 = vld [vmem:[#allocation2 + $0x1e0] sm:$0xff] }
0x1851   :  { %v2987_v25 = vsel %vm9105_vm1, %v2966_v63, %v2973_v28  ;;  %3023 = vmatpush1.bf16.msra.mxu0 %v3000_v21  ;;  %v2998_v22 = vpack.c.bf16 %v2986_v48, %v9108_v14  ;;  %v2985_v29 = vsel %vm9109_vm0, %v2973_v28, %v2966_v63  ;;  %v2981_v17 = vsel %vm9110_vm6, %v2979_v26, %v2960_v46  ;;  %vm9113_vm4 = vmmov %vm9112_vm7  ;;  %v9118_v46 = vld [vmem:[#allocation19_spill] sm:$0xff]  ;;  %v8114_v21 = vld [vmem:[#allocation2 + $0x1d0] sm:$0xff] }
0x1852   :  { %v2999_v33 = vpack.c.bf16 %v2987_v25, %v9107_v58  ;;  %v3007_v56 = vunpack.c.l.bf16 %v3005_v5  ;;  %v2995_v53 = vpack.c.bf16 %v2985_v29, %v9111_v30  ;;  %v2984_v34 = vsel %vm9112_vm7, %v2972_v57, %v2967_v49  ;;  %v8102_v57 = vld [vmem:[#allocation2 + $0x1a0] sm:$0xff]  ;;  %v8106_v49 = vld [vmem:[#allocation2 + $0x1f0] sm:$0xff] }
0x1853   :  { %v2980_v27 = vsel %vm9113_vm4, %v2978_v6, %v2961_v47  ;;  %vm9114_vm1 = vcmp.eq.s32.totalorder %v9095_v37, 1  ;;  %v2994_v36 = vpack.c.bf16 %v2984_v34, %v9115_v4  ;;  %vm9117_vm3 = vcmp.eq.s32.totalorder %v9089_v23, 1 }
0x1854   :  { %3024 = vmatprep.subr.bf16.mxu0 %v2999_v33  ;;  %3010 = vperm.xlu0 %5779, %v3007_v56   ;;  %v2983_v15 = vsel %vm9114_vm1, %v2950_v2, %v2981_v17  ;;  %v2982_v26 = vsel %vm9117_vm3, %v8022_v12, %v2980_v27  ;;  %vm9119_vm0 = vcmask 654336   ;;  %vm9120_vm6 = vcmask 130048  }
0x1855   :  { %3025 = vmatpush1.bf16.msra.mxu0 %v2998_v22  ;;  %v2992_v62 = vpack.c.bf16 %v2982_v26, %v9118_v46  ;;  %5272 = vmatmul.mubr.msk.bf16.vlgmr.msra.gmra.mxu1 %vm9120_vm6, %v3163_v40  ;;  %vm9121_vm7 = vcmp.lt.s32.totalorder %v9089_v23, 126  ;;  %vm9123_vm1 = vcmp.lt.s32.totalorder %v9089_v23, 2  ;;  %vm9126_vm6 = vcmp.eq.s32.totalorder %v9089_v23, 127 }
0x1856   :  { %3026 = vmatprep.subr.bf16.mxu0 %v2997_v51  ;;  %v2993_v51 = vpack.c.bf16 %v2983_v15, %v9116_v43  ;;  %3337 = vmatprep.mubr.bf16.mxu1 %v9049_v16  ;;  %vm9122_vm4 = vmmov %vm9121_vm7 }
0x1857   :  { %vm9124_vm3 = vmmov %vm9123_vm1 }
0x1859   :  { %3027 = vmatpush1.bf16.msra.mxu0 %v2996_v8 }
0x185a   :  { %3028 = vmatprep.subr.bf16.mxu0 %v2995_v53 }
0x185d   :  { %3029 = vmatpush1.bf16.msra.mxu0 %v2994_v36 }
0x185e   :  { %3030 = vmatprep.subr.bf16.mxu0 %v2993_v51 }
0x1861   :  { %3031 = vmatpush1.bf16.msra.mxu0 %v2992_v62 }
0x1864   :  { %5269 = vmatmul.mubr.msk.bf16.vlgmr.msra.gmra.mxu0 %vm9119_vm0, %v2955_v11  ;;  %v8098_v11 = vld [vmem:[#allocation2 + $0x180] sm:$0xff]  ;;  %vm9125_vm0 = vcmp.eq.s32.totalorder %v9095_v37, 127 }
0x1865   :  { %3154 = vmatprep.mubr.bf16.mxu0 %v9049_v16 }
0x18cf   :  { %v3011_v8 = vpop.permute.xlu0 %3010 }
0x1924   :  { %v3050_v2 = vpop.f32.mrf.mxu0 }
0x1925   :  { %v3051_v6 = vadd.f32 %v3050_v2, %v3011_v8 }
0x1926   :  { %v3052_v47 = vpop.f32.mrf.mxu0 }
0x1927   :  { %v3053_v32 = vadd.f32 %v3052_v47, %v3011_v8  ;;  %v8089_v41 = vmax.f32 %v3051_v6, 0.0 }
0x1928   :  { %v3054_v10 = vpop.f32.mrf.mxu0 }
0x1929   :  { %v3058_v18 = vmax.f32 %v3053_v32, 0.0 }
0x192a   :  { %v3055_v38 = vpop.f32.mrf.mxu0 }
0x192b   :  { %v6220_v12 = vpack.i.bf16 %v3058_v18, %v8089_v41 }
0x192d   :  { %6221 = vrot.lane.b32.xlu0 %v6220_v12, %s6753_s28  ;;  %6216 = vrot.lane.b32.xlu1 %v6220_v12, %s6751_s27 }
0x1931   :  { %6231 = vrot.lane.b32.xlu0 %v6220_v12, %s6754_s29  ;;  %6226 = vrot.lane.b32.xlu1 %v6220_v12, %s6752_s2 }
0x1935   :  { %3103 = vrot.lane.b32.xlu1 %v8098_v11, %s6752_s2 }
0x1939   :  { %3220 = vrot.lane.b32.xlu1 %v8102_v57, %s6752_s2 }
0x193d   :  { %3425 = vrot.lane.b32.xlu1 %v8106_v49, %s6752_s2 }
0x1941   :  { %3421 = vrot.lane.b32.xlu1 %v8110_v7, %s6752_s2 }
0x1945   :  { %3417 = vrot.lane.b32.xlu1 %v8114_v21, %s6752_s2 }
0x199f   :  { %v6222_v9 = vpop.permute.xlu0 %6221  ;;  %v6217_v63 = vpop.permute.xlu1 %6216 }
0x19a0   :  { %v6224_v28 = vunpack.i.h.bf16 %v6222_v9  ;;  %v6223_v5 = vunpack.i.l.bf16 %v6222_v9  ;;  %v6219_v25 = vunpack.i.h.bf16 %v6217_v63  ;;  %v6218_v48 = vunpack.i.l.bf16 %v6217_v63 }
0x19a2   :  { %v3082_v33 = vsel %vm9121_vm7, %v6223_v5, %v6224_v28  ;;  %v3083_v56 = vsel %vm9122_vm4, %v6224_v28, %v6223_v5  ;;  %v3064_v22 = vsel %vm9123_vm1, %v6218_v48, %v6219_v25  ;;  %v3065_v29 = vsel %vm9124_vm3, %v6219_v25, %v6218_v48 }
0x19a3   :  { %v6232_v17 = vpop.permute.xlu0 %6231  ;;  %v6227_v53 = vpop.permute.xlu1 %6226  ;;  %v3093_v34 = vsel %vm9125_vm0, %v3064_v22, %v3083_v56  ;;  %v3092_v27 = vsel %vm9126_vm6, %v3065_v29, %v3082_v33  ;;  %vm9127_vm7 = vcmp.eq.s32.totalorder %v9095_v37, 126  ;;  %vm9128_vm4 = vcmp.eq.s32.totalorder %v9089_v23, 126 }
0x19a4   :  { %v6234_v15 = vunpack.i.h.bf16 %v6232_v17  ;;  %v6233_v36 = vunpack.i.l.bf16 %v6232_v17  ;;  %v6229_v51 = vunpack.i.h.bf16 %v6227_v53  ;;  %v6228_v26 = vunpack.i.l.bf16 %v6227_v53 }
0x19a5   :  { %v3095_v62 = vsel %vm9127_vm7, %v3058_v18, %v3093_v34  ;;  %v3094_v8 = vsel %vm9128_vm4, %v8089_v41, %v3092_v27  ;;  %vm9129_vm1 = vcmp.lt.s32.totalorder %v9089_v23, 127  ;;  %vm9130_vm3 = vcmp.lt.s32.totalorder %v9089_v23, 1 }
0x19a6   :  { %v3076_v2 = vsel %vm9129_vm1, %v6233_v36, %v6234_v15  ;;  %v3071_v6 = vsel %vm9130_vm3, %v6229_v51, %v6228_v26  ;;  %v3101_v47 = vpack.c.bf16 %v3095_v62, %v3095_v62  ;;  %v3100_v32 = vpack.c.bf16 %v3094_v8, %v3094_v8  ;;  %vm9131_vm0 = vmmov %vm9130_vm3  ;;  %v8174_v62 = vld [vmem:[#allocation2 + $0x1d8] sm:$0xff] }
0x19a7   :  { %v3104_v10 = vpop.permute.xlu1 %3103  ;;  %v3070_v38 = vsel %vm9131_vm0, %v6228_v26, %v6229_v51  ;;  %vm9132_vm6 = vmmov %vm9129_vm1  ;;  %vm9133_vm7 = vcmp.eq.s32.totalorder %v9095_v37, 0  ;;  %vm9134_vm4 = vcmp.eq.s32.totalorder %v9095_v37, 127  ;;  %vm9135_vm1 = vcmp.eq.s32.totalorder %v9089_v23, 127  ;;  %v8163_v26 = vld [vmem:[#allocation2 + $0x1f8] sm:$0xff] }
0x19a8   :  { %v3077_v12 = vsel %vm9132_vm6, %v6234_v15, %v6233_v36  ;;  %v3085_v40 = vsel %vm9133_vm7, %v3083_v56, %v3064_v22  ;;  %v3105_v9 = vrot.slane %v3104_v10, 4  ;;  %5270 = vmatprep.subr.msk.bf16.mxu0 %vm152_vm5, %v3101_v47  ;;  %v3117_v63 = vsel %vm152_vm5, %v3100_v32, 0  ;;  %vm9136_vm3 = vmmov %vm9133_vm7 }
0x19a9   :  { %v3091_v28 = vsel %vm9134_vm4, %v3070_v38, %v3077_v12  ;;  %v3090_v5 = vsel %vm9135_vm1, %v3071_v6, %v3076_v2  ;;  %3133 = vmatpush1.bf16.msra.mxu0 %v3117_v63  ;;  %v3089_v48 = vsel %vm9136_vm3, %v3077_v12, %v3070_v38  ;;  %vm9137_vm0 = vcmp.eq.s32.totalorder %v9089_v23, 0 }
0x19aa   :  { %v3099_v25 = vpack.c.bf16 %v3091_v28, %v3058_v18  ;;  %v3107_v17 = vunpack.c.l.bf16 %v3105_v9  ;;  %v3084_v56 = vsel %vm9137_vm0, %v3082_v33, %v3065_v29  ;;  %v3098_v53 = vpack.c.bf16 %v3090_v5, %v8089_v41  ;;  %vm9139_vm7 = vmmov %vm9137_vm0 }
0x19ab   :  { %v3221_v22 = vpop.permute.xlu1 %3220  ;;  %vm9138_vm6 = vcmp.eq.s32.totalorder %v9095_v37, 1  ;;  %v3088_v36 = vsel %vm9139_vm7, %v3076_v2, %v3071_v6  ;;  %vm9140_vm4 = vcmp.eq.s32.totalorder %v9089_v23, 1  ;;  %vm9141_vm1 = vcmask 326656  }
0x19ac   :  { %3134 = vmatprep.subr.bf16.mxu0 %v3099_v25  ;;  %v3087_v34 = vsel %vm9138_vm6, %v3058_v18, %v3085_v40  ;;  %v3222_v27 = vrot.slane %v3221_v22, 4  ;;  %3110 = vperm.xlu0 %5779, %v3107_v17   ;;  %v3086_v33 = vsel %vm9140_vm4, %v8089_v41, %v3084_v56  ;;  %v8169_v18 = vld [vmem:[#allocation2 + $0x1e8] sm:$0xff]  ;;  %v3201_v41 = vpop.f32.mrf.mxu1  ;;  %vm9160_vm4 = vcmp.eq.s32.totalorder %v7322_v3, 3 }
0x19ad   :  { %v3097_v15 = vpack.c.bf16 %v3089_v48, %v3087_v34  ;;  %3135 = vmatpush1.bf16.msra.mxu0 %v3098_v53  ;;  %v3096_v29 = vpack.c.bf16 %v3088_v36, %v3086_v33 }
0x19ae   :  { %v3224_v51 = vunpack.c.l.bf16 %v3222_v27  ;;  %v3203_v8 = vpop.f32.mrf.mxu1 }
0x19af   :  { %3136 = vmatprep.subr.bf16.mxu0 %v3097_v15 }
0x19b0   :  { %3227 = vperm.xlu0 %5779, %v3224_v51   ;;  %v3205_v2 = vpop.f32.mrf.mxu1 }
0x19b1   :  { %3137 = vmatpush1.bf16.msra.mxu0 %v3096_v29 }
0x19b2   :  { %v3206_v6 = vpop.f32.mrf.mxu1 }
0x19b4   :  { %5271 = vmatmul.mubr.msk.bf16.vlgmr.msra.gmra.mxu0 %vm9141_vm1, %v8098_v11  ;;  %3427 = vrot.lane.b32.xlu0 %v8163_v26, %s6752_s2  ;;  %v3426_v11 = vpop.permute.xlu1 %3425  ;;  %vm9161_vm1 = vmmov %vm9160_vm4 }
0x19b5   :  { %3271 = vmatprep.mubr.bf16.mxu0 %v9049_v16  ;;  %v3433_v38 = vrot.slane %v3426_v11, 4 }
0x19b7   :  { %v3445_v9 = vunpack.c.l.bf16 %v3433_v38 }
0x19b8   :  { %3423 = vrot.lane.b32.xlu0 %v8169_v18, %s6752_s2  ;;  %v3422_v10 = vpop.permute.xlu1 %3421 }
0x19b9   :  { %v3431_v63 = vrot.slane %v3422_v10, 4 }
0x19bb   :  { %v3443_v56 = vunpack.c.l.bf16 %v3431_v63 }
0x19bc   :  { %3419 = vrot.lane.b32.xlu0 %v8174_v62, %s6752_s2  ;;  %v3418_v28 = vpop.permute.xlu1 %3417 }
0x19bd   :  { %v3429_v22 = vrot.slane %v3418_v28, 4 }
0x19bf   :  { %v3441_v36 = vunpack.c.l.bf16 %v3429_v22 }
0x1a27   :  { %v3111_v47 = vpop.permute.xlu0 %3110 }
0x1a2b   :  { %v3228_v32 = vpop.permute.xlu0 %3227 }
0x1a2f   :  { %v3428_v12 = vpop.permute.xlu0 %3427 }
0x1a30   :  { %v3434_v40 = vrot.slane %v3428_v12, 4 }
0x1a32   :  { %v3446_v5 = vunpack.c.l.bf16 %v3434_v40 }
0x1a33   :  { %v3424_v25 = vpop.permute.xlu0 %3423 }
0x1a34   :  { %v6235_v48 = vpack.i.bf16 %v3446_v5, %v3445_v9  ;;  %v3432_v17 = vrot.slane %v3424_v25, 4 }
0x1a36   :  { %v3444_v53 = vunpack.c.l.bf16 %v3432_v17  ;;  %6236 = vperm.xlu1 %5753, %v6235_v48  }
0x1a37   :  { %v3420_v34 = vpop.permute.xlu0 %3419 }
0x1a38   :  { %v6240_v27 = vpack.i.bf16 %v3444_v53, %v3443_v56  ;;  %v3430_v15 = vrot.slane %v3420_v34, 4 }
0x1a3a   :  { %v3442_v51 = vunpack.c.l.bf16 %v3430_v15  ;;  %6241 = vperm.xlu0 %5779, %v6240_v27  }
0x1a3c   :  { %v6245_v33 = vpack.i.bf16 %v3442_v51, %v3441_v36 }
0x1a3e   :  { %6246 = vperm.xlu1 %5753, %v6245_v33   ;;  %v3282_v33 = vld [vmem:[#allocation2 + $0x1b0] sm:$0xff] }
0x1a74   :  { %v3156_v29 = vpop.f32.mrf.mxu0 }
0x1a75   :  { %v3157_v2 = vadd.f32 %v3156_v29, %v3111_v47  ;;  %v9143_v29 = vld [vmem:[#allocation26_spill] sm:$0xff] }
0x1a76   :  { %v3158_v6 = vpop.f32.mrf.mxu0 }
0x1a77   :  { %v3208_v11 = vadd.f32 %v3201_v41, %v3157_v2  ;;  %v3159_v10 = vadd.f32 %v3158_v6, %v3111_v47  ;;  %v9144_v2 = vld [vmem:[#allocation27_spill] sm:$0xff]  ;;  %v9145_v6 = vld [vmem:[#allocation28_spill] sm:$0xff] }
0x1a78   :  { %v3160_v38 = vpop.f32.mrf.mxu0 }
0x1a79   :  { %vm3210_vm3 = vcmp.ge.f32.partialorder %v3208_v11, 0.0  ;;  %v3212_v12 = vmul.f32 0.1, %v3208_v11  ;;  %v3209_v40 = vadd.f32 %v3203_v8, %v3159_v10  ;;  %v9147_v10 = vld [vmem:[#allocation30_spill] sm:$0xff]  ;;  %v9148_v38 = vld [vmem:[#allocation31_spill] sm:$0xff] }
0x1a7a   :  { %v3161_v9 = vpop.f32.mrf.mxu0 }
0x1a7b   :  { %vm3211_vm0 = vcmp.ge.f32.partialorder %v3209_v40, 0.0  ;;  %v3213_v63 = vmul.f32 0.1, %v3209_v40  ;;  %v3214_v28 = vsel %vm3210_vm3, %v3208_v11, %v3212_v12  ;;  %v9146_v11 = vld [vmem:[#allocation29_spill] sm:$0xff]  ;;  %v9149_v12 = vld [vmem:[#allocation32_spill] sm:$0xff]  ;;  %v9151_v9 = vld [vmem:[#allocation34_spill] sm:$0xff] }
0x1a7c   :  { %v3217_v5 = vpack.c.bf16 %v3214_v28, %v3214_v28  ;;  %v9153_v28 = vld [vmem:[#allocation36_spill] sm:$0xff] }
0x1a7d   :  { %v3215_v25 = vsel %vm3211_vm0, %v3209_v40, %v3213_v63  ;;  %v9150_v40 = vld [vmem:[#allocation33_spill] sm:$0xff]  ;;  %v9152_v63 = vld [vmem:[#allocation35_spill] sm:$0xff] }
0x1a7e   :  { %v3218_v48 = vpack.c.bf16 %v3215_v25, %v3215_v25  ;;  %v3234_v17 = vsel %vm152_vm5, %v3217_v5, 0  ;;  %v5281_v5 = vcombine.low %v8114_v21, %v8174_v62  ;;  %v5284_v25 = vcombine.high %v8110_v7, %v8169_v18 }
0x1a80   :  { %5273 = vmatprep.subr.msk.bf16.mxu0 %vm152_vm5, %v3218_v48 }
0x1a81   :  { %3254 = vmatpush1.bf16.msra.mxu0 %v3234_v17 }
0x1a82   :  { %5277 = vmatprep.subr.msk.bf16.mxu0 %vm152_vm5, %v3218_v48  ;;  %v5283_v48 = vcombine.low %v8110_v7, %v8169_v18 }
0x1a84   :  { %5274 = vmatmul.mubr.msk.bf16.vlgmr.msra.gmra.mxu0 %vm309_vm14, %v8102_v57  ;;  %v5282_v57 = vcombine.high %v8114_v21, %v8174_v62  ;;  %v5285_v21 = vcombine.low %v8106_v49, %v8163_v26  ;;  %v3346_v62 = vld [vmem:[#allocation2 + $0x1c0] sm:$0xff] }
0x1a85   :  { %3365 = vmatpush1.bf16.msra.mxu0 %v3234_v17  ;;  %3382 = vmatprep.mubr.bf16.mxu0 %v9049_v16  ;;  %v5286_v17 = vcombine.high %v8106_v49, %v8163_v26 }
0x1a86   :  { %3829 = vmatprep.subr.bf16.mxu0 %v9049_v16 }
0x1a8c   :  { %5278 = vmatmul.mubr.msk.bf16.vlgmr.msra.gmra.mxu0 %vm309_vm14, %v3346_v62 }
0x1ab1   :  { %v6237_v49 = vpop.permute.xlu1 %6236 }
0x1ab9   :  { %v6247_v26 = vpop.permute.xlu1 %6246 }
0x1b44   :  { %v3273_v41 = vpop.f32.mrf.mxu0 }
0x1b45   :  { %v3274_v8 = vadd.f32 %v3273_v41, %v3228_v32  ;;  %v8235_v41 = vld [vmem:[#allocation2 + $0x208] sm:$0xff] }
0x1b46   :  { %v3275_v47 = vpop.f32.mrf.mxu0 }
0x1b47   :  { %v3280_v56 = vmax.f32 %v3274_v8, 0.0  ;;  %v3276_v22 = vadd.f32 %v3275_v47, %v3228_v32  ;;  %v9142_v32 = vld [vmem:[#allocation25_spill] sm:$0xff]  ;;  %v8237_v8 = vld [vmem:[#allocation2 + $0x200] sm:$0xff] }
0x1b48   :  { %v3277_v53 = vpop.f32.mrf.mxu0  ;;  %v5291_v7 = vcombine.high %v8237_v8, %v8235_v41 }
0x1b49   :  { %v3283_v34 = vpack.c.bf16 %v3280_v56, %v3280_v56  ;;  %v3281_v27 = vmax.f32 %v3276_v22, 0.0 }
0x1b4a   :  { %v3278_v15 = vpop.f32.mrf.mxu0  ;;  %5292 = vmatprep.mubr.msk.bf16.mxu0 %vm1647_vm2, %v5291_v7 }
0x1b4b   :  { %v3284_v36 = vpack.c.bf16 %v3281_v27, %v3281_v27  ;;  %v3300_v51 = vsel %vm152_vm5, %v3283_v34, 0 }
0x1b4d   :  { %5275 = vmatprep.subr.msk.bf16.mxu1 %vm152_vm5, %v3284_v36 }
0x1b4e   :  { %3320 = vmatpush1.bf16.msra.mxu1 %v3300_v51  ;;  %v6242_v51 = vpop.permute.xlu0 %6241 }
0x1b4f   :  { %3507 = vmatprep.subr.bf16.mxu1 %v9049_v16 }
0x1b51   :  { %5276 = vmatmul.mubr.msk.bf16.vlgmr.msra.gmra.mxu1 %vm309_vm14, %v3282_v33 }
0x1b52   :  { %3508 = vmatpush1.bf16.msra.mxu1 %v7260_v19  ;;  %5287 = vmatprep.mubr.msk.bf16.mxu1 %vm1647_vm2, %v5282_v57 }
0x1b53   :  { %3509 = vmatprep.subr.bf16.mxu1 %v9049_v16 }
0x1b56   :  { %3510 = vmatpush1.bf16.msra.mxu1 %v7272_v24 }
0x1b57   :  { %3511 = vmatprep.subr.bf16.mxu1 %v9049_v16 }
0x1b5a   :  { %3512 = vmatpush1.bf16.msra.mxu1 %v9142_v32 }
0x1b5b   :  { %3513 = vmatprep.subr.bf16.mxu1 %v9049_v16 }
0x1b5e   :  { %3514 = vmatpush1.bf16.msra.mxu1 %v9143_v29 }
0x1b5f   :  { %3515 = vmatprep.subr.bf16.mxu1 %v9049_v16 }
0x1b62   :  { %3516 = vmatpush1.bf16.msra.mxu1 %v9144_v2 }
0x1b63   :  { %3517 = vmatprep.subr.bf16.mxu1 %v9049_v16 }
0x1b66   :  { %3518 = vmatpush1.bf16.msra.mxu1 %v9145_v6 }
0x1b67   :  { %3519 = vmatprep.subr.bf16.mxu1 %v9049_v16 }
0x1b6a   :  { %3520 = vmatpush1.bf16.msra.mxu1 %v9146_v11 }
0x1b6b   :  { %3521 = vmatprep.subr.bf16.mxu1 %v9049_v16 }
0x1b6e   :  { %3522 = vmatpush1.bf16.msra.mxu1 %v9147_v10 }
0x1b6f   :  { %3525 = vmatprep.subr.bf16.mxu1 %v9049_v16 }
0x1b72   :  { %3526 = vmatpush2.bf16.msra.mxu1 %v9148_v38 }
0x1b73   :  { %3527 = vmatprep.subr.bf16.mxu1 %v9049_v16 }
0x1b76   :  { %3528 = vmatpush2.bf16.msra.mxu1 %v9149_v12 }
0x1b77   :  { %3529 = vmatprep.subr.bf16.mxu1 %v9049_v16 }
0x1b7a   :  { %3530 = vmatpush2.bf16.msra.mxu1 %v9150_v40 }
0x1b7b   :  { %3531 = vmatprep.subr.bf16.mxu1 %v9049_v16 }
0x1b7e   :  { %3532 = vmatpush2.bf16.msra.mxu1 %v9151_v9 }
0x1b7f   :  { %3533 = vmatprep.subr.bf16.mxu1 %v9049_v16 }
0x1b82   :  { %3534 = vmatpush2.bf16.msra.mxu1 %v9152_v63 }
0x1b83   :  { %3535 = vmatprep.subr.bf16.mxu1 %v9049_v16 }
0x1b86   :  { %3536 = vmatpush2.bf16.msra.mxu1 %v9153_v28 }
0x1b87   :  { %3537 = vmatprep.subr.bf16.mxu1 %v9049_v16 }
0x1b8a   :  { %3538 = vmatpush2.bf16.msra.mxu1 %v7456_v45 }
0x1b8b   :  { %4103 = vmatprep.subr.bf16.mxu1 %v9049_v16 }
0x1b8d   :  { %3540 = vmatmul.mubr.bf16.vlgmr.msra.gmra.mxu1 %v5281_v5 }
0x1b8e   :  { %5288 = vmatprep.mubr.msk.bf16.mxu1 %vm1647_vm2, %v5284_v25 }
0x1b95   :  { %3548 = vmatmul.mubr.bf16.gmra.mxu1 %v5283_v48 }
0x1b96   :  { %5289 = vmatprep.mubr.msk.bf16.mxu1 %vm1647_vm2, %v5286_v17  ;;  %vm9156_vm2 = vcmp.eq.s32.totalorder %v7322_v3, 1 }
0x1b97   :  { %vm9158_vm6 = vmmov %vm9156_vm2 }
0x1b98   :  { %vm9159_vm7 = vmmov %vm9156_vm2 }
0x1b99   :  { %vm9163_vm3 = vmmov %vm9156_vm2 }
0x1b9d   :  { %3556 = vmatmul.mubr.bf16.gmra.mxu1 %v5285_v21 }
0x1c11   :  { %v8242_v18 = vpop.f32.mrf.mxu1 }
0x1c12   :  { %9154 = vst [vmem:[#allocation25_spill] sm:$0xff] %v8242_v18 }
0x1c13   :  { %v8244_v47 = vpop.f32.mrf.mxu1 }
0x1c14   :  { %9155 = vst [vmem:[#allocation26_spill] sm:$0xff] %v8244_v47 }
0x1c15   :  { %v3343_v56 = vpop.f32.mrf.mxu1 }
0x1c17   :  { %v3344_v22 = vpop.f32.mrf.mxu1 }
0x1c4d   :  { %v3541_v53 = vpop.f32.mrf.mxu1 }
0x1c4e   :  { %v6669_v27 = vadd.low.f32.bf16 %v3541_v53, %v6247_v26 }
0x1c4f   :  { %v3543_v34 = vpop.f32.mrf.mxu1 }
0x1c50   :  { %v8246_v33 = vmax.f32 %v6669_v27, 0.0 }
0x1c51   :  { %v3544_v15 = vpop.f32.mrf.mxu1 }
0x1c52   :  { %v6670_v36 = vadd.high.f32.bf16 %v3544_v15, %v6247_v26 }
0x1c53   :  { %v3546_v57 = vpop.f32.mrf.mxu1 }
0x1c54   :  { %v8248_v32 = vmax.f32 %v6670_v36, 0.0 }
0x1c55   :  { %v3549_v29 = vpop.f32.mrf.mxu1 }
0x1c56   :  { %v6255_v2 = vpack.i.bf16 %v8248_v32, %v8246_v33  ;;  %v6671_v11 = vadd.low.f32.bf16 %v3549_v29, %v6242_v51  ;;  %v3788_v21 = vpack.c.bf16 %v8248_v32, %v8246_v33 }
0x1c57   :  { %v3551_v6 = vpop.f32.mrf.mxu1 }
0x1c58   :  { %6256 = vrot.lane.b32.xlu1 %v6255_v2, %s6752_s2  ;;  %6251 = vrot.lane.b32.xlu0 %v6255_v2, %s6762_s7  ;;  %v8254_v40 = vmax.f32 %v6671_v11, 0.0 }
0x1c59   :  { %v3552_v10 = vpop.f32.mrf.mxu1 }
0x1c5a   :  { %v6672_v38 = vadd.high.f32.bf16 %v3552_v10, %v6242_v51 }
0x1c5b   :  { %v3554_v12 = vpop.f32.mrf.mxu1 }
0x1c5c   :  { %v8256_v9 = vmax.f32 %v6672_v38, 0.0  ;;  %6266 = vrot.lane.b32.xlu1 %v6255_v2, %s6763_s8  ;;  %6261 = vrot.lane.b32.xlu0 %v6255_v2, %s6754_s29 }
0x1c5d   :  { %v3557_v63 = vpop.f32.mrf.mxu1 }
0x1c5e   :  { %v3789_v28 = vpack.c.bf16 %v8256_v9, %v8254_v40  ;;  %v6275_v5 = vpack.i.bf16 %v8256_v9, %v8254_v40  ;;  %v6674_v7 = vadd.low.f32.bf16 %v3557_v63, %v6237_v49 }
0x1c5f   :  { %v3559_v25 = vpop.f32.mrf.mxu1 }
0x1c60   :  { %3830 = vmatpush1.bf16.msra.mxu0 %v3789_v28  ;;  %6276 = vrot.lane.b32.xlu1 %v6275_v5, %s6752_s2  ;;  %v8274_v22 = vmax.f32 %v6674_v7, 0.0 }
0x1c61   :  { %6271 = vrot.lane.b32.xlu0 %v6275_v5, %s6762_s7  ;;  %v3560_v48 = vpop.f32.mrf.mxu1  ;;  %3831 = vmatprep.subr.bf16.mxu0 %v9049_v16 }
0x1c62   :  { %v6673_v17 = vadd.high.f32.bf16 %v3560_v48, %v6237_v49 }
0x1c63   :  { %v3562_v62 = vpop.f32.mrf.mxu1 }
0x1c64   :  { %6286 = vrot.lane.b32.xlu1 %v6275_v5, %s6763_s8  ;;  %3832 = vmatpush1.bf16.msra.mxu0 %v3788_v21  ;;  %v8272_v56 = vmax.f32 %v6673_v17, 0.0 }
0x1c65   :  { %6281 = vrot.lane.b32.xlu0 %v6275_v5, %s6754_s29  ;;  %3833 = vmatprep.subr.bf16.mxu0 %v9049_v16 }
0x1c66   :  { %v6305_v26 = vpack.i.bf16 %v8272_v56, %v8274_v22 }
0x1c68   :  { %6296 = vrot.lane.b32.xlu1 %v6275_v5, %s6751_s27 }
0x1c69   :  { %6291 = vrot.lane.b32.xlu0 %v6275_v5, %s6764_s9 }
0x1c6c   :  { %6306 = vrot.lane.b32.xlu1 %v6305_v26, %s6752_s2 }
0x1c6d   :  { %6301 = vrot.lane.b32.xlu0 %v6305_v26, %s6762_s7 }
0x1c70   :  { %6321 = vrot.lane.b32.xlu1 %v6305_v26, %s6763_s8 }
0x1c71   :  { %6311 = vrot.lane.b32.xlu0 %v6305_v26, %s6754_s29 }
0x1c74   :  { %6326 = vrot.lane.b32.xlu1 %v6275_v5, %s6765_s10 }
0x1c75   :  { %6316 = vrot.lane.b32.xlu0 %v6275_v5, %s6753_s28 }
0x1c78   :  { %6336 = vrot.lane.b32.xlu1 %v6305_v26, %s6751_s27 }
0x1c79   :  { %6331 = vrot.lane.b32.xlu0 %v6305_v26, %s6764_s9 }
0x1c7c   :  { %6351 = vrot.lane.b32.xlu1 %v6305_v26, %s6765_s10 }
0x1c7d   :  { %6341 = vrot.lane.b32.xlu0 %v6305_v26, %s6753_s28 }
0x1c80   :  { %6356 = vrot.lane.b32.xlu1 %v6255_v2, %s6751_s27 }
0x1c81   :  { %6346 = vrot.lane.b32.xlu0 %v6255_v2, %s6764_s9 }
0x1c84   :  { %6366 = vrot.lane.b32.xlu1 %v6255_v2, %s6765_s10 }
0x1c85   :  { %6361 = vrot.lane.b32.xlu0 %v6255_v2, %s6753_s28 }
0x1c88   :  { %3801 = vrot.lane.b32.xlu1 %v8235_v41, %s6752_s2 }
0x1c89   :  { %3799 = vrot.lane.b32.xlu0 %v8237_v8, %s6752_s2 }
0x1cca   :  { %v6257_v49 = vpop.permute.xlu1 %6256  ;;  %v6252_v53 = vpop.permute.xlu0 %6251 }
0x1ccb   :  { %v6259_v2 = vunpack.i.h.bf16 %v6257_v49  ;;  %v6258_v10 = vunpack.i.l.bf16 %v6257_v49  ;;  %v6254_v38 = vunpack.i.h.bf16 %v6252_v53  ;;  %v6253_v23 = vunpack.i.l.bf16 %v6252_v53 }
0x1cce   :  { %v6267_v34 = vpop.permute.xlu1 %6266  ;;  %v6262_v27 = vpop.permute.xlu0 %6261 }
0x1ccf   :  { %v6269_v63 = vunpack.i.h.bf16 %v6267_v34  ;;  %v6264_v28 = vunpack.i.h.bf16 %v6262_v27  ;;  %v6268_v58 = vunpack.i.l.bf16 %v6267_v34  ;;  %v6263_v42 = vunpack.i.l.bf16 %v6262_v27 }
0x1cd2   :  { %v6277_v15 = vpop.permute.xlu1 %6276 }
0x1cd3   :  { %v6272_v36 = vpop.permute.xlu0 %6271  ;;  %v6279_v5 = vunpack.i.h.bf16 %v6277_v15  ;;  %v6278_v25 = vunpack.i.l.bf16 %v6277_v15  ;;  %v8303_v15 = vsel %vm1493_vm11, %v6264_v28, %v6269_v63 }
0x1cd4   :  { %v6274_v43 = vunpack.i.h.bf16 %v6272_v36  ;;  %v6273_v4 = vunpack.i.l.bf16 %v6272_v36 }
0x1cd6   :  { %v6287_v51 = vpop.permute.xlu1 %6286  ;;  %v8324_v36 = vsel %vm925_vm9, %v6274_v43, %v6279_v5 }
0x1cd7   :  { %v6282_v57 = vpop.permute.xlu0 %6281  ;;  %v6289_v48 = vunpack.i.h.bf16 %v6287_v51  ;;  %v6288_v17 = vunpack.i.l.bf16 %v6287_v51 }
0x1cd8   :  { %v6284_v21 = vunpack.i.h.bf16 %v6282_v57  ;;  %v6283_v62 = vunpack.i.l.bf16 %v6282_v57 }
0x1cda   :  { %v8298_v29 = vpop.permute.xlu1 %6296  ;;  %v8306_v51 = vsel %vm1493_vm11, %v6284_v21, %v6289_v48  ;;  %v8309_v57 = vsel %vm1493_vm11, %v6283_v62, %v6288_v17 }
0x1cdb   :  { %v8300_v6 = vpop.permute.xlu0 %6291  ;;  %v6299_v48 = vunpack.i.h.bf16 %v8298_v29 }
0x1cde   :  { %v6307_v11 = vpop.permute.xlu1 %6306 }
0x1cdf   :  { %v6302_v12 = vpop.permute.xlu0 %6301  ;;  %v6309_v7 = vunpack.i.h.bf16 %v6307_v11  ;;  %v6308_v26 = vunpack.i.l.bf16 %v6307_v11 }
0x1ce0   :  { %v6304_v47 = vunpack.i.h.bf16 %v6302_v12  ;;  %v6303_v18 = vunpack.i.l.bf16 %v6302_v12  ;;  %v8327_v12 = vsel %vm925_vm9, %v6273_v4, %v6278_v25  ;;  %v3761_v4 = vsel %vm68_vm10, %v8306_v51, %v8324_v36 }
0x1ce1   :  { %v8349_v25 = vsel %vm925_vm9, %v6254_v38, %v6259_v2  ;;  %v6293_v38 = vunpack.i.l.bf16 %v8300_v6 }
0x1ce2   :  { %v6322_v46 = vpop.permute.xlu1 %6321  ;;  %v8312_v11 = vsel %vm925_vm9, %v6304_v47, %v6309_v7  ;;  %v3759_v2 = vsel %vm68_vm10, %v8303_v15, %v8349_v25 }
0x1ce3   :  { %v6324_v30 = vunpack.i.h.bf16 %v6322_v46  ;;  %v6323_v14 = vunpack.i.l.bf16 %v6322_v46  ;;  %v6312_v49 = vpop.permute.xlu0 %6311  ;;  %v8315_v46 = vsel %vm925_vm9, %v6303_v18, %v6308_v26 }
0x1ce4   :  { %v6314_v13 = vunpack.i.h.bf16 %v6312_v49  ;;  %v6313_v37 = vunpack.i.l.bf16 %v6312_v49 }
0x1ce6   :  { %v8318_v34 = vsel %vm1493_vm11, %v6314_v13, %v6324_v30  ;;  %v8321_v53 = vsel %vm1493_vm11, %v6313_v37, %v6323_v14  ;;  %v6327_v27 = vpop.permute.xlu1 %6326  ;;  %v8338_v37 = vsel %vm1493_vm11, %v6263_v42, %v6268_v58  ;;  %v3760_v30 = vsel %vm68_vm10, %v8309_v57, %v8327_v12  ;;  %vm9157_vm11 = vmmov %vm9156_vm2 }
0x1ce7   :  { %v6317_v63 = vpop.permute.xlu0 %6316  ;;  %v3762_v18 = vsel %vm68_vm10, %v8321_v53, %v8315_v46  ;;  %v3763_v13 = vsel %vm68_vm10, %v8318_v34, %v8312_v11  ;;  %v6329_v43 = vunpack.i.h.bf16 %v6327_v27  ;;  %v6328_v47 = vunpack.i.l.bf16 %v6327_v27 }
0x1ce8   :  { %v3787_v14 = vpack.c.bf16 %v3763_v13, %v3762_v18  ;;  %v6319_v28 = vunpack.i.h.bf16 %v6317_v63  ;;  %v6318_v5 = vunpack.i.l.bf16 %v6317_v63  ;;  %v8352_v42 = vsel %vm925_vm9, %v6253_v23, %v6258_v10 }
0x1ce9   :  { %v3758_v21 = vsel %vm68_vm10, %v8338_v37, %v8352_v42  ;;  %v6298_v23 = vunpack.i.l.bf16 %v8298_v29  ;;  %v6294_v10 = vunpack.i.h.bf16 %v8300_v6  ;;  %v3786_v62 = vpack.c.bf16 %v3761_v4, %v3760_v30 }
0x1cea   :  { %3834 = vmatpush1.bf16.msra.mxu0 %v3787_v14  ;;  %v6337_v58 = vpop.permute.xlu1 %6336  ;;  %v8368_v7 = vsel %vm1515_vm12, %v6319_v28, %v6329_v43  ;;  %v8371_v26 = vsel %vm1515_vm12, %v6318_v5, %v6328_v47  ;;  %v3785_v31 = vpack.c.bf16 %v3759_v2, %v3758_v21 }
0x1ceb   :  { %v6332_v17 = vpop.permute.xlu0 %6331  ;;  %3835 = vmatprep.subr.bf16.mxu0 %v9049_v16  ;;  %v6339_v49 = vunpack.i.h.bf16 %v6337_v58  ;;  %v6338_v27 = vunpack.i.l.bf16 %v6337_v58  ;;  %v3617_v6 = vsel %vm910_vm13, %v6294_v10, %v6299_v48  ;;  %v3616_v30 = vsel %vm910_vm13, %v6293_v38, %v6298_v23 }
0x1cec   :  { %v6334_v63 = vunpack.i.h.bf16 %v6332_v17  ;;  %v6333_v18 = vunpack.i.l.bf16 %v6332_v17  ;;  %v3748_v47 = vsel %vm68_vm10, %v8371_v26, %v3616_v30  ;;  %v3749_v28 = vsel %vm68_vm10, %v8368_v7, %v3617_v6 }
0x1ced   :  { %v3754_v38 = vsel %vm9156_vm2, %v8254_v40, %v3748_v47 }
0x1cee   :  { %3836 = vmatpush1.bf16.msra.mxu0 %v3786_v62  ;;  %v6352_v13 = vpop.permute.xlu1 %6351  ;;  %v3619_v5 = vsel %vm910_vm13, %v6334_v63, %v6339_v49  ;;  %v3618_v58 = vsel %vm910_vm13, %v6333_v18, %v6338_v27  ;;  %v3755_v49 = vsel %vm9159_vm7, %v8256_v9, %v3749_v28 }
0x1cef   :  { %v6354_v14 = vunpack.i.h.bf16 %v6352_v13  ;;  %v6353_v61 = vunpack.i.l.bf16 %v6352_v13  ;;  %v6342_v29 = vpop.permute.xlu0 %6341  ;;  %3837 = vmatprep.subr.bf16.mxu0 %v9049_v16 }
0x1cf0   :  { %v6344_v4 = vunpack.i.h.bf16 %v6342_v29  ;;  %v6343_v43 = vunpack.i.l.bf16 %v6342_v29 }
0x1cf2   :  { %v3745_v17 = vsel %vm1515_vm12, %v6344_v4, %v6354_v14  ;;  %v3744_v48 = vsel %vm1515_vm12, %v6343_v43, %v6353_v61  ;;  %3838 = vmatpush1.bf16.msra.mxu0 %v3785_v31  ;;  %v6357_v21 = vpop.permute.xlu1 %6356 }
0x1cf3   :  { %v3750_v2 = vsel %vm68_vm10, %v3744_v48, %v3618_v58  ;;  %v3751_v23 = vsel %vm68_vm10, %v3745_v17, %v3619_v5  ;;  %v6347_v10 = vpop.permute.xlu0 %6346  ;;  %3839 = vmatprep.subr.bf16.mxu0 %v9049_v16  ;;  %v6359_v62 = vunpack.i.h.bf16 %v6357_v21  ;;  %v6358_v27 = vunpack.i.l.bf16 %v6357_v21 }
0x1cf4   :  { %v3756_v61 = vsel %vm9157_vm11, %v8274_v22, %v3750_v2  ;;  %v3757_v31 = vsel %vm9158_vm6, %v8272_v56, %v3751_v23  ;;  %v6349_v63 = vunpack.i.h.bf16 %v6347_v10  ;;  %v6348_v18 = vunpack.i.l.bf16 %v6347_v10  ;;  %vm9167_vm11 = vmmov %vm9161_vm1 }
0x1cf5   :  { %v3784_v14 = vpack.c.bf16 %v3757_v31, %v3756_v61  ;;  %v3783_v2 = vpack.c.bf16 %v3755_v49, %v3754_v38  ;;  %v3774_v61 = vsel %vm9160_vm4, %v3618_v58, %v3744_v48  ;;  %v3775_v31 = vsel %vm9161_vm1, %v3619_v5, %v3745_v17  ;;  %vm9170_vm4 = vmmov %vm9161_vm1 }
0x1cf6   :  { %v6367_v13 = vpop.permute.xlu1 %6366  ;;  %v3615_v23 = vsel %vm910_vm13, %v6349_v63, %v6359_v62  ;;  %v3614_v59 = vsel %vm910_vm13, %v6348_v18, %v6358_v27  ;;  %v8423_v63 = vpop.f32.mrf.mxu0 }
0x1cf7   :  { %v6369_v29 = vunpack.i.h.bf16 %v6367_v13  ;;  %v6368_v4 = vunpack.i.l.bf16 %v6367_v13  ;;  %v6362_v43 = vpop.permute.xlu0 %6361  ;;  %3840 = vmatpush1.bf16.msra.mxu0 %v3784_v14 }
0x1cf8   :  { %v6364_v47 = vunpack.i.h.bf16 %v6362_v43  ;;  %v6363_v44 = vunpack.i.l.bf16 %v6362_v43  ;;  %3841 = vmatprep.subr.bf16.mxu0 %v9049_v16 }
0x1cfa   :  { %v3741_v28 = vsel %vm1515_vm12, %v6364_v47, %v6369_v29  ;;  %v3740_v21 = vsel %vm1515_vm12, %v6363_v44, %v6368_v4  ;;  %v3802_v10 = vpop.permute.xlu1 %3801  ;;  %vm9162_vm12 = vmmov %vm9156_vm2  ;;  %v3773_v4 = vsel %vm9167_vm11, %v3617_v6, %v8368_v7  ;;  %v8437_v47 = vpop.f32.mrf.mxu0 }
0x1cfb   :  { %v3746_v13 = vsel %vm68_vm10, %v3740_v21, %v3614_v59  ;;  %v3747_v38 = vsel %vm68_vm10, %v3741_v28, %v3615_v23  ;;  %v3800_v62 = vpop.permute.xlu0 %3799  ;;  %v3804_v49 = vrot.slane %v3802_v10, 4  ;;  %3842 = vmatpush1.bf16.msra.mxu0 %v3783_v2  ;;  %vm9164_vm10 = vcmp.eq.s32.totalorder %v7322_v3, 2  ;;  %vm9166_vm2 = vmmov %vm9161_vm1  ;;  %v6606_v3 = vld [vmem:[#allocation2 + $0x210] ss:$8 sps:$4 sm:$0xff]  }
0x1cfc   :  { %v3803_v27 = vrot.slane %v3800_v62, 4  ;;  %v3752_v44 = vsel %vm9162_vm12, %v8246_v33, %v3746_v13  ;;  %v3753_v58 = vsel %vm9163_vm3, %v8248_v32, %v3747_v38  ;;  %3843 = vmatprep.subr.bf16.mxu0 %v9049_v16  ;;  %v3780_v18 = vsel %vm9164_vm10, %v8274_v22, %v3774_v61  ;;  %vm9165_vm0 = vmmov %vm9164_vm10  ;;  %v3388_v10 = vpop.f32.mrf.mxu0 }
0x1cfd   :  { %v3782_v5 = vpack.c.bf16 %v3753_v58, %v3752_v44  ;;  %v3808_v17 = vunpack.c.l.bf16 %v3804_v49  ;;  %v3781_v14 = vsel %vm9165_vm0, %v8272_v56, %v3775_v31  ;;  %v3772_v29 = vsel %vm9166_vm2, %v3616_v30, %v8371_v26  ;;  %vm9168_vm6 = vmmov %vm9165_vm0  ;;  %v8509_v44 = vld [vmem:[#allocation2 + $0x228] sm:$0xff] }
0x1cfe   :  { %v3807_v48 = vunpack.c.l.bf16 %v3803_v27  ;;  %v3796_v2 = vpack.c.bf16 %v3781_v14, %v3780_v18  ;;  %v3778_v61 = vsel %vm9168_vm6, %v8254_v40, %v3772_v29  ;;  %vm9169_vm7 = vmmov %vm9165_vm0  ;;  %v3770_v7 = vsel %vm9170_vm4, %v3614_v59, %v3740_v21  ;;  %v3389_v30 = vpop.f32.mrf.mxu0  ;;  %v8507_v27 = vld [vmem:[#allocation2 + $0x220] sm:$0xff]  ;;  %v8528_v29 = vld [vmem:[#allocation2 + $0x230] sm:$0xff] }
0x1cff   :  { %3844 = vmatpush1.bf16.msra.mxu0 %v3782_v5  ;;  %v3779_v26 = vsel %vm9169_vm7, %v8256_v9, %v3773_v4  ;;  %v3771_v6 = vsel %vm9161_vm1, %v3615_v23, %v3741_v28  ;;  %vm9171_vm12 = vmmov %vm9165_vm0  ;;  %vm9179_vm4 = vcmask 392192   ;;  %v5297_v58 = vcombine.high %v8507_v27, %v8509_v44 }
0x1d00   :  { %v6370_v43 = vpack.i.bf16 %v3808_v17, %v3807_v48  ;;  %3847 = vmatprep.subr.bf16.mxu0 %v9049_v16  ;;  %v3795_v31 = vpack.c.bf16 %v3779_v26, %v3778_v61  ;;  %v3776_v13 = vsel %vm9171_vm12, %v8246_v33, %v3770_v7  ;;  %vm9172_vm3 = vmmov %vm9165_vm0 }
0x1d01   :  { %v3777_v40 = vsel %vm9172_vm3, %v8248_v32, %v3771_v6  ;;  %vm9173_vm10 = vmmov %vm9161_vm1  ;;  %5300 = vmatprep.mubr.msk.bf16.mxu1 %vm1369_vm8, %v5297_v58  ;;  %vm9180_vm3 = vcmask 252928  }
0x1d02   :  { %6371 = vperm.xlu0 %5779, %v6370_v43   ;;  %v3794_v59 = vpack.c.bf16 %v3777_v40, %v3776_v13  ;;  %v3768_v9 = vsel %vm9173_vm10, %v8315_v46, %v8321_v53  ;;  %vm9174_vm0 = vmmov %vm9161_vm1  ;;  %v5290_v53 = vcombine.low %v8237_v8, %v8235_v41 }
0x1d03   :  { %3848 = vmatpush2.bf16.msra.mxu0 %v3796_v2  ;;  %v3769_v23 = vsel %vm9174_vm0, %v8312_v11, %v8318_v34  ;;  %vm9175_vm2 = vmmov %vm9174_vm0 }
0x1d04   :  { %3849 = vmatprep.subr.bf16.mxu0 %v9049_v16  ;;  %v3793_v33 = vpack.c.bf16 %v3769_v23, %v3768_v9  ;;  %v3766_v32 = vsel %vm9175_vm2, %v8327_v12, %v8309_v57  ;;  %vm9176_vm11 = vmmov %vm9174_vm0 }
0x1d05   :  { %v3767_v28 = vsel %vm9176_vm11, %v8324_v36, %v8306_v51  ;;  %vm9177_vm6 = vmmov %vm9174_vm0  ;;  %v3790_v51 = vpack.c.bf16 %v8272_v56, %v8274_v22  ;;  %vm9184_vm11 = vcmp.eq.s32.totalorder %v7106_v52, 0 }
0x1d06   :  { %v3792_v46 = vpack.c.bf16 %v3767_v28, %v3766_v32  ;;  %v3764_v11 = vsel %vm9177_vm6, %v8352_v42, %v8338_v37  ;;  %vm9178_vm7 = vmmov %vm9174_vm0  ;;  %vm9182_vm0 = vcmp.eq.s32.totalorder %v7106_v52, 15 }
0x1d07   :  { %3850 = vmatpush2.bf16.msra.mxu0 %v3795_v31  ;;  %v3765_v34 = vsel %vm9178_vm7, %v8349_v25, %v8303_v15  ;;  %vm9181_vm10 = vmmov %vm9180_vm3  ;;  %vm9186_vm7 = vcmask 244736  }
0x1d08   :  { %3851 = vmatprep.subr.bf16.mxu0 %v9049_v16  ;;  %v3791_v57 = vpack.c.bf16 %v3765_v34, %v3764_v11  ;;  %vm9183_vm2 = vmmov %vm9182_vm0 }
0x1d09   :  { %vm9185_vm6 = vmmov %vm9184_vm11 }
0x1d0b   :  { %3852 = vmatpush2.bf16.msra.mxu0 %v3794_v59 }
0x1d0c   :  { %3853 = vmatprep.subr.bf16.mxu0 %v9049_v16 }
0x1d0f   :  { %3854 = vmatpush2.bf16.msra.mxu0 %v3793_v33 }
0x1d10   :  { %3855 = vmatprep.subr.bf16.mxu0 %v9049_v16 }
0x1d13   :  { %3856 = vmatpush2.bf16.msra.mxu0 %v3792_v46 }
0x1d14   :  { %3857 = vmatprep.subr.bf16.mxu0 %v9049_v16 }
0x1d17   :  { %3858 = vmatpush2.bf16.msra.mxu0 %v3791_v57 }
0x1d18   :  { %3859 = vmatprep.subr.bf16.mxu0 %v9049_v16 }
0x1d1b   :  { %3860 = vmatpush2.bf16.msra.mxu0 %v3790_v51 }
0x1d1c   :  { %5627 = vmatprep.subr.bf16.mxu0 %v9050_v60 }
0x1d1e   :  { %3862 = vmatmul.mubr.bf16.vlgmr.msra.gmra.mxu0 %v5290_v53 }
0x1d1f   :  { %5628 = vmatpush3.bf16.msra.mxu0 %v7456_v45  ;;  %5633 = vmatprep.mubr.msk.bf16.mxu0 %vm6757_vm15, %v9050_v60 }
0x1d20   :  { %5629 = vmatprep.subr.bf16.mxu0 %v9050_v60 }
0x1d23   :  { %5630 = vmatpush3.bf16.msra.mxu0 %v7260_v19 }
0x1d24   :  { %5631 = vmatprep.subr.bf16.mxu0 %v9050_v60 }
0x1d27   :  { %5632 = vmatpush3.bf16.msra.mxu0 %v7272_v24 }
0x1d28   :  { %5637 = vmatprep.subr.bf16.mxu0 %v9050_v60 }
0x1d2a   :  { %5634 = vmatmul.mubr.msk.bf16.vlgmr.msra.gmra.mxu0 %vm9179_vm4, %v6606_v3  ;;  %vm9187_vm4 = vmmov %vm9186_vm7 }
0x1d2b   :  { %5638 = vmatpush3.bf16.msra.mxu0 %v7732_v35  ;;  %5639 = vmatprep.mubr.msk.bf16.mxu0 %vm6757_vm15, %v9050_v60 }
0x1d2c   :  { %5643 = vmatprep.subr.bf16.mxu0 %v9050_v60 }
0x1d7d   :  { %v6372_v19 = vpop.permute.xlu0 %6371 }
0x1dde   :  { %v3863_v45 = vpop.f32.mrf.mxu0 }
0x1ddf   :  { %v6675_v22 = vadd.low.f32.bf16 %v3863_v45, %v6372_v19 }
0x1de0   :  { %v3865_v41 = vpop.f32.mrf.mxu0 }
0x1de2   :  { %v3866_v8 = vpop.f32.mrf.mxu0 }
0x1de3   :  { %v6676_v12 = vadd.high.f32.bf16 %v3866_v8, %v6372_v19 }
0x1de4   :  { %v3868_v56 = vpop.f32.mrf.mxu0 }
0x1dea   :  { %v3914_v15 = vpop.f32.mrf.mxu0 }
0x1deb   :  { %v3921_v36 = vadd.f32 %v6675_v22, %v3914_v15 }
0x1dec   :  { %v5635_v24 = vpop.f32.mrf.mxu0 }
0x1ded   :  { %v3925_v25 = vmul.f32 0.1, %v3921_v36  ;;  %vm3923_vm1 = vcmp.ge.f32.partialorder %v3921_v36, 0.0 }
0x1dee   :  { %v3917_v37 = vpop.f32.mrf.mxu0 }
0x1def   :  { %v3922_v42 = vadd.f32 %v6676_v12, %v3917_v37  ;;  %v3927_v38 = vsel %vm3923_vm1, %v3921_v36, %v3925_v25  ;;  %vm9188_vm1 = vmmov %vm9185_vm6 }
0x1df0   :  { %v5636_v35 = vpop.f32.mrf.mxu0 }
0x1df1   :  { %vm3924_vm12 = vcmp.ge.f32.partialorder %v3922_v42, 0.0  ;;  %v3926_v21 = vmul.f32 0.1, %v3922_v42 }
0x1df3   :  { %v3928_v62 = vsel %vm3924_vm12, %v3922_v42, %v3926_v21  ;;  %vm9189_vm12 = vmmov %vm9188_vm1 }
0x1df4   :  { %v3929_v49 = vpack.c.bf16 %v3928_v62, %v3927_v38 }
0x1df6   :  { %5640 = vmatmul.mubr.msk.bf16.vlgmr.msra.gmra.mxu0 %vm309_vm14, %v3929_v49 }
0x1df7   :  { %5659 = vmatprep.mubr.msk.bf16.mxu0 %vm6757_vm15, %v9050_v60 }
0x1eb6   :  { %v8514_v5 = vpop.f32.mrf.mxu0 }
0x1eb8   :  { %v5641_v17 = vpop.f32.mrf.mxu0 }
0x1eba   :  { %v8516_v48 = vpop.f32.mrf.mxu0 }
0x1ebb   :  { %v6380_v18 = vpack.i.bf16 %v8516_v48, %v8514_v5  ;;  %v4049_v8 = vpack.c.bf16 %v8516_v48, %v8514_v5 }
0x1ebc   :  { %v5642_v14 = vpop.f32.mrf.mxu0 }
0x1ebd   :  { %6381 = vrot.lane.b32.xlu0 %v6380_v18, %s6752_s2  ;;  %6376 = vrot.lane.b32.xlu1 %v6380_v18, %s6760_s5 }
0x1ec1   :  { %6391 = vrot.lane.b32.xlu0 %v6380_v18, %s6761_s6  ;;  %6386 = vrot.lane.b32.xlu1 %v6380_v18, %s6754_s29 }
0x1ec5   :  { %6401 = vrot.lane.b32.xlu0 %v6380_v18, %s6751_s27  ;;  %6396 = vrot.lane.b32.xlu1 %v6380_v18, %s6758_s30 }
0x1ec9   :  { %6411 = vrot.lane.b32.xlu0 %v6380_v18, %s6759_s4  ;;  %6406 = vrot.lane.b32.xlu1 %v6380_v18, %s6753_s28 }
0x1ecd   :  { %4059 = vrot.lane.b32.xlu1 %v8528_v29, %s6752_s2  ;;  %4055 = vrot.lane.b32.xlu0 %v8507_v27, %s6752_s2 }
0x1ed1   :  { %4057 = vrot.lane.b32.xlu1 %v8509_v44, %s6752_s2 }
0x1f2f   :  { %v6382_v4 = vpop.permute.xlu0 %6381  ;;  %v6377_v43 = vpop.permute.xlu1 %6376 }
0x1f30   :  { %v6384_v2 = vunpack.i.h.bf16 %v6382_v4  ;;  %v6383_v10 = vunpack.i.l.bf16 %v6382_v4  ;;  %v6379_v61 = vunpack.i.h.bf16 %v6377_v43  ;;  %v6378_v26 = vunpack.i.l.bf16 %v6377_v43 }
0x1f32   :  { %v4006_v59 = vsel %vm925_vm9, %v6379_v61, %v6384_v2  ;;  %v4005_v9 = vsel %vm925_vm9, %v6378_v26, %v6383_v10 }
0x1f33   :  { %v6392_v7 = vpop.permute.xlu0 %6391  ;;  %v6387_v6 = vpop.permute.xlu1 %6386 }
0x1f34   :  { %v6394_v30 = vunpack.i.h.bf16 %v6392_v7  ;;  %v6393_v31 = vunpack.i.l.bf16 %v6392_v7  ;;  %v6389_v13 = vunpack.i.h.bf16 %v6387_v6  ;;  %v6388_v40 = vunpack.i.l.bf16 %v6387_v6 }
0x1f36   :  { %v4020_v23 = vsel %vm9180_vm3, %v6389_v13, %v6394_v30  ;;  %v4019_v33 = vsel %vm9181_vm10, %v6388_v40, %v6393_v31  ;;  %vm9190_vm3 = vcmp.eq.s32.totalorder %v7106_v52, 1  ;;  %v5296_v13 = vcombine.low %v8507_v27, %v8509_v44 }
0x1f37   :  { %v6402_v32 = vpop.permute.xlu0 %6401  ;;  %v6397_v28 = vpop.permute.xlu1 %6396  ;;  %v4041_v46 = vsel %vm9182_vm0, %v4005_v9, %v4019_v33  ;;  %v4042_v11 = vsel %vm9183_vm2, %v4006_v59, %v4020_v23  ;;  %v4039_v25 = vsel %vm9184_vm11, %v4019_v33, %v4005_v9  ;;  %v4040_v42 = vsel %vm9185_vm6, %v4020_v23, %v4006_v59  ;;  %vm9191_vm10 = vmmov %vm9190_vm3 }
0x1f38   :  { %v4050_v34 = vpack.c.bf16 %v4042_v11, %v4041_v46  ;;  %v6403_v35 = vunpack.i.l.bf16 %v6402_v32  ;;  %v6399_v21 = vunpack.i.h.bf16 %v6397_v28  ;;  %v6398_v38 = vunpack.i.l.bf16 %v6397_v28  ;;  %vm9192_vm2 = vmmov %vm9182_vm0 }
0x1f39   :  { %v4048_v18 = vpack.c.bf16 %v4040_v42, %v4039_v25  ;;  %vm9193_vm11 = vcmp.eq.s32.totalorder %v7106_v52, 14  ;;  %v5299_v40 = vcombine.high %v8528_v29, %v8528_v29 }
0x1f3a   :  { %4104 = vmatpush1.bf16.msra.mxu1 %v4050_v34  ;;  %v3991_v4 = vsel %vm910_vm13, %v6398_v38, %v6403_v35  ;;  %vm9194_vm6 = vmmov %vm9193_vm11 }
0x1f3b   :  { %v6412_v57 = vpop.permute.xlu0 %6411  ;;  %v6407_v51 = vpop.permute.xlu1 %6406  ;;  %4105 = vmatprep.subr.bf16.mxu1 %v9049_v16 }
0x1f3c   :  { %v6414_v56 = vunpack.i.h.bf16 %v6412_v57  ;;  %v6413_v22 = vunpack.i.l.bf16 %v6412_v57  ;;  %v6409_v36 = vunpack.i.h.bf16 %v6407_v51  ;;  %v6408_v24 = vunpack.i.l.bf16 %v6407_v51 }
0x1f3e   :  { %4106 = vmatpush1.bf16.msra.mxu1 %v7136_v55  ;;  %v6404_v55 = vunpack.i.h.bf16 %v6402_v32  ;;  %v4034_v49 = vsel %vm9186_vm7, %v6409_v36, %v6414_v56  ;;  %v4033_v58 = vsel %vm9187_vm4, %v6408_v24, %v6413_v22  ;;  %vm9195_vm7 = vmmov %vm9187_vm4 }
0x1f3f   :  { %v4060_v53 = vpop.permute.xlu1 %4059  ;;  %v4056_v3 = vpop.permute.xlu0 %4055  ;;  %4107 = vmatprep.subr.bf16.mxu1 %v9049_v16  ;;  %v4035_v43 = vsel %vm9188_vm1, %v4033_v58, %v3991_v4  ;;  %v4043_v7 = vsel %vm9182_vm0, %v3991_v4, %v4033_v58  ;;  %vm9196_vm1 = vmmov %vm9187_vm4 }
0x1f40   :  { %v4063_v45 = vrot.slane %v4060_v53, 4  ;;  %v4061_v41 = vrot.slane %v4056_v3, 4  ;;  %v3992_v14 = vsel %vm910_vm13, %v6399_v21, %v6404_v55  ;;  %v4037_v10 = vsel %vm9190_vm3, %v8514_v5, %v4035_v43  ;;  %v8635_v53 = vld [vmem:[#allocation2 + $0x240] sm:$0xff]  ;;  %v4325_v3 = vld [vmem:[#allocation2 + $0x250] sm:$0xff]  ;;  %vm9198_vm3 = vmmov %vm9182_vm0 }
0x1f41   :  { %v4036_v2 = vsel %vm9189_vm12, %v4034_v49, %v3992_v14  ;;  %v4044_v6 = vsel %vm9192_vm2, %v3992_v14, %v4034_v49  ;;  %v4045_v30 = vsel %vm9193_vm11, %v8514_v5, %v4043_v7  ;;  %vm9197_vm12 = vmmov %vm9182_vm0  ;;  %vm9202_vm11 = vcmask 252928  }
0x1f42   :  { %v4069_v19 = vunpack.c.l.bf16 %v4063_v45  ;;  %4108 = vmatpush1.bf16.msra.mxu1 %v4049_v8  ;;  %v4067_v12 = vunpack.c.l.bf16 %v4061_v41  ;;  %v4038_v61 = vsel %vm9191_vm10, %v8516_v48, %v4036_v2  ;;  %vm9199_vm10 = vmmov %vm9194_vm6 }
0x1f43   :  { %v4058_v15 = vpop.permute.xlu1 %4057  ;;  %4109 = vmatprep.subr.bf16.mxu1 %v9049_v16  ;;  %v4047_v26 = vpack.c.bf16 %v4038_v61, %v4037_v10  ;;  %vm9200_vm2 = vmmov %vm9194_vm6 }
0x1f44   :  { %v4062_v37 = vrot.slane %v4058_v15, 4  ;;  %4082 = vperm.xlu0 %5779, %v4069_v19  }
0x1f46   :  { %v4068_v62 = vunpack.c.l.bf16 %v4062_v37  ;;  %4110 = vmatpush1.bf16.msra.mxu1 %v7085_v39 }
0x1f47   :  { %4111 = vmatprep.subr.bf16.mxu1 %v9049_v16 }
0x1f48   :  { %v6415_v17 = vpack.i.bf16 %v4068_v62, %v4067_v12 }
0x1f4a   :  { %6416 = vperm.xlu1 %5753, %v6415_v17   ;;  %4112 = vmatpush1.bf16.msra.mxu1 %v4048_v18 }
0x1f4b   :  { %4113 = vmatprep.subr.bf16.mxu1 %v9049_v16 }
0x1f4e   :  { %4114 = vmatpush1.bf16.msra.mxu1 %v7152_v0  ;;  %v4046_v0 = vsel %vm9194_vm6, %v8516_v48, %v4044_v6  ;;  %vm9203_vm6 = vmmov %vm9202_vm11 }
0x1f4f   :  { %4115 = vmatprep.subr.bf16.mxu1 %v9049_v16  ;;  %v4051_v31 = vpack.c.bf16 %v4046_v0, %v4045_v30 }
0x1f52   :  { %4116 = vmatpush1.bf16.msra.mxu1 %v4047_v26 }
0x1f53   :  { %4117 = vmatprep.subr.bf16.mxu1 %v9049_v16 }
0x1f56   :  { %4118 = vmatpush1.bf16.msra.mxu1 %v7162_v1  ;;  %v5298_v1 = vcombine.low %v8528_v29, %v8528_v29 }
0x1f57   :  { %4131 = vmatprep.subr.bf16.mxu1 %v9049_v16 }
0x1f5a   :  { %4132 = vmatpush2.bf16.msra.mxu1 %v4051_v31 }
0x1f5b   :  { %4133 = vmatprep.subr.bf16.mxu1 %v9049_v16 }
0x1f5e   :  { %4134 = vmatpush2.bf16.msra.mxu1 %v7124_v20 }
0x1f5f   :  { %5663 = vmatprep.subr.bf16.mxu1 %v9050_v60 }
0x1f61   :  { %4136 = vmatmul.mubr.bf16.vlgmr.msra.gmra.mxu1 %v5296_v13 }
0x1f62   :  { %5664 = vmatpush3.bf16.msra.mxu1 %v4049_v8  ;;  %5301 = vmatprep.mubr.msk.bf16.mxu1 %vm1369_vm8, %v5299_v40 }
0x1f63   :  { %5665 = vmatprep.subr.bf16.mxu1 %v9050_v60 }
0x1f66   :  { %5666 = vmatpush3.bf16.msra.mxu1 %v7085_v39 }
0x1f67   :  { %5679 = vmatprep.subr.bf16.mxu1 %v9050_v60 }
0x1f69   :  { %4144 = vmatmul.mubr.bf16.gmra.mxu1 %v5298_v1 }
0x1f6a   :  { %5667 = vmatprep.mubr.msk.bf16.mxu1 %vm6757_vm15, %v9050_v60 }
0x1f71   :  { %5668 = vmatmul.mubr.msk.bf16.vlgmr.msra.gmra.mxu1 %vm1369_vm8, %v4325_v3 }
0x1f72   :  { %5689 = vmatprep.mubr.msk.bf16.mxu1 %vm6757_vm15, %v9050_v60 }
0x1fbf   :  { %v4083_v23 = vpop.permute.xlu0 %4082 }
0x1fc5   :  { %v6417_v20 = vpop.permute.xlu1 %6416 }
0x2021   :  { %v4137_v27 = vpop.f32.mrf.mxu1 }
0x2022   :  { %v6678_v32 = vadd.low.f32.bf16 %v4137_v27, %v6417_v20 }
0x2023   :  { %v4139_v44 = vpop.f32.mrf.mxu1 }
0x2024   :  { %v8609_v11 = vmax.f32 %v6678_v32, 0.0 }
0x2025   :  { %v4140_v5 = vpop.f32.mrf.mxu1 }
0x2026   :  { %v6677_v48 = vadd.high.f32.bf16 %v4140_v5, %v6417_v20 }
0x2027   :  { %v4142_v59 = vpop.f32.mrf.mxu1 }
0x2028   :  { %v8601_v9 = vmax.f32 %v6677_v48, 0.0 }
0x2029   :  { %v4145_v33 = vpop.f32.mrf.mxu1 }
0x202a   :  { %v4146_v29 = vadd.f32 %v4145_v33, %v4083_v23  ;;  %4169 = vrot.lane.b32.xlu1 %v8601_v9, %s6751_s27  ;;  %4160 = vrot.lane.b32.xlu0 %v8601_v9, %s6758_s30 }
0x202b   :  { %v4147_v39 = vpop.f32.mrf.mxu1 }
0x202c   :  { %v8607_v28 = vmax.f32 %v4146_v29, 0.0 }
0x202d   :  { %v4148_v46 = vpop.f32.mrf.mxu1 }
0x202e   :  { %4232 = vrot.lane.b32.xlu1 %v8601_v9, %s6759_s4  ;;  %4223 = vrot.lane.b32.xlu0 %v8601_v9, %s6753_s28  ;;  %v6425_v57 = vpack.i.bf16 %v8609_v11, %v8607_v28  ;;  %v6445_v51 = vpack.i.bf16 %v8607_v28, %v8601_v9 }
0x202f   :  { %v4149_v34 = vpop.f32.mrf.mxu1 }
0x2032   :  { %6426 = vrot.lane.b32.xlu1 %v6425_v57, %s6751_s27  ;;  %6421 = vrot.lane.b32.xlu0 %v6425_v57, %s6758_s30 }
0x2036   :  { %6436 = vrot.lane.b32.xlu1 %v6425_v57, %s6759_s4  ;;  %6431 = vrot.lane.b32.xlu0 %v6425_v57, %s6753_s28 }
0x203a   :  { %4188 = vrot.lane.b32.xlu1 %v8609_v11, %s6752_s2  ;;  %4179 = vrot.lane.b32.xlu0 %v8609_v11, %s6760_s5 }
0x203e   :  { %6446 = vrot.lane.b32.xlu1 %v6445_v51, %s6752_s2  ;;  %6441 = vrot.lane.b32.xlu0 %v6445_v51, %s6760_s5 }
0x2042   :  { %6456 = vrot.lane.b32.xlu1 %v6445_v51, %s6761_s6  ;;  %6451 = vrot.lane.b32.xlu0 %v6445_v51, %s6754_s29 }
0x2046   :  { %4209 = vrot.lane.b32.xlu1 %v8609_v11, %s6761_s6  ;;  %4200 = vrot.lane.b32.xlu0 %v8609_v11, %s6754_s29 }
0x204a   :  { %4269 = vrot.lane.b32.xlu0 %v8635_v53, %s6752_s2 }
0x209c   :  { %v4170_v45 = vpop.permute.xlu1 %4169  ;;  %v4161_v41 = vpop.permute.xlu0 %4160 }
0x209d   :  { %v4177_v2 = vsel %vm910_vm13, %v4161_v41, %v4170_v45 }
0x20a0   :  { %v4233_v8 = vpop.permute.xlu1 %4232  ;;  %v4224_v19 = vpop.permute.xlu0 %4223 }
0x20a1   :  { %v8643_v38 = vsel %vm9195_vm7, %v4224_v19, %v4233_v8  ;;  %vm9204_vm7 = vmmov %vm9182_vm0 }
0x20a2   :  { %v4255_v61 = vsel %vm9182_vm0, %v4177_v2, %v8643_v38 }
0x20a4   :  { %v6427_v56 = vpop.permute.xlu1 %6426  ;;  %v6422_v22 = vpop.permute.xlu0 %6421 }
0x20a5   :  { %v6429_v15 = vunpack.i.h.bf16 %v6427_v56  ;;  %v6428_v36 = vunpack.i.l.bf16 %v6427_v56  ;;  %v6424_v24 = vunpack.i.h.bf16 %v6422_v22  ;;  %v6423_v12 = vunpack.i.l.bf16 %v6422_v22 }
0x20a7   :  { %v4176_v62 = vsel %vm910_vm13, %v6424_v24, %v6429_v15  ;;  %v4178_v49 = vsel %vm910_vm13, %v6423_v12, %v6428_v36  ;;  %vm9201_vm13 = vmmov %vm9200_vm2  ;;  %v4263_v24 = vpack.c.bf16 %v8601_v9, %v8609_v11 }
0x20a8   :  { %v6437_v37 = vpop.permute.xlu1 %6436  ;;  %v6432_v55 = vpop.permute.xlu0 %6431  ;;  %v4258_v31 = vsel %vm9201_vm13, %v8601_v9, %v4255_v61  ;;  %vm9213_vm13 = vcmp.eq.s32.totalorder %v7106_v52, 1 }
0x20a9   :  { %v6439_v25 = vunpack.i.h.bf16 %v6437_v37  ;;  %v6438_v42 = vunpack.i.l.bf16 %v6437_v37  ;;  %v6434_v35 = vunpack.i.h.bf16 %v6432_v55  ;;  %v6433_v21 = vunpack.i.l.bf16 %v6432_v55 }
0x20ab   :  { %v4239_v58 = vsel %vm9187_vm4, %v6434_v35, %v6439_v25  ;;  %v4241_v17 = vsel %vm9196_vm1, %v6433_v21, %v6438_v42  ;;  %vm9205_vm4 = vmmov %vm9182_vm0 }
0x20ac   :  { %v4254_v18 = vsel %vm9197_vm12, %v4176_v62, %v4239_v58  ;;  %v4189_v14 = vpop.permute.xlu1 %4188  ;;  %v4180_v4 = vpop.permute.xlu0 %4179  ;;  %v4256_v43 = vsel %vm9198_vm3, %v4178_v49, %v4241_v17  ;;  %vm9206_vm1 = vmmov %vm9203_vm6 }
0x20ad   :  { %v4259_v10 = vsel %vm9199_vm10, %v8607_v28, %v4256_v43  ;;  %v4257_v7 = vsel %vm9200_vm2, %v8609_v11, %v4254_v18  ;;  %v4197_v45 = vsel %vm925_vm9, %v4180_v4, %v4189_v14  ;;  %vm9207_vm12 = vmmov %vm9182_vm0 }
0x20ae   :  { %v4267_v26 = vpack.c.bf16 %v4259_v10, %v4259_v10  ;;  %v4266_v13 = vpack.c.bf16 %v4258_v31, %v4257_v7 }
0x20b0   :  { %v6447_v6 = vpop.permute.xlu1 %6446  ;;  %v6442_v30 = vpop.permute.xlu0 %6441  ;;  %v4283_v0 = vsel %vm152_vm5, %v4267_v26, 0 }
0x20b1   :  { %5644 = vmatpush3.bf16.msra.mxu0 %v4283_v0  ;;  %v6449_v40 = vunpack.i.h.bf16 %v6447_v6  ;;  %v6448_v1 = vunpack.i.l.bf16 %v6447_v6  ;;  %v6444_v20 = vunpack.i.h.bf16 %v6442_v30  ;;  %v6443_v27 = vunpack.i.l.bf16 %v6442_v30 }
0x20b2   :  { %5645 = vmatprep.subr.bf16.mxu0 %v9050_v60 }
0x20b3   :  { %v4199_v32 = vsel %vm925_vm9, %v6444_v20, %v6449_v40  ;;  %v4198_v29 = vsel %vm925_vm9, %v6443_v27, %v6448_v1  ;;  %vm9208_vm9 = vcmp.eq.s32.totalorder %v7106_v52, 0  ;;  %v4363_v52 = vpop.f32.mrf.mxu1  ;;  %v4418_v1 = vld [vmem:[#allocation2 + $0x268] sm:$0xff]  ;;  %v4417_v20 = vld [vmem:[#allocation2 + $0x260] sm:$0xff] }
0x20b4   :  { %v6457_v44 = vpop.permute.xlu1 %6456  ;;  %v6452_v5 = vpop.permute.xlu0 %6451  ;;  %vm9209_vm3 = vmmov %vm9208_vm9 }
0x20b5   :  { %v6459_v48 = vunpack.i.h.bf16 %v6457_v44  ;;  %v6458_v59 = vunpack.i.l.bf16 %v6457_v44  ;;  %v6454_v23 = vunpack.i.h.bf16 %v6452_v5  ;;  %v6453_v33 = vunpack.i.l.bf16 %v6452_v5  ;;  %5646 = vmatpush3.bf16.msra.mxu0 %v4266_v13  ;;  %vm9210_vm10 = vmmov %vm9209_vm3 }
0x20b6   :  { %5647 = vmatprep.subr.bf16.mxu0 %v9050_v60  ;;  %v4244_v55 = vsel %vm9210_vm10, %v4241_v17, %v4178_v49  ;;  %vm9211_vm0 = vmmov %vm9209_vm3 }
0x20b7   :  { %v4220_v39 = vsel %vm9202_vm11, %v6454_v23, %v6459_v48  ;;  %v4219_v46 = vsel %vm9203_vm6, %v6453_v33, %v6458_v59  ;;  %vm9212_vm2 = vmmov %vm9211_vm0  ;;  %v4247_v21 = vsel %vm9213_vm13, %v8607_v28, %v4244_v55 }
0x20b8   :  { %v4210_v34 = vpop.permute.xlu1 %4209  ;;  %v4201_v57 = vpop.permute.xlu0 %4200  ;;  %v4252_v51 = vsel %vm9204_vm7, %v4198_v29, %v4219_v46  ;;  %v4253_v3 = vsel %vm9205_vm4, %v4199_v32, %v4220_v39  ;;  %v4249_v12 = vsel %vm9208_vm9, %v4219_v46, %v4198_v29  ;;  %v4250_v37 = vsel %vm9209_vm3, %v4220_v39, %v4199_v32  ;;  %vm9214_vm11 = vmmov %vm9211_vm0  ;;  %v9221_v29 = vld [vmem:[#allocation22_spill] sm:$0xff] }
0x20b9   :  { %v4218_v41 = vsel %vm9206_vm1, %v4201_v57, %v4210_v34  ;;  %v4265_v8 = vpack.c.bf16 %v4253_v3, %v4252_v51  ;;  %v4262_v25 = vpack.c.bf16 %v4250_v37, %v4249_v12  ;;  %v4242_v35 = vsel %vm9212_vm2, %v4239_v58, %v4176_v62  ;;  %vm9215_vm6 = vmmov %vm9213_vm13 }
0x20ba   :  { %v4251_v19 = vsel %vm9207_vm12, %v4197_v45, %v4218_v41  ;;  %v4248_v42 = vsel %vm9211_vm0, %v4218_v41, %v4197_v45  ;;  %v4243_v18 = vsel %vm9214_vm11, %v8643_v38, %v4177_v2  ;;  %v4245_v49 = vsel %vm9215_vm6, %v8609_v11, %v4242_v35  ;;  %vm9216_vm7 = vmmov %vm9215_vm6  ;;  %v6631_v11 = vld [vmem:[#allocation5 + $0x1b0] ss:$8 sps:$4 sm:$0xff]  }
0x20bb   :  { %5648 = vmatpush3.bf16.msra.mxu0 %v4265_v8  ;;  %v4264_v22 = vpack.c.bf16 %v4251_v19, %v8607_v28  ;;  %v4261_v14 = vpack.c.bf16 %v4248_v42, %v4247_v21  ;;  %v4246_v62 = vsel %vm9216_vm7, %v8601_v9, %v4243_v18  ;;  %vm9217_vm4 = vcmask 982016   ;;  %v6630_v28 = vld [vmem:[#allocation5 + $0x1c0] ss:$8 sps:$4 sm:$0xff]   ;;  %v5669_v9 = vpop.f32.mrf.mxu1 }
0x20bc   :  { %v4270_v56 = vpop.permute.xlu0 %4269  ;;  %5649 = vmatprep.subr.bf16.mxu0 %v9050_v60  ;;  %v4260_v58 = vpack.c.bf16 %v4246_v62, %v4245_v49  ;;  %vm9219_vm12 = vcmp.eq.s32.totalorder %v6995_v50, 62  ;;  %vm9223_vm3 = vcmp.eq.s32.totalorder %v6995_v50, 0  ;;  %vm9226_vm0 = vcmp.eq.s32.totalorder %v6995_v50, 1 }
0x20bd   :  { %v4271_v15 = vrot.slane %v4270_v56, 4  ;;  %v4366_v38 = vpop.f32.mrf.mxu1  ;;  %vm9224_vm10 = vmmov %vm9223_vm3  ;;  %v5305_v37 = vcombine.low %v4417_v20, %v4418_v1  ;;  %vm9228_vm2 = vcmask 654336  }
0x20be   :  { %vm9232_vm6 = vmmov %vm9219_vm12 }
0x20bf   :  { %v4273_v36 = vunpack.c.l.bf16 %v4271_v15  ;;  %5650 = vmatpush3.bf16.msra.mxu0 %v4264_v22  ;;  %v5670_v17 = vpop.f32.mrf.mxu1  ;;  %v9225_v22 = vld [vmem:[#allocation23_spill] sm:$0xff]  ;;  %vm9233_vm7 = vmmov %vm9232_vm6 }
0x20c0   :  { %5651 = vmatprep.subr.bf16.mxu0 %v9050_v60 }
0x20c1   :  { %4276 = vperm.xlu1 %5753, %v4273_v36  }
0x20c3   :  { %5652 = vmatpush3.bf16.msra.mxu0 %v4263_v24  ;;  %v9227_v24 = vld [vmem:[#allocation24_spill] sm:$0xff] }
0x20c4   :  { %5653 = vmatprep.subr.bf16.mxu0 %v9050_v60 }
0x20c7   :  { %5654 = vmatpush3.bf16.msra.mxu0 %v4262_v25 }
0x20c8   :  { %5655 = vmatprep.subr.bf16.mxu0 %v9050_v60 }
0x20cb   :  { %5656 = vmatpush3.bf16.msra.mxu0 %v4261_v14 }
0x20cc   :  { %5657 = vmatprep.subr.bf16.mxu0 %v9050_v60 }
0x20cf   :  { %5658 = vmatpush3.bf16.msra.mxu0 %v4260_v58 }
0x20d0   :  { %5671 = vmatprep.subr.bf16.mxu0 %v9050_v60 }
0x20d2   :  { %5660 = vmatmul.mubr.msk.bf16.vlgmr.msra.gmra.mxu0 %vm9217_vm4, %v8635_v53 }
0x20d3   :  { %5672 = vmatpush3.bf16.msra.mxu0 %v6630_v28  ;;  %5675 = vmatprep.mubr.msk.bf16.mxu0 %vm6757_vm15, %v9050_v60  ;;  %v4509_v28 = vld [vmem:[#allocation2 + $0x270] sm:$0xff] }
0x20d4   :  { %5673 = vmatprep.subr.bf16.mxu0 %v9050_v60 }
0x20d7   :  { %5674 = vmatpush3.bf16.msra.mxu0 %v6631_v11  ;;  %v4597_v11 = vld [vmem:[#allocation2 + $0x280] sm:$0xff] }
0x20d8   :  { %5693 = vmatprep.subr.bf16.mxu0 %v9050_v60 }
0x213c   :  { %v4277_v4 = vpop.permute.xlu1 %4276 }
0x2192   :  { %v4319_v43 = vpop.f32.mrf.mxu0 }
0x2193   :  { %v4320_v2 = vadd.f32 %v4319_v43, %v4277_v4 }
0x2194   :  { %v5661_v10 = vpop.f32.mrf.mxu0 }
0x2195   :  { %v4369_v53 = vadd.f32 %v4363_v52, %v4320_v2 }
0x2196   :  { %v4322_v61 = vpop.f32.mrf.mxu0 }
0x2197   :  { %vm4370_vm1 = vcmp.ge.f32.partialorder %v4369_v53, 0.0  ;;  %v4371_v26 = vmul.f32 0.1, %v4369_v53 }
0x2198   :  { %v5662_v7 = vpop.f32.mrf.mxu0 }
0x2199   :  { %v4372_v6 = vsel %vm4370_vm1, %v4369_v53, %v4371_v26 }
0x219a   :  { %v4373_v30 = vpack.c.bf16 %v4372_v6, %v4372_v6 }
0x219c   :  { %5676 = vmatmul.mubr.msk.bf16.vlgmr.msra.gmra.mxu0 %vm1369_vm8, %v4373_v30  ;;  %vm9218_vm8 = vcmp.eq.s32.totalorder %v6995_v50, 63  ;;  %v6637_v50 = vld [vmem:[#allocation5 + $0x220] ss:$8 sps:$4 sm:$0xff]  }
0x219d   :  { %5703 = vmatprep.mubr.msk.bf16.mxu0 %vm6757_vm15, %v9050_v60  ;;  %vm9220_vm9 = vmmov %vm9218_vm8 }
0x219e   :  { %vm9230_vm13 = vmmov %vm9218_vm8 }
0x219f   :  { %vm9231_vm11 = vmmov %vm9218_vm8 }
0x21a0   :  { %vm9234_vm4 = vmmov %vm9218_vm8 }
0x21a1   :  { %vm9235_vm1 = vmmov %vm9234_vm4 }
0x225c   :  { %v4411_v0 = vpop.f32.mrf.mxu0 }
0x225d   :  { %4425 = vrot.lane.b32.xlu1 %v4411_v0, %s6753_s28  ;;  %4419 = vrot.lane.b32.xlu0 %v4411_v0, %s6751_s27 }
0x225e   :  { %v5677_v31 = vpop.f32.mrf.mxu0 }
0x2260   :  { %v4414_v13 = vpop.f32.mrf.mxu0 }
0x2261   :  { %4423 = vrot.lane.b32.xlu1 %v4411_v0, %s6754_s29  ;;  %4421 = vrot.lane.b32.xlu0 %v4411_v0, %s6752_s2 }
0x2262   :  { %v5678_v40 = vpop.f32.mrf.mxu0 }
0x2265   :  { %4442 = vrot.lane.b32.xlu1 %v4418_v1, %s6752_s2  ;;  %4440 = vrot.lane.b32.xlu0 %v4417_v20, %s6752_s2 }
0x22cf   :  { %v4426_v27 = vpop.permute.xlu1 %4425  ;;  %v4420_v44 = vpop.permute.xlu0 %4419 }
0x22d0   :  { %v4431_v5 = vsel %vm9218_vm8, %v4420_v44, %v4426_v27  ;;  %v4427_v19 = vsel %vm9224_vm10, %v4426_v27, %v4420_v44  ;;  %vm9236_vm8 = vmmov %vm9223_vm3 }
0x22d1   :  { %v4432_v48 = vsel %vm9219_vm12, %v4411_v0, %v4431_v5  ;;  %v4428_v36 = vsel %vm9226_vm0, %v4411_v0, %v4427_v19  ;;  %vm9237_vm12 = vmmov %vm9223_vm3  ;;  %v6641_v19 = vld [vmem:[#allocation5 + $0x200] ss:$8 sps:$4 sm:$0xff]  }
0x22d2   :  { %v4437_v59 = vpack.c.bf16 %v4432_v48, %v7004_v54  ;;  %v9222_v54 = vld [vmem:[#allocation21_spill] sm:$0xff]  ;;  %v4433_v12 = vpack.c.bf16 %v4428_v36, %v9227_v24  ;;  %vm9239_vm10 = vmmov %vm9226_vm0  ;;  %v6646_v24 = vld [vmem:[#allocation5 + $0x1d4] ss:$8 sps:$4 sm:$0xff]  }
0x22d3   :  { %v4424_v23 = vpop.permute.xlu1 %4423  ;;  %v4422_v33 = vpop.permute.xlu0 %4421  ;;  %v4435_v41 = vpack.c.bf16 %v4411_v0, %v9222_v54  ;;  %v6636_v54 = vld [vmem:[#allocation5 + $0x224] ss:$8 sps:$4 sm:$0xff]   ;;  %v6645_v36 = vld [vmem:[#allocation5 + $0x1e0] ss:$8 sps:$4 sm:$0xff]  }
0x22d4   :  { %v4430_v32 = vsel %vm9220_vm9, %v4422_v33, %v4424_v23  ;;  %5680 = vmatpush3.bf16.msra.mxu1 %v4437_v59  ;;  %v4429_v8 = vsel %vm9223_vm3, %v4424_v23, %v4422_v33  ;;  %vm9238_vm9 = vmmov %vm9223_vm3 }
0x22d5   :  { %v4436_v39 = vpack.c.bf16 %v4430_v32, %v9221_v29  ;;  %5681 = vmatprep.subr.bf16.mxu1 %v9050_v60  ;;  %v4434_v15 = vpack.c.bf16 %v4429_v8, %v9225_v22  ;;  %v6640_v8 = vld [vmem:[#allocation5 + $0x204] ss:$8 sps:$4 sm:$0xff]   ;;  %v6643_v22 = vld [vmem:[#allocation5 + $0x1f0] ss:$8 sps:$4 sm:$0xff]  }
0x22d7   :  { %v4443_v46 = vpop.permute.xlu1 %4442  ;;  %v4441_v34 = vpop.permute.xlu0 %4440 }
0x22d8   :  { %v4445_v57 = vrot.slane %v4443_v46, 4  ;;  %v4444_v51 = vrot.slane %v4441_v34, 4  ;;  %5682 = vmatpush3.bf16.msra.mxu1 %v4436_v39 }
0x22d9   :  { %5683 = vmatprep.subr.bf16.mxu1 %v9050_v60 }
0x22da   :  { %v4449_v3 = vunpack.c.l.bf16 %v4445_v57  ;;  %v4448_v45 = vunpack.c.l.bf16 %v4444_v51  ;;  %v6632_v57 = vld [vmem:[#allocation5 + $0x244] ss:$8 sps:$4 sm:$0xff]   ;;  %v6633_v51 = vld [vmem:[#allocation5 + $0x240] ss:$8 sps:$4 sm:$0xff]  }
0x22dc   :  { %v6460_v56 = vpack.i.bf16 %v4449_v3, %v4448_v45  ;;  %5684 = vmatpush3.bf16.msra.mxu1 %v4435_v41  ;;  %v6634_v3 = vld [vmem:[#allocation5 + $0x234] ss:$8 sps:$4 sm:$0xff]   ;;  %v6635_v45 = vld [vmem:[#allocation5 + $0x230] ss:$8 sps:$4 sm:$0xff]  }
0x22dd   :  { %5685 = vmatprep.subr.bf16.mxu1 %v9050_v60 }
0x22de   :  { %6461 = vperm.xlu0 %5779, %v6460_v56   ;;  %v6642_v56 = vld [vmem:[#allocation5 + $0x1f4] ss:$8 sps:$4 sm:$0xff]  }
0x22e0   :  { %5686 = vmatpush3.bf16.msra.mxu1 %v4434_v15  ;;  %v6644_v15 = vld [vmem:[#allocation5 + $0x1e4] ss:$8 sps:$4 sm:$0xff]  }
0x22e1   :  { %5687 = vmatprep.subr.bf16.mxu1 %v9050_v60 }
0x22e4   :  { %5688 = vmatpush3.bf16.msra.mxu1 %v4433_v12  ;;  %v6647_v12 = vld [vmem:[#allocation5 + $0x1d0] ss:$8 sps:$4 sm:$0xff]  }
0x22e5   :  { %5707 = vmatprep.subr.bf16.mxu1 %v9050_v60 }
0x22e7   :  { %5690 = vmatmul.mubr.msk.bf16.vlgmr.msra.gmra.mxu1 %vm9228_vm2, %v5305_v37 }
0x22e8   :  { %5708 = vmatpush3.bf16.msra.mxu1 %v4435_v41  ;;  %5709 = vmatprep.mubr.msk.bf16.mxu1 %vm6757_vm15, %v9050_v60  ;;  %vm9229_vm15 = vcmask 130048   ;;  %v6638_v41 = vld [vmem:[#allocation5 + $0x214] ss:$8 sps:$4 sm:$0xff]  }
0x22ef   :  { %5710 = vmatmul.mubr.msk.bf16.vlgmr.msra.gmra.mxu1 %vm9229_vm15, %v4597_v11 }
0x22f0   :  { %4780 = vmatprep.mubr.bf16.mxu1 %v9049_v16 }
0x2359   :  { %v6462_v55 = vpop.permute.xlu0 %6461 }
0x23a7   :  { %v4500_v25 = vpop.f32.mrf.mxu1 }
0x23a8   :  { %v6679_v35 = vadd.low.f32.bf16 %v4500_v25, %v6462_v55 }
0x23a9   :  { %v5691_v42 = vpop.f32.mrf.mxu1 }
0x23aa   :  { %v4507_v49 = vmax.f32 %v6679_v35, 0.0 }
0x23ab   :  { %v4503_v21 = vpop.f32.mrf.mxu1 }
0x23ac   :  { %v6680_v18 = vadd.high.f32.bf16 %v4503_v21, %v6462_v55 }
0x23ad   :  { %v5692_v14 = vpop.f32.mrf.mxu1 }
0x23ae   :  { %v4508_v62 = vmax.f32 %v6680_v18, 0.0 }
0x23af   :  { %v4635_v37 = vpop.f32.mrf.mxu1 }
0x23b0   :  { %v6470_v58 = vpack.i.bf16 %v4508_v62, %v4507_v49  ;;  %v4540_v48 = vpack.c.bf16 %v4508_v62, %v4507_v49 }
0x23b1   :  { %v5711_v55 = vpop.f32.mrf.mxu1 }
0x23b2   :  { %6471 = vrot.lane.b32.xlu0 %v6470_v58, %s6753_s28  ;;  %6466 = vrot.lane.b32.xlu1 %v6470_v58, %s6751_s27 }
0x23b3   :  { %v4638_v25 = vpop.f32.mrf.mxu1 }
0x23b5   :  { %v5712_v42 = vpop.f32.mrf.mxu1 }
0x23b6   :  { %6481 = vrot.lane.b32.xlu0 %v6470_v58, %s6754_s29  ;;  %6476 = vrot.lane.b32.xlu1 %v6470_v58, %s6752_s2 }
0x23ba   :  { %4544 = vrot.lane.b32.xlu1 %v4509_v28, %s6752_s2 }
0x2424   :  { %v6472_v52 = vpop.permute.xlu0 %6471  ;;  %v6467_v9 = vpop.permute.xlu1 %6466 }
0x2425   :  { %v6474_v38 = vunpack.i.h.bf16 %v6472_v52  ;;  %v6473_v17 = vunpack.i.l.bf16 %v6472_v52  ;;  %v6469_v4 = vunpack.i.h.bf16 %v6467_v9  ;;  %v6468_v43 = vunpack.i.l.bf16 %v6467_v9 }
0x2427   :  { %v4535_v2 = vsel %vm9230_vm13, %v6469_v4, %v6474_v38  ;;  %v4534_v10 = vsel %vm9231_vm11, %v6468_v43, %v6473_v17  ;;  %v4527_v33 = vsel %vm9238_vm9, %v6474_v38, %v6469_v4  ;;  %v4526_v32 = vsel %vm9223_vm3, %v6473_v17, %v6468_v43  ;;  %v6648_v4 = vld [vmem:[%s8945_s0 + $0x8] sm:$0xff] }
0x2428   :  { %v6482_v53 = vpop.permute.xlu0 %6481  ;;  %v6477_v61 = vpop.permute.xlu1 %6476  ;;  %v4536_v26 = vsel %vm9232_vm6, %v4507_v49, %v4534_v10  ;;  %v4537_v7 = vsel %vm9233_vm7, %v4508_v62, %v4535_v2  ;;  %v4528_v39 = vsel %vm9239_vm10, %v4507_v49, %v4526_v32  ;;  %v4529_v46 = vsel %vm9226_vm0, %v4508_v62, %v4527_v33  ;;  %v6649_v10 = vld [vmem:[%s8945_s0] sm:$0xff]  ;;  %s6766_s0 = smov [#allocation7]  }
0x2429   :  { %v6484_v6 = vunpack.i.h.bf16 %v6482_v53  ;;  %v6483_v30 = vunpack.i.l.bf16 %v6482_v53  ;;  %v6479_v0 = vunpack.i.h.bf16 %v6477_v61  ;;  %v6478_v31 = vunpack.i.l.bf16 %v6477_v61  ;;  %s5164_s19 = sshll.u32 %s6766_s0, 4  ;;  %s5165_s19 = int_to_ptr.vmem [resolvable:$true] %s5164_s19 }
0x242a   :  { %v4542_v13 = vpack.c.bf16 %v4537_v7, %v4536_v26  ;;  %v4538_v34 = vpack.c.bf16 %v4529_v46, %v4528_v39  ;;  %v4687_v26 = vld [vmem:[#allocation2 + $0x290] sm:$0xff]  ;;  %s6721_s20 = scalar_lea.vmem %s5165_s19, 64  ;;  %p6726_p11 = scmp.lt.s32.totalorder %s5165_s19, %s5165_s19 }
0x242b   :  { %v4533_v40 = vsel %vm9234_vm4, %v6479_v0, %v6484_v6  ;;  %v4532_v1 = vsel %vm9235_vm1, %v6478_v31, %v6483_v30  ;;  %v4531_v59 = vsel %vm9236_vm8, %v6484_v6, %v6479_v0  ;;  %v4530_v23 = vsel %vm9237_vm12, %v6483_v30, %v6478_v31  ;;  %p6722_p10 = scmp.ne.s32.totalorder %s5165_s19, %s6721_s20  ;;  %p6727_p12 = scmp.lt.s32.totalorder %s6721_s20, %s6721_s20 }
0x242c   :  { %v4541_v20 = vpack.c.bf16 %v4533_v40, %v4532_v1  ;;  %5694 = vmatpush3.bf16.msra.mxu0 %v4542_v13  ;;  %v4545_v27 = vpop.permute.xlu1 %4544  ;;  %v4539_v29 = vpack.c.bf16 %v4531_v59, %v4530_v23  ;;  %v9240_v40 = vld [vmem:[#allocation11_spill] sm:$0xff]  ;;  %v9246_v23 = vld [vmem:[#allocation12_spill] sm:$0xff] }
0x242d   :  { %v4546_v44 = vrot.slane %v4545_v27, 4  ;;  %5695 = vmatprep.subr.bf16.mxu0 %v9050_v60  ;;  %vm9241_vm13 = vcmp.lt.s32.totalorder %v9240_v40, 126  ;;  %vm9243_vm6 = vcmp.lt.s32.totalorder %v9240_v40, 2  ;;  %vm9245_vm4 = vcmp.eq.s32.totalorder %v9240_v40, 127  ;;  %p6728_p13 = por %p6727_p12, %p6726_p11 }
0x242e   :  { %vm9242_vm11 = vmmov %vm9241_vm13  ;;  %vm9247_vm1 = vcmp.eq.s32.totalorder %v9246_v23, 127  ;;  %vm9248_vm8 = vcmp.eq.s32.totalorder %v9246_v23, 126  ;;  %vm9249_vm12 = vcmp.eq.s32.totalorder %v9240_v40, 126  ;;  %vm9250_vm9 = vcmp.lt.s32.totalorder %v9240_v40, 127 }
0x242f   :  { %v4548_v5 = vunpack.c.l.bf16 %v4546_v44  ;;  %vm9244_vm7 = vmmov %vm9243_vm6  ;;  %vm9252_vm10 = vcmp.lt.s32.totalorder %v9240_v40, 1  ;;  %p6729_p0 = pnand %p6728_p13, %p6722_p10 }
0x2430   :  { %5696 = vmatpush3.bf16.msra.mxu0 %v4541_v20  ;;  %vm9251_vm3 = vmmov %vm9250_vm9 }
0x2431   :  { %4551 = vperm.xlu0 %5779, %v4548_v5   ;;  %5697 = vmatprep.subr.bf16.mxu0 %v9050_v60  ;;  %vm9253_vm0 = vmmov %vm9252_vm10 }
0x2434   :  { %5698 = vmatpush3.bf16.msra.mxu0 %v4540_v48 }
0x2435   :  { %5699 = vmatprep.subr.bf16.mxu0 %v9050_v60 }
0x2438   :  { %5700 = vmatpush3.bf16.msra.mxu0 %v4539_v29 }
0x2439   :  { %5701 = vmatprep.subr.bf16.mxu0 %v9050_v60  ;;  %v6639_v60 = vld [vmem:[#allocation5 + $0x210] ss:$8 sps:$4 sm:$0xff]  }
0x243c   :  { %5702 = vmatpush3.bf16.msra.mxu0 %v4538_v34 }
0x243d   :  { %4646 = vmatprep.subr.bf16.mxu0 %v6632_v57 }
0x243f   :  { %5704 = vmatmul.mubr.msk.bf16.vlgmr.msra.gmra.mxu0 %vm9228_vm2, %v4509_v28  ;;  %vm9256_vm2 = vmmov %vm9247_vm1 }
0x2440   :  { %4647 = vmatpush1.bf16.msra.mxu0 %v6633_v51  ;;  %4678 = vmatprep.mubr.bf16.mxu0 %v9049_v16 }
0x2441   :  { %4648 = vmatprep.subr.bf16.mxu0 %v6634_v3 }
0x2444   :  { %4649 = vmatpush1.bf16.msra.mxu0 %v6635_v45 }
0x2445   :  { %4650 = vmatprep.subr.bf16.mxu0 %v6636_v54 }
0x2448   :  { %4651 = vmatpush1.bf16.msra.mxu0 %v6637_v50 }
0x2449   :  { %4652 = vmatprep.subr.bf16.mxu0 %v6638_v41  ;;  %v9254_v41 = vld [vmem:[#allocation13_spill] sm:$0xff] }
0x244c   :  { %4653 = vmatpush1.bf16.msra.mxu0 %v6639_v60 }
0x244d   :  { %4654 = vmatprep.subr.bf16.mxu0 %v6640_v8  ;;  %v9255_v8 = vld [vmem:[#allocation14_spill] sm:$0xff] }
0x2450   :  { %4655 = vmatpush1.bf16.msra.mxu0 %v6641_v19 }
0x2451   :  { %4656 = vmatprep.subr.bf16.mxu0 %v6642_v56 }
0x2454   :  { %4657 = vmatpush1.bf16.msra.mxu0 %v6643_v22 }
0x2455   :  { %4658 = vmatprep.subr.bf16.mxu0 %v6644_v15  ;;  %v9257_v15 = vld [vmem:[#allocation15_spill] sm:$0xff] }
0x2458   :  { %4659 = vmatpush1.bf16.msra.mxu0 %v6645_v36 }
0x2459   :  { %4660 = vmatprep.subr.bf16.mxu0 %v6646_v24 }
0x245c   :  { %4661 = vmatpush1.bf16.msra.mxu0 %v6647_v12 }
0x24ac   :  { %v4552_v35 = vpop.permute.xlu0 %4551 }
0x24ff   :  { %v4591_v21 = vpop.f32.mrf.mxu0 }
0x2500   :  { %v4592_v18 = vadd.f32 %v4591_v21, %v4552_v35  ;;  %v9262_v35 = vld [vmem:[#allocation18_spill] sm:$0xff] }
0x2501   :  { %v5705_v14 = vpop.f32.mrf.mxu0 }
0x2502   :  { %v4641_v49 = vadd.f32 %v4635_v37, %v4592_v18  ;;  %v9259_v37 = vld [vmem:[#allocation16_spill] sm:$0xff] }
0x2503   :  { %v4594_v62 = vpop.f32.mrf.mxu0 }
0x2504   :  { %vm4642_vm15 = vcmp.ge.f32.partialorder %v4641_v49, 0.0  ;;  %v4643_v58 = vmul.f32 0.1, %v4641_v49  ;;  %v9266_v62 = vld [vmem:[#allocation20_spill] sm:$0xff] }
0x2505   :  { %v5706_v28 = vpop.f32.mrf.mxu0 }
0x2506   :  { %v4644_v11 = vsel %vm4642_vm15, %v4641_v49, %v4643_v58  ;;  %vm9258_vm15 = vmmov %vm9245_vm4  ;;  %v9267_v28 = vld [vmem:[#allocation17_spill] sm:$0xff] }
0x2507   :  { %v4645_v52 = vpack.c.bf16 %v4644_v11, %v4644_v11 }
0x2509   :  { %4679 = vmatmul.mubr.bf16.vlgmr.msra.gmra.mxu0 %v4645_v52 }
0x250a   :  { %4931 = vmatprep.mubr.bf16.mxu0 %v9049_v16 }
0x25c9   :  { %v8790_v9 = vpop.f32.mrf.mxu0 }
0x25ca   :  { %v4728_v53 = vpack.c.bf16 %v8790_v9, %v6649_v10 }
0x25cb   :  { %v4682_v38 = vpop.f32.mrf.mxu0 }
0x25cc   :  { %v6490_v17 = vpack.i.bf16 %v4682_v38, %v8790_v9  ;;  %v4729_v43 = vpack.c.bf16 %v4682_v38, %v6648_v4 }
0x25cd   :  { %v4684_v2 = vpop.f32.mrf.mxu0 }
0x25ce   :  { %6491 = vrot.lane.b32.xlu0 %v6490_v17, %s6753_s28  ;;  %6486 = vrot.lane.b32.xlu1 %v6490_v17, %s6751_s27 }
0x25cf   :  { %4913 = vmatprep.subr.bf16.mxu0 %v4729_v43  ;;  %v4685_v61 = vpop.f32.mrf.mxu0 }
0x25d0   :  { %4914 = vmatpush1.bf16.msra.mxu0 %v4728_v53 }
0x25d2   :  { %6501 = vrot.lane.b32.xlu0 %v6490_v17, %s6754_s29  ;;  %6496 = vrot.lane.b32.xlu1 %v6490_v17, %s6752_s2  ;;  %v9269_v17 = vld [vmem:[#allocation19_spill] sm:$0xff] }
0x25d6   :  { %4735 = vrot.lane.b32.xlu1 %v4687_v26, %s6752_s2 }
0x2640   :  { %v6492_v7 = vpop.permute.xlu0 %6491  ;;  %v6487_v6 = vpop.permute.xlu1 %6486 }
0x2641   :  { %v6494_v30 = vunpack.i.h.bf16 %v6492_v7  ;;  %v6493_v0 = vunpack.i.l.bf16 %v6492_v7  ;;  %v6489_v31 = vunpack.i.h.bf16 %v6487_v6  ;;  %v6488_v13 = vunpack.i.l.bf16 %v6487_v6 }
0x2643   :  { %v4710_v1 = vsel %vm9241_vm13, %v6493_v0, %v6494_v30  ;;  %v4711_v20 = vsel %vm9242_vm11, %v6494_v30, %v6493_v0  ;;  %v4692_v27 = vsel %vm9243_vm6, %v6488_v13, %v6489_v31  ;;  %v4693_v44 = vsel %vm9244_vm7, %v6489_v31, %v6488_v13  ;;  %v4895_v0 = vld [vmem:[#allocation2 + $0x2b0] sm:$0xff]  ;;  %v8870_v31 = vld [vmem:[#allocation2 + $0x2c0] sm:$0xff] }
0x2644   :  { %v4720_v5 = vsel %vm9245_vm4, %v4693_v44, %v4710_v1  ;;  %v6502_v48 = vpop.permute.xlu0 %6501  ;;  %v6497_v59 = vpop.permute.xlu1 %6496  ;;  %v4721_v33 = vsel %vm9247_vm1, %v4692_v27, %v4711_v20  ;;  %vm9260_vm13 = vcmp.eq.s32.totalorder %v9246_v23, 0  ;;  %vm9263_vm6 = vcmp.eq.s32.totalorder %v9240_v40, 0  ;;  %v8874_v13 = vld [vmem:[#allocation2 + $0x2d0] sm:$0xff] }
0x2645   :  { %v6504_v32 = vunpack.i.h.bf16 %v6502_v48  ;;  %v6503_v29 = vunpack.i.l.bf16 %v6502_v48  ;;  %v6499_v39 = vunpack.i.h.bf16 %v6497_v59  ;;  %v6498_v46 = vunpack.i.l.bf16 %v6497_v59  ;;  %vm9261_vm11 = vmmov %vm9260_vm13 }
0x2646   :  { %v4723_v34 = vsel %vm9248_vm8, %v4682_v38, %v4721_v33  ;;  %v4722_v57 = vsel %vm9249_vm12, %v8790_v9, %v4720_v5  ;;  %v4713_v42 = vsel %vm9261_vm11, %v4711_v20, %v4692_v27  ;;  %vm9264_vm7 = vmmov %vm9263_vm6  ;;  %vm9265_vm4 = vcmp.eq.s32.totalorder %v9246_v23, 1 }
0x2647   :  { %v4704_v51 = vsel %vm9250_vm9, %v6503_v29, %v6504_v32  ;;  %v4705_v3 = vsel %vm9251_vm3, %v6504_v32, %v6503_v29  ;;  %v4698_v45 = vsel %vm9252_vm10, %v6498_v46, %v6499_v39  ;;  %v4699_v54 = vsel %vm9253_vm0, %v6499_v39, %v6498_v46 }
0x2648   :  { %v4736_v50 = vpop.permute.xlu1 %4735  ;;  %v4733_v60 = vpack.c.bf16 %v4723_v34, %v9254_v41  ;;  %v4732_v19 = vpack.c.bf16 %v4722_v57, %v9255_v8  ;;  %v4719_v56 = vsel %vm9256_vm2, %v4698_v45, %v4705_v3  ;;  %v4718_v24 = vsel %vm9258_vm15, %v4699_v54, %v4704_v51 }
0x2649   :  { %v4737_v22 = vrot.slane %v4736_v50, 4  ;;  %v4731_v36 = vpack.c.bf16 %v4719_v56, %v9257_v15  ;;  %v4730_v55 = vpack.c.bf16 %v4718_v24, %v9259_v37  ;;  %v4717_v25 = vsel %vm9260_vm13, %v4705_v3, %v4698_v45 }
0x264a   :  { %4754 = vmatprep.subr.bf16.mxu1 %v4733_v60  ;;  %v4727_v21 = vpack.c.bf16 %v4717_v25, %v9262_v35  ;;  %v4716_v18 = vsel %vm9263_vm6, %v4704_v51, %v4699_v54  ;;  %v4712_v14 = vsel %vm9264_vm7, %v4710_v1, %v4693_v44  ;;  %v4715_v49 = vsel %vm9265_vm4, %v4682_v38, %v4713_v42 }
0x264b   :  { %v4739_v12 = vunpack.c.l.bf16 %v4737_v22  ;;  %4755 = vmatpush1.bf16.msra.mxu1 %v4732_v19  ;;  %v4726_v58 = vpack.c.bf16 %v4716_v18, %v9266_v62  ;;  %v4725_v11 = vpack.c.bf16 %v4715_v49, %v9267_v28  ;;  %vm9268_vm1 = vcmp.eq.s32.totalorder %v9240_v40, 1 }
0x264c   :  { %4756 = vmatprep.subr.bf16.mxu1 %v4731_v36  ;;  %v4714_v52 = vsel %vm9268_vm1, %v8790_v9, %v4712_v14  ;;  %vm9270_vm8 = vcmask 654336   ;;  %vm9271_vm12 = vcmask 130048   ;;  %vm9272_vm9 = vcmp.lt.s32.totalorder %v9240_v40, 126 }
0x264d   :  { %4742 = vperm.xlu0 %5779, %v4739_v12   ;;  %v4724_v4 = vpack.c.bf16 %v4714_v52, %v9269_v17  ;;  %5312 = vmatmul.mubr.msk.bf16.vlgmr.msra.gmra.mxu0 %vm9271_vm12, %v4895_v0  ;;  %vm9273_vm3 = vmmov %vm9272_vm9  ;;  %vm9274_vm10 = vcmp.lt.s32.totalorder %v9240_v40, 2  ;;  %vm9276_vm13 = vcmp.eq.s32.totalorder %v9246_v23, 126  ;;  %vm9277_vm11 = vcmp.eq.s32.totalorder %v9240_v40, 126 }
0x264e   :  { %5069 = vmatprep.mubr.bf16.mxu0 %v9049_v16  ;;  %vm9275_vm0 = vmmov %vm9274_vm10  ;;  %vm9278_vm6 = vcmp.lt.s32.totalorder %v9240_v40, 127  ;;  %vm9280_vm4 = vcmp.lt.s32.totalorder %v9240_v40, 1 }
0x264f   :  { %4757 = vmatpush1.bf16.msra.mxu1 %v4730_v55  ;;  %vm9279_vm7 = vmmov %vm9278_vm6 }
0x2650   :  { %4758 = vmatprep.subr.bf16.mxu1 %v4729_v43  ;;  %vm9281_vm1 = vmmov %vm9280_vm4 }
0x2651   :  { %vm9283_vm12 = vmmov %vm9258_vm15 }
0x2653   :  { %4759 = vmatpush1.bf16.msra.mxu1 %v4728_v53 }
0x2654   :  { %4760 = vmatprep.subr.bf16.mxu1 %v4727_v21 }
0x2657   :  { %4761 = vmatpush1.bf16.msra.mxu1 %v4726_v58 }
0x2658   :  { %4762 = vmatprep.subr.bf16.mxu1 %v4725_v11 }
0x265b   :  { %4763 = vmatpush1.bf16.msra.mxu1 %v4724_v4 }
0x265e   :  { %5309 = vmatmul.mubr.msk.bf16.vlgmr.msra.gmra.mxu1 %vm9270_vm8, %v4687_v26  ;;  %v8865_v26 = vld [vmem:[#allocation2 + $0x2a0] sm:$0xff]  ;;  %vm9282_vm8 = vmmov %vm9256_vm2 }
0x265f   :  { %4886 = vmatprep.mubr.bf16.mxu1 %v9049_v16 }
0x26c8   :  { %v4743_v43 = vpop.permute.xlu0 %4742 }
0x271e   :  { %v4782_v38 = vpop.f32.mrf.mxu1 }
0x271f   :  { %v4783_v2 = vadd.f32 %v4782_v38, %v4743_v43 }
0x2720   :  { %v4784_v10 = vpop.f32.mrf.mxu1 }
0x2721   :  { %v4785_v53 = vadd.f32 %v4784_v10, %v4743_v43  ;;  %v8857_v7 = vmax.f32 %v4783_v2, 0.0  ;;  %v4933_v10 = vpop.f32.mrf.mxu0 }
0x2722   :  { %v4786_v61 = vpop.f32.mrf.mxu1 }
0x2723   :  { %v4790_v6 = vmax.f32 %v4785_v53, 0.0  ;;  %v4935_v53 = vpop.f32.mrf.mxu0 }
0x2724   :  { %v4787_v30 = vpop.f32.mrf.mxu1 }
0x2725   :  { %v6510_v9 = vpack.i.bf16 %v4790_v6, %v8857_v7  ;;  %v4937_v61 = vpop.f32.mrf.mxu0 }
0x2727   :  { %6511 = vrot.lane.b32.xlu0 %v6510_v9, %s6753_s28  ;;  %6506 = vrot.lane.b32.xlu1 %v6510_v9, %s6751_s27 }
0x272b   :  { %6521 = vrot.lane.b32.xlu0 %v6510_v9, %s6754_s29  ;;  %6516 = vrot.lane.b32.xlu1 %v6510_v9, %s6752_s2 }
0x272f   :  { %4835 = vrot.lane.b32.xlu1 %v8865_v26, %s6752_s2 }
0x2733   :  { %4952 = vrot.lane.b32.xlu1 %v8870_v31, %s6752_s2 }
0x2737   :  { %5018 = vrot.lane.b32.xlu1 %v8874_v13, %s6752_s2 }
0x2799   :  { %v6512_v1 = vpop.permute.xlu0 %6511  ;;  %v6507_v20 = vpop.permute.xlu1 %6506 }
0x279a   :  { %v6514_v27 = vunpack.i.h.bf16 %v6512_v1  ;;  %v6513_v44 = vunpack.i.l.bf16 %v6512_v1  ;;  %v6509_v5 = vunpack.i.h.bf16 %v6507_v20  ;;  %v6508_v48 = vunpack.i.l.bf16 %v6507_v20 }
0x279c   :  { %v4814_v59 = vsel %vm9272_vm9, %v6513_v44, %v6514_v27  ;;  %v4815_v33 = vsel %vm9273_vm3, %v6514_v27, %v6513_v44  ;;  %v4796_v32 = vsel %vm9274_vm10, %v6508_v48, %v6509_v5  ;;  %v4797_v29 = vsel %vm9275_vm0, %v6509_v5, %v6508_v48 }
0x279d   :  { %v4825_v39 = vsel %vm9256_vm2, %v4796_v32, %v4815_v33  ;;  %v6522_v46 = vpop.permute.xlu0 %6521  ;;  %v6517_v34 = vpop.permute.xlu1 %6516  ;;  %v4824_v57 = vsel %vm9258_vm15, %v4797_v29, %v4814_v59  ;;  %vm9284_vm9 = vcmp.eq.s32.totalorder %v9246_v23, 0  ;;  %vm9286_vm10 = vcmp.eq.s32.totalorder %v9240_v40, 0 }
0x279e   :  { %v6524_v51 = vunpack.i.h.bf16 %v6522_v46  ;;  %v6523_v3 = vunpack.i.l.bf16 %v6522_v46  ;;  %v6519_v45 = vunpack.i.h.bf16 %v6517_v34  ;;  %v6518_v54 = vunpack.i.l.bf16 %v6517_v34  ;;  %vm9285_vm3 = vmmov %vm9284_vm9 }
0x279f   :  { %v4827_v50 = vsel %vm9276_vm13, %v4790_v6, %v4825_v39  ;;  %v4826_v41 = vsel %vm9277_vm11, %v8857_v7, %v4824_v57  ;;  %v4817_v42 = vsel %vm9284_vm9, %v4815_v33, %v4796_v32  ;;  %v4816_v14 = vsel %vm9286_vm10, %v4814_v59, %v4797_v29  ;;  %vm9288_vm2 = vmmov %vm9286_vm10 }
0x27a0   :  { %v4808_v60 = vsel %vm9278_vm6, %v6523_v3, %v6524_v51  ;;  %v4809_v8 = vsel %vm9279_vm7, %v6524_v51, %v6523_v3  ;;  %v4802_v19 = vsel %vm9280_vm4, %v6518_v54, %v6519_v45  ;;  %v4803_v56 = vsel %vm9281_vm1, %v6519_v45, %v6518_v54  ;;  %v5078_v51 = vld [vmem:[#allocation2 + $0x2e0] sm:$0xff] }
0x27a1   :  { %v4836_v22 = vpop.permute.xlu1 %4835  ;;  %v4833_v15 = vpack.c.bf16 %v4827_v50, %v4827_v50  ;;  %v4832_v36 = vpack.c.bf16 %v4826_v41, %v4826_v41  ;;  %v4823_v24 = vsel %vm9282_vm8, %v4802_v19, %v4809_v8  ;;  %v4822_v25 = vsel %vm9283_vm12, %v4803_v56, %v4808_v60 }
0x27a2   :  { %v4837_v12 = vrot.slane %v4836_v22, 4  ;;  %v4831_v37 = vpack.c.bf16 %v4823_v24, %v4790_v6  ;;  %v4821_v21 = vsel %vm9285_vm3, %v4809_v8, %v4802_v19  ;;  %v4830_v62 = vpack.c.bf16 %v4822_v25, %v8857_v7  ;;  %v9292_v25 = vld [vmem:[#allocation26_spill] sm:$0xff] }
0x27a3   :  { %5310 = vmatprep.subr.msk.bf16.mxu1 %vm152_vm5, %v4833_v15  ;;  %v4849_v55 = vsel %vm152_vm5, %v4832_v36, 0  ;;  %vm9287_vm0 = vcmp.eq.s32.totalorder %v9246_v23, 1  ;;  %v4820_v11 = vsel %vm9288_vm2, %v4808_v60, %v4803_v56  ;;  %vm9289_vm15 = vcmp.eq.s32.totalorder %v9240_v40, 1  ;;  %v6650_v23 = vld [vmem:[#allocation2 + $0x1b0] sm:$0xff] }
0x27a4   :  { %v4839_v35 = vunpack.c.l.bf16 %v4837_v12  ;;  %4865 = vmatpush1.bf16.msra.mxu1 %v4849_v55  ;;  %v4819_v58 = vsel %vm9287_vm0, %v4790_v6, %v4817_v42  ;;  %v4818_v4 = vsel %vm9289_vm15, %v8857_v7, %v4816_v14  ;;  %vm9290_vm13 = vcmask 326656   ;;  %v4938_v6 = vpop.f32.mrf.mxu0 }
0x27a5   :  { %4866 = vmatprep.subr.bf16.mxu1 %v4831_v37  ;;  %v4953_v18 = vpop.permute.xlu1 %4952  ;;  %v4829_v28 = vpack.c.bf16 %v4821_v21, %v4819_v58  ;;  %v4828_v38 = vpack.c.bf16 %v4820_v11, %v4818_v4  ;;  %v9291_v37 = vld [vmem:[#allocation25_spill] sm:$0xff] }
0x27a6   :  { %v4954_v49 = vrot.slane %v4953_v18, 4  ;;  %4842 = vperm.xlu0 %5779, %v4839_v35  }
0x27a8   :  { %v4956_v52 = vunpack.c.l.bf16 %v4954_v49  ;;  %4867 = vmatpush1.bf16.msra.mxu1 %v4830_v62 }
0x27a9   :  { %4868 = vmatprep.subr.bf16.mxu1 %v4829_v28  ;;  %v5019_v17 = vpop.permute.xlu1 %5018 }
0x27aa   :  { %v5020_v43 = vrot.slane %v5019_v17, 4  ;;  %4959 = vperm.xlu0 %5779, %v4956_v52  }
0x27ac   :  { %v5022_v2 = vunpack.c.l.bf16 %v5020_v43  ;;  %4869 = vmatpush1.bf16.msra.mxu1 %v4828_v38 }
0x27ae   :  { %5025 = vperm.xlu1 %5753, %v5022_v2   ;;  %3286 = vrot.lane.b32.xlu0 %v6650_v23, %s6752_s2 }
0x27af   :  { %5311 = vmatmul.mubr.msk.bf16.vlgmr.msra.gmra.mxu1 %vm9290_vm13, %v8865_v26 }
0x27b0   :  { %5003 = vmatprep.mubr.bf16.mxu1 %v9049_v16 }
0x2821   :  { %v4843_v40 = vpop.permute.xlu0 %4842 }
0x2825   :  { %v4960_v7 = vpop.permute.xlu0 %4959 }
0x2829   :  { %v3287_v30 = vpop.permute.xlu0 %3286  ;;  %v5026_v18 = vpop.permute.xlu1 %5025 }
0x282a   :  { %v3288_v9 = vrot.slane %v3287_v30, 4 }
0x282c   :  { %v3290_v0 = vunpack.c.l.bf16 %v3288_v9 }
0x282e   :  { %3293 = vperm.xlu0 %5779, %v3290_v0  }
0x286f   :  { %v4888_v1 = vpop.f32.mrf.mxu1 }
0x2870   :  { %v4889_v20 = vadd.f32 %v4888_v1, %v4843_v40 }
0x2871   :  { %v4890_v27 = vpop.f32.mrf.mxu1 }
0x2872   :  { %v4940_v44 = vadd.f32 %v4933_v10, %v4889_v20  ;;  %v4891_v5 = vadd.f32 %v4890_v27, %v4843_v40 }
0x2873   :  { %v4892_v48 = vpop.f32.mrf.mxu1 }
0x2874   :  { %vm4942_vm11 = vcmp.ge.f32.partialorder %v4940_v44, 0.0  ;;  %v4944_v26 = vmul.f32 0.1, %v4940_v44  ;;  %v4941_v59 = vadd.f32 %v4935_v53, %v4891_v5 }
0x2875   :  { %v4893_v33 = vpop.f32.mrf.mxu1 }
0x2876   :  { %vm4943_vm6 = vcmp.ge.f32.partialorder %v4941_v59, 0.0  ;;  %v4945_v32 = vmul.f32 0.1, %v4941_v59  ;;  %v4946_v29 = vsel %vm4942_vm11, %v4940_v44, %v4944_v26 }
0x2877   :  { %v4949_v39 = vpack.c.bf16 %v4946_v29, %v4946_v29 }
0x2878   :  { %v4947_v46 = vsel %vm4943_vm6, %v4941_v59, %v4945_v32 }
0x2879   :  { %v4950_v34 = vpack.c.bf16 %v4947_v46, %v4947_v46  ;;  %v4966_v57 = vsel %vm152_vm5, %v4949_v39, 0 }
0x287b   :  { %5313 = vmatprep.subr.msk.bf16.mxu1 %vm152_vm5, %v4950_v34 }
0x287c   :  { %4986 = vmatpush1.bf16.msra.mxu1 %v4966_v57 }
0x287d   :  { %5317 = vmatprep.subr.msk.bf16.mxu1 %vm152_vm5, %v4950_v34 }
0x287f   :  { %5314 = vmatmul.mubr.msk.bf16.vlgmr.msra.gmra.mxu1 %vm309_vm14, %v8870_v31 }
0x2880   :  { %5097 = vmatpush1.bf16.msra.mxu1 %v4966_v57  ;;  %5114 = vmatprep.mubr.bf16.mxu1 %v9049_v16 }
0x2887   :  { %5318 = vmatmul.mubr.msk.bf16.vlgmr.msra.gmra.mxu1 %vm309_vm14, %v5078_v51 }
0x28a9   :  { %v3294_v12 = vpop.permute.xlu0 %3293 }
0x28aa   :  { %v3340_v55 = vadd.f32 %v9291_v37, %v3294_v12  ;;  %v3342_v42 = vadd.f32 %v9292_v25, %v3294_v12 }
0x28ac   :  { %v3391_v35 = vadd.f32 %v8423_v63, %v3340_v55  ;;  %v3392_v21 = vadd.f32 %v8437_v47, %v3342_v42 }
0x28ae   :  { %v5279_v49 = vmul.f32 -1.442695, %v3391_v35  ;;  %v5280_v58 = vmul.f32 -1.442695, %v3392_v21 }
0x28b0   :  { %6612 = vpow2.f32 %v5279_v49 }
0x28b1   :  { %6614 = vpow2.f32 %v5280_v58 }
0x28bd   :  { %v6613_v63 = vpop.eup %6612 }
0x28be   :  { %v6615_v2 = vpop.eup %6614  ;;  %v3399_v53 = vadd.f32 1.0, %v6613_v63 }
0x28bf   :  { %v3400_v61 = vadd.f32 1.0, %v6615_v2 }
0x293f   :  { %v5005_v3 = vpop.f32.mrf.mxu1 }
0x2940   :  { %v5006_v45 = vadd.f32 %v5005_v3, %v4960_v7 }
0x2941   :  { %v5007_v54 = vpop.f32.mrf.mxu1 }
0x2942   :  { %v5012_v50 = vmax.f32 %v5006_v45, 0.0  ;;  %v5008_v41 = vadd.f32 %v5007_v54, %v4960_v7 }
0x2943   :  { %v5009_v60 = vpop.f32.mrf.mxu1 }
0x2944   :  { %v5015_v8 = vpack.c.bf16 %v5012_v50, %v5012_v50  ;;  %v5013_v19 = vmax.f32 %v5008_v41, 0.0 }
0x2945   :  { %v5010_v56 = vpop.f32.mrf.mxu1 }
0x2946   :  { %v5016_v22 = vpack.c.bf16 %v5013_v19, %v5013_v19  ;;  %v5032_v31 = vsel %vm152_vm5, %v5015_v8, 0 }
0x2947   :  { %v5116_v16 = vpop.f32.mrf.mxu1 }
0x2948   :  { %5315 = vmatprep.subr.msk.bf16.mxu0 %vm152_vm5, %v5016_v22  ;;  %vm5143_vm5 = vcmask 1040384  }
0x2949   :  { %5052 = vmatpush1.bf16.msra.mxu0 %v5032_v31  ;;  %v5118_v15 = vpop.f32.mrf.mxu1 }
0x294b   :  { %v5120_v36 = vpop.f32.mrf.mxu1 }
0x294c   :  { %5316 = vmatmul.mubr.msk.bf16.vlgmr.msra.gmra.mxu0 %vm309_vm14, %v8874_v13 }
0x294d   :  { %v5121_v24 = vpop.f32.mrf.mxu1 }
0x2a0c   :  { %v5071_v14 = vpop.f32.mrf.mxu0 }
0x2a0d   :  { %v5072_v62 = vadd.f32 %v5071_v14, %v5026_v18 }
0x2a0e   :  { %v5073_v28 = vpop.f32.mrf.mxu0 }
0x2a0f   :  { %v5123_v13 = vadd.f32 %v5116_v16, %v5072_v62  ;;  %v5074_v11 = vadd.f32 %v5073_v28, %v5026_v18 }
0x2a10   :  { %v5075_v52 = vpop.f32.mrf.mxu0 }
0x2a11   :  { %v5319_v17 = vmul.f32 -1.442695, %v5123_v13  ;;  %v5124_v4 = vadd.f32 %v5118_v15, %v5074_v11 }
0x2a12   :  { %v5076_v43 = vpop.f32.mrf.mxu0 }
0x2a13   :  { %6616 = vpow2.f32 %v5319_v17  ;;  %v5320_v38 = vmul.f32 -1.442695, %v5124_v4 }
0x2a15   :  { %6618 = vpow2.f32 %v5320_v38 }
0x2a20   :  { %v6617_v47 = vpop.eup %6616 }
0x2a21   :  { %v5131_v23 = vadd.f32 1.0, %v6617_v47 }
0x2a22   :  { %v6619_v10 = vpop.eup %6618 }
0x2a23   :  { %6620 = vrcp.f32 %v5131_v23  ;;  %v5132_v6 = vadd.f32 1.0, %v6619_v10 }
0x2a25   :  { %6622 = vrcp.f32 %v5132_v6 }
0x2a26   :  { %6624 = vrcp.f32 %v3399_v53 }
0x2a27   :  { %6626 = vrcp.f32 %v3400_v61 }
0x2a30   :  { %v6621_v40 = vpop.eup %6620 }
0x2a31   :  { %v5139_v7 = vrot.slane %v6621_v40, 7 }
0x2a32   :  { %v6623_v30 = vpop.eup %6622 }
0x2a33   :  { %v6625_v9 = vpop.eup %6624  ;;  %v5140_v0 = vrot.slane %v6623_v30, 7 }
0x2a34   :  { %v6627_v1 = vpop.eup %6626  ;;  %v5144_v20 = vsel %vm5143_vm5, %v6625_v9, %v5139_v7 }
0x2a35   :  { %v5145_v27 = vsel %vm5143_vm5, %v6627_v1, %v5140_v0 }
0x2a36   :  { %v5148_v44 = vcombine.low %v5144_v20, %v5145_v27 }
0x2a38   :  { %5321 = vst.sshfl [vmem:[#allocation7] sm:$0x33 pattern:$0x76325410] %v5148_v44 }
0x2a39   :  { %6732 = shalt.err (!%p6729_p0)
}
0x2a3a   :  { %5167 = dma.vmem_to_hbm [thread:$0]  %s5165_s19, 64, %s8948_s3, [#allocation4]  }
0x2a3b   :  { %6745 = dma.done.wait [#allocation4], 64  }
0x2a3c   :  { %6746 = vsyncadd [#allocation4], 4294967232 }
0x2a3d   :  { %5171 = vsyncpa [#allocation3], 1 }
0x2a3e   :  { %5172 = vsyncpa [#allocation6], 1 }
0x2a3f   :  { %5173 = vsyncpa [#allocation4], 1 }

</bundles_post_ra>
